<compile_context>
chip_gen: v7x
topology: tpu7x:2x2x1
jax: 0.10.0
libtpu: 0.0.40
codegen_flags: <defaults>
</compile_context>

<pallas_src>
import functools

import jax
import jax.numpy as jnp
from jax.experimental import pallas as pl
from jax.experimental.pallas import tpu as pltpu


# ---------------------------------------------------------------- kernel ----

def _nonlocal_kernel(x_ref, wproj_ref, bproj_ref, ww_ref, bw_ref, z_ref, *,
                     n_inter, hw, hwp, n_batch, attn_dtype):
    """Fused NonLocalBlock forward for `n_batch` batch elements.

    x_ref block   : (n_batch*HW, C)  rows per-batch window-major (rh, rw, i, j)
    wproj_ref     : (C, 3*Cm)        packed [g | phi | theta] 1x1-conv weights
    bproj_ref     : (1, 3*Cm)        f32 biases (same order)
    ww_ref        : (Cm, C)          W 1x1-conv weight with eval-BN folded in
    bw_ref        : (1, C)
    z_ref block   : (n_batch*HW, C)
    """
    approx = attn_dtype != jnp.float32
    prec = jax.lax.Precision.DEFAULT if approx else jax.lax.Precision.HIGHEST

    x = x_ref[...]                                             # (n*HW, C) f32
    xc = x.astype(attn_dtype)

    # one lane-dense MXU pass for the three 1x1-conv projections.
    proj = (jnp.dot(xc, wproj_ref[...], precision=prec,
                    preferred_element_type=jnp.float32)
            + bproj_ref[...])                                  # (n*HW, 3Cm)

    ys = []
    for b in range(n_batch):                                   # static unroll
        pb = proj[b * hw:(b + 1) * hw]                         # (HW, 3Cm)
        gphi = pb[:, :2 * n_inter]                             # [g|phi], lane 0
        theta = pb[:, 2 * n_inter:].astype(attn_dtype)         # (HW, Cm)

        # 2x2 max-pool: rows are window-major, so the four window offsets are
        # the four contiguous row blocks of length HWp (tile-aligned slices).
        pooled = jnp.maximum(
            jnp.maximum(gphi[0 * hwp:1 * hwp], gphi[1 * hwp:2 * hwp]),
            jnp.maximum(gphi[2 * hwp:3 * hwp], gphi[3 * hwp:4 * hwp]))
        g_p = pooled[:, :n_inter].astype(attn_dtype)           # (HWp, Cm)
        phi_p = pooled[:, n_inter:].astype(attn_dtype)         # (HWp, Cm)

        # attention: f = theta @ phi^T (contract channels); softmax over keys
        # with normalization deferred until after the PV matmul.
        f = jax.lax.dot_general(theta, phi_p, (((1,), (1,)), ((), ())),
                                precision=prec,
                                preferred_element_type=jnp.float32)  # (HW,HWp)
        m = jnp.max(f, axis=-1, keepdims=True)
        e = jnp.exp(f - m)
        s = jnp.sum(e, axis=-1, keepdims=True)
        y = jnp.dot(e.astype(attn_dtype), g_p, precision=prec,
                    preferred_element_type=jnp.float32)              # (HW, Cm)
        ys.append(y * pl.reciprocal(s, approx=approx))

    y_all = ys[0] if n_batch == 1 else jnp.concatenate(ys, axis=0)

    # W projection (eval-mode BatchNorm already folded in) + residual.
    wy = (jnp.dot(y_all.astype(attn_dtype), ww_ref[...], precision=prec,
                  preferred_element_type=jnp.float32)
          + bw_ref[...])                                       # (n*HW, C)
    z_ref[...] = wy + x


# ---------------------------------------------------------------- wrapper ---

def _fold_batch_default():
    # v7x has two TensorCores per chip -> keep B sharded across cores there.
    # v5e/v6e are single-TC: a grid over B is a serial loop paying fixed
    # per-step overhead, so fold B into the M dim and run one grid step.
    try:
        kind = jax.devices()[0].device_kind.lower()
    except Exception:
        return True
    return "v7" not in kind


def nonlocal_block(x_nchw, params, *, attn_dtype=jnp.bfloat16, bn_eps=1e-5,
                   fold_batch=None):
    B, C, H, W = x_nchw.shape
    Cm = params["w_theta"].shape[1]
    assert H % 2 == 0 and W % 2 == 0, "sub_sample=True needs even H, W"
    Hp, Wp = H // 2, W // 2
    HW, HWp = H * W, Hp * Wp
    if fold_batch is None:
        fold_batch = _fold_batch_default()
    nb = B if fold_batch else 1            # batch elements per grid step
    rows = nb * HW

    # ---- host-side prep (cheap XLA glue, no activation HBM round-trips) ----
    # pack the three projections [g | phi | theta] (pooled slab at lane 0) and
    # pre-cast the matmul weights to attn_dtype (single-pass MXU).
    w_proj = jnp.concatenate(
        [params["w_g"], params["w_phi"], params["w_theta"]],
        axis=1).astype(attn_dtype)
    b_proj = jnp.concatenate(
        [params["b_g"], params["b_phi"], params["b_theta"]],
        axis=1).astype(jnp.float32)
    # fold eval-mode BatchNorm into the W 1x1 conv.
    scale = params["bn_gamma"] * jax.lax.rsqrt(params["bn_var"] + bn_eps)
    w_w = (params["w_w"] * scale).astype(attn_dtype)
    b_w = ((params["b_w"] - params["bn_mean"]) * scale
           + params["bn_beta"]).astype(jnp.float32)

    # NCHW -> channels-last, per-batch window-major rows (rh, rw, i, j): the
    # in-kernel 2x2 max-pool becomes a max over 4 contiguous row blocks.
    xt = jnp.transpose(x_nchw, (0, 2, 3, 1)).astype(jnp.float32)   # (B,H,W,C)
    xp = (xt.reshape(B, Hp, 2, Wp, 2, C)
            .transpose(0, 2, 4, 1, 3, 5)
            .reshape(B * HW, C))

    kernel = functools.partial(_nonlocal_kernel, n_inter=Cm, hw=HW, hwp=HWp,
                               n_batch=nb, attn_dtype=attn_dtype)

    def bcast(shape):
        return pl.BlockSpec(shape, lambda i, _n=len(shape): (0,) * _n)

    out_shape = jax.ShapeDtypeStruct((B * HW, C), jnp.float32)
    # residual writes in place over xp; only valid when dtypes match exactly.
    io_alias = {0: 0} if xp.dtype == out_shape.dtype else {}

    # TODO(synk): for large feature maps the (HW, HWp) f32 logits need either
    #   pltpu.CompilerParams(vmem_limit_bytes=...) headroom or a query-tiled
    #   flash-style (online-softmax) grid axis; gate that path on
    #   pltpu.get_tpu_info().vmem_capacity_bytes (64 MiB v7x vs 128 MiB
    #   v5e/v6e, 16/32 MiB scoped defaults), not a fixed HW threshold.
    z = pl.pallas_call(
        kernel,
        grid=(B // nb,),
        in_specs=[pl.BlockSpec((rows, C), lambda i: (i, 0)),
                  bcast((C, 3 * Cm)), bcast((1, 3 * Cm)),
                  bcast((Cm, C)), bcast((1, C))],
        out_specs=pl.BlockSpec((rows, C), lambda i: (i, 0)),
        out_shape=out_shape,
        input_output_aliases=io_alias,
        compiler_params=pltpu.CompilerParams(
            dimension_semantics=("parallel",)),
    )(xp, w_proj, b_proj, w_w, b_w)

    # undo the window-major permutation, back to NCHW.
    z = (z.reshape(B, 2, 2, Hp, Wp, C)
          .transpose(0, 3, 1, 4, 2, 5)
          .reshape(B, H, W, C))
    return jnp.transpose(z, (0, 3, 1, 2))


# -------------------------------------------------------------- reference ---

def reference(x_nchw, params, bn_eps=1e-5):
    B, C, H, W = x_nchw.shape
    Cm = params["w_theta"].shape[1]
    prec = jax.lax.Precision.HIGHEST
    xf = jnp.transpose(x_nchw, (0, 2, 3, 1)).reshape(B, H * W, C)

    def proj(w, b):
        return jnp.einsum("bnc,cm->bnm", xf, w, precision=prec) + b

    theta = proj(params["w_theta"], params["b_theta"])
    g = proj(params["w_g"], params["b_g"])
    phi = proj(params["w_phi"], params["b_phi"])

    def pool(t):
        t = t.reshape(B, H, W, Cm).reshape(B, H // 2, 2, W // 2, 2, Cm)
        return jnp.max(t, axis=(2, 4)).reshape(B, (H // 2) * (W // 2), Cm)

    g, phi = pool(g), pool(phi)
    f = jnp.einsum("bqm,bkm->bqk", theta, phi, precision=prec)
    p = jax.nn.softmax(f, axis=-1)
    y = jnp.einsum("bqk,bkm->bqm", p, g, precision=prec)
    wy = jnp.einsum("bqm,mc->bqc", y, params["w_w"], precision=prec) + params["b_w"]
    bn = ((wy - params["bn_mean"]) * jax.lax.rsqrt(params["bn_var"] + bn_eps)
          * params["bn_gamma"] + params["bn_beta"])
    z = bn + xf
    return jnp.transpose(z.reshape(B, H, W, C), (0, 3, 1, 2))


# ------------------------------------------------------------------- main ---

if __name__ == "__main__":
    B, C, H, W = 2, 64, 16, 16          # in_channels=64 -> inter_channels=32
    Cm = C // 2
    key = jax.random.PRNGKey(0)
    ks = jax.random.split(key, 13)
    s = 0.05

    params = dict(
        w_g=jax.random.normal(ks[0], (C, Cm), jnp.float32) * s,
        b_g=jax.random.normal(ks[1], (1, Cm), jnp.float32) * s,
        w_theta=jax.random.normal(ks[2], (C, Cm), jnp.float32) * s,
        b_theta=jax.random.normal(ks[3], (1, Cm), jnp.float32) * s,
        w_phi=jax.random.normal(ks[4], (C, Cm), jnp.float32) * s,
        b_phi=jax.random.normal(ks[5], (1, Cm), jnp.float32) * s,
        w_w=jax.random.normal(ks[6], (Cm, C), jnp.float32) * s,
        b_w=jax.random.normal(ks[7], (1, C), jnp.float32) * s,
        # NOTE: the module inits BN weight/bias to 0 (W_y == 0 at init); the
        # self-test uses non-trivial BN params so the projections, pooling,
        # softmax and W conv are actually exercised by the check.
        bn_gamma=1.0 + 0.2 * jax.random.normal(ks[8], (1, C), jnp.float32),
        bn_beta=0.1 * jax.random.normal(ks[9], (1, C), jnp.float32),
        bn_mean=0.1 * jax.random.normal(ks[10], (1, C), jnp.float32),
        bn_var=1.0 + 0.3 * jax.random.uniform(ks[11], (1, C), jnp.float32),
    )

    x = jax.random.normal(ks[12], (B, C, H, W), jnp.float32)
    z_ref = reference(x, params)

    # exercise both grid layouts (B folded into M / B-parallel) and both dtypes
    # so single-TC and dual-TC code paths are validated regardless of chip.
    for fold in (True, False):
        run_f32 = jax.jit(functools.partial(
            nonlocal_block, attn_dtype=jnp.float32, fold_batch=fold))
        run_bf16 = jax.jit(functools.partial(
            nonlocal_block, attn_dtype=jnp.bfloat16, fold_batch=fold))

        z32 = jax.block_until_ready(run_f32(x, params))
        assert z32.shape == (B, C, H, W)
        assert jnp.allclose(z32, z_ref, atol=2e-3, rtol=2e-3), \
            f"f32 kernel mismatch (fold_batch={fold})"

        zbf = jax.block_until_ready(run_bf16(x, params))
        assert zbf.shape == (B, C, H, W)
        assert jnp.allclose(zbf, z_ref, atol=2e-2, rtol=2e-2), \
            f"bf16 kernel mismatch (fold_batch={fold})"

    print("KERNEL_OK")
</pallas_src>

<mosaic_0001>
module attributes {stable_mosaic.version = 11 : i64} {
  func.func @_nonlocal_kernel(%arg0: i32, %arg1: memref<512x64xf32, #tpu.memory_space<vmem>>, %arg2: memref<64x96xf32, #tpu.memory_space<vmem>>, %arg3: memref<1x96xf32, #tpu.memory_space<vmem>>, %arg4: memref<32x64xf32, #tpu.memory_space<vmem>>, %arg5: memref<1x64xf32, #tpu.memory_space<vmem>>, %arg6: memref<512x64xf32, #tpu.memory_space<vmem>>) attributes {dimension_semantics = [#tpu.dimension_semantics<parallel>], iteration_bounds = array<i64: 1>, scalar_prefetch = 0 : i64, scratch_operands = 0 : i64, tpu.core_type = #tpu.core_type<tc>, window_params = [{transform_indices = @transform_0, window_bounds = array<i64: 512, 64>}, {pipeline_mode = #tpu.pipeline_mode<synchronous>, transform_indices = @transform_1, window_bounds = array<i64: 64, 96>}, {pipeline_mode = #tpu.pipeline_mode<synchronous>, transform_indices = @transform_2, window_bounds = array<i64: 1, 96>}, {pipeline_mode = #tpu.pipeline_mode<synchronous>, transform_indices = @transform_3, window_bounds = array<i64: 32, 64>}, {pipeline_mode = #tpu.pipeline_mode<synchronous>, transform_indices = @transform_4, window_bounds = array<i64: 1, 64>}, {transform_indices = @transform_5, window_bounds = array<i64: 512, 64>}]} {
    %c0 = arith.constant 0 : index
    %c0_0 = arith.constant 0 : index
    %0 = vector.load %arg1[%c0, %c0_0] : memref<512x64xf32, #tpu.memory_space<vmem>>, vector<512x64xf32>
    %c0_1 = arith.constant 0 : index
    %c0_2 = arith.constant 0 : index
    %1 = vector.load %arg2[%c0_1, %c0_2] : memref<64x96xf32, #tpu.memory_space<vmem>>, vector<64x96xf32>
    %cst = arith.constant dense<0.000000e+00> : vector<512x96xf32>
    %2 = tpu.matmul %0, %1, %cst {dimension_numbers = #tpu.dot_dimension_numbers<[1], [0], [0], [1], [0, 0, 1, 1], [], []>, precision = #tpu.contract_precision<fp32>} : vector<512x64xf32>, vector<64x96xf32>, vector<512x96xf32> -> vector<512x96xf32>
    %c0_3 = arith.constant 0 : index
    %c0_4 = arith.constant 0 : index
    %3 = vector.load %arg3[%c0_3, %c0_4] : memref<1x96xf32, #tpu.memory_space<vmem>>, vector<1x96xf32>
    %4 = vector.broadcast %3 : vector<1x96xf32> to vector<512x96xf32>
    %5 = arith.addf %2, %4 : vector<512x96xf32>
    %6 = vector.extract_strided_slice %5 {offsets = [0, 0], sizes = [256, 96], strides = [1, 1]} : vector<512x96xf32> to vector<256x96xf32>
    %7 = vector.extract_strided_slice %6 {offsets = [0, 0], sizes = [256, 64], strides = [1, 1]} : vector<256x96xf32> to vector<256x64xf32>
    %8 = vector.extract_strided_slice %6 {offsets = [0, 64], sizes = [256, 32], strides = [1, 1]} : vector<256x96xf32> to vector<256x32xf32>
    %9 = vector.extract_strided_slice %7 {offsets = [0, 0], sizes = [64, 64], strides = [1, 1]} : vector<256x64xf32> to vector<64x64xf32>
    %10 = vector.extract_strided_slice %7 {offsets = [64, 0], sizes = [64, 64], strides = [1, 1]} : vector<256x64xf32> to vector<64x64xf32>
    %11 = arith.maximumf %9, %10 : vector<64x64xf32>
    %12 = vector.extract_strided_slice %7 {offsets = [128, 0], sizes = [64, 64], strides = [1, 1]} : vector<256x64xf32> to vector<64x64xf32>
    %13 = vector.extract_strided_slice %7 {offsets = [192, 0], sizes = [64, 64], strides = [1, 1]} : vector<256x64xf32> to vector<64x64xf32>
    %14 = arith.maximumf %12, %13 : vector<64x64xf32>
    %15 = arith.maximumf %11, %14 : vector<64x64xf32>
    %16 = vector.extract_strided_slice %15 {offsets = [0, 0], sizes = [64, 32], strides = [1, 1]} : vector<64x64xf32> to vector<64x32xf32>
    %17 = vector.extract_strided_slice %15 {offsets = [0, 32], sizes = [64, 32], strides = [1, 1]} : vector<64x64xf32> to vector<64x32xf32>
    %cst_5 = arith.constant dense<0.000000e+00> : vector<256x64xf32>
    %18 = tpu.matmul %8, %17, %cst_5 {dimension_numbers = #tpu.dot_dimension_numbers<[1], [1], [0], [0], [0, 0, 1, 0], [], []>, precision = #tpu.contract_precision<fp32>} : vector<256x32xf32>, vector<64x32xf32>, vector<256x64xf32> -> vector<256x64xf32>
    %cst_6 = arith.constant dense<0xFF800000> : vector<256xf32>
    %19 = vector.multi_reduction <maximumf>, %18, %cst_6 [1] : vector<256x64xf32> to vector<256xf32>
    %20 = vector.shape_cast %19 : vector<256xf32> to vector<256x1xf32>
    %21 = vector.broadcast %20 : vector<256x1xf32> to vector<256x64xf32>
    %22 = arith.subf %18, %21 : vector<256x64xf32>
    %23 = math.exp %22 : vector<256x64xf32>
    %cst_7 = arith.constant dense<0.000000e+00> : vector<256xf32>
    %24 = vector.multi_reduction <add>, %23, %cst_7 [1] : vector<256x64xf32> to vector<256xf32>
    %25 = vector.shape_cast %24 : vector<256xf32> to vector<256x1xf32>
    %cst_8 = arith.constant dense<0.000000e+00> : vector<256x32xf32>
    %26 = tpu.matmul %23, %16, %cst_8 {dimension_numbers = #tpu.dot_dimension_numbers<[1], [0], [0], [1], [0, 0, 1, 1], [], []>, precision = #tpu.contract_precision<fp32>} : vector<256x64xf32>, vector<64x32xf32>, vector<256x32xf32> -> vector<256x32xf32>
    %27 = tpu.reciprocal %25 : vector<256x1xf32> -> vector<256x1xf32>
    %28 = vector.broadcast %27 : vector<256x1xf32> to vector<256x32xf32>
    %29 = arith.mulf %26, %28 : vector<256x32xf32>
    %30 = vector.extract_strided_slice %5 {offsets = [256, 0], sizes = [256, 96], strides = [1, 1]} : vector<512x96xf32> to vector<256x96xf32>
    %31 = vector.extract_strided_slice %30 {offsets = [0, 0], sizes = [256, 64], strides = [1, 1]} : vector<256x96xf32> to vector<256x64xf32>
    %32 = vector.extract_strided_slice %30 {offsets = [0, 64], sizes = [256, 32], strides = [1, 1]} : vector<256x96xf32> to vector<256x32xf32>
    %33 = vector.extract_strided_slice %31 {offsets = [0, 0], sizes = [64, 64], strides = [1, 1]} : vector<256x64xf32> to vector<64x64xf32>
    %34 = vector.extract_strided_slice %31 {offsets = [64, 0], sizes = [64, 64], strides = [1, 1]} : vector<256x64xf32> to vector<64x64xf32>
    %35 = arith.maximumf %33, %34 : vector<64x64xf32>
    %36 = vector.extract_strided_slice %31 {offsets = [128, 0], sizes = [64, 64], strides = [1, 1]} : vector<256x64xf32> to vector<64x64xf32>
    %37 = vector.extract_strided_slice %31 {offsets = [192, 0], sizes = [64, 64], strides = [1, 1]} : vector<256x64xf32> to vector<64x64xf32>
    %38 = arith.maximumf %36, %37 : vector<64x64xf32>
    %39 = arith.maximumf %35, %38 : vector<64x64xf32>
    %40 = vector.extract_strided_slice %39 {offsets = [0, 0], sizes = [64, 32], strides = [1, 1]} : vector<64x64xf32> to vector<64x32xf32>
    %41 = vector.extract_strided_slice %39 {offsets = [0, 32], sizes = [64, 32], strides = [1, 1]} : vector<64x64xf32> to vector<64x32xf32>
    %cst_9 = arith.constant dense<0.000000e+00> : vector<256x64xf32>
    %42 = tpu.matmul %32, %41, %cst_9 {dimension_numbers = #tpu.dot_dimension_numbers<[1], [1], [0], [0], [0, 0, 1, 0], [], []>, precision = #tpu.contract_precision<fp32>} : vector<256x32xf32>, vector<64x32xf32>, vector<256x64xf32> -> vector<256x64xf32>
    %cst_10 = arith.constant dense<0xFF800000> : vector<256xf32>
    %43 = vector.multi_reduction <maximumf>, %42, %cst_10 [1] : vector<256x64xf32> to vector<256xf32>
    %44 = vector.shape_cast %43 : vector<256xf32> to vector<256x1xf32>
    %45 = vector.broadcast %44 : vector<256x1xf32> to vector<256x64xf32>
    %46 = arith.subf %42, %45 : vector<256x64xf32>
    %47 = math.exp %46 : vector<256x64xf32>
    %cst_11 = arith.constant dense<0.000000e+00> : vector<256xf32>
    %48 = vector.multi_reduction <add>, %47, %cst_11 [1] : vector<256x64xf32> to vector<256xf32>
    %49 = vector.shape_cast %48 : vector<256xf32> to vector<256x1xf32>
    %cst_12 = arith.constant dense<0.000000e+00> : vector<256x32xf32>
    %50 = tpu.matmul %47, %40, %cst_12 {dimension_numbers = #tpu.dot_dimension_numbers<[1], [0], [0], [1], [0, 0, 1, 1], [], []>, precision = #tpu.contract_precision<fp32>} : vector<256x64xf32>, vector<64x32xf32>, vector<256x32xf32> -> vector<256x32xf32>
    %51 = tpu.reciprocal %49 : vector<256x1xf32> -> vector<256x1xf32>
    %52 = vector.broadcast %51 : vector<256x1xf32> to vector<256x32xf32>
    %53 = arith.mulf %50, %52 : vector<256x32xf32>
    %54 = tpu.concatenate %29, %53 in 0 : vector<256x32xf32>, vector<256x32xf32> -> vector<512x32xf32>
    %c0_13 = arith.constant 0 : index
    %c0_14 = arith.constant 0 : index
    %55 = vector.load %arg4[%c0_13, %c0_14] : memref<32x64xf32, #tpu.memory_space<vmem>>, vector<32x64xf32>
    %cst_15 = arith.constant dense<0.000000e+00> : vector<512x64xf32>
    %56 = tpu.matmul %54, %55, %cst_15 {dimension_numbers = #tpu.dot_dimension_numbers<[1], [0], [0], [1], [0, 0, 1, 1], [], []>, precision = #tpu.contract_precision<fp32>} : vector<512x32xf32>, vector<32x64xf32>, vector<512x64xf32> -> vector<512x64xf32>
    %c0_16 = arith.constant 0 : index
    %c0_17 = arith.constant 0 : index
    %57 = vector.load %arg5[%c0_16, %c0_17] : memref<1x64xf32, #tpu.memory_space<vmem>>, vector<1x64xf32>
    %58 = vector.broadcast %57 : vector<1x64xf32> to vector<512x64xf32>
    %59 = arith.addf %56, %58 : vector<512x64xf32>
    %60 = arith.addf %59, %0 : vector<512x64xf32>
    %c0_18 = arith.constant 0 : index
    %c0_19 = arith.constant 0 : index
    %61 = vector.load %arg6[%c0_18, %c0_19] : memref<512x64xf32, #tpu.memory_space<vmem>>, vector<512x64xf32>
    tpu.vector_store %arg6[%c0_18, %c0_19], %60 {strides = array<i32>} : memref<512x64xf32, #tpu.memory_space<vmem>>, vector<512x64xf32>,
    return
  }
  func.func @transform_0(%arg0: i32) -> (i32, i32) {
    %c0_i32 = arith.constant 0 : i32
    %c0_i32_0 = arith.constant 0 : i32
    return %arg0, %c0_i32 : i32, i32
  }
  func.func @transform_1(%arg0: i32) -> (i32, i32) {
    %c0_i32 = arith.constant 0 : i32
    %c0_i32_0 = arith.constant 0 : i32
    %c0_i32_1 = arith.constant 0 : i32
    return %c0_i32, %c0_i32_0 : i32, i32
  }
  func.func @transform_2(%arg0: i32) -> (i32, i32) {
    %c0_i32 = arith.constant 0 : i32
    %c0_i32_0 = arith.constant 0 : i32
    %c0_i32_1 = arith.constant 0 : i32
    return %c0_i32, %c0_i32_0 : i32, i32
  }
  func.func @transform_3(%arg0: i32) -> (i32, i32) {
    %c0_i32 = arith.constant 0 : i32
    %c0_i32_0 = arith.constant 0 : i32
    %c0_i32_1 = arith.constant 0 : i32
    return %c0_i32, %c0_i32_0 : i32, i32
  }
  func.func @transform_4(%arg0: i32) -> (i32, i32) {
    %c0_i32 = arith.constant 0 : i32
    %c0_i32_0 = arith.constant 0 : i32
    %c0_i32_1 = arith.constant 0 : i32
    return %c0_i32, %c0_i32_0 : i32, i32
  }
  func.func @transform_5(%arg0: i32) -> (i32, i32) {
    %c0_i32 = arith.constant 0 : i32
    %c0_i32_0 = arith.constant 0 : i32
    return %arg0, %c0_i32 : i32, i32
  }
}

</mosaic_0001>

<bundles_post_ra>
// kernel: nonlocal_block.1
= control target key start
LH: loop header
LB: loop body
LE: loop exit
PB: predicated region body
PF: predicated region fallthrough
CT: control target
= control target key end

     0   :  { %vm99_vm0 = vcmask 523264   ;;  %s22790_s15 = smov 64   ;;  %vm3682_vm1 = vcmask 261120   ;;  %s29396_s1 = inlined_call_operand.vmem [shape: f32[64,96], index: 1, kind: input, shape index: {}]   ;;  %s29397_s0 = inlined_call_operand.vmem [shape: f32[512,64], index: 0, kind: input, shape index: {}, may-alias: {0,5}]   ;;  %s29398_s2 = inlined_call_operand.vmem [shape: f32[1,96], index: 2, kind: input, shape index: {}]   ;;  %s29399_s3 = inlined_call_operand.vmem [shape: f32[32,64], index: 3, kind: input, shape index: {}]   ;;  %s29400_s4 = inlined_call_operand.vmem [shape: f32[1,64], index: 4, kind: input, shape index: {}]   ;;  %s29401_s5 = inlined_call_operand.vmem [shape: f32[512,64], index: 5, kind: output, shape index: {}, may-alias: {0,5}]  }
   0x1   :  { %v22824_v0 = vld [vmem:[%s29396_s1] sm:$0xff]  ;;  %v22829_v1 = vld [vmem:[%s29396_s1 + $0x8] sm:$0xff]  ;;  %v22834_v2 = vld [vmem:[%s29396_s1 + $0x10] sm:$0xff] }
   0x2   :  { %v29409_v3 = vand.u32 4294901760, %v22824_v0  ;;  %v29408_v4 = vand.u32 4294901760, %v22829_v1  ;;  %v22841_v5 = vld [vmem:[%s29396_s1 + $0x18] sm:$0xff]  ;;  %v29407_v6 = vand.u32 4294901760, %v22834_v2  ;;  %v22847_v7 = vld [vmem:[%s29396_s1 + $0x20] sm:$0xff]  ;;  %v22852_v8 = vld [vmem:[%s29396_s1 + $0x28] sm:$0xff] }
   0x3   :  { %v29406_v9 = vand.u32 4294901760, %v22841_v5  ;;  %v29405_v10 = vand.u32 4294901760, %v22847_v7  ;;  %v29404_v11 = vand.u32 4294901760, %v22852_v8  ;;  %v22860_v12 = vld [vmem:[%s29396_s1 + $0x30] sm:$0xff]  ;;  %v22865_v13 = vld [vmem:[%s29396_s1 + $0x38] sm:$0xff]  ;;  %v20_v14 = vld [vmem:[%s29397_s0] sm:$0xff] }
   0x4   :  { %v22874_v15 = vpack.c.bf16 %v29408_v4, %v29409_v3  ;;  %v29403_v16 = vand.u32 4294901760, %v22860_v12  ;;  %v101_v17 = vsel %vm99_vm0, %v20_v14, 0  ;;  %v21_v18 = vld [vmem:[%s29397_s0 + $0x8] sm:$0xff]  ;;  %v22_v19 = vld [vmem:[%s29397_s0 + $0x10] sm:$0xff]  ;;  %v23_v20 = vld [vmem:[%s29397_s0 + $0x18] sm:$0xff]  ;;  %v29402_v22 = vand.u32 4294901760, %v22865_v13 }
   0x5   :  { %v22891_v21 = vpack.c.bf16 %v29406_v9, %v29407_v6  ;;  %v22894_v23 = vand.u32 4294901760, %v101_v17  ;;  %v104_v24 = vsel %vm99_vm0, %v21_v18, 0  ;;  %v24_v25 = vld [vmem:[%s29397_s0 + $0x20] sm:$0xff]  ;;  %v25_v26 = vld [vmem:[%s29397_s0 + $0x28] sm:$0xff]  ;;  %v26_v27 = vld [vmem:[%s29397_s0 + $0x30] sm:$0xff]  ;;  %v22912_v28 = vpack.c.bf16 %v29404_v11, %v29405_v10 }
   0x6   :  { %20527 = vmatprep.subr.bf16.mxu1 %v22874_v15  ;;  %20575 = vmatprep.subr.bf16.mxu0 %v22874_v15  ;;  %v22914_v29 = vand.u32 4294901760, %v104_v24  ;;  %v107_v30 = vsel %vm99_vm0, %v22_v19, 0  ;;  %v110_v31 = vsel %vm99_vm0, %v23_v20, 0  ;;  %v113_v35 = vsel %vm99_vm0, %v24_v25, 0  ;;  %v27_v36 = vld [vmem:[%s29397_s0 + $0x38] sm:$0xff]  ;;  %v28_v54 = vld [vmem:[%s29397_s0 + $0x40] sm:$0xff] }
   0x7   :  { %20529 = vmatpush3.bf16.msra.mxu1 %v22874_v15  ;;  %20577 = vmatpush3.bf16.msra.mxu0 %v22874_v15  ;;  %v22921_v32 = vsub.f32 %v101_v17, %v22894_v23  ;;  %v22923_v33 = vand.u32 4294901760, %v107_v30  ;;  %v22925_v34 = vand.u32 4294901760, %v110_v31  ;;  %v22936_v38 = vand.u32 4294901760, %v113_v35  ;;  %v29_v60 = vld [vmem:[%s29397_s0 + $0x48] sm:$0xff]  ;;  %v30_v61 = vld [vmem:[%s29397_s0 + $0x50] sm:$0xff]  ;;  %v31_v14 = vld [vmem:[%s29397_s0 + $0x58] sm:$0xff] }
   0x8   :  { %20531 = vmatprep.subr.bf16.mxu1 %v22891_v21  ;;  %20579 = vmatprep.subr.bf16.mxu0 %v22891_v21  ;;  %v22934_v37 = vsub.f32 %v104_v24, %v22914_v29  ;;  %v116_v39 = vsel %vm99_vm0, %v25_v26, 0  ;;  %v119_v40 = vsel %vm99_vm0, %v26_v27, 0  ;;  %v122_v48 = vsel %vm99_vm0, %v27_v36, 0  ;;  %v32_v20 = vld [vmem:[%s29397_s0 + $0x60] sm:$0xff] }
   0x9   :  { %30453 = vst [vmem:[#allocation2_spill] sm:$0xff] %v22921_v32  ;;  %v367_v41 = vand.u32 4294901760, %v22921_v32  ;;  %v22942_v42 = vsub.f32 %v107_v30, %v22923_v33  ;;  %v22945_v43 = vsub.f32 %v110_v31, %v22925_v34  ;;  %v22947_v44 = vand.u32 4294901760, %v116_v39 }
   0xa   :  { %30454 = vst [vmem:[#allocation3_spill] sm:$0xff] %v22934_v37  ;;  %v377_v45 = vand.u32 4294901760, %v22934_v37  ;;  %v22951_v46 = vsub.f32 %v113_v35, %v22936_v38  ;;  %v22953_v47 = vand.u32 4294901760, %v119_v40  ;;  %v22966_v51 = vpack.c.bf16 %v29402_v22, %v29403_v16 }
   0xb   :  { %30455 = vst [vmem:[#allocation4_spill] sm:$0xff] %v22942_v42  ;;  %30456 = vst [vmem:[#allocation5_spill] sm:$0xff] %v22945_v43  ;;  %20533 = vmatpush3.bf16.msra.mxu1 %v22891_v21  ;;  %20581 = vmatpush3.bf16.msra.mxu0 %v22891_v21  ;;  %v368_v49 = vsub.f32 %v22921_v32, %v367_v41  ;;  %v387_v50 = vand.u32 4294901760, %v22942_v42  ;;  %v397_v52 = vand.u32 4294901760, %v22945_v43  ;;  %v22976_v57 = vand.u32 4294901760, %v122_v48 }
   0xc   :  { %30457 = vst [vmem:[#allocation6_spill] sm:$0xff] %v22951_v46  ;;  %20535 = vmatprep.subr.bf16.mxu1 %v22912_v28  ;;  %20583 = vmatprep.subr.bf16.mxu0 %v22912_v28  ;;  %v22970_v53 = vsub.f32 %v116_v39, %v22947_v44  ;;  %v378_v56 = vsub.f32 %v22934_v37, %v377_v45  ;;  %v407_v58 = vand.u32 4294901760, %v22951_v46  ;;  %v125_v63 = vsel %vm99_vm0, %v28_v54, 0 }
   0xd   :  { %v369_v55 = vand.u32 4294901760, %v368_v49  ;;  %18046 = vmatprep.mubr.f32.mxu0 %v367_v41  ;;  %v22980_v59 = vsub.f32 %v119_v40, %v22953_v47  ;;  %v388_v62 = vsub.f32 %v22942_v42, %v387_v50  ;;  %v398_v17 = vsub.f32 %v22945_v43, %v397_v52  ;;  %v33_v49 = vld [vmem:[%s29397_s0 + $0x68] sm:$0xff] }
   0xe   :  { %30458 = vst [vmem:[#allocation7_spill] sm:$0xff] %v22970_v53  ;;  %v417_v18 = vand.u32 4294901760, %v22970_v53  ;;  %v22999_v19 = vand.u32 4294901760, %v125_v63  ;;  %v379_v24 = vand.u32 4294901760, %v378_v56  ;;  %v23005_v25 = vsub.f32 %v122_v48, %v22976_v57 }
   0xf   :  { %30459 = vst [vmem:[#allocation8_spill] sm:$0xff] %v22980_v59  ;;  %20537 = vmatpush3.bf16.msra.mxu1 %v22912_v28  ;;  %20585 = vmatpush3.bf16.msra.mxu0 %v22912_v28  ;;  %v128_v26 = vsel %vm99_vm0, %v29_v60, 0  ;;  %v131_v27 = vsel %vm99_vm0, %v30_v61, 0  ;;  %v408_v30 = vsub.f32 %v22951_v46, %v407_v58  ;;  %v427_v31 = vand.u32 4294901760, %v22980_v59  ;;  %v34_v61 = vld [vmem:[%s29397_s0 + $0x70] sm:$0xff] }
  0x10   :  { %20539 = vmatprep.subr.bf16.mxu1 %v22966_v51  ;;  %20587 = vmatprep.subr.bf16.mxu0 %v22966_v51  ;;  %30460 = vst [vmem:[#allocation9_spill] sm:$0xff] %v23005_v25  ;;  %v23011_v35 = vand.u32 4294901760, %v128_v26  ;;  %v134_v36 = vsel %vm99_vm0, %v31_v14, 0  ;;  %v389_v39 = vand.u32 4294901760, %v388_v62  ;;  %v23017_v40 = vsub.f32 %v125_v63, %v22999_v19 }
  0x11   :  { %17710 = vmatprep.mubr.f32.mxu1 %v369_v55  ;;  %v23019_v41 = vand.u32 4294901760, %v131_v27  ;;  %v137_v48 = vsel %vm99_vm0, %v32_v20, 0  ;;  %v399_v54 = vand.u32 4294901760, %v398_v17  ;;  %v418_v55 = vsub.f32 %v22970_v53, %v417_v18 }
  0x12   :  { %30461 = vst [vmem:[#allocation10_spill] sm:$0xff] %v23017_v40  ;;  %v437_v56 = vand.u32 4294901760, %v23005_v25  ;;  %v23027_v60 = vand.u32 4294901760, %v134_v36  ;;  %v428_v62 = vsub.f32 %v22980_v59, %v427_v31  ;;  %v23034_v63 = vsub.f32 %v128_v26, %v23011_v35 }
  0x13   :  { %20541 = vmatpush3.bf16.msra.mxu1 %v22966_v51  ;;  %20589 = vmatpush3.bf16.msra.mxu0 %v22966_v51  ;;  %v23036_v14 = vand.u32 4294901760, %v137_v48  ;;  %v140_v17 = vsel %vm99_vm0, %v33_v49, 0  ;;  %v409_v20 = vand.u32 4294901760, %v408_v30  ;;  %v447_v22 = vand.u32 4294901760, %v23017_v40 }
  0x14   :  { %30462 = vst [vmem:[#allocation11_spill] sm:$0xff] %v23034_v63  ;;  %v23041_v16 = vsub.f32 %v131_v27, %v23019_v41  ;;  %v438_v26 = vsub.f32 %v23005_v25, %v437_v56  ;;  %v23049_v11 = vsub.f32 %v134_v36, %v23027_v60  ;;  %v23051_v49 = vand.u32 4294901760, %v140_v17 }
  0x15   :  { %v419_v27 = vand.u32 4294901760, %v418_v55  ;;  %v429_v30 = vand.u32 4294901760, %v428_v62  ;;  %v448_v36 = vsub.f32 %v23017_v40, %v447_v22 }
  0x16   :  { %17711 = vmatmul.mubr.f32.vlgmr.msra.gmra.mrb[0].mxu1 %v379_v24  ;;  %18047 = vmatmul.mubr.f32.vlgmr.msra.gmra.mrb[0].mxu0 %v377_v45  ;;  %30463 = vst [vmem:[#allocation12_spill] sm:$0xff] %v23041_v16  ;;  %v143_v24 = vsel %vm99_vm0, %v34_v61, 0  ;;  %v35_v45 = vld [vmem:[%s29397_s0 + $0x78] sm:$0xff]  ;;  %30464 = vst [vmem:[#allocation13_spill] sm:$0xff] %v23049_v11  ;;  %v23058_v61 = vsub.f32 %v137_v48, %v23036_v14  ;;  %v467_v10 = vand.u32 4294901760, %v23041_v16  ;;  %v439_v55 = vand.u32 4294901760, %v438_v26 }
  0x17   :  { %17713 = vmatprep.mubr.f32.mxu1 %v389_v39  ;;  %18049 = vmatprep.mubr.f32.mxu0 %v387_v50  ;;  %30465 = vst [vmem:[#allocation14_spill] sm:$0xff] %v23051_v49  ;;  %v36_v50 = vld [vmem:[%s29397_s0 + $0x80] sm:$0xff]  ;;  %v457_v39 = vand.u32 4294901760, %v23034_v63  ;;  %v23062_v9 = vand.u32 4294901760, %v143_v24  ;;  %v146_v6 = vsel %vm99_vm0, %v35_v45, 0  ;;  %v477_v48 = vand.u32 4294901760, %v23049_v11 }
  0x18   :  { %30466 = vst [vmem:[#allocation15_spill] sm:$0xff] %v23058_v61  ;;  %v23071_v62 = vsub.f32 %v140_v17, %v23051_v49  ;;  %v487_v45 = vand.u32 4294901760, %v23058_v61  ;;  %v23078_v4 = vand.u32 4294901760, %v146_v6  ;;  %v39_v26 = vld [vmem:[%s29397_s0 + $0x98] sm:$0xff]  ;;  %v449_v17 = vand.u32 4294901760, %v448_v36 }
  0x19   :  { %30467 = vst [vmem:[#allocation16_spill] sm:$0xff] %v23062_v9  ;;  %v468_v3 = vsub.f32 %v23041_v16, %v467_v10  ;;  %v478_v40 = vsub.f32 %v23049_v11, %v477_v48 }
  0x1a   :  { %17714 = vmatmul.mubr.f32.gmra.mrb[2].mxu1 %v399_v54  ;;  %18050 = vmatmul.mubr.f32.gmra.mrb[2].mxu0 %v397_v52  ;;  %v37_v52 = vld [vmem:[%s29397_s0 + $0x88] sm:$0xff]  ;;  %v149_v54 = vsel %vm99_vm0, %v36_v50, 0  ;;  %30468 = vst [vmem:[#allocation17_spill] sm:$0xff] %v23071_v62  ;;  %30469 = vst [vmem:[#allocation18_spill] sm:$0xff] %v23078_v4  ;;  %v497_v25 = vand.u32 4294901760, %v23071_v62  ;;  %v488_v36 = vsub.f32 %v23058_v61, %v487_v45 }
  0x1b   :  { %17716 = vmatprep.mubr.f32.mxu1 %v409_v20  ;;  %18052 = vmatprep.mubr.f32.mxu0 %v407_v58  ;;  %v38_v58 = vld [vmem:[%s29397_s0 + $0x90] sm:$0xff]  ;;  %v458_v20 = vsub.f32 %v23034_v63, %v457_v39  ;;  %v152_v50 = vsel %vm99_vm0, %v37_v52, 0  ;;  %v40_v63 = vld [vmem:[%s29397_s0 + $0xa0] sm:$0xff]  ;;  %v23101_v16 = vsub.f32 %v146_v6, %v23078_v4  ;;  %v469_v11 = vand.u32 4294901760, %v468_v3 }
  0x1c   :  { %v155_v52 = vsel %vm99_vm0, %v38_v58, 0  ;;  %v161_v59 = vsel %vm99_vm0, %v40_v63, 0  ;;  %v41_v58 = vld [vmem:[%s29397_s0 + $0xa8] sm:$0xff]  ;;  %v42_v6 = vld [vmem:[%s29397_s0 + $0xb0] sm:$0xff] }
  0x1d   :  { %30473 = vst [vmem:[#allocation22_spill] sm:$0xff] %v23101_v16  ;;  %v164_v3 = vsel %vm99_vm0, %v41_v58, 0  ;;  %v517_v61 = vand.u32 4294901760, %v23101_v16  ;;  %v167_v42 = vsel %vm99_vm0, %v42_v6, 0 }
  0x1e   :  { %17717 = vmatmul.mubr.f32.gmra.mrb[4].mxu1 %v419_v27  ;;  %18053 = vmatmul.mubr.f32.gmra.mrb[4].mxu0 %v417_v18  ;;  %v23086_v27 = vsub.f32 %v143_v24, %v23062_v9  ;;  %v23088_v18 = vand.u32 4294901760, %v149_v54  ;;  %v459_v24 = vand.u32 4294901760, %v458_v20  ;;  %v23148_v6 = vand.u32 4294901760, %v167_v42 }
  0x1f   :  { %17719 = vmatprep.mubr.f32.mxu1 %v429_v30  ;;  %18055 = vmatprep.mubr.f32.mxu0 %v427_v31  ;;  %v23096_v30 = vand.u32 4294901760, %v152_v50  ;;  %v158_v31 = vsel %vm99_vm0, %v39_v26, 0  ;;  %v23121_v26 = vand.u32 4294901760, %v161_v59  ;;  %v518_v58 = vsub.f32 %v23101_v16, %v517_v61 }
  0x20   :  { %30470 = vst [vmem:[#allocation19_spill] sm:$0xff] %v23086_v27  ;;  %30471 = vst [vmem:[#allocation20_spill] sm:$0xff] %v23088_v18  ;;  %v507_v53 = vand.u32 4294901760, %v23086_v27  ;;  %v23113_v20 = vand.u32 4294901760, %v158_v31 }
  0x21   :  { %30472 = vst [vmem:[#allocation21_spill] sm:$0xff] %v23096_v30  ;;  %v23119_v63 = vsub.f32 %v152_v50, %v23096_v30  ;;  %30478 = vst [vmem:[#allocation27_spill] sm:$0xff] %v23121_v26 }
  0x22   :  { %17720 = vmatmul.mubr.f32.gmra.mrb[6].mxu1 %v439_v55  ;;  %18056 = vmatmul.mubr.f32.gmra.mrb[6].mxu0 %v437_v56  ;;  %v23109_v55 = vsub.f32 %v149_v54, %v23088_v18  ;;  %v23111_v56 = vand.u32 4294901760, %v155_v52  ;;  %30476 = vst [vmem:[#allocation25_spill] sm:$0xff] %v23113_v20  ;;  %v489_v54 = vand.u32 4294901760, %v488_v36  ;;  %v508_v46 = vsub.f32 %v23086_v27, %v507_v53 }
  0x23   :  { %17722 = vmatprep.mubr.f32.mxu1 %v449_v17  ;;  %18058 = vmatprep.mubr.f32.mxu0 %v447_v22  ;;  %30477 = vst [vmem:[#allocation26_spill] sm:$0xff] %v23119_v63  ;;  %v479_v22 = vand.u32 4294901760, %v478_v40  ;;  %v498_v17 = vsub.f32 %v23071_v62, %v497_v25  ;;  %v43_v40 = vld [vmem:[%s29397_s0 + $0xb8] sm:$0xff]  ;;  %30483 = vst [vmem:[#allocation32_spill] sm:$0xff] %v23148_v6 }
  0x24   :  { %30474 = vst [vmem:[#allocation23_spill] sm:$0xff] %v23109_v55  ;;  %30475 = vst [vmem:[#allocation24_spill] sm:$0xff] %v23111_v56  ;;  %v527_v43 = vand.u32 4294901760, %v23109_v55  ;;  %v23129_v50 = vsub.f32 %v155_v52, %v23111_v56  ;;  %v23145_v52 = vsub.f32 %v161_v59, %v23121_v26  ;;  %v509_v27 = vand.u32 4294901760, %v508_v46  ;;  %v45_v59 = vld [vmem:[%s29397_s0 + $0xc8] sm:$0xff] }
  0x25   :  { %v499_v36 = vand.u32 4294901760, %v498_v17 }
  0x26   :  { %17723 = vmatmul.mubr.f32.gmra.mrb[8].mxu1 %v459_v24  ;;  %18059 = vmatmul.mubr.f32.gmra.mrb[8].mxu0 %v457_v39  ;;  %30479 = vst [vmem:[#allocation28_spill] sm:$0xff] %v23129_v50  ;;  %v23136_v39 = vsub.f32 %v158_v31, %v23113_v20  ;;  %v23138_v24 = vand.u32 4294901760, %v164_v3  ;;  %30482 = vst [vmem:[#allocation31_spill] sm:$0xff] %v23145_v52  ;;  %v170_v31 = vsel %vm99_vm0, %v43_v40, 0  ;;  %v547_v37 = vand.u32 4294901760, %v23129_v50 }
  0x27   :  { %17725 = vmatprep.mubr.f32.mxu1 %v469_v11  ;;  %18061 = vmatprep.mubr.f32.mxu0 %v467_v10  ;;  %v44_v10 = vld [vmem:[%s29397_s0 + $0xc0] sm:$0xff]  ;;  %v537_v11 = vand.u32 4294901760, %v23119_v63  ;;  %v528_v62 = vsub.f32 %v23109_v55, %v527_v43  ;;  %v23166_v17 = vand.u32 4294901760, %v170_v31  ;;  %v519_v40 = vand.u32 4294901760, %v518_v58 }
  0x28   :  { %30480 = vst [vmem:[#allocation29_spill] sm:$0xff] %v23136_v39  ;;  %30481 = vst [vmem:[#allocation30_spill] sm:$0xff] %v23138_v24  ;;  %v173_v32 = vsel %vm99_vm0, %v44_v10, 0  ;;  %v23169_v10 = vsub.f32 %v167_v42, %v23148_v6  ;;  %v548_v16 = vsub.f32 %v23129_v50, %v547_v37  ;;  %v49_v50 = vld [vmem:[%s29397_s0 + $0xe8] sm:$0xff] }
  0x29   :  { %v538_v46 = vsub.f32 %v23119_v63, %v537_v11  ;;  %30485 = vst [vmem:[#allocation34_spill] sm:$0xff] %v23166_v17  ;;  %v529_v55 = vand.u32 4294901760, %v528_v62  ;;  %v23187_v62 = vsub.f32 %v170_v31, %v23166_v17  ;;  %v188_v26 = vsel %vm99_vm0, %v49_v50, 0 }
  0x2a   :  { %17726 = vmatmul.mubr.f32.gmra.mrb[10].mxu1 %v479_v22  ;;  %18062 = vmatmul.mubr.f32.gmra.mrb[10].mxu0 %v477_v48  ;;  %v23159_v22 = vsub.f32 %v164_v3, %v23138_v24  ;;  %30486 = vst [vmem:[#allocation35_spill] sm:$0xff] %v23169_v10  ;;  %v23171_v48 = vand.u32 4294901760, %v173_v32  ;;  %v176_v3 = vsel %vm99_vm0, %v45_v59, 0  ;;  %v30489_v59 = vand.u32 4294901760, %v23145_v52 }
  0x2b   :  { %17728 = vmatprep.mubr.f32.mxu1 %v489_v54  ;;  %18064 = vmatprep.mubr.f32.mxu0 %v487_v45  ;;  %v46_v45 = vld [vmem:[%s29397_s0 + $0xd0] sm:$0xff]  ;;  %v539_v54 = vand.u32 4294901760, %v538_v46  ;;  %30490 = vst [vmem:[#allocation37_spill] sm:$0xff] %v23187_v62  ;;  %v549_v31 = vand.u32 4294901760, %v548_v16  ;;  %v52_v16 = vld [vmem:[%s29397_s0 + $0x100] sm:$0xff] }
  0x2c   :  { %30484 = vst [vmem:[#allocation33_spill] sm:$0xff] %v23159_v22  ;;  %30487 = vst [vmem:[#allocation36_spill] sm:$0xff] %v23171_v48  ;;  %v179_v63 = vsel %vm99_vm0, %v46_v45, 0  ;;  %v48_v45 = vld [vmem:[%s29397_s0 + $0xe0] sm:$0xff]  ;;  %v23196_v58 = vsub.f32 %v173_v32, %v23171_v48  ;;  %v50_v32 = vld [vmem:[%s29397_s0 + $0xf0] sm:$0xff] }
  0x2d   :  { %v23198_v46 = vand.u32 4294901760, %v179_v63  ;;  %v185_v6 = vsel %vm99_vm0, %v48_v45, 0 }
  0x2e   :  { %17729 = vmatmul.mubr.f32.gmra.mrb[12].mxu1 %v499_v36  ;;  %18065 = vmatmul.mubr.f32.gmra.mrb[12].mxu0 %v497_v25  ;;  %v47_v36 = vld [vmem:[%s29397_s0 + $0xd8] sm:$0xff]  ;;  %v30488_v25 = vand.u32 4294901760, %v23136_v39  ;;  %30492 = vst [vmem:[#allocation39_spill] sm:$0xff] %v23196_v58  ;;  %v607_v48 = vand.u32 4294901760, %v23196_v58 }
  0x2f   :  { %17731 = vmatprep.mubr.f32.mxu1 %v509_v27  ;;  %18067 = vmatprep.mubr.f32.mxu0 %v507_v53  ;;  %v568_v53 = vsub.f32 %v23145_v52, %v30489_v59  ;;  %v23189_v27 = vand.u32 4294901760, %v176_v3  ;;  %30493 = vst [vmem:[#allocation40_spill] sm:$0xff] %v23198_v46  ;;  %v182_v59 = vsel %vm99_vm0, %v47_v36, 0  ;;  %v597_v36 = vand.u32 4294901760, %v23187_v62 }
  0x30   :  { %v558_v42 = vsub.f32 %v23136_v39, %v30488_v25  ;;  %v587_v25 = vand.u32 4294901760, %v23169_v10  ;;  %v23226_v24 = vsub.f32 %v179_v63, %v23198_v46  ;;  %v608_v20 = vsub.f32 %v23196_v58, %v607_v48 }
  0x31   :  { %30491 = vst [vmem:[#allocation38_spill] sm:$0xff] %v23189_v27  ;;  %v598_v63 = vsub.f32 %v23187_v62, %v597_v36 }
  0x32   :  { %17732 = vmatmul.mubr.f32.gmra.mrb[14].mxu1 %v519_v40  ;;  %18068 = vmatmul.mubr.f32.gmra.mrb[14].mxu0 %v517_v61  ;;  %v559_v17 = vand.u32 4294901760, %v558_v42  ;;  %v30494_v40 = vand.u32 4294901760, %v23159_v22  ;;  %v23219_v42 = vsub.f32 %v176_v3, %v23189_v27  ;;  %v588_v45 = vsub.f32 %v23169_v10, %v587_v25  ;;  %30497 = vst [vmem:[#allocation43_spill] sm:$0xff] %v23226_v24 }
  0x33   :  { %17734 = vmatprep.mubr.f32.mxu1 %v529_v55  ;;  %18070 = vmatprep.mubr.f32.mxu0 %v527_v43  ;;  %v51_v43 = vld [vmem:[%s29397_s0 + $0xf8] sm:$0xff]  ;;  %v569_v55 = vand.u32 4294901760, %v568_v53  ;;  %v23229_v53 = vand.u32 4294901760, %v185_v6  ;;  %v191_v3 = vsel %vm99_vm0, %v50_v32, 0  ;;  %v30501_v32 = vand.u32 4294901760, %v23136_v39 }
  0x34   :  { %v578_v61 = vsub.f32 %v23159_v22, %v30494_v40  ;;  %30495 = vst [vmem:[#allocation41_spill] sm:$0xff] %v23219_v42  ;;  %v23221_v40 = vand.u32 4294901760, %v182_v59  ;;  %v194_v27 = vsel %vm99_vm0, %v51_v43, 0  ;;  %v617_v46 = vand.u32 4294901760, %v23219_v42 }
  0x35   :  { %30498 = vst [vmem:[#allocation44_spill] sm:$0xff] %v23229_v53  ;;  %v23249_v43 = vand.u32 4294901760, %v191_v3  ;;  %v23261_v39 = vsub.f32 %v185_v6, %v23229_v53  ;;  %v599_v56 = vand.u32 4294901760, %v598_v63 }
  0x36   :  { %30496 = vst [vmem:[#allocation42_spill] sm:$0xff] %v23221_v40  ;;  %17735 = vmatmul.mubr.f32.gmra.mrb[16].mxu1 %v539_v54  ;;  %18071 = vmatmul.mubr.f32.gmra.mrb[16].mxu0 %v537_v11  ;;  %v197_v54 = vsel %vm99_vm0, %v52_v16, 0  ;;  %v53_v11 = vld [vmem:[%s29397_s0 + $0x108] sm:$0xff]  ;;  %v579_v10 = vand.u32 4294901760, %v578_v61  ;;  %v23240_v50 = vsub.f32 %v182_v59, %v23221_v40  ;;  %v23251_v61 = vand.u32 4294901760, %v194_v27 }
  0x37   :  { %17737 = vmatprep.mubr.f32.mxu1 %v549_v31  ;;  %18073 = vmatprep.mubr.f32.mxu0 %v547_v37  ;;  %v23242_v37 = vand.u32 4294901760, %v188_v26  ;;  %v54_v31 = vld [vmem:[%s29397_s0 + $0x110] sm:$0xff]  ;;  %30502 = vst [vmem:[#allocation47_spill] sm:$0xff] %v23249_v43  ;;  %v23253_v16 = vand.u32 4294901760, %v197_v54  ;;  %v200_v62 = vsel %vm99_vm0, %v53_v11, 0  ;;  %v30505_v59 = vand.u32 4294901760, %v23145_v52 }
  0x38   :  { %30499 = vst [vmem:[#allocation45_spill] sm:$0xff] %v23240_v50  ;;  %30503 = vst [vmem:[#allocation48_spill] sm:$0xff] %v23251_v61  ;;  %v589_v40 = vand.u32 4294901760, %v588_v45  ;;  %v618_v30 = vsub.f32 %v23219_v42, %v617_v46  ;;  %v55_v45 = vld [vmem:[%s29397_s0 + $0x118] sm:$0xff]  ;;  %v30509_v11 = vand.u32 4294901760, %v23159_v22  ;;  %v637_v6 = vand.u32 4294901760, %v23240_v50 }
  0x39   :  { %30500 = vst [vmem:[#allocation46_spill] sm:$0xff] %v23242_v37  ;;  %30504 = vst [vmem:[#allocation49_spill] sm:$0xff] %v23253_v16  ;;  %v23266_v18 = vsub.f32 %v188_v26, %v23242_v37  ;;  %v23280_v63 = vsub.f32 %v194_v27, %v23251_v61  ;;  %v23283_v26 = vsub.f32 %v197_v54, %v23253_v16  ;;  %v647_v42 = vand.u32 4294901760, %v23261_v39 }
  0x3a   :  { %17738 = vmatmul.mubr.f32.gmra.mrb[18].mxu1 %v559_v17  ;;  %18074 = vmatmul.mubr.f32.gmra.mrb[18].mxu0 %v30501_v32  ;;  %v627_v17 = vand.u32 4294901760, %v23226_v24  ;;  %30506 = vst [vmem:[#allocation50_spill] sm:$0xff] %v23261_v39  ;;  %v203_v32 = vsel %vm99_vm0, %v54_v31, 0  ;;  %v23277_v31 = vsub.f32 %v191_v3, %v23249_v43  ;;  %v206_v3 = vsel %vm99_vm0, %v55_v45, 0 }
  0x3b   :  { %17740 = vmatprep.mubr.f32.mxu1 %v569_v55  ;;  %18076 = vmatprep.mubr.f32.mxu0 %v30505_v59  ;;  %30507 = vst [vmem:[#allocation51_spill] sm:$0xff] %v23266_v18  ;;  %v23268_v55 = vand.u32 4294901760, %v200_v62  ;;  %30511 = vst [vmem:[#allocation54_spill] sm:$0xff] %v23280_v63  ;;  %v56_v59 = vld [vmem:[%s29397_s0 + $0x120] sm:$0xff]  ;;  %v23290_v58 = vand.u32 4294901760, %v203_v32  ;;  %v619_v27 = vand.u32 4294901760, %v618_v30  ;;  %v648_v22 = vsub.f32 %v23261_v39, %v647_v42 }
  0x3c   :  { %30510 = vst [vmem:[#allocation53_spill] sm:$0xff] %v23277_v31  ;;  %30512 = vst [vmem:[#allocation55_spill] sm:$0xff] %v23283_v26  ;;  %v209_v52 = vsel %vm99_vm0, %v56_v59, 0  ;;  %v30520_v39 = vand.u32 4294901760, %v23280_v63  ;;  %v59_v30 = vld [vmem:[%s29397_s0 + $0x138] sm:$0xff]  ;;  %v30542_v53 = vand.u32 4294901760, %v23283_v26 }
  0x3d   :  { %30508 = vst [vmem:[#allocation52_spill] sm:$0xff] %v23268_v55  ;;  %30513 = vst [vmem:[#allocation56_spill] sm:$0xff] %v23290_v58  ;;  %v23295_v54 = vsub.f32 %v200_v62, %v23268_v55  ;;  %v23307_v59 = vsub.f32 %v203_v32, %v23290_v58 }
  0x3e   :  { %17741 = vmatmul.mubr.f32.gmra.mrb[20].mxu1 %v579_v10  ;;  %18077 = vmatmul.mubr.f32.gmra.mrb[20].mxu0 %v30509_v11  ;;  %v609_v10 = vand.u32 4294901760, %v608_v20  ;;  %v628_v11 = vsub.f32 %v23226_v24, %v627_v17  ;;  %v57_v20 = vld [vmem:[%s29397_s0 + $0x128] sm:$0xff]  ;;  %v23309_v24 = vand.u32 4294901760, %v206_v3 }
  0x3f   :  { %17743 = vmatprep.mubr.f32.mxu1 %v589_v40  ;;  %18079 = vmatprep.mubr.f32.mxu0 %v587_v25  ;;  %30514 = vst [vmem:[#allocation57_spill] sm:$0xff] %v23295_v54  ;;  %v638_v25 = vsub.f32 %v23240_v50, %v637_v6  ;;  %30515 = vst [vmem:[#allocation58_spill] sm:$0xff] %v23307_v59  ;;  %v30518_v40 = vand.u32 4294901760, %v23266_v18  ;;  %v30521_v50 = vand.u32 4294901760, %v23283_v26 }
  0x40   :  { %v629_v62 = vand.u32 4294901760, %v628_v11  ;;  %30516 = vst [vmem:[#allocation59_spill] sm:$0xff] %v23309_v24 }
  0x41   :  { %v658_v45 = vsub.f32 %v23266_v18, %v30518_v40  ;;  %v639_v32 = vand.u32 4294901760, %v638_v25  ;;  %v23330_v40 = vsub.f32 %v23283_v26, %v30521_v50  ;;  %v23337_v25 = vsub.f32 %v206_v3, %v23309_v24 }
  0x42   :  { %17744 = vmatmul.mubr.f32.gmra.mrb[22].mxu1 %v599_v56  ;;  %18080 = vmatmul.mubr.f32.gmra.mrb[22].mxu0 %v597_v36  ;;  %v23311_v56 = vand.u32 4294901760, %v209_v52  ;;  %v212_v36 = vsel %vm99_vm0, %v57_v20, 0  ;;  %v678_v20 = vsub.f32 %v23280_v63, %v30520_v39  ;;  %v60_v39 = vld [vmem:[%s29397_s0 + $0x140] sm:$0xff]  ;;  %v218_v3 = vsel %vm99_vm0, %v59_v30, 0  ;;  %v63_v30 = vld [vmem:[%s29397_s0 + $0x158] sm:$0xff] }
  0x43   :  { %17746 = vmatprep.mubr.f32.mxu1 %v609_v10  ;;  %18082 = vmatprep.mubr.f32.mxu0 %v607_v48  ;;  %v58_v48 = vld [vmem:[%s29397_s0 + $0x130] sm:$0xff]  ;;  %v30519_v10 = vand.u32 4294901760, %v23277_v31  ;;  %30522 = vst [vmem:[#allocation61_spill] sm:$0xff] %v23337_v25  ;;  %v659_v55 = vand.u32 4294901760, %v658_v45  ;;  %v230_v61 = vsel %vm99_vm0, %v63_v30, 0 }
  0x44   :  { %30517 = vst [vmem:[#allocation60_spill] sm:$0xff] %v23311_v56  ;;  %v23345_v50 = vsub.f32 %v209_v52, %v23311_v56  ;;  %v215_v58 = vsel %vm99_vm0, %v58_v48, 0  ;;  %v679_v24 = vand.u32 4294901760, %v678_v20  ;;  %v689_v52 = vand.u32 4294901760, %v23330_v40  ;;  %v62_v45 = vld [vmem:[%s29397_s0 + $0x150] sm:$0xff]  ;;  %v64_v40 = vld [vmem:[%s29397_s0 + $0x160] sm:$0xff] }
  0x45   :  { %v668_v11 = vsub.f32 %v23277_v31, %v30519_v10  ;;  %v23339_v10 = vand.u32 4294901760, %v212_v36  ;;  %v221_v48 = vsel %vm99_vm0, %v60_v39, 0  ;;  %v23374_v20 = vand.u32 4294901760, %v215_v58 }
  0x46   :  { %17747 = vmatmul.mubr.f32.gmra.mrb[24].mxu1 %v619_v27  ;;  %18083 = vmatmul.mubr.f32.gmra.mrb[24].mxu0 %v617_v46  ;;  %v649_v46 = vand.u32 4294901760, %v648_v22  ;;  %30524 = vst [vmem:[#allocation63_spill] sm:$0xff] %v23345_v50  ;;  %v23383_v39 = vand.u32 4294901760, %v218_v3  ;;  %v23392_v56 = vand.u32 4294901760, %v221_v48  ;;  %v227_v16 = vsel %vm99_vm0, %v62_v45, 0 }
  0x47   :  { %17749 = vmatprep.mubr.f32.mxu1 %v629_v62  ;;  %18085 = vmatprep.mubr.f32.mxu0 %v627_v17  ;;  %30523 = vst [vmem:[#allocation62_spill] sm:$0xff] %v23339_v10  ;;  %v30525_v17 = vand.u32 4294901760, %v23295_v54  ;;  %v61_v62 = vld [vmem:[%s29397_s0 + $0x148] sm:$0xff]  ;;  %v669_v27 = vand.u32 4294901760, %v668_v11  ;;  %v23372_v11 = vsub.f32 %v212_v36, %v23339_v10  ;;  %30528 = vst [vmem:[#allocation65_spill] sm:$0xff] %v23374_v20  ;;  %v233_v43 = vsel %vm99_vm0, %v64_v40, 0 }
  0x48   :  { %30529 = vst [vmem:[#allocation66_spill] sm:$0xff] %v23383_v39  ;;  %30531 = vst [vmem:[#allocation67_spill] sm:$0xff] %v23392_v56  ;;  %v30534_v45 = vand.u32 4294901760, %v23277_v31  ;;  %v23413_v40 = vsub.f32 %v215_v58, %v23374_v20  ;;  %v23430_v58 = vand.u32 4294901760, %v230_v61  ;;  %v30543_v9 = vand.u32 4294901760, %v23345_v50 }
  0x49   :  { %v23351_v22 = vsub.f32 %v23295_v54, %v30525_v17  ;;  %v30526_v17 = vand.u32 4294901760, %v23307_v59  ;;  %30527 = vst [vmem:[#allocation64_spill] sm:$0xff] %v23372_v11 }
  0x4a   :  { %17750 = vmatmul.mubr.f32.gmra.mrb[26].mxu1 %v639_v32  ;;  %18086 = vmatmul.mubr.f32.gmra.mrb[26].mxu0 %v637_v6  ;;  %v30530_v32 = vand.u32 4294901760, %v22824_v0  ;;  %30536 = vst [vmem:[#allocation68_spill] sm:$0xff] %v23413_v40  ;;  %v728_v49 = vsub.f32 %v23345_v50, %v30543_v9 }
  0x4b   :  { %17752 = vmatprep.mubr.f32.mxu1 %v649_v46  ;;  %18088 = vmatprep.mubr.f32.mxu0 %v647_v42  ;;  %v23368_v6 = vsub.f32 %v23307_v59, %v30526_v17  ;;  %v65_v42 = vld [vmem:[%s29397_s0 + $0x168] sm:$0xff]  ;;  %v224_v17 = vsel %vm99_vm0, %v61_v62, 0  ;;  %v699_v10 = vand.u32 4294901760, %v23351_v22  ;;  %v30532_v46 = vand.u32 4294901760, %v23266_v18 }
  0x4c   :  { %v23389_v36 = vsub.f32 %v22824_v0, %v30530_v32  ;;  %v236_v62 = vsel %vm99_vm0, %v65_v42, 0  ;;  %v30533_v0 = vand.u32 4294901760, %v22829_v1  ;;  %v23415_v42 = vand.u32 4294901760, %v224_v17 }
  0x4d   :  { %v23432_v32 = vand.u32 4294901760, %v233_v43  ;;  %v23434_v31 = vand.u32 4294901760, %v236_v62  ;;  %v30541_v18 = vand.u32 4294901760, %v23280_v63  ;;  %v709_v4 = vand.u32 4294901760, %v23368_v6 }
  0x4e   :  { %17753 = vmatmul.mubr.f32.gmra.mrb[28].mxu1 %v659_v55  ;;  %18089 = vmatmul.mubr.f32.gmra.mrb[28].mxu0 %v30532_v46  ;;  %v1008_v37 = vand.u32 4294901760, %v23389_v36  ;;  %v23404_v22 = vsub.f32 %v22829_v1, %v30533_v0  ;;  %v30535_v55 = vand.u32 4294901760, %v23337_v25  ;;  %v66_v1 = vld [vmem:[%s29397_s0 + $0x170] sm:$0xff]  ;;  %v23423_v46 = vand.u32 4294901760, %v227_v16 }
  0x4f   :  { %17755 = vmatprep.mubr.f32.mxu1 %v669_v27  ;;  %18091 = vmatprep.mubr.f32.mxu0 %v30534_v45  ;;  %v23421_v27 = vsub.f32 %v218_v3, %v23383_v39  ;;  %30539 = vst [vmem:[#allocation71_spill] sm:$0xff] %v23432_v32  ;;  %30540 = vst [vmem:[#allocation72_spill] sm:$0xff] %v23434_v31  ;;  %v67_v3 = vld [vmem:[%s29397_s0 + $0x178] sm:$0xff]  ;;  %v239_v39 = vsel %vm99_vm0, %v66_v1, 0  ;;  %v23459_v6 = vsub.f32 %v230_v61, %v23430_v58 }
  0x50   :  { %v718_v30 = vsub.f32 %v23337_v25, %v30535_v55  ;;  %v1009_v0 = vsub.f32 %v23389_v36, %v1008_v37  ;;  %v1015_v45 = vand.u32 4294901760, %v23404_v22  ;;  %v23428_v55 = vsub.f32 %v221_v48, %v23392_v56 }
  0x51   :  { %30537 = vst [vmem:[#allocation69_spill] sm:$0xff] %v23421_v27  ;;  %30546 = vst [vmem:[#allocation75_spill] sm:$0xff] %v23459_v6  ;;  %v23462_v9 = vsub.f32 %v233_v43, %v23432_v32  ;;  %v23476_v43 = vsub.f32 %v236_v62, %v23434_v31  ;;  %v729_v26 = vand.u32 4294901760, %v728_v49  ;;  %v30554_v62 = vand.u32 4294901760, %v23421_v27 }
  0x52   :  { %30538 = vst [vmem:[#allocation70_spill] sm:$0xff] %v23428_v55  ;;  %17756 = vmatmul.mubr.f32.gmra.mrb[30].mxu1 %v679_v24  ;;  %18092 = vmatmul.mubr.f32.gmra.mrb[30].mxu0 %v30541_v18  ;;  %v1010_v20 = vand.u32 4294901760, %v1009_v0  ;;  %v1016_v48 = vsub.f32 %v23404_v22, %v1015_v45  ;;  %v20590_v56 = vpack.c.bf16 %v1015_v45, %v1008_v37  ;;  %v747_v24 = vand.u32 4294901760, %v23413_v40 }
  0x53   :  { %17758 = vmatprep.mubr.f32.mxu1 %v689_v52  ;;  %18094 = vmatprep.mubr.f32.mxu0 %v30542_v53  ;;  %v23451_v18 = vsub.f32 %v224_v17, %v23415_v42  ;;  %v719_v1 = vand.u32 4294901760, %v718_v30  ;;  %v23454_v0 = vsub.f32 %v227_v16, %v23423_v46  ;;  %v242_v37 = vsel %vm99_vm0, %v67_v3, 0  ;;  %30547 = vst [vmem:[#allocation76_spill] sm:$0xff] %v23462_v9  ;;  %v68_v17 = vld [vmem:[%s29397_s0 + $0x180] sm:$0xff] }
  0x54   :  { %v1017_v52 = vand.u32 4294901760, %v1016_v48  ;;  %20591 = vmatprep.subr.bf16.mxu0 %v20590_v56  ;;  %v23464_v45 = vand.u32 4294901760, %v239_v39  ;;  %v30549_v16 = vand.u32 4294901760, %v23295_v54  ;;  %v30550_v30 = vand.u32 4294901760, %v23372_v11  ;;  %30551 = vst [vmem:[#allocation78_spill] sm:$0xff] %v23476_v43 }
  0x55   :  { %30544 = vst [vmem:[#allocation73_spill] sm:$0xff] %v23451_v18  ;;  %30545 = vst [vmem:[#allocation74_spill] sm:$0xff] %v23454_v0  ;;  %20593 = vmatpush3.bf16.msra.mxu0 %v20590_v56  ;;  %v29499_v61 = vand.u32 4294901760, %v23428_v55  ;;  %v30552_v53 = vand.u32 4294901760, %v23307_v59  ;;  %v748_v56 = vsub.f32 %v23413_v40, %v747_v24 }
  0x56   :  { %30548 = vst [vmem:[#allocation77_spill] sm:$0xff] %v23464_v45  ;;  %17759 = vmatmul.mubr.f32.gmra.mrb[32].mxu1 %v699_v10  ;;  %18095 = vmatmul.mubr.f32.gmra.mrb[32].mxu0 %v30549_v16  ;;  %v738_v3 = vsub.f32 %v23372_v11, %v30550_v30  ;;  %v20542_v48 = vpack.c.bf16 %v1017_v52, %v1010_v20  ;;  %v29500_v10 = vand.u32 4294901760, %v23451_v18  ;;  %v23482_v16 = vand.u32 4294901760, %v242_v37 }
  0x57   :  { %17761 = vmatprep.mubr.f32.mxu1 %v709_v4  ;;  %18097 = vmatprep.mubr.f32.mxu0 %v30552_v53  ;;  %v245_v30 = vsel %vm99_vm0, %v68_v17, 0  ;;  %v758_v20 = vsub.f32 %v23421_v27, %v30554_v62  ;;  %v23492_v49 = vsub.f32 %v239_v39, %v23464_v45  ;;  %v69_v53 = vld [vmem:[%s29397_s0 + $0x188] sm:$0xff]  ;;  %v30555_v17 = vand.u32 4294901760, %v23337_v25  ;;  %v71_v25 = vld [vmem:[%s29397_s0 + $0x198] sm:$0xff] }
  0x58   :  { %30553 = vst [vmem:[#allocation79_spill] sm:$0xff] %v23482_v16  ;;  %20543 = vmatprep.subr.bf16.mxu1 %v20542_v48  ;;  %v739_v54 = vand.u32 4294901760, %v738_v3  ;;  %v768_v62 = vsub.f32 %v23428_v55, %v29499_v61  ;;  %v30556_v39 = vand.u32 4294901760, %v23345_v50  ;;  %v749_v52 = vand.u32 4294901760, %v748_v56  ;;  %v70_v3 = vld [vmem:[%s29397_s0 + $0x190] sm:$0xff] }
  0x59   :  { %20545 = vmatpush3.bf16.msra.mxu1 %v20542_v48  ;;  %v778_v48 = vsub.f32 %v23451_v18, %v29500_v10  ;;  %v30559_v61 = vand.u32 4294901760, %v23454_v0  ;;  %v759_v56 = vand.u32 4294901760, %v758_v20  ;;  %v30560_v4 = vand.u32 4294901760, %v23459_v6 }
  0x5a   :  { %17762 = vmatmul.mubr.f32.gmra.mrb[34].mxu1 %v719_v1  ;;  %18098 = vmatmul.mubr.f32.gmra.mrb[34].mxu0 %v30555_v17  ;;  %v23509_v1 = vsub.f32 %v242_v37, %v23482_v16  ;;  %v23511_v17 = vand.u32 4294901760, %v245_v30  ;;  %v30561_v37 = vand.u32 4294901760, %v23462_v9  ;;  %v769_v20 = vand.u32 4294901760, %v768_v62  ;;  %v74_v16 = vld [vmem:[%s29397_s0 + $0x1b0] sm:$0xff] }
  0x5b   :  { %17764 = vmatprep.mubr.f32.mxu1 %v729_v26  ;;  %18100 = vmatprep.mubr.f32.mxu0 %v30556_v39  ;;  %v788_v26 = vsub.f32 %v23454_v0, %v30559_v61  ;;  %v248_v39 = vsel %vm99_vm0, %v69_v53, 0  ;;  %v23523_v10 = vsub.f32 %v23459_v6, %v30560_v4  ;;  %v30562_v61 = vand.u32 4294901760, %v23372_v11 }
  0x5c   :  { %30557 = vst [vmem:[#allocation80_spill] sm:$0xff] %v23509_v1  ;;  %30558 = vst [vmem:[#allocation81_spill] sm:$0xff] %v23511_v17  ;;  %v23528_v40 = vsub.f32 %v23462_v9, %v30561_v37  ;;  %v30563_v53 = vand.u32 4294901760, %v23476_v43  ;;  %v251_v59 = vsel %vm99_vm0, %v70_v3, 0  ;;  %v30564_v37 = vand.u32 4294901760, %v22834_v2 }
  0x5d   :  { %v779_v63 = vand.u32 4294901760, %v778_v48  ;;  %v23551_v62 = vand.u32 4294901760, %v248_v39  ;;  %v789_v3 = vand.u32 4294901760, %v788_v26  ;;  %v254_v11 = vsel %vm99_vm0, %v71_v25, 0 }
  0x5e   :  { %17765 = vmatmul.mubr.f32.gmra.mrb[36].mxu1 %v739_v54  ;;  %18101 = vmatmul.mubr.f32.gmra.mrb[36].mxu0 %v30562_v61  ;;  %v23539_v4 = vsub.f32 %v23476_v43, %v30563_v53  ;;  %v23545_v50 = vsub.f32 %v22834_v2, %v30564_v37  ;;  %v23549_v61 = vsub.f32 %v245_v30, %v23511_v17  ;;  %v72_v53 = vld [vmem:[%s29397_s0 + $0x1a0] sm:$0xff]  ;;  %v799_v48 = vand.u32 4294901760, %v23523_v10  ;;  %v73_v10 = vld [vmem:[%s29397_s0 + $0x1a8] sm:$0xff] }
  0x5f   :  { %17767 = vmatprep.mubr.f32.mxu1 %v749_v52  ;;  %18103 = vmatprep.mubr.f32.mxu0 %v747_v24  ;;  %30566 = vst [vmem:[#allocation83_spill] sm:$0xff] %v23551_v62  ;;  %v30567_v52 = vand.u32 4294901760, %v22841_v5  ;;  %v809_v30 = vand.u32 4294901760, %v23528_v40  ;;  %v30568_v37 = vand.u32 4294901760, %v23492_v49  ;;  %v23570_v17 = vand.u32 4294901760, %v251_v59 }
  0x60   :  { %30565 = vst [vmem:[#allocation82_spill] sm:$0xff] %v23549_v61  ;;  %v1022_v2 = vand.u32 4294901760, %v23545_v50  ;;  %v30570_v25 = vand.u32 4294901760, %v23421_v27  ;;  %v23592_v27 = vand.u32 4294901760, %v254_v11  ;;  %v30575_v45 = vand.u32 4294901760, %v22847_v7 }
  0x61   :  { %v23561_v24 = vsub.f32 %v22841_v5, %v30567_v52  ;;  %v23568_v54 = vsub.f32 %v23492_v49, %v30568_v37  ;;  %30569 = vst [vmem:[#allocation84_spill] sm:$0xff] %v23570_v17  ;;  %v257_v5 = vsel %vm99_vm0, %v72_v53, 0  ;;  %v30571_v37 = vand.u32 4294901760, %v23428_v55 }
  0x62   :  { %17768 = vmatmul.mubr.f32.gmra.mrb[38].mxu1 %v759_v56  ;;  %18104 = vmatmul.mubr.f32.gmra.mrb[38].mxu0 %v30570_v25  ;;  %v1023_v40 = vsub.f32 %v23545_v50, %v1022_v2  ;;  %v30572_v56 = vand.u32 4294901760, %v23509_v1  ;;  %v23590_v53 = vsub.f32 %v248_v39, %v23551_v62  ;;  %30574 = vst [vmem:[#allocation86_spill] sm:$0xff] %v23592_v27  ;;  %v23607_v62 = vand.u32 4294901760, %v257_v5 }
  0x63   :  { %v1029_v52 = vand.u32 4294901760, %v23561_v24  ;;  %17770 = vmatprep.mubr.f32.mxu1 %v769_v20  ;;  %18106 = vmatprep.mubr.f32.mxu0 %v30571_v37  ;;  %v829_v26 = vand.u32 4294901760, %v23568_v54  ;;  %v23605_v39 = vsub.f32 %v251_v59, %v23570_v17  ;;  %v260_v31 = vsel %vm99_vm0, %v73_v10, 0 }
  0x64   :  { %v23586_v25 = vsub.f32 %v23509_v1, %v30572_v56  ;;  %30573 = vst [vmem:[#allocation85_spill] sm:$0xff] %v23590_v53  ;;  %v1024_v20 = vand.u32 4294901760, %v1023_v40  ;;  %v23601_v56 = vsub.f32 %v22847_v7, %v30575_v45  ;;  %30577 = vst [vmem:[#allocation88_spill] sm:$0xff] %v23607_v62  ;;  %v30578_v40 = vand.u32 4294901760, %v23451_v18 }
  0x65   :  { %v1030_v55 = vsub.f32 %v23561_v24, %v1029_v52  ;;  %v20594_v37 = vpack.c.bf16 %v1029_v52, %v1022_v2  ;;  %30576 = vst [vmem:[#allocation87_spill] sm:$0xff] %v23605_v39  ;;  %v263_v2 = vsel %vm99_vm0, %v74_v16, 0  ;;  %v30579_v7 = vand.u32 4294901760, %v22852_v8 }
  0x66   :  { %17771 = vmatmul.mubr.f32.gmra.mrb[40].mxu1 %v779_v63  ;;  %18107 = vmatmul.mubr.f32.gmra.mrb[40].mxu0 %v30578_v40  ;;  %v1036_v32 = vand.u32 4294901760, %v23601_v56  ;;  %v30580_v59 = vand.u32 4294901760, %v23454_v0  ;;  %v30581_v63 = vand.u32 4294901760, %v23549_v61  ;;  %v23629_v16 = vsub.f32 %v254_v11, %v23592_v27  ;;  %v76_v40 = vld [vmem:[%s29397_s0 + $0x1c0] sm:$0xff] }
  0x67   :  { %v1031_v52 = vand.u32 4294901760, %v1030_v55  ;;  %v23617_v45 = vsub.f32 %v22852_v8, %v30579_v7  ;;  %17773 = vmatprep.mubr.f32.mxu1 %v789_v3  ;;  %v75_v8 = vld [vmem:[%s29397_s0 + $0x1b8] sm:$0xff]  ;;  %v23634_v3 = vand.u32 4294901760, %v260_v31  ;;  %20595 = vmatprep.subr.bf16.mxu0 %v20594_v37  ;;  %v23643_v11 = vsub.f32 %v257_v5, %v23607_v62 }
  0x68   :  { %18109 = vmatprep.mubr.f32.mxu0 %v30580_v59  ;;  %v23625_v10 = vsub.f32 %v23549_v61, %v30581_v63  ;;  %30582 = vst [vmem:[#allocation89_spill] sm:$0xff] %v23629_v16  ;;  %v1037_v59 = vsub.f32 %v23601_v56, %v1036_v32  ;;  %v23645_v55 = vand.u32 4294901760, %v263_v2  ;;  %20597 = vmatpush3.bf16.msra.mxu0 %v20594_v37  ;;  %v30585_v0 = vand.u32 4294901760, %v22860_v12 }
  0x69   :  { %v20546_v7 = vpack.c.bf16 %v1031_v52, %v1024_v20  ;;  %v1043_v63 = vand.u32 4294901760, %v23617_v45  ;;  %30583 = vst [vmem:[#allocation90_spill] sm:$0xff] %v23643_v11  ;;  %v30586_v20 = vand.u32 4294901760, %v23459_v6  ;;  %v266_v52 = vsel %vm99_vm0, %v75_v8, 0 }
  0x6a   :  { %30584 = vst [vmem:[#allocation91_spill] sm:$0xff] %v23645_v55  ;;  %v23650_v18 = vsub.f32 %v22860_v12, %v30585_v0  ;;  %17774 = vmatmul.mubr.f32.gmra.mrb[42].mxu1 %v799_v48  ;;  %v1038_v27 = vand.u32 4294901760, %v1037_v59  ;;  %v30587_v5 = vand.u32 4294901760, %v23462_v9  ;;  %v849_v37 = vand.u32 4294901760, %v23625_v10  ;;  %v22720_v0 = vld [vmem:[%s29396_s1 + $0x38] sm:$0xff] }
  0x6b   :  { %18110 = vmatmul.mubr.f32.gmra.mrb[42].mxu0 %v30586_v20  ;;  %v1044_v54 = vsub.f32 %v23617_v45, %v1043_v63  ;;  %v20598_v17 = vpack.c.bf16 %v1043_v63, %v1036_v32  ;;  %17776 = vmatprep.mubr.f32.mxu1 %v809_v30  ;;  %v269_v62 = vsel %vm99_vm0, %v76_v40, 0  ;;  %v30588_v48 = vand.u32 4294901760, %v22865_v13  ;;  %v77_v40 = vld [vmem:[%s29397_s0 + $0x1c8] sm:$0xff] }
  0x6c   :  { %18112 = vmatprep.mubr.f32.mxu0 %v30587_v5  ;;  %v1050_v12 = vand.u32 4294901760, %v23650_v18  ;;  %v30589_v32 = vand.u32 4294901760, %v23590_v53  ;;  %v23673_v10 = vsub.f32 %v260_v31, %v23634_v3  ;;  %20547 = vmatprep.subr.bf16.mxu1 %v20546_v7  ;;  %v23679_v13 = vsub.f32 %v263_v2, %v23645_v55  ;;  %v78_v5 = vld [vmem:[%s29397_s0 + $0x1d0] sm:$0xff] }
  0x6d   :  { %v23666_v8 = vsub.f32 %v22720_v0, %v30588_v48  ;;  %v1045_v63 = vand.u32 4294901760, %v1044_v54  ;;  %20599 = vmatprep.subr.bf16.mxu0 %v20598_v17  ;;  %v23681_v20 = vand.u32 4294901760, %v266_v52  ;;  %20549 = vmatpush3.bf16.msra.mxu1 %v20546_v7  ;;  %v30592_v48 = vand.u32 4294901760, %v23539_v4 }
  0x6e   :  { %v858_v30 = vsub.f32 %v23590_v53, %v30589_v32  ;;  %30590 = vst [vmem:[#allocation92_spill] sm:$0xff] %v23673_v10  ;;  %30591 = vst [vmem:[#allocation93_spill] sm:$0xff] %v23679_v13  ;;  %20601 = vmatpush3.bf16.msra.mxu0 %v20598_v17  ;;  %v1051_v31 = vsub.f32 %v23650_v18, %v1050_v12  ;;  %v30593_v54 = vand.u32 4294901760, %v23476_v43  ;;  %v30594_v2 = vand.u32 4294901760, %v23605_v39 }
  0x6f   :  { %v1057_v0 = vand.u32 4294901760, %v23666_v8  ;;  %17777 = vmatmul.mubr.f32.gmra.mrb[44].mxu1 %v30592_v48  ;;  %v23696_v9 = vand.u32 4294901760, %v269_v62  ;;  %v20550_v7 = vpack.c.bf16 %v1045_v63, %v1038_v27  ;;  %v30595_v17 = vand.u32 4294901760, %v23492_v49  ;;  %v79_v27 = vld [vmem:[%s29397_s0 + $0x1d8] sm:$0xff] }
  0x70   :  { %18113 = vmatmul.mubr.f32.gmra.mrb[44].mxu0 %v30593_v54  ;;  %v868_v32 = vsub.f32 %v23605_v39, %v30594_v2  ;;  %17779 = vmatprep.mubr.f32.mxu1 %v829_v26  ;;  %v272_v6 = vsel %vm99_vm0, %v77_v40, 0  ;;  %v1052_v4 = vand.u32 4294901760, %v1051_v31  ;;  %v30596_v54 = vand.u32 4294901760, %v23629_v16 }
  0x71   :  { %18115 = vmatprep.mubr.f32.mxu0 %v30595_v17  ;;  %v1058_v48 = vsub.f32 %v23666_v8, %v1057_v0  ;;  %v20602_v43 = vpack.c.bf16 %v1057_v0, %v1050_v12  ;;  %v275_v2 = vsel %vm99_vm0, %v78_v5, 0  ;;  %20551 = vmatprep.subr.bf16.mxu1 %v20550_v7  ;;  %v897_v26 = vand.u32 4294901760, %v23673_v10  ;;  %v80_v12 = vld [vmem:[%s29397_s0 + $0x1e0] sm:$0xff] }
  0x72   :  { %v878_v55 = vsub.f32 %v23629_v16, %v30596_v54  ;;  %v23712_v40 = vsub.f32 %v266_v52, %v23681_v20  ;;  %20553 = vmatpush3.bf16.msra.mxu1 %v20550_v7  ;;  %v30598_v5 = vand.u32 4294901760, %v23586_v25  ;;  %v30599_v0 = vand.u32 4294901760, %v23509_v1  ;;  %v83_v1 = vld [vmem:[%s29397_s0 + $0x1f8] sm:$0xff] }
  0x73   :  { %v1059_v31 = vand.u32 4294901760, %v1058_v48  ;;  %20603 = vmatprep.subr.bf16.mxu0 %v20602_v43  ;;  %v859_v17 = vand.u32 4294901760, %v858_v30  ;;  %v869_v54 = vand.u32 4294901760, %v868_v32  ;;  %v23722_v63 = vsub.f32 %v269_v62, %v23696_v9  ;;  %v81_v62 = vld [vmem:[%s29397_s0 + $0x1e8] sm:$0xff] }
  0x74   :  { %30597 = vst [vmem:[#allocation94_spill] sm:$0xff] %v23712_v40  ;;  %17780 = vmatmul.mubr.f32.gmra.mrb[46].mxu1 %v30598_v5  ;;  %18116 = vmatmul.mubr.f32.gmra.mrb[46].mxu0 %v30599_v0  ;;  %v23724_v52 = vand.u32 4294901760, %v272_v6  ;;  %v30601_v59 = vand.u32 4294901760, %v23549_v61  ;;  %v30602_v7 = vand.u32 4294901760, %v23643_v11  ;;  %v23731_v25 = vand.u32 4294901760, %v275_v2 }
  0x75   :  { %30600 = vst [vmem:[#allocation95_spill] sm:$0xff] %v23722_v63  ;;  %17782 = vmatprep.mubr.f32.mxu1 %v849_v37  ;;  %v278_v5 = vsel %vm99_vm0, %v79_v27, 0  ;;  %v20554_v0 = vpack.c.bf16 %v1059_v31, %v1052_v4  ;;  %v281_v30 = vsel %vm99_vm0, %v80_v12, 0  ;;  %20605 = vmatpush3.bf16.msra.mxu0 %v20602_v43  ;;  %v879_v37 = vand.u32 4294901760, %v878_v55  ;;  %v82_v4 = vld [vmem:[%s29397_s0 + $0x1f0] sm:$0xff] }
  0x76   :  { %18118 = vmatprep.mubr.f32.mxu0 %v30601_v59  ;;  %v888_v48 = vsub.f32 %v23643_v11, %v30602_v7  ;;  %30603 = vst [vmem:[#allocation96_spill] sm:$0xff] %v23731_v25  ;;  %v898_v32 = vsub.f32 %v23673_v10, %v897_v26  ;;  %v30604_v59 = vand.u32 4294901760, %v23679_v13  ;;  %v917_v7 = vand.u32 4294901760, %v23712_v40  ;;  %20607 = vmatprep.subr.bf16.mxu0 %v22874_v15 }
  0x77   :  { %20555 = vmatprep.subr.bf16.mxu1 %v20554_v0  ;;  %v30605_v27 = vand.u32 4294901760, %v23590_v53  ;;  %v927_v43 = vand.u32 4294901760, %v23722_v63  ;;  %v23751_v55 = vsub.f32 %v272_v6, %v23724_v52  ;;  %v23753_v12 = vand.u32 4294901760, %v278_v5 }
  0x78   :  { %v908_v61 = vsub.f32 %v23679_v13, %v30604_v59  ;;  %17783 = vmatmul.mubr.f32.gmra.mrb[48].mxu1 %v859_v17  ;;  %v23757_v31 = vpack.c.bf16 %v23404_v22, %v23389_v36  ;;  %v30608_v59 = vand.u32 4294901760, %v23605_v39  ;;  %v889_v10 = vand.u32 4294901760, %v888_v48  ;;  %v30658_v39 = vld [vmem:[#allocation88_spill] sm:$0xff] }
  0x79   :  { %18119 = vmatmul.mubr.f32.gmra.mrb[48].mxu0 %v30605_v27  ;;  %30606 = vst [vmem:[#allocation97_spill] sm:$0xff] %v23751_v55  ;;  %30607 = vst [vmem:[#allocation98_spill] sm:$0xff] %v23753_v12  ;;  %17785 = vmatprep.mubr.f32.mxu1 %v869_v54  ;;  %v23762_v17 = vsub.f32 %v275_v2, %v23731_v25  ;;  %v23764_v27 = vand.u32 4294901760, %v281_v30  ;;  %v284_v53 = vsel %vm99_vm0, %v81_v62, 0  ;;  %v287_v6 = vsel %vm99_vm0, %v82_v4, 0 }
  0x7a   :  { %18121 = vmatprep.mubr.f32.mxu0 %v30608_v59  ;;  %20557 = vmatpush3.bf16.msra.mxu1 %v20554_v0  ;;  %v899_v36 = vand.u32 4294901760, %v898_v32  ;;  %v909_v22 = vand.u32 4294901760, %v908_v61  ;;  %v918_v54 = vsub.f32 %v23712_v40, %v917_v7  ;;  %v30611_v2 = vand.u32 4294901760, %v23629_v16 }
  0x7b   :  { %30609 = vst [vmem:[#allocation99_spill] sm:$0xff] %v23762_v17  ;;  %30610 = vst [vmem:[#allocation100_spill] sm:$0xff] %v23764_v27  ;;  %20559 = vmatprep.subr.bf16.mxu1 %v23757_v31  ;;  %v928_v48 = vsub.f32 %v23722_v63, %v927_v43  ;;  %v937_v62 = vand.u32 4294901760, %v23751_v55  ;;  %v23778_v4 = vsub.f32 %v278_v5, %v23753_v12  ;;  %v23780_v59 = vand.u32 4294901760, %v284_v53 }
  0x7c   :  { %17786 = vmatmul.mubr.f32.gmra.mrb[50].mxu1 %v879_v37  ;;  %v30614_v61 = vand.u32 4294901760, %v23643_v11  ;;  %v947_v0 = vand.u32 4294901760, %v23762_v17  ;;  %v23786_v37 = vsub.f32 %v281_v30, %v23764_v27  ;;  %v23788_v32 = vand.u32 4294901760, %v287_v6 }
  0x7d   :  { %18122 = vmatmul.mubr.f32.gmra.mrb[50].mxu0 %v30611_v2  ;;  %30612 = vst [vmem:[#allocation101_spill] sm:$0xff] %v23778_v4  ;;  %30613 = vst [vmem:[#allocation102_spill] sm:$0xff] %v23780_v59  ;;  %17788 = vmatprep.mubr.f32.mxu1 %v889_v10  ;;  %v290_v2 = vsel %vm99_vm0, %v83_v1, 0  ;;  %v919_v63 = vand.u32 4294901760, %v918_v54  ;;  %v938_v5 = vsub.f32 %v23751_v55, %v937_v62  ;;  %v957_v40 = vand.u32 4294901760, %v23778_v4  ;;  %v30656_v55 = vld [vmem:[#allocation84_spill] sm:$0xff] }
  0x7e   :  { %18124 = vmatprep.mubr.f32.mxu0 %v30614_v61  ;;  %30615 = vst [vmem:[#allocation103_spill] sm:$0xff] %v23786_v37  ;;  %30616 = vst [vmem:[#allocation104_spill] sm:$0xff] %v23788_v32  ;;  %v23794_v10 = vsub.f32 %v284_v53, %v23780_v59  ;;  %v23796_v61 = vand.u32 4294901760, %v290_v2  ;;  %v30619_v30 = vand.u32 4294901760, %v23679_v13  ;;  %v929_v11 = vand.u32 4294901760, %v928_v48  ;;  %v30657_v13 = vld [vmem:[#allocation86_spill] sm:$0xff] }
  0x7f   :  { %v948_v16 = vsub.f32 %v23762_v17, %v947_v0  ;;  %v967_v1 = vand.u32 4294901760, %v23786_v37  ;;  %v958_v53 = vsub.f32 %v23778_v4, %v957_v40  ;;  %v30655_v4 = vld [vmem:[#allocation83_spill] sm:$0xff] }
  0x80   :  { %17789 = vmatmul.mubr.f32.gmra.mrb[52].mxu1 %v899_v36  ;;  %30617 = vst [vmem:[#allocation105_spill] sm:$0xff] %v23794_v10  ;;  %30618 = vst [vmem:[#allocation106_spill] sm:$0xff] %v23796_v61  ;;  %v939_v36 = vand.u32 4294901760, %v938_v5  ;;  %v977_v54 = vand.u32 4294901760, %v23794_v10 }
  0x81   :  { %18125 = vmatmul.mubr.f32.gmra.mrb[52].mxu0 %v897_v26  ;;  %17791 = vmatprep.mubr.f32.mxu1 %v909_v22  ;;  %v23803_v26 = vsub.f32 %v287_v6, %v23788_v32  ;;  %v23808_v22 = vsub.f32 %v290_v2, %v23796_v61  ;;  %v949_v48 = vand.u32 4294901760, %v948_v16  ;;  %v959_v6 = vand.u32 4294901760, %v958_v53  ;;  %v30635_v53 = vld [vmem:[#allocation40_spill] sm:$0xff] }
  0x82   :  { %18127 = vmatprep.mubr.f32.mxu0 %v30619_v30  ;;  %v968_v30 = vsub.f32 %v23786_v37, %v967_v1  ;;  %v30654_v37 = vld [vmem:[#allocation81_spill] sm:$0xff] }
  0x83   :  { %30620 = vst [vmem:[#allocation107_spill] sm:$0xff] %v23803_v26  ;;  %30621 = vst [vmem:[#allocation108_spill] sm:$0xff] %v23808_v22  ;;  %v987_v17 = vand.u32 4294901760, %v23803_v26 }
  0x84   :  { %17792 = vmatmul.mubr.f32.gmra.mrb[54].mxu1 %v919_v63  ;;  %v978_v63 = vsub.f32 %v23794_v10, %v977_v54  ;;  %v969_v5 = vand.u32 4294901760, %v968_v30  ;;  %v30638_v30 = vld [vmem:[#allocation46_spill] sm:$0xff]  ;;  %v30653_v10 = vld [vmem:[#allocation79_spill] sm:$0xff] }
  0x85   :  { %18128 = vmatmul.mubr.f32.gmra.mrb[54].mxu0 %v917_v7  ;;  %17794 = vmatprep.mubr.f32.mxu1 %v929_v11  ;;  %v997_v7 = vand.u32 4294901760, %v23808_v22  ;;  %v988_v2 = vsub.f32 %v23803_v26, %v987_v17  ;;  %v30652_v26 = vld [vmem:[#allocation77_spill] sm:$0xff] }
  0x86   :  { %18130 = vmatprep.mubr.f32.mxu0 %v927_v43  ;;  %v979_v11 = vand.u32 4294901760, %v978_v63  ;;  %v30640_v63 = vld [vmem:[#allocation48_spill] sm:$0xff] }
  0x87   :  { %v998_v16 = vsub.f32 %v23808_v22, %v997_v7  ;;  %v989_v43 = vand.u32 4294901760, %v988_v2  ;;  %v30643_v2 = vld [vmem:[#allocation56_spill] sm:$0xff] }
  0x88   :  { %17795 = vmatmul.mubr.f32.gmra.mrb[56].mxu1 %v939_v36  ;;  %v30634_v36 = vld [vmem:[#allocation38_spill] sm:$0xff]  ;;  %v30651_v22 = vld [vmem:[#allocation72_spill] sm:$0xff] }
  0x89   :  { %18131 = vmatmul.mubr.f32.gmra.mrb[56].mxu0 %v937_v62  ;;  %17797 = vmatprep.mubr.f32.mxu1 %v949_v48  ;;  %v999_v62 = vand.u32 4294901760, %v998_v16  ;;  %v30637_v48 = vld [vmem:[#allocation44_spill] sm:$0xff] }
  0x8a   :  { %18133 = vmatprep.mubr.f32.mxu0 %v947_v0  ;;  %v30632_v0 = vld [vmem:[#allocation34_spill] sm:$0xff]  ;;  %v30645_v16 = vld [vmem:[#allocation60_spill] sm:$0xff] }
  0x8c   :  { %17798 = vmatmul.mubr.f32.gmra.mrb[58].mxu1 %v959_v6  ;;  %v30639_v6 = vld [vmem:[#allocation47_spill] sm:$0xff] }
  0x8d   :  { %18134 = vmatmul.mubr.f32.gmra.mrb[58].mxu0 %v957_v40  ;;  %17800 = vmatprep.mubr.f32.mxu1 %v969_v5  ;;  %v20562_v40 = vpack.c.bf16 %v23561_v24, %v23545_v50  ;;  %v30625_v50 = vld [vmem:[#allocation20_spill] sm:$0xff] }
  0x8e   :  { %18136 = vmatprep.mubr.f32.mxu0 %v967_v1  ;;  %v30627_v24 = vld [vmem:[#allocation24_spill] sm:$0xff] }
  0x8f   :  { %v30633_v1 = vld [vmem:[#allocation36_spill] sm:$0xff] }
  0x90   :  { %17801 = vmatmul.mubr.f32.gmra.mrb[60].mxu1 %v979_v11  ;;  %v30642_v5 = vld [vmem:[#allocation52_spill] sm:$0xff]  ;;  %v30644_v11 = vld [vmem:[#allocation59_spill] sm:$0xff] }
  0x91   :  { %18137 = vmatmul.mubr.f32.gmra.mrb[60].mxu0 %v977_v54  ;;  %17803 = vmatprep.mubr.f32.mxu1 %v989_v43  ;;  %v30636_v54 = vld [vmem:[#allocation42_spill] sm:$0xff] }
  0x92   :  { %18139 = vmatprep.mubr.f32.mxu0 %v987_v17  ;;  %v20566_v17 = vpack.c.bf16 %v23617_v45, %v23601_v56  ;;  %v30628_v56 = vld [vmem:[#allocation25_spill] sm:$0xff]  ;;  %v30629_v45 = vld [vmem:[#allocation27_spill] sm:$0xff]  ;;  %v30646_v43 = vld [vmem:[#allocation62_spill] sm:$0xff] }
  0x94   :  { %17804 = vmatmul.mubr.f32.gmra.mrb[62].mxu1 %v999_v62  ;;  %v30647_v62 = vld [vmem:[#allocation65_spill] sm:$0xff] }
  0x95   :  { %18140 = vmatmul.mubr.f32.gmra.mrb[62].mxu0 %v997_v7  ;;  %17822 = vmatprep.mubr.f32.mxu1 %v22894_v23  ;;  %v30641_v7 = vld [vmem:[#allocation49_spill] sm:$0xff] }
  0x96   :  { %18158 = vmatprep.mubr.f32.mxu0 %v22894_v23 }
  0x98   :  { %17823 = vmatmul.mubr.f32.vlgmr.msra.gmra.mrb[0].mxu1 %v22914_v29 }
  0x99   :  { %18159 = vmatmul.mubr.f32.vlgmr.msra.gmra.mrb[0].mxu0 %v22914_v29  ;;  %17825 = vmatprep.mubr.f32.mxu1 %v22923_v33 }
  0x9a   :  { %18161 = vmatprep.mubr.f32.mxu0 %v22923_v33  ;;  %20561 = vmatpush3.bf16.msra.mxu1 %v23757_v31  ;;  %v30631_v31 = vld [vmem:[#allocation32_spill] sm:$0xff] }
  0x9b   :  { %20609 = vmatpush3.bf16.msra.mxu0 %v22874_v15  ;;  %20563 = vmatprep.subr.bf16.mxu1 %v20562_v40  ;;  %v20570_v15 = vpack.c.bf16 %v23666_v8, %v23650_v18  ;;  %v30626_v18 = vld [vmem:[#allocation21_spill] sm:$0xff]  ;;  %v30630_v8 = vld [vmem:[#allocation30_spill] sm:$0xff] }
  0x9c   :  { %20611 = vmatprep.subr.bf16.mxu0 %v22891_v21  ;;  %17826 = vmatmul.mubr.f32.gmra.mrb[2].mxu1 %v22925_v34 }
  0x9d   :  { %18162 = vmatmul.mubr.f32.gmra.mrb[2].mxu0 %v22925_v34  ;;  %17828 = vmatprep.mubr.f32.mxu1 %v22936_v38 }
  0x9e   :  { %18164 = vmatprep.mubr.f32.mxu0 %v22936_v38  ;;  %20565 = vmatpush3.bf16.msra.mxu1 %v20562_v40  ;;  %v30648_v40 = vld [vmem:[#allocation66_spill] sm:$0xff] }
  0x9f   :  { %20613 = vmatpush3.bf16.msra.mxu0 %v22891_v21  ;;  %20567 = vmatprep.subr.bf16.mxu1 %v20566_v17  ;;  %v30622_v21 = vld [vmem:[#allocation14_spill] sm:$0xff] }
  0xa0   :  { %20615 = vmatprep.subr.bf16.mxu0 %v22912_v28  ;;  %17829 = vmatmul.mubr.f32.gmra.mrb[4].mxu1 %v22947_v44 }
  0xa1   :  { %18165 = vmatmul.mubr.f32.gmra.mrb[4].mxu0 %v22947_v44  ;;  %17831 = vmatprep.mubr.f32.mxu1 %v22953_v47 }
  0xa2   :  { %18167 = vmatprep.mubr.f32.mxu0 %v22953_v47  ;;  %20569 = vmatpush3.bf16.msra.mxu1 %v20566_v17  ;;  %v30649_v17 = vld [vmem:[#allocation67_spill] sm:$0xff] }
  0xa3   :  { %20617 = vmatpush3.bf16.msra.mxu0 %v22912_v28  ;;  %20571 = vmatprep.subr.bf16.mxu1 %v20570_v15  ;;  %v30623_v28 = vld [vmem:[#allocation16_spill] sm:$0xff] }
  0xa4   :  { %20619 = vmatprep.subr.bf16.mxu0 %v22966_v51  ;;  %17832 = vmatmul.mubr.f32.gmra.mrb[6].mxu1 %v22976_v57 }
  0xa5   :  { %18168 = vmatmul.mubr.f32.gmra.mrb[6].mxu0 %v22976_v57  ;;  %17834 = vmatprep.mubr.f32.mxu1 %v22999_v19 }
  0xa6   :  { %18170 = vmatprep.mubr.f32.mxu0 %v22999_v19  ;;  %20573 = vmatpush3.bf16.msra.mxu1 %v20570_v15  ;;  %v30650_v15 = vld [vmem:[#allocation71_spill] sm:$0xff] }
  0xa7   :  { %20621 = vmatpush3.bf16.msra.mxu0 %v22966_v51  ;;  %v30624_v51 = vld [vmem:[#allocation18_spill] sm:$0xff] }
  0xa8   :  { %17835 = vmatmul.mubr.f32.gmra.mrb[8].mxu1 %v23011_v35 }
  0xa9   :  { %18171 = vmatmul.mubr.f32.gmra.mrb[8].mxu0 %v23011_v35  ;;  %17837 = vmatprep.mubr.f32.mxu1 %v23019_v41 }
  0xaa   :  { %18173 = vmatprep.mubr.f32.mxu0 %v23019_v41 }
  0xac   :  { %17838 = vmatmul.mubr.f32.gmra.mrb[10].mxu1 %v23027_v60 }
  0xad   :  { %18174 = vmatmul.mubr.f32.gmra.mrb[10].mxu0 %v23027_v60  ;;  %17840 = vmatprep.mubr.f32.mxu1 %v23036_v14 }
  0xae   :  { %18176 = vmatprep.mubr.f32.mxu0 %v23036_v14 }
  0xb0   :  { %17841 = vmatmul.mubr.f32.gmra.mrb[12].mxu1 %v30622_v21 }
  0xb1   :  { %18177 = vmatmul.mubr.f32.gmra.mrb[12].mxu0 %v30622_v21  ;;  %17843 = vmatprep.mubr.f32.mxu1 %v30623_v28 }
  0xb2   :  { %18179 = vmatprep.mubr.f32.mxu0 %v30623_v28 }
  0xb4   :  { %17844 = vmatmul.mubr.f32.gmra.mrb[14].mxu1 %v30624_v51 }
  0xb5   :  { %18180 = vmatmul.mubr.f32.gmra.mrb[14].mxu0 %v30624_v51  ;;  %17846 = vmatprep.mubr.f32.mxu1 %v30625_v50 }
  0xb6   :  { %18182 = vmatprep.mubr.f32.mxu0 %v30625_v50 }
  0xb8   :  { %17847 = vmatmul.mubr.f32.gmra.mrb[16].mxu1 %v30626_v18 }
  0xb9   :  { %18183 = vmatmul.mubr.f32.gmra.mrb[16].mxu0 %v30626_v18  ;;  %17849 = vmatprep.mubr.f32.mxu1 %v30627_v24 }
  0xba   :  { %18185 = vmatprep.mubr.f32.mxu0 %v30627_v24 }
  0xbc   :  { %17850 = vmatmul.mubr.f32.gmra.mrb[18].mxu1 %v30628_v56 }
  0xbd   :  { %18186 = vmatmul.mubr.f32.gmra.mrb[18].mxu0 %v30628_v56  ;;  %17852 = vmatprep.mubr.f32.mxu1 %v30629_v45 }
  0xbe   :  { %18188 = vmatprep.mubr.f32.mxu0 %v30629_v45 }
  0xc0   :  { %17853 = vmatmul.mubr.f32.gmra.mrb[20].mxu1 %v30630_v8 }
  0xc1   :  { %18189 = vmatmul.mubr.f32.gmra.mrb[20].mxu0 %v30630_v8  ;;  %17855 = vmatprep.mubr.f32.mxu1 %v30631_v31 }
  0xc2   :  { %18191 = vmatprep.mubr.f32.mxu0 %v30631_v31 }
  0xc4   :  { %17856 = vmatmul.mubr.f32.gmra.mrb[22].mxu1 %v30632_v0 }
  0xc5   :  { %18192 = vmatmul.mubr.f32.gmra.mrb[22].mxu0 %v30632_v0  ;;  %17858 = vmatprep.mubr.f32.mxu1 %v30633_v1 }
  0xc6   :  { %18194 = vmatprep.mubr.f32.mxu0 %v30633_v1 }
  0xc8   :  { %17859 = vmatmul.mubr.f32.gmra.mrb[24].mxu1 %v30634_v36 }
  0xc9   :  { %18195 = vmatmul.mubr.f32.gmra.mrb[24].mxu0 %v30634_v36  ;;  %17861 = vmatprep.mubr.f32.mxu1 %v30635_v53 }
  0xca   :  { %18197 = vmatprep.mubr.f32.mxu0 %v30635_v53 }
  0xcc   :  { %17862 = vmatmul.mubr.f32.gmra.mrb[26].mxu1 %v30636_v54 }
  0xcd   :  { %18198 = vmatmul.mubr.f32.gmra.mrb[26].mxu0 %v30636_v54  ;;  %17864 = vmatprep.mubr.f32.mxu1 %v30637_v48 }
  0xce   :  { %18200 = vmatprep.mubr.f32.mxu0 %v30637_v48 }
  0xd0   :  { %17865 = vmatmul.mubr.f32.gmra.mrb[28].mxu1 %v30638_v30 }
  0xd1   :  { %18201 = vmatmul.mubr.f32.gmra.mrb[28].mxu0 %v30638_v30  ;;  %17867 = vmatprep.mubr.f32.mxu1 %v30639_v6 }
  0xd2   :  { %18203 = vmatprep.mubr.f32.mxu0 %v30639_v6 }
  0xd4   :  { %17868 = vmatmul.mubr.f32.gmra.mrb[30].mxu1 %v30640_v63 }
  0xd5   :  { %18204 = vmatmul.mubr.f32.gmra.mrb[30].mxu0 %v30640_v63  ;;  %17870 = vmatprep.mubr.f32.mxu1 %v30641_v7 }
  0xd6   :  { %18206 = vmatprep.mubr.f32.mxu0 %v30641_v7 }
  0xd8   :  { %17871 = vmatmul.mubr.f32.gmra.mrb[32].mxu1 %v30642_v5 }
  0xd9   :  { %18207 = vmatmul.mubr.f32.gmra.mrb[32].mxu0 %v30642_v5  ;;  %17873 = vmatprep.mubr.f32.mxu1 %v30643_v2 }
  0xda   :  { %18209 = vmatprep.mubr.f32.mxu0 %v30643_v2 }
  0xdc   :  { %17874 = vmatmul.mubr.f32.gmra.mrb[34].mxu1 %v30644_v11 }
  0xdd   :  { %18210 = vmatmul.mubr.f32.gmra.mrb[34].mxu0 %v30644_v11  ;;  %17876 = vmatprep.mubr.f32.mxu1 %v30645_v16 }
  0xde   :  { %18212 = vmatprep.mubr.f32.mxu0 %v30645_v16 }
  0xe0   :  { %17877 = vmatmul.mubr.f32.gmra.mrb[36].mxu1 %v30646_v43 }
  0xe1   :  { %18213 = vmatmul.mubr.f32.gmra.mrb[36].mxu0 %v30646_v43  ;;  %17879 = vmatprep.mubr.f32.mxu1 %v30647_v62 }
  0xe2   :  { %18215 = vmatprep.mubr.f32.mxu0 %v30647_v62 }
  0xe4   :  { %17880 = vmatmul.mubr.f32.gmra.mrb[38].mxu1 %v30648_v40 }
  0xe5   :  { %18216 = vmatmul.mubr.f32.gmra.mrb[38].mxu0 %v30648_v40  ;;  %17882 = vmatprep.mubr.f32.mxu1 %v30649_v17 }
  0xe6   :  { %18218 = vmatprep.mubr.f32.mxu0 %v30649_v17 }
  0xe8   :  { %17883 = vmatmul.mubr.f32.gmra.mrb[40].mxu1 %v23415_v42 }
  0xe9   :  { %18219 = vmatmul.mubr.f32.gmra.mrb[40].mxu0 %v23415_v42  ;;  %17885 = vmatprep.mubr.f32.mxu1 %v23423_v46 }
  0xea   :  { %18221 = vmatprep.mubr.f32.mxu0 %v23423_v46 }
  0xec   :  { %17886 = vmatmul.mubr.f32.gmra.mrb[42].mxu1 %v23430_v58 }
  0xed   :  { %18222 = vmatmul.mubr.f32.gmra.mrb[42].mxu0 %v23430_v58  ;;  %17888 = vmatprep.mubr.f32.mxu1 %v30650_v15 }
  0xee   :  { %18224 = vmatprep.mubr.f32.mxu0 %v30650_v15 }
  0xf0   :  { %17889 = vmatmul.mubr.f32.gmra.mrb[44].mxu1 %v30651_v22 }
  0xf1   :  { %18225 = vmatmul.mubr.f32.gmra.mrb[44].mxu0 %v30651_v22  ;;  %17891 = vmatprep.mubr.f32.mxu1 %v30652_v26 }
  0xf2   :  { %18227 = vmatprep.mubr.f32.mxu0 %v30652_v26 }
  0xf4   :  { %17892 = vmatmul.mubr.f32.gmra.mrb[46].mxu1 %v30653_v10 }
  0xf5   :  { %18228 = vmatmul.mubr.f32.gmra.mrb[46].mxu0 %v30653_v10  ;;  %17894 = vmatprep.mubr.f32.mxu1 %v30654_v37 }
  0xf6   :  { %18230 = vmatprep.mubr.f32.mxu0 %v30654_v37  ;;  %v30659_v37 = vld [vmem:[#allocation91_spill] sm:$0xff] }
  0xf8   :  { %17895 = vmatmul.mubr.f32.gmra.mrb[48].mxu1 %v30655_v4 }
  0xf9   :  { %18231 = vmatmul.mubr.f32.gmra.mrb[48].mxu0 %v30655_v4  ;;  %17897 = vmatprep.mubr.f32.mxu1 %v30656_v55 }
  0xfa   :  { %18233 = vmatprep.mubr.f32.mxu0 %v30656_v55 }
  0xfc   :  { %17898 = vmatmul.mubr.f32.gmra.mrb[50].mxu1 %v30657_v13 }
  0xfd   :  { %18234 = vmatmul.mubr.f32.gmra.mrb[50].mxu0 %v30657_v13  ;;  %17900 = vmatprep.mubr.f32.mxu1 %v30658_v39 }
  0xfe   :  { %18236 = vmatprep.mubr.f32.mxu0 %v30658_v39 }
 0x100   :  { %17901 = vmatmul.mubr.f32.gmra.mrb[52].mxu1 %v23634_v3 }
 0x101   :  { %18237 = vmatmul.mubr.f32.gmra.mrb[52].mxu0 %v23634_v3  ;;  %17903 = vmatprep.mubr.f32.mxu1 %v30659_v37 }
 0x102   :  { %18239 = vmatprep.mubr.f32.mxu0 %v30659_v37 }
 0x104   :  { %17904 = vmatmul.mubr.f32.gmra.mrb[54].mxu1 %v23681_v20 }
 0x105   :  { %18240 = vmatmul.mubr.f32.gmra.mrb[54].mxu0 %v23681_v20  ;;  %17906 = vmatprep.mubr.f32.mxu1 %v23696_v9 }
 0x106   :  { %18242 = vmatprep.mubr.f32.mxu0 %v23696_v9 }
 0x108   :  { %17907 = vmatmul.mubr.f32.gmra.mrb[56].mxu1 %v23724_v52 }
 0x109   :  { %18243 = vmatmul.mubr.f32.gmra.mrb[56].mxu0 %v23724_v52  ;;  %17909 = vmatprep.mubr.f32.mxu1 %v23731_v25 }
 0x10a   :  { %18245 = vmatprep.mubr.f32.mxu0 %v23731_v25  ;;  %v30660_v25 = vld [vmem:[#allocation2_spill] sm:$0xff] }
 0x10c   :  { %17910 = vmatmul.mubr.f32.gmra.mrb[58].mxu1 %v23753_v12 }
 0x10d   :  { %18246 = vmatmul.mubr.f32.gmra.mrb[58].mxu0 %v23753_v12  ;;  %17912 = vmatprep.mubr.f32.mxu1 %v23764_v27  ;;  %v30661_v12 = vld [vmem:[#allocation3_spill] sm:$0xff] }
 0x10e   :  { %18248 = vmatprep.mubr.f32.mxu0 %v23764_v27  ;;  %v30662_v27 = vld [vmem:[#allocation4_spill] sm:$0xff] }
 0x110   :  { %17913 = vmatmul.mubr.f32.gmra.mrb[60].mxu1 %v23780_v59 }
 0x111   :  { %18249 = vmatmul.mubr.f32.gmra.mrb[60].mxu0 %v23780_v59  ;;  %17915 = vmatprep.mubr.f32.mxu1 %v23788_v32  ;;  %v30663_v59 = vld [vmem:[#allocation5_spill] sm:$0xff] }
 0x112   :  { %18251 = vmatprep.mubr.f32.mxu0 %v23788_v32  ;;  %v30664_v32 = vld [vmem:[#allocation6_spill] sm:$0xff] }
 0x114   :  { %17916 = vmatmul.mubr.f32.gmra.mrb[62].mxu1 %v23796_v61 }
 0x115   :  { %18252 = vmatmul.mubr.f32.gmra.mrb[62].mxu0 %v23796_v61  ;;  %17934 = vmatprep.mubr.f32.mxu1 %v30660_v25  ;;  %v30665_v61 = vld [vmem:[#allocation7_spill] sm:$0xff]  ;;  %v30679_v25 = vld [vmem:[#allocation29_spill] sm:$0xff] }
 0x116   :  { %18270 = vmatprep.mubr.f32.mxu0 %v22894_v23  ;;  %v30666_v23 = vld [vmem:[#allocation8_spill] sm:$0xff] }
 0x118   :  { %17935 = vmatmul.mubr.f32.vlgmr.msra.gmra.mrb[0].mxu1 %v30661_v12  ;;  %v30680_v12 = vld [vmem:[#allocation31_spill] sm:$0xff] }
 0x119   :  { %18271 = vmatmul.mubr.f32.vlgmr.msra.gmra.mrb[0].mxu0 %v22914_v29  ;;  %17937 = vmatprep.mubr.f32.mxu1 %v30662_v27  ;;  %v30667_v29 = vld [vmem:[#allocation9_spill] sm:$0xff] }
 0x11a   :  { %18273 = vmatprep.mubr.f32.mxu0 %v22923_v33  ;;  %v30668_v33 = vld [vmem:[#allocation10_spill] sm:$0xff]  ;;  %v30681_v27 = vld [vmem:[#allocation33_spill] sm:$0xff] }
 0x11c   :  { %17938 = vmatmul.mubr.f32.gmra.mrb[2].mxu1 %v30663_v59  ;;  %v30682_v59 = vld [vmem:[#allocation35_spill] sm:$0xff] }
 0x11d   :  { %18274 = vmatmul.mubr.f32.gmra.mrb[2].mxu0 %v22925_v34  ;;  %17940 = vmatprep.mubr.f32.mxu1 %v30664_v32  ;;  %v30669_v34 = vld [vmem:[#allocation11_spill] sm:$0xff]  ;;  %v30683_v32 = vld [vmem:[#allocation37_spill] sm:$0xff] }
 0x11e   :  { %18276 = vmatprep.mubr.f32.mxu0 %v22936_v38  ;;  %v30670_v38 = vld [vmem:[#allocation12_spill] sm:$0xff] }
 0x120   :  { %17941 = vmatmul.mubr.f32.gmra.mrb[4].mxu1 %v30665_v61  ;;  %v30684_v61 = vld [vmem:[#allocation39_spill] sm:$0xff] }
 0x121   :  { %18277 = vmatmul.mubr.f32.gmra.mrb[4].mxu0 %v22947_v44  ;;  %17943 = vmatprep.mubr.f32.mxu1 %v30666_v23  ;;  %v30671_v44 = vld [vmem:[#allocation13_spill] sm:$0xff]  ;;  %v24089_v23 = vld [vmem:[%s29398_s2] ss:$0 sm:$0xff]  ;;  %s22789_s2 = smov 96  }
 0x122   :  { %18279 = vmatprep.mubr.f32.mxu0 %v22953_v47  ;;  %v30672_v47 = vld [vmem:[#allocation15_spill] sm:$0xff] }
 0x124   :  { %17944 = vmatmul.mubr.f32.gmra.mrb[6].mxu1 %v30667_v29 }
 0x125   :  { %18280 = vmatmul.mubr.f32.gmra.mrb[6].mxu0 %v22976_v57  ;;  %17946 = vmatprep.mubr.f32.mxu1 %v30668_v33  ;;  %v30673_v57 = vld [vmem:[#allocation17_spill] sm:$0xff] }
 0x126   :  { %18282 = vmatprep.mubr.f32.mxu0 %v22999_v19  ;;  %v30674_v19 = vld [vmem:[#allocation19_spill] sm:$0xff] }
 0x128   :  { %17947 = vmatmul.mubr.f32.gmra.mrb[8].mxu1 %v30669_v34 }
 0x129   :  { %18283 = vmatmul.mubr.f32.gmra.mrb[8].mxu0 %v23011_v35  ;;  %17949 = vmatprep.mubr.f32.mxu1 %v30670_v38  ;;  %v30675_v35 = vld [vmem:[#allocation22_spill] sm:$0xff] }
 0x12a   :  { %18285 = vmatprep.mubr.f32.mxu0 %v23019_v41  ;;  %v30676_v41 = vld [vmem:[#allocation23_spill] sm:$0xff] }
 0x12c   :  { %17950 = vmatmul.mubr.f32.gmra.mrb[10].mxu1 %v30671_v44 }
 0x12d   :  { %18286 = vmatmul.mubr.f32.gmra.mrb[10].mxu0 %v23027_v60  ;;  %17952 = vmatprep.mubr.f32.mxu1 %v30672_v47  ;;  %v30677_v60 = vld [vmem:[#allocation26_spill] sm:$0xff] }
 0x12e   :  { %18288 = vmatprep.mubr.f32.mxu0 %v23036_v14  ;;  %v30678_v14 = vld [vmem:[#allocation28_spill] sm:$0xff] }
 0x130   :  { %17953 = vmatmul.mubr.f32.gmra.mrb[12].mxu1 %v30673_v57 }
 0x131   :  { %18289 = vmatmul.mubr.f32.gmra.mrb[12].mxu0 %v30622_v21  ;;  %17955 = vmatprep.mubr.f32.mxu1 %v30674_v19  ;;  %v30685_v21 = vld [vmem:[#allocation41_spill] sm:$0xff] }
 0x132   :  { %18291 = vmatprep.mubr.f32.mxu0 %v30623_v28  ;;  %v30686_v28 = vld [vmem:[#allocation43_spill] sm:$0xff] }
 0x134   :  { %17956 = vmatmul.mubr.f32.gmra.mrb[14].mxu1 %v30675_v35 }
 0x135   :  { %18292 = vmatmul.mubr.f32.gmra.mrb[14].mxu0 %v30624_v51  ;;  %17958 = vmatprep.mubr.f32.mxu1 %v30676_v41  ;;  %v30687_v51 = vld [vmem:[#allocation45_spill] sm:$0xff] }
 0x136   :  { %18294 = vmatprep.mubr.f32.mxu0 %v30625_v50  ;;  %v30688_v50 = vld [vmem:[#allocation50_spill] sm:$0xff] }
 0x138   :  { %17959 = vmatmul.mubr.f32.gmra.mrb[16].mxu1 %v30677_v60 }
 0x139   :  { %18295 = vmatmul.mubr.f32.gmra.mrb[16].mxu0 %v30626_v18  ;;  %17961 = vmatprep.mubr.f32.mxu1 %v30678_v14  ;;  %v30689_v18 = vld [vmem:[#allocation51_spill] sm:$0xff] }
 0x13a   :  { %18297 = vmatprep.mubr.f32.mxu0 %v30627_v24  ;;  %v30690_v24 = vld [vmem:[#allocation53_spill] sm:$0xff] }
 0x13c   :  { %17962 = vmatmul.mubr.f32.gmra.mrb[18].mxu1 %v30679_v25 }
 0x13d   :  { %18298 = vmatmul.mubr.f32.gmra.mrb[18].mxu0 %v30628_v56  ;;  %17964 = vmatprep.mubr.f32.mxu1 %v30680_v12  ;;  %v30691_v56 = vld [vmem:[#allocation54_spill] sm:$0xff] }
 0x13e   :  { %18300 = vmatprep.mubr.f32.mxu0 %v30629_v45  ;;  %v30692_v45 = vld [vmem:[#allocation55_spill] sm:$0xff] }
 0x140   :  { %17965 = vmatmul.mubr.f32.gmra.mrb[20].mxu1 %v30681_v27 }
 0x141   :  { %18301 = vmatmul.mubr.f32.gmra.mrb[20].mxu0 %v30630_v8  ;;  %17967 = vmatprep.mubr.f32.mxu1 %v30682_v59  ;;  %v30693_v8 = vld [vmem:[#allocation57_spill] sm:$0xff] }
 0x142   :  { %18303 = vmatprep.mubr.f32.mxu0 %v30631_v31  ;;  %v30694_v31 = vld [vmem:[#allocation58_spill] sm:$0xff] }
 0x144   :  { %17968 = vmatmul.mubr.f32.gmra.mrb[22].mxu1 %v30683_v32 }
 0x145   :  { %18304 = vmatmul.mubr.f32.gmra.mrb[22].mxu0 %v30632_v0  ;;  %17970 = vmatprep.mubr.f32.mxu1 %v30684_v61  ;;  %v30695_v0 = vld [vmem:[#allocation61_spill] sm:$0xff] }
 0x146   :  { %18306 = vmatprep.mubr.f32.mxu0 %v30633_v1  ;;  %v30696_v1 = vld [vmem:[#allocation63_spill] sm:$0xff] }
 0x148   :  { %17971 = vmatmul.mubr.f32.gmra.mrb[24].mxu1 %v30685_v21 }
 0x149   :  { %18307 = vmatmul.mubr.f32.gmra.mrb[24].mxu0 %v30634_v36  ;;  %17973 = vmatprep.mubr.f32.mxu1 %v30686_v28  ;;  %v30697_v36 = vld [vmem:[#allocation64_spill] sm:$0xff] }
 0x14a   :  { %18309 = vmatprep.mubr.f32.mxu0 %v30635_v53  ;;  %v30698_v53 = vld [vmem:[#allocation68_spill] sm:$0xff] }
 0x14c   :  { %17974 = vmatmul.mubr.f32.gmra.mrb[26].mxu1 %v30687_v51 }
 0x14d   :  { %18310 = vmatmul.mubr.f32.gmra.mrb[26].mxu0 %v30636_v54  ;;  %17976 = vmatprep.mubr.f32.mxu1 %v30688_v50  ;;  %v30699_v54 = vld [vmem:[#allocation69_spill] sm:$0xff] }
 0x14e   :  { %18312 = vmatprep.mubr.f32.mxu0 %v30637_v48  ;;  %v30700_v48 = vld [vmem:[#allocation70_spill] sm:$0xff] }
 0x150   :  { %17977 = vmatmul.mubr.f32.gmra.mrb[28].mxu1 %v30689_v18 }
 0x151   :  { %18313 = vmatmul.mubr.f32.gmra.mrb[28].mxu0 %v30638_v30  ;;  %17979 = vmatprep.mubr.f32.mxu1 %v30690_v24  ;;  %v30701_v30 = vld [vmem:[#allocation73_spill] sm:$0xff] }
 0x152   :  { %18315 = vmatprep.mubr.f32.mxu0 %v30639_v6  ;;  %v30702_v6 = vld [vmem:[#allocation74_spill] sm:$0xff] }
 0x154   :  { %17980 = vmatmul.mubr.f32.gmra.mrb[30].mxu1 %v30691_v56 }
 0x155   :  { %18316 = vmatmul.mubr.f32.gmra.mrb[30].mxu0 %v30640_v63  ;;  %17982 = vmatprep.mubr.f32.mxu1 %v30692_v45  ;;  %v30703_v63 = vld [vmem:[#allocation75_spill] sm:$0xff] }
 0x156   :  { %18318 = vmatprep.mubr.f32.mxu0 %v30641_v7  ;;  %v30704_v7 = vld [vmem:[#allocation76_spill] sm:$0xff] }
 0x158   :  { %17983 = vmatmul.mubr.f32.gmra.mrb[32].mxu1 %v30693_v8 }
 0x159   :  { %18319 = vmatmul.mubr.f32.gmra.mrb[32].mxu0 %v30642_v5  ;;  %17985 = vmatprep.mubr.f32.mxu1 %v30694_v31  ;;  %v30705_v5 = vld [vmem:[#allocation78_spill] sm:$0xff] }
 0x15a   :  { %18321 = vmatprep.mubr.f32.mxu0 %v30643_v2  ;;  %v30708_v2 = vld [vmem:[#allocation81_spill] sm:$0xff] }
 0x15c   :  { %17986 = vmatmul.mubr.f32.gmra.mrb[34].mxu1 %v30695_v0 }
 0x15d   :  { %18322 = vmatmul.mubr.f32.gmra.mrb[34].mxu0 %v30644_v11  ;;  %17988 = vmatprep.mubr.f32.mxu1 %v30696_v1  ;;  %v30710_v11 = vld [vmem:[#allocation87_spill] sm:$0xff] }
 0x15e   :  { %18324 = vmatprep.mubr.f32.mxu0 %v30645_v16  ;;  %v30719_v16 = vld [vmem:[#allocation96_spill] sm:$0xff] }
 0x160   :  { %17989 = vmatmul.mubr.f32.gmra.mrb[36].mxu1 %v30697_v36 }
 0x161   :  { %18325 = vmatmul.mubr.f32.gmra.mrb[36].mxu0 %v30646_v43  ;;  %17991 = vmatprep.mubr.f32.mxu1 %v30698_v53  ;;  %v30721_v43 = vld [vmem:[#allocation98_spill] sm:$0xff] }
 0x162   :  { %18327 = vmatprep.mubr.f32.mxu0 %v30647_v62  ;;  %v30723_v62 = vld [vmem:[#allocation100_spill] sm:$0xff] }
 0x164   :  { %17992 = vmatmul.mubr.f32.gmra.mrb[38].mxu1 %v30699_v54 }
 0x165   :  { %18328 = vmatmul.mubr.f32.gmra.mrb[38].mxu0 %v30648_v40  ;;  %17994 = vmatprep.mubr.f32.mxu1 %v30700_v48  ;;  %v30725_v40 = vld [vmem:[#allocation102_spill] sm:$0xff] }
 0x166   :  { %18330 = vmatprep.mubr.f32.mxu0 %v30649_v17  ;;  %v30727_v17 = vld [vmem:[#allocation104_spill] sm:$0xff] }
 0x168   :  { %17995 = vmatmul.mubr.f32.gmra.mrb[40].mxu1 %v30701_v30 }
 0x169   :  { %18331 = vmatmul.mubr.f32.gmra.mrb[40].mxu0 %v23415_v42  ;;  %17997 = vmatprep.mubr.f32.mxu1 %v30702_v6  ;;  %v30706_v42 = vld [vmem:[#allocation80_spill] sm:$0xff] }
 0x16a   :  { %18333 = vmatprep.mubr.f32.mxu0 %v23423_v46  ;;  %v30707_v46 = vld [vmem:[#allocation82_spill] sm:$0xff] }
 0x16c   :  { %17998 = vmatmul.mubr.f32.gmra.mrb[42].mxu1 %v30703_v63 }
 0x16d   :  { %18334 = vmatmul.mubr.f32.gmra.mrb[42].mxu0 %v23430_v58  ;;  %18000 = vmatprep.mubr.f32.mxu1 %v30704_v7  ;;  %v30709_v58 = vld [vmem:[#allocation85_spill] sm:$0xff] }
 0x16e   :  { %18336 = vmatprep.mubr.f32.mxu0 %v30650_v15  ;;  %v30729_v15 = vld [vmem:[#allocation106_spill] sm:$0xff] }
 0x170   :  { %18001 = vmatmul.mubr.f32.gmra.mrb[44].mxu1 %v30705_v5 }
 0x171   :  { %18337 = vmatmul.mubr.f32.gmra.mrb[44].mxu0 %v30651_v22  ;;  %18003 = vmatprep.mubr.f32.mxu1 %v23492_v49  ;;  %v30711_v22 = vld [vmem:[#allocation89_spill] sm:$0xff]  ;;  %v30712_v49 = vld [vmem:[#allocation90_spill] sm:$0xff] }
 0x172   :  { %18339 = vmatprep.mubr.f32.mxu0 %v30652_v26  ;;  %v30714_v26 = vld [vmem:[#allocation93_spill] sm:$0xff] }
 0x174   :  { %18004 = vmatmul.mubr.f32.gmra.mrb[46].mxu1 %v30706_v42 }
 0x175   :  { %18340 = vmatmul.mubr.f32.gmra.mrb[46].mxu0 %v30653_v10  ;;  %18006 = vmatprep.mubr.f32.mxu1 %v30707_v46  ;;  %v30713_v10 = vld [vmem:[#allocation92_spill] sm:$0xff] }
 0x176   :  { %18342 = vmatprep.mubr.f32.mxu0 %v30708_v2 }
 0x178   :  { %18007 = vmatmul.mubr.f32.gmra.mrb[48].mxu1 %v30709_v58 }
 0x179   :  { %18343 = vmatmul.mubr.f32.gmra.mrb[48].mxu0 %v30655_v4  ;;  %18009 = vmatprep.mubr.f32.mxu1 %v30710_v11  ;;  %v30715_v4 = vld [vmem:[#allocation94_spill] sm:$0xff] }
 0x17a   :  { %18345 = vmatprep.mubr.f32.mxu0 %v30656_v55  ;;  %v30716_v55 = vld [vmem:[#allocation95_spill] sm:$0xff] }
 0x17c   :  { %18010 = vmatmul.mubr.f32.gmra.mrb[50].mxu1 %v30711_v22 }
 0x17d   :  { %18346 = vmatmul.mubr.f32.gmra.mrb[50].mxu0 %v30657_v13  ;;  %18012 = vmatprep.mubr.f32.mxu1 %v30712_v49  ;;  %v30717_v13 = vld [vmem:[#allocation97_spill] sm:$0xff] }
 0x17e   :  { %18348 = vmatprep.mubr.f32.mxu0 %v30658_v39  ;;  %v30718_v39 = vld [vmem:[#allocation99_spill] sm:$0xff] }
 0x180   :  { %18013 = vmatmul.mubr.f32.gmra.mrb[52].mxu1 %v30713_v10 }
 0x181   :  { %18349 = vmatmul.mubr.f32.gmra.mrb[52].mxu0 %v23634_v3  ;;  %18015 = vmatprep.mubr.f32.mxu1 %v30714_v26  ;;  %v30720_v3 = vld [vmem:[#allocation101_spill] sm:$0xff] }
 0x182   :  { %18351 = vmatprep.mubr.f32.mxu0 %v30659_v37  ;;  %v30722_v37 = vld [vmem:[#allocation103_spill] sm:$0xff] }
 0x184   :  { %18016 = vmatmul.mubr.f32.gmra.mrb[54].mxu1 %v30715_v4 }
 0x185   :  { %18352 = vmatmul.mubr.f32.gmra.mrb[54].mxu0 %v23681_v20  ;;  %18018 = vmatprep.mubr.f32.mxu1 %v30716_v55  ;;  %v30724_v20 = vld [vmem:[#allocation105_spill] sm:$0xff] }
 0x186   :  { %18354 = vmatprep.mubr.f32.mxu0 %v23696_v9  ;;  %v30726_v9 = vld [vmem:[#allocation107_spill] sm:$0xff] }
 0x188   :  { %18019 = vmatmul.mubr.f32.gmra.mrb[56].mxu1 %v30717_v13 }
 0x189   :  { %18355 = vmatmul.mubr.f32.gmra.mrb[56].mxu0 %v23724_v52  ;;  %18021 = vmatprep.mubr.f32.mxu1 %v30718_v39  ;;  %v30728_v52 = vld [vmem:[#allocation108_spill] sm:$0xff] }
 0x18a   :  { %18357 = vmatprep.mubr.f32.mxu0 %v30719_v16 }
 0x18c   :  { %18022 = vmatmul.mubr.f32.gmra.mrb[58].mxu1 %v30720_v3 }
 0x18d   :  { %18358 = vmatmul.mubr.f32.gmra.mrb[58].mxu0 %v30721_v43  ;;  %18024 = vmatprep.mubr.f32.mxu1 %v30722_v37 }
 0x18e   :  { %18360 = vmatprep.mubr.f32.mxu0 %v30723_v62 }
 0x190   :  { %18025 = vmatmul.mubr.f32.gmra.mrb[60].mxu1 %v30724_v20 }
 0x191   :  { %18361 = vmatmul.mubr.f32.gmra.mrb[60].mxu0 %v30725_v40  ;;  %18027 = vmatprep.mubr.f32.mxu1 %v30726_v9 }
 0x192   :  { %18363 = vmatprep.mubr.f32.mxu0 %v30727_v17 }
 0x194   :  { %18028 = vmatmul.mubr.f32.gmra.mrb[62].mxu1 %v30728_v52 }
 0x195   :  { %18364 = vmatmul.mubr.f32.gmra.mrb[62].mxu0 %v30729_v15 }
 0x1eb   :  { %v17936_v29 = vpop.f32.mrb[0].mxu1 }
 0x1ec   :  { %v18272_v33 = vpop.f32.mrb[0].mxu0  ;;  %v21054_v34 = vadd.f32 %v17936_v29, %v24089_v23  ;;  %v1578_v38 = vpop.f32.mrb[1].mxu1 }
 0x1ed   :  { %v3156_v44 = vpop.f32.mrb[1].mxu0  ;;  %v21056_v47 = vadd.f32 %v24089_v23, %v1578_v38 }
 0x1ee   :  { %v24093_v57 = vadd.f32 %v21054_v34, %v18272_v33 }
 0x1ef   :  { %v24095_v19 = vadd.f32 %v21056_v47, %v3156_v44  ;;  %v17939_v35 = vpop.f32.mrb[2].mxu1 }
 0x1f0   :  { %v18275_v41 = vpop.f32.mrb[2].mxu0  ;;  %v21058_v60 = vadd.f32 %v17939_v35, %v24089_v23  ;;  %v1592_v14 = vpop.f32.mrb[3].mxu1 }
 0x1f1   :  { %v3168_v25 = vpop.f32.mrb[3].mxu0  ;;  %v21060_v12 = vadd.f32 %v24089_v23, %v1592_v14 }
 0x1f2   :  { %v24099_v27 = vadd.f32 %v21058_v60, %v18275_v41 }
 0x1f3   :  { %v24101_v59 = vadd.f32 %v21060_v12, %v3168_v25  ;;  %v17942_v32 = vpop.f32.mrb[4].mxu1 }
 0x1f4   :  { %v18278_v61 = vpop.f32.mrb[4].mxu0  ;;  %v21062_v21 = vadd.f32 %v17942_v32, %v24089_v23  ;;  %v1606_v28 = vpop.f32.mrb[5].mxu1 }
 0x1f5   :  { %v3180_v51 = vpop.f32.mrb[5].mxu0  ;;  %v21064_v50 = vadd.f32 %v24089_v23, %v1606_v28 }
 0x1f6   :  { %v24105_v18 = vadd.f32 %v21062_v21, %v18278_v61 }
 0x1f7   :  { %v24107_v24 = vadd.f32 %v21064_v50, %v3180_v51  ;;  %v17945_v56 = vpop.f32.mrb[6].mxu1 }
 0x1f8   :  { %v18281_v45 = vpop.f32.mrb[6].mxu0  ;;  %v21066_v8 = vadd.f32 %v17945_v56, %v24089_v23  ;;  %v1620_v31 = vpop.f32.mrb[7].mxu1 }
 0x1f9   :  { %v3192_v0 = vpop.f32.mrb[7].mxu0  ;;  %v21068_v1 = vadd.f32 %v24089_v23, %v1620_v31 }
 0x1fa   :  { %v24111_v36 = vadd.f32 %v21066_v8, %v18281_v45 }
 0x1fb   :  { %v24113_v53 = vadd.f32 %v21068_v1, %v3192_v0  ;;  %v17948_v54 = vpop.f32.mrb[8].mxu1 }
 0x1fc   :  { %v18284_v48 = vpop.f32.mrb[8].mxu0  ;;  %v21070_v30 = vadd.f32 %v17948_v54, %v24089_v23  ;;  %v1634_v6 = vpop.f32.mrb[9].mxu1 }
 0x1fd   :  { %v3204_v63 = vpop.f32.mrb[9].mxu0  ;;  %v21072_v7 = vadd.f32 %v24089_v23, %v1634_v6 }
 0x1fe   :  { %v24117_v5 = vadd.f32 %v21070_v30, %v18284_v48 }
 0x1ff   :  { %v24119_v42 = vadd.f32 %v21072_v7, %v3204_v63  ;;  %v17951_v46 = vpop.f32.mrb[10].mxu1 }
 0x200   :  { %v18287_v2 = vpop.f32.mrb[10].mxu0  ;;  %v3539_v58 = vmax.f32 %v24093_v57, %v24117_v5  ;;  %v21074_v11 = vadd.f32 %v17951_v46, %v24089_v23  ;;  %v1648_v22 = vpop.f32.mrb[11].mxu1 }
 0x201   :  { %v3216_v49 = vpop.f32.mrb[11].mxu0  ;;  %v3538_v10 = vmax.f32 %v24095_v19, %v24119_v42  ;;  %v21076_v26 = vadd.f32 %v24089_v23, %v1648_v22 }
 0x202   :  { %v24127_v4 = vadd.f32 %v21074_v11, %v18287_v2 }
 0x203   :  { %v24129_v55 = vadd.f32 %v21076_v26, %v3216_v49  ;;  %v17954_v13 = vpop.f32.mrb[12].mxu1 }
 0x204   :  { %v18290_v39 = vpop.f32.mrb[12].mxu0  ;;  %v3541_v16 = vmax.f32 %v24099_v27, %v24127_v4  ;;  %v21078_v3 = vadd.f32 %v17954_v13, %v24089_v23  ;;  %v1662_v43 = vpop.f32.mrb[13].mxu1 }
 0x205   :  { %v3228_v37 = vpop.f32.mrb[13].mxu0  ;;  %v3540_v62 = vmax.f32 %v24101_v59, %v24129_v55  ;;  %v21080_v20 = vadd.f32 %v24089_v23, %v1662_v43 }
 0x206   :  { %v24137_v40 = vadd.f32 %v21078_v3, %v18290_v39 }
 0x207   :  { %v24139_v9 = vadd.f32 %v21080_v20, %v3228_v37  ;;  %v17957_v17 = vpop.f32.mrb[14].mxu1 }
 0x208   :  { %v18293_v52 = vpop.f32.mrb[14].mxu0  ;;  %v3543_v15 = vmax.f32 %v24105_v18, %v24137_v40  ;;  %v21082_v29 = vadd.f32 %v17957_v17, %v24089_v23  ;;  %v1676_v33 = vpop.f32.mrb[15].mxu1 }
 0x209   :  { %v3240_v34 = vpop.f32.mrb[15].mxu0  ;;  %v3542_v38 = vmax.f32 %v24107_v24, %v24139_v9  ;;  %v21084_v44 = vadd.f32 %v24089_v23, %v1676_v33 }
 0x20a   :  { %v24147_v47 = vadd.f32 %v21082_v29, %v18293_v52 }
 0x20b   :  { %v24149_v35 = vadd.f32 %v21084_v44, %v3240_v34  ;;  %v17960_v41 = vpop.f32.mrb[16].mxu1 }
 0x20c   :  { %v18296_v60 = vpop.f32.mrb[16].mxu0  ;;  %v3545_v14 = vmax.f32 %v24111_v36, %v24147_v47  ;;  %v21086_v25 = vadd.f32 %v17960_v41, %v24089_v23  ;;  %v1690_v12 = vpop.f32.mrb[17].mxu1 }
 0x20d   :  { %v3252_v32 = vpop.f32.mrb[17].mxu0  ;;  %v3544_v61 = vmax.f32 %v24113_v53, %v24149_v35  ;;  %v21088_v21 = vadd.f32 %v24089_v23, %v1690_v12 }
 0x20e   :  { %v24157_v28 = vadd.f32 %v21086_v25, %v18296_v60 }
 0x20f   :  { %v24159_v51 = vadd.f32 %v21088_v21, %v3252_v32  ;;  %v17963_v50 = vpop.f32.mrb[18].mxu1 }
 0x210   :  { %v18299_v56 = vpop.f32.mrb[18].mxu0  ;;  %v21090_v45 = vadd.f32 %v17963_v50, %v24089_v23  ;;  %v1704_v8 = vpop.f32.mrb[19].mxu1 }
 0x211   :  { %v3264_v31 = vpop.f32.mrb[19].mxu0  ;;  %v21092_v0 = vadd.f32 %v24089_v23, %v1704_v8 }
 0x212   :  { %v24163_v1 = vadd.f32 %v21090_v45, %v18299_v56 }
 0x213   :  { %v24165_v54 = vadd.f32 %v21092_v0, %v3264_v31  ;;  %v17966_v48 = vpop.f32.mrb[20].mxu1 }
 0x214   :  { %v18302_v30 = vpop.f32.mrb[20].mxu0  ;;  %v21094_v6 = vadd.f32 %v17966_v48, %v24089_v23  ;;  %v1718_v63 = vpop.f32.mrb[21].mxu1 }
 0x215   :  { %v3276_v7 = vpop.f32.mrb[21].mxu0  ;;  %v21096_v46 = vadd.f32 %v24089_v23, %v1718_v63 }
 0x216   :  { %v24169_v2 = vadd.f32 %v21094_v6, %v18302_v30 }
 0x217   :  { %v24171_v11 = vadd.f32 %v21096_v46, %v3276_v7  ;;  %v17969_v22 = vpop.f32.mrb[22].mxu1 }
 0x218   :  { %v18305_v49 = vpop.f32.mrb[22].mxu0  ;;  %v21098_v26 = vadd.f32 %v17969_v22, %v24089_v23  ;;  %v1732_v13 = vpop.f32.mrb[23].mxu1 }
 0x219   :  { %v3288_v39 = vpop.f32.mrb[23].mxu0  ;;  %v21100_v3 = vadd.f32 %v24089_v23, %v1732_v13 }
 0x21a   :  { %v24175_v43 = vadd.f32 %v21098_v26, %v18305_v49 }
 0x21b   :  { %v24177_v37 = vadd.f32 %v21100_v3, %v3288_v39  ;;  %v17972_v20 = vpop.f32.mrb[24].mxu1 }
 0x21c   :  { %v18308_v17 = vpop.f32.mrb[24].mxu0  ;;  %v21102_v52 = vadd.f32 %v17972_v20, %v24089_v23  ;;  %v1746_v29 = vpop.f32.mrb[25].mxu1 }
 0x21d   :  { %v3300_v33 = vpop.f32.mrb[25].mxu0  ;;  %v21104_v34 = vadd.f32 %v24089_v23, %v1746_v29 }
 0x21e   :  { %v24181_v44 = vadd.f32 %v21102_v52, %v18308_v17 }
 0x21f   :  { %v24183_v41 = vadd.f32 %v21104_v34, %v3300_v33  ;;  %v17975_v60 = vpop.f32.mrb[26].mxu1 }
 0x220   :  { %30730 = vst [vmem:[#allocation14_spill] sm:$0xff] %v24181_v44  ;;  %v18311_v25 = vpop.f32.mrb[26].mxu0  ;;  %v3547_v12 = vmax.f32 %v24157_v28, %v24181_v44  ;;  %v21106_v32 = vadd.f32 %v17975_v60, %v24089_v23  ;;  %v1760_v21 = vpop.f32.mrb[27].mxu1 }
 0x221   :  { %v3312_v50 = vpop.f32.mrb[27].mxu0  ;;  %v3546_v56 = vmax.f32 %v24159_v51, %v24183_v41  ;;  %v21108_v45 = vadd.f32 %v24089_v23, %v1760_v21 }
 0x222   :  { %v24191_v8 = vadd.f32 %v21106_v32, %v18311_v25  ;;  %v3555_v31 = vmax.f32 %v3539_v58, %v3547_v12 }
 0x223   :  { %v24196_v0 = vadd.f32 %v21108_v45, %v3312_v50  ;;  %v17978_v48 = vpop.f32.mrb[28].mxu1  ;;  %v3554_v6 = vmax.f32 %v3538_v10, %v3546_v56 }
 0x224   :  { %30731 = vst [vmem:[#allocation16_spill] sm:$0xff] %v24191_v8  ;;  %v18314_v30 = vpop.f32.mrb[28].mxu0  ;;  %v3549_v63 = vmax.f32 %v24163_v1, %v24191_v8  ;;  %v21110_v7 = vadd.f32 %v17978_v48, %v24089_v23  ;;  %v1774_v46 = vpop.f32.mrb[29].mxu1  ;;  %v6021_v49 = vand.u32 4294901760, %v3555_v31 }
 0x225   :  { %30732 = vst [vmem:[#allocation18_spill] sm:$0xff] %v24196_v0  ;;  %v3324_v22 = vpop.f32.mrb[29].mxu0  ;;  %v3548_v26 = vmax.f32 %v24165_v54, %v24196_v0  ;;  %v21112_v58 = vadd.f32 %v24089_v23, %v1774_v46  ;;  %3666 = vrot.lane.b32.xlu0 %v3554_v6, %s22789_s2  ;;  %v6018_v13 = vand.u32 4294901760, %v3554_v6 }
 0x226   :  { %v24208_v39 = vadd.f32 %v21110_v7, %v18314_v30  ;;  %v24210_v10 = vsub.f32 %v3555_v31, %v6021_v49  ;;  %v3557_v3 = vmax.f32 %v3541_v16, %v3549_v63 }
 0x227   :  { %v24215_v20 = vadd.f32 %v21112_v58, %v3324_v22  ;;  %v24217_v17 = vsub.f32 %v3554_v6, %v6018_v13  ;;  %v17981_v52 = vpop.f32.mrb[30].mxu1  ;;  %v24219_v33 = vpack.c.bf16 %v6021_v49, %v6018_v13  ;;  %v3556_v34 = vmax.f32 %v3540_v62, %v3548_v26 }
 0x228   :  { %30733 = vst [vmem:[#allocation20_spill] sm:$0xff] %v24208_v39  ;;  %v18317_v29 = vpop.f32.mrb[30].mxu0  ;;  %v3551_v60 = vmax.f32 %v24169_v2, %v24208_v39  ;;  %v21114_v25 = vadd.f32 %v17981_v52, %v24089_v23  ;;  %v1788_v12 = vpop.f32.mrb[31].mxu1  ;;  %v6027_v16 = vand.u32 4294901760, %v3557_v3  ;;  %v29558_v21 = vand.u32 4294901760, %v24210_v10 }
 0x229   :  { %30734 = vst [vmem:[#allocation21_spill] sm:$0xff] %v24215_v20  ;;  %30735 = vst [vmem:[#allocation24_spill] sm:$0xff] %v24219_v33  ;;  %v3336_v32 = vpop.f32.mrb[31].mxu0  ;;  %v3550_v50 = vmax.f32 %v24171_v11, %v24215_v20  ;;  %v21116_v56 = vadd.f32 %v24089_v23, %v1788_v12  ;;  %3668 = vrot.lane.b32.xlu0 %v3555_v31, %s22789_s2  ;;  %3670 = vrot.lane.b32.xlu1 %v3556_v34, %s22789_s2  ;;  %v6024_v62 = vand.u32 4294901760, %v3556_v34 }
 0x22a   :  { %v29559_v45 = vand.u32 4294901760, %v24217_v17  ;;  %v24234_v48 = vadd.f32 %v21114_v25, %v18317_v29  ;;  %v24236_v30 = vsub.f32 %v3557_v3, %v6027_v16  ;;  %v3559_v6 = vmax.f32 %v3543_v15, %v3551_v60 }
 0x22b   :  { %v6421_v63 = vsub.f32 %v24210_v10, %v29558_v21  ;;  %v24244_v7 = vadd.f32 %v21116_v56, %v3336_v32  ;;  %v24246_v31 = vsub.f32 %v3556_v34, %v6024_v62  ;;  %v17984_v46 = vpop.f32.mrb[32].mxu1  ;;  %v24248_v49 = vpack.c.bf16 %v6027_v16, %v6024_v62 }
 0x22c   :  { %30736 = vst [vmem:[#allocation25_spill] sm:$0xff] %v24234_v48  ;;  %v18320_v22 = vpop.f32.mrb[32].mxu0  ;;  %v3558_v26 = vmax.f32 %v3542_v38, %v3550_v50  ;;  %v3553_v58 = vmax.f32 %v24175_v43, %v24234_v48  ;;  %v21118_v15 = vadd.f32 %v17984_v46, %v24089_v23  ;;  %v1802_v13 = vpop.f32.mrb[33].mxu1  ;;  %v6033_v29 = vand.u32 4294901760, %v3559_v6 }
 0x22d   :  { %30737 = vst [vmem:[#allocation27_spill] sm:$0xff] %v24244_v7  ;;  %30738 = vst [vmem:[#allocation30_spill] sm:$0xff] %v24248_v49  ;;  %v3348_v52 = vpop.f32.mrb[33].mxu0  ;;  %v6414_v34 = vsub.f32 %v24217_v17, %v29559_v45  ;;  %v3552_v60 = vmax.f32 %v24177_v37, %v24244_v7  ;;  %v21120_v25 = vadd.f32 %v24089_v23, %v1802_v13  ;;  %3672 = vrot.lane.b32.xlu1 %v3557_v3, %s22789_s2 }
 0x22e   :  { %3674 = vrot.lane.b32.xlu0 %v3558_v26, %s22789_s2  ;;  %v6030_v38 = vand.u32 4294901760, %v3558_v26  ;;  %v6422_v12 = vand.u32 4294901760, %v6421_v63  ;;  %v24264_v32 = vadd.f32 %v21118_v15, %v18320_v22  ;;  %v24266_v16 = vsub.f32 %v3559_v6, %v6033_v29 }
 0x22f   :  { %v3561_v50 = vmax.f32 %v3545_v14, %v3553_v58  ;;  %v6415_v56 = vand.u32 4294901760, %v6414_v34  ;;  %v24271_v62 = vadd.f32 %v21120_v25, %v3348_v52  ;;  %v17987_v13 = vpop.f32.mrb[34].mxu1  ;;  %v3560_v63 = vmax.f32 %v3544_v61, %v3552_v60 }
 0x230   :  { %v24273_v46 = vsub.f32 %v3558_v26, %v6030_v38  ;;  %v18323_v21 = vpop.f32.mrb[34].mxu0  ;;  %v24275_v3 = vpack.c.bf16 %v6033_v29, %v6030_v38  ;;  %v21122_v22 = vadd.f32 %v17987_v13, %v24089_v23  ;;  %v1816_v15 = vpop.f32.mrb[35].mxu1  ;;  %v6427_v14 = vand.u32 4294901760, %v24246_v31 }
 0x231   :  { %v3360_v45 = vpop.f32.mrb[35].mxu0  ;;  %v6039_v49 = vand.u32 4294901760, %v3561_v50  ;;  %v24281_v33 = vpack.c.bf16 %v6422_v12, %v6415_v56  ;;  %v21124_v26 = vadd.f32 %v24089_v23, %v1816_v15  ;;  %3676 = vrot.lane.b32.xlu1 %v3559_v6, %s22789_s2  ;;  %v6036_v58 = vand.u32 4294901760, %v3560_v63 }
 0x232   :  { %30739 = vst [vmem:[#allocation32_spill] sm:$0xff] %v24275_v3  ;;  %3678 = vrot.lane.b32.xlu0 %v3560_v63, %s22789_s2  ;;  %v6434_v52 = vand.u32 4294901760, %v24236_v30  ;;  %v6441_v61 = vand.u32 4294901760, %v24273_v46  ;;  %v24289_v29 = vadd.f32 %v21122_v22, %v18323_v21  ;;  %v6428_v60 = vsub.f32 %v24246_v31, %v6427_v14 }
 0x233   :  { %30740 = vst [vmem:[#allocation34_spill] sm:$0xff] %v24281_v33  ;;  %v6461_v34 = vsub.f32 %v3561_v50, %v6039_v49  ;;  %v6448_v25 = vand.u32 4294901760, %v24266_v16  ;;  %v24293_v38 = vadd.f32 %v21124_v26, %v3360_v45  ;;  %v6454_v12 = vsub.f32 %v3560_v63, %v6036_v58  ;;  %v17990_v56 = vpop.f32.mrb[36].mxu1 }
 0x234   :  { %v18326_v13 = vpop.f32.mrb[36].mxu0  ;;  %v24295_v6 = vpack.c.bf16 %v6039_v49, %v6036_v58  ;;  %v6435_v15 = vsub.f32 %v24236_v30, %v6434_v52  ;;  %v21126_v33 = vadd.f32 %v17990_v56, %v24089_v23  ;;  %v1830_v3 = vpop.f32.mrb[37].mxu1  ;;  %v6429_v21 = vand.u32 4294901760, %v6428_v60 }
 0x235   :  { %v3372_v48 = vpop.f32.mrb[37].mxu0  ;;  %v6442_v22 = vsub.f32 %v24273_v46, %v6441_v61  ;;  %v6449_v7 = vsub.f32 %v24266_v16, %v6448_v25  ;;  %v21128_v39 = vadd.f32 %v24089_v23, %v1830_v3  ;;  %3680 = vrot.lane.b32.xlu1 %v3561_v50, %s22789_s2  ;;  %v6455_v49 = vand.u32 4294901760, %v6454_v12 }
 0x236   :  { %30741 = vst [vmem:[#allocation36_spill] sm:$0xff] %v24295_v6  ;;  %3594 = vrot.lane.b32.xlu0 %v24095_v19, %s22790_s15  ;;  %v6436_v45 = vand.u32 4294901760, %v6435_v15  ;;  %v6462_v63 = vand.u32 4294901760, %v6461_v34  ;;  %v24305_v26 = vadd.f32 %v21126_v33, %v18326_v13  ;;  %v24309_v60 = vpack.c.bf16 %v24210_v10, %v24217_v17 }
 0x237   :  { %v6443_v58 = vand.u32 4294901760, %v6442_v22  ;;  %v6450_v56 = vand.u32 4294901760, %v6449_v7  ;;  %v24311_v6 = vadd.f32 %v21128_v39, %v3372_v48  ;;  %v17993_v3 = vpop.f32.mrb[38].mxu1  ;;  %v6456_v8 = vsub.f32 %v6454_v12, %v6455_v49 }
 0x238   :  { %30742 = vst [vmem:[#allocation38_spill] sm:$0xff] %v24309_v60  ;;  %v18329_v20 = vpop.f32.mrb[38].mxu0  ;;  %v24313_v50 = vpack.c.bf16 %v6436_v45, %v6429_v21  ;;  %v6463_v0 = vsub.f32 %v6461_v34, %v6462_v63  ;;  %v21130_v19 = vadd.f32 %v17993_v3, %v24089_v23  ;;  %v1844_v15 = vpop.f32.mrb[39].mxu1  ;;  %v24320_v7 = vpack.c.bf16 %v24236_v30, %v24246_v31 }
 0x239   :  { %v3384_v44 = vpop.f32.mrb[39].mxu0  ;;  %v24316_v33 = vpack.c.bf16 %v6450_v56, %v6443_v58  ;;  %v24324_v39 = vpack.c.bf16 %v24266_v16, %v24273_v46  ;;  %v21132_v48 = vadd.f32 %v24089_v23, %v1844_v15  ;;  %3596 = vrot.lane.b32.xlu1 %v24093_v57, %s22790_s15  ;;  %v6457_v13 = vand.u32 4294901760, %v6456_v8 }
 0x23a   :  { %30743 = vst [vmem:[#allocation40_spill] sm:$0xff] %v24313_v50  ;;  %30745 = vst [vmem:[#allocation44_spill] sm:$0xff] %v24320_v7  ;;  %3598 = vrot.lane.b32.xlu0 %v24101_v59, %s22790_s15  ;;  %v6464_v21 = vand.u32 4294901760, %v6463_v0  ;;  %v24331_v22 = vpack.c.bf16 %v6461_v34, %v6454_v12  ;;  %v24333_v45 = vadd.f32 %v21130_v19, %v18329_v20  ;;  %v30748_v30 = vand.u32 4294901760, %v24217_v17 }
 0x23b   :  { %30744 = vst [vmem:[#allocation42_spill] sm:$0xff] %v24316_v33  ;;  %30746 = vst [vmem:[#allocation46_spill] sm:$0xff] %v24324_v39  ;;  %v30749_v31 = vand.u32 4294901760, %v24210_v10  ;;  %v24341_v46 = vpack.c.bf16 %v6434_v52, %v6427_v14  ;;  %v24343_v58 = vpack.c.bf16 %v6448_v25, %v6441_v61  ;;  %v24345_v57 = vadd.f32 %v21132_v48, %v3384_v44  ;;  %v17996_v56 = vpop.f32.mrb[40].mxu1 }
 0x23c   :  { %30747 = vst [vmem:[#allocation47_spill] sm:$0xff] %v24331_v22  ;;  %v18332_v59 = vpop.f32.mrb[40].mxu0  ;;  %v24347_v8 = vpack.c.bf16 %v6464_v21, %v6457_v13  ;;  %v24349_v0 = vpack.c.bf16 %v6462_v63, %v6455_v49  ;;  %v21134_v20 = vadd.f32 %v17996_v56, %v24089_v23  ;;  %v1858_v34 = vpop.f32.mrb[41].mxu1 }
 0x23d   :  { %v24339_v16 = vpack.c.bf16 %v30749_v31, %v30748_v30  ;;  %30751 = vst [vmem:[#allocation49_spill] sm:$0xff] %v24341_v46  ;;  %30752 = vst [vmem:[#allocation52_spill] sm:$0xff] %v24343_v58  ;;  %v3396_v17 = vpop.f32.mrb[41].mxu0  ;;  %v21136_v10 = vadd.f32 %v24089_v23, %v1858_v34  ;;  %3600 = vrot.lane.b32.xlu1 %v24099_v27, %s22790_s15 }
 0x23e   :  { %30753 = vst [vmem:[#allocation56_spill] sm:$0xff] %v24347_v8  ;;  %30754 = vst [vmem:[#allocation59_spill] sm:$0xff] %v24349_v0  ;;  %3602 = vrot.lane.b32.xlu0 %v24107_v24, %s22790_s15  ;;  %v24357_v44 = vadd.f32 %v21134_v20, %v18332_v59 }
 0x23f   :  { %30750 = vst [vmem:[#allocation48_spill] sm:$0xff] %v24339_v16  ;;  %v24359_v14 = vadd.f32 %v21136_v10, %v3396_v17  ;;  %v17999_v52 = vpop.f32.mrb[42].mxu1 }
 0x240   :  { %v18335_v61 = vpop.f32.mrb[42].mxu0  ;;  %v7952_v25 = vmax.f32 %v24264_v32, %v24357_v44  ;;  %v21138_v12 = vadd.f32 %v17999_v52, %v24089_v23  ;;  %v1872_v49 = vpop.f32.mrb[43].mxu1 }
 0x241   :  { %v3408_v63 = vpop.f32.mrb[43].mxu0  ;;  %v7951_v3 = vmax.f32 %v24271_v62, %v24359_v14  ;;  %v21140_v27 = vadd.f32 %v24089_v23, %v1872_v49  ;;  %3604 = vrot.lane.b32.xlu1 %v24105_v18, %s22790_s15 }
 0x242   :  { %3606 = vrot.lane.b32.xlu0 %v24113_v53, %s22790_s15  ;;  %v24371_v24 = vadd.f32 %v21138_v12, %v18335_v61 }
 0x243   :  { %v24373_v19 = vadd.f32 %v21140_v27, %v3408_v63  ;;  %v18002_v15 = vpop.f32.mrb[44].mxu1 }
 0x244   :  { %v18338_v48 = vpop.f32.mrb[44].mxu0  ;;  %v7954_v13 = vmax.f32 %v24289_v29, %v24371_v24  ;;  %v21142_v21 = vadd.f32 %v18002_v15, %v24089_v23  ;;  %v1886_v30 = vpop.f32.mrb[45].mxu1  ;;  %v30758_v15 = vld [vmem:[#allocation14_spill] sm:$0xff] }
 0x245   :  { %v3420_v31 = vpop.f32.mrb[45].mxu0  ;;  %v7953_v56 = vmax.f32 %v24293_v38, %v24373_v19  ;;  %v21144_v18 = vadd.f32 %v24089_v23, %v1886_v30  ;;  %3608 = vrot.lane.b32.xlu1 %v24111_v36, %s22790_s15 }
 0x246   :  { %3610 = vrot.lane.b32.xlu0 %v24119_v42, %s22790_s15  ;;  %v24385_v53 = vadd.f32 %v21142_v21, %v18338_v48 }
 0x247   :  { %v24387_v59 = vadd.f32 %v21144_v18, %v3420_v31  ;;  %v18005_v20 = vpop.f32.mrb[46].mxu1 }
 0x248   :  { %v18341_v34 = vpop.f32.mrb[46].mxu0  ;;  %v21146_v10 = vadd.f32 %v18005_v20, %v24089_v23  ;;  %v1900_v52 = vpop.f32.mrb[47].mxu1 }
 0x249   :  { %v3432_v61 = vpop.f32.mrb[47].mxu0  ;;  %v21148_v36 = vadd.f32 %v24089_v23, %v1900_v52  ;;  %3612 = vrot.lane.b32.xlu1 %v24117_v5, %s22790_s15 }
 0x24a   :  { %3614 = vrot.lane.b32.xlu0 %v24129_v55, %s22790_s15  ;;  %v24399_v42 = vadd.f32 %v21146_v10, %v18341_v34 }
 0x24b   :  { %v24401_v49 = vadd.f32 %v21148_v36, %v3432_v61  ;;  %v18008_v63 = vpop.f32.mrb[48].mxu1 }
 0x24c   :  { %v18344_v27 = vpop.f32.mrb[48].mxu0  ;;  %v21150_v48 = vadd.f32 %v18008_v63, %v24089_v23  ;;  %v1914_v21 = vpop.f32.mrb[49].mxu1 }
 0x24d   :  { %v3444_v30 = vpop.f32.mrb[49].mxu0  ;;  %v21152_v5 = vadd.f32 %v24089_v23, %v1914_v21  ;;  %3616 = vrot.lane.b32.xlu1 %v24127_v4, %s22790_s15 }
 0x24e   :  { %3618 = vrot.lane.b32.xlu0 %v24139_v9, %s22790_s15  ;;  %v24413_v55 = vadd.f32 %v21150_v48, %v18344_v27 }
 0x24f   :  { %v24415_v18 = vadd.f32 %v21152_v5, %v3444_v30  ;;  %v18011_v20 = vpop.f32.mrb[50].mxu1 }
 0x250   :  { %v18347_v34 = vpop.f32.mrb[50].mxu0  ;;  %v21154_v10 = vadd.f32 %v18011_v20, %v24089_v23  ;;  %v1928_v52 = vpop.f32.mrb[51].mxu1 }
 0x251   :  { %v3456_v61 = vpop.f32.mrb[51].mxu0  ;;  %v21156_v36 = vadd.f32 %v24089_v23, %v1928_v52  ;;  %3620 = vrot.lane.b32.xlu1 %v24137_v40, %s22790_s15 }
 0x252   :  { %3622 = vrot.lane.b32.xlu0 %v24149_v35, %s22790_s15  ;;  %v24423_v4 = vadd.f32 %v21154_v10, %v18347_v34 }
 0x253   :  { %v24425_v9 = vadd.f32 %v21156_v36, %v3456_v61  ;;  %v18014_v63 = vpop.f32.mrb[52].mxu1 }
 0x254   :  { %v18350_v27 = vpop.f32.mrb[52].mxu0  ;;  %v21158_v48 = vadd.f32 %v18014_v63, %v24089_v23  ;;  %v1942_v21 = vpop.f32.mrb[53].mxu1 }
 0x255   :  { %v3468_v30 = vpop.f32.mrb[53].mxu0  ;;  %v21160_v5 = vadd.f32 %v24089_v23, %v1942_v21  ;;  %3624 = vrot.lane.b32.xlu1 %v24147_v47, %s22790_s15 }
 0x256   :  { %3626 = vrot.lane.b32.xlu0 %v24159_v51, %s22790_s15  ;;  %v24433_v40 = vadd.f32 %v21158_v48, %v18350_v27 }
 0x257   :  { %v24435_v35 = vadd.f32 %v21160_v5, %v3468_v30  ;;  %v18017_v20 = vpop.f32.mrb[54].mxu1 }
 0x258   :  { %v18353_v34 = vpop.f32.mrb[54].mxu0  ;;  %v21162_v10 = vadd.f32 %v18017_v20, %v24089_v23  ;;  %v1956_v52 = vpop.f32.mrb[55].mxu1 }
 0x259   :  { %v3480_v61 = vpop.f32.mrb[55].mxu0  ;;  %v21164_v36 = vadd.f32 %v24089_v23, %v1956_v52  ;;  %3628 = vrot.lane.b32.xlu1 %v24157_v28, %s22790_s15 }
 0x25a   :  { %3630 = vrot.lane.b32.xlu0 %v24165_v54, %s22790_s15  ;;  %v24443_v47 = vadd.f32 %v21162_v10, %v18353_v34 }
 0x25b   :  { %v24445_v51 = vadd.f32 %v21164_v36, %v3480_v61  ;;  %v18020_v63 = vpop.f32.mrb[56].mxu1 }
 0x25c   :  { %v18356_v27 = vpop.f32.mrb[56].mxu0  ;;  %v21166_v48 = vadd.f32 %v18020_v63, %v24089_v23  ;;  %v1970_v21 = vpop.f32.mrb[57].mxu1 }
 0x25d   :  { %v3492_v30 = vpop.f32.mrb[57].mxu0  ;;  %v21168_v5 = vadd.f32 %v24089_v23, %v1970_v21  ;;  %3632 = vrot.lane.b32.xlu1 %v24163_v1, %s22790_s15 }
 0x25e   :  { %3634 = vrot.lane.b32.xlu0 %v24171_v11, %s22790_s15  ;;  %v24453_v28 = vadd.f32 %v21166_v48, %v18356_v27 }
 0x25f   :  { %v24455_v54 = vadd.f32 %v21168_v5, %v3492_v30  ;;  %v18023_v20 = vpop.f32.mrb[58].mxu1 }
 0x260   :  { %v18359_v34 = vpop.f32.mrb[58].mxu0  ;;  %v7960_v10 = vmax.f32 %v24413_v55, %v24453_v28  ;;  %v21170_v52 = vadd.f32 %v18023_v20, %v24089_v23  ;;  %v1984_v61 = vpop.f32.mrb[59].mxu1 }
 0x261   :  { %v3504_v36 = vpop.f32.mrb[59].mxu0  ;;  %v7959_v63 = vmax.f32 %v24415_v18, %v24455_v54  ;;  %v21172_v1 = vadd.f32 %v24089_v23, %v1984_v61  ;;  %3636 = vrot.lane.b32.xlu1 %v24169_v2, %s22790_s15 }
 0x262   :  { %3638 = vrot.lane.b32.xlu0 %v24177_v37, %s22790_s15  ;;  %v24467_v11 = vadd.f32 %v21170_v52, %v18359_v34  ;;  %v24472_v27 = vmax.f32 %v7952_v25, %v7960_v10 }
 0x263   :  { %v24474_v48 = vadd.f32 %v21172_v1, %v3504_v36  ;;  %v18026_v21 = vpop.f32.mrb[60].mxu1  ;;  %v24479_v5 = vmax.f32 %v7951_v3, %v7959_v63 }
 0x264   :  { %v18362_v30 = vpop.f32.mrb[60].mxu0  ;;  %v7962_v2 = vmax.f32 %v24423_v4, %v24467_v11  ;;  %v21174_v37 = vadd.f32 %v18026_v21, %v24089_v23  ;;  %v1998_v20 = vpop.f32.mrb[61].mxu1  ;;  %v10433_v52 = vand.u32 4294901760, %v24472_v27 }
 0x265   :  { %v3516_v34 = vpop.f32.mrb[61].mxu0  ;;  %v7961_v25 = vmax.f32 %v24425_v9, %v24474_v48  ;;  %v21176_v10 = vadd.f32 %v24089_v23, %v1998_v20  ;;  %3640 = vrot.lane.b32.xlu1 %v24175_v43, %s22790_s15  ;;  %v10430_v3 = vand.u32 4294901760, %v24479_v5 }
 0x266   :  { %3642 = vrot.lane.b32.xlu0 %v24183_v41, %s22790_s15  ;;  %v24493_v61 = vadd.f32 %v21174_v37, %v18362_v30  ;;  %v24496_v36 = vsub.f32 %v24472_v27, %v10433_v52  ;;  %v24501_v63 = vmax.f32 %v7954_v13, %v7962_v2 }
 0x267   :  { %v24503_v1 = vadd.f32 %v21176_v10, %v3516_v34  ;;  %v18029_v21 = vpop.f32.mrb[62].mxu1  ;;  %v10824_v43 = vsub.f32 %v24479_v5, %v10430_v3  ;;  %v24506_v31 = vpack.c.bf16 %v10433_v52, %v10430_v3  ;;  %v24511_v41 = vmax.f32 %v7953_v56, %v7961_v25  ;;  %v30759_v56 = vld [vmem:[#allocation18_spill] sm:$0xff] }
 0x268   :  { %30755 = vst [vmem:[#allocation60_spill] sm:$0xff] %v24493_v61  ;;  %v18365_v20 = vpop.f32.mrb[62].mxu0  ;;  %v7964_v30 = vmax.f32 %v24433_v40, %v24493_v61  ;;  %v21178_v37 = vadd.f32 %v18029_v21, %v24089_v23  ;;  %v2012_v13 = vpop.f32.mrb[63].mxu1  ;;  %v10439_v34 = vand.u32 4294901760, %v24501_v63  ;;  %v10832_v10 = vand.u32 4294901760, %v24496_v36  ;;  %v30772_v61 = vld [vmem:[#allocation20_spill] sm:$0xff] }
 0x269   :  { %30756 = vst [vmem:[#allocation62_spill] sm:$0xff] %v24503_v1  ;;  %30757 = vst [vmem:[#allocation65_spill] sm:$0xff] %v24506_v31  ;;  %v3528_v2 = vpop.f32.mrb[63].mxu0  ;;  %v7963_v52 = vmax.f32 %v24435_v35, %v24503_v1  ;;  %v21180_v3 = vadd.f32 %v24089_v23, %v2012_v13  ;;  %3644 = vrot.lane.b32.xlu1 %v30758_v15, %s22790_s15  ;;  %v10436_v25 = vand.u32 4294901760, %v24511_v41  ;;  %v10825_v21 = vand.u32 4294901760, %v10824_v43 }
 0x26a   :  { %3646 = vrot.lane.b32.xlu0 %v30759_v56, %s22790_s15  ;;  %v24526_v12 = vadd.f32 %v21178_v37, %v18365_v20  ;;  %v10845_v17 = vsub.f32 %v24501_v63, %v10439_v34  ;;  %v30761_v31 = vmax.f32 %v24305_v26, %v24385_v53  ;;  %v10833_v58 = vsub.f32 %v24496_v36, %v10832_v10 }
 0x26b   :  { %v24533_v23 = vadd.f32 %v21180_v3, %v3528_v2  ;;  %v10838_v15 = vsub.f32 %v24511_v41, %v10436_v25  ;;  %v24536_v13 = vpack.c.bf16 %v10439_v34, %v10436_v25  ;;  %v30764_v56 = vmax.f32 %v24311_v6, %v24387_v59  ;;  %v30766_v2 = vld [vmem:[#allocation21_spill] sm:$0xff] }
 0x26c   :  { %30760 = vst [vmem:[#allocation66_spill] sm:$0xff] %v24526_v12  ;;  %v7972_v0 = vmax.f32 %v30761_v31, %v7964_v30  ;;  %v7966_v20 = vmax.f32 %v24443_v47, %v24526_v12  ;;  %v10826_v16 = vsub.f32 %v10824_v43, %v10825_v21  ;;  %v10834_v22 = vand.u32 4294901760, %v10833_v58  ;;  %v30765_v30 = vld [vmem:[#allocation16_spill] sm:$0xff] }
 0x26d   :  { %30762 = vst [vmem:[#allocation67_spill] sm:$0xff] %v24533_v23  ;;  %30763 = vst [vmem:[#allocation71_spill] sm:$0xff] %v24536_v13  ;;  %v7971_v46 = vmax.f32 %v30764_v56, %v7963_v52  ;;  %v7965_v31 = vmax.f32 %v24445_v51, %v24533_v23  ;;  %3648 = vrot.lane.b32.xlu1 %v30765_v30, %s22790_s15  ;;  %v10839_v3 = vand.u32 4294901760, %v10838_v15  ;;  %v10846_v25 = vand.u32 4294901760, %v10845_v17 }
 0x26e   :  { %v10445_v37 = vand.u32 4294901760, %v7972_v0  ;;  %3650 = vrot.lane.b32.xlu0 %v30766_v2, %s22790_s15  ;;  %v30767_v52 = vmax.f32 %v24333_v45, %v24399_v42  ;;  %v10827_v39 = vand.u32 4294901760, %v10826_v16  ;;  %v24553_v58 = vpack.c.bf16 %v24496_v36, %v10824_v43  ;;  %v30773_v16 = vld [vmem:[#allocation27_spill] sm:$0xff] }
 0x26f   :  { %v10442_v34 = vand.u32 4294901760, %v7971_v46  ;;  %v30770_v30 = vmax.f32 %v24345_v57, %v24401_v49  ;;  %v10840_v2 = vsub.f32 %v10838_v15, %v10839_v3  ;;  %v10847_v12 = vsub.f32 %v10845_v17, %v10846_v25 }
 0x270   :  { %v10859_v13 = vsub.f32 %v7972_v0, %v10445_v37  ;;  %v7974_v56 = vmax.f32 %v30767_v52, %v7966_v20  ;;  %30768 = vst [vmem:[#allocation72_spill] sm:$0xff] %v24553_v58  ;;  %v24560_v50 = vpack.c.bf16 %v10834_v22, %v10827_v39  ;;  %v24576_v1 = vpack.c.bf16 %v10846_v25, %v10839_v3 }
 0x271   :  { %v10852_v7 = vsub.f32 %v7971_v46, %v10442_v34  ;;  %v24555_v60 = vpack.c.bf16 %v10445_v37, %v10442_v34  ;;  %v7973_v8 = vmax.f32 %v30770_v30, %v7965_v31  ;;  %3652 = vrot.lane.b32.xlu1 %v30772_v61, %s22790_s15  ;;  %v10841_v43 = vand.u32 4294901760, %v10840_v2 }
 0x272   :  { %v10451_v33 = vand.u32 4294901760, %v7974_v56  ;;  %30771 = vst [vmem:[#allocation79_spill] sm:$0xff] %v24560_v50  ;;  %v10860_v23 = vand.u32 4294901760, %v10859_v13  ;;  %3654 = vrot.lane.b32.xlu0 %v30773_v16, %s22790_s15  ;;  %v24566_v37 = vpack.c.bf16 %v10845_v17, %v10838_v15  ;;  %v10848_v52 = vand.u32 4294901760, %v10847_v12  ;;  %30779 = vst [vmem:[#allocation2_spill] sm:$0xff] %v24576_v1  ;;  %v30780_v17 = vld [vmem:[#allocation25_spill] sm:$0xff] }
 0x273   :  { %30769 = vst [vmem:[#allocation77_spill] sm:$0xff] %v24555_v60  ;;  %v10448_v36 = vand.u32 4294901760, %v7973_v8  ;;  %v10853_v20 = vand.u32 4294901760, %v10852_v7  ;;  %v24568_v30 = vpack.c.bf16 %v10859_v13, %v10852_v7  ;;  %v24572_v50 = vpack.c.bf16 %v10832_v10, %v10825_v21 }
 0x274   :  { %30774 = vst [vmem:[#allocation83_spill] sm:$0xff] %v24566_v37  ;;  %v10873_v34 = vsub.f32 %v7974_v56, %v10451_v33  ;;  %v10861_v31 = vsub.f32 %v10859_v13, %v10860_v23  ;;  %v24574_v61 = vpack.c.bf16 %v10848_v52, %v10841_v43 }
 0x275   :  { %30775 = vst [vmem:[#allocation84_spill] sm:$0xff] %v24568_v30  ;;  %v10866_v39 = vsub.f32 %v7973_v8, %v10448_v36  ;;  %v24570_v22 = vpack.c.bf16 %v10451_v33, %v10448_v36  ;;  %v10854_v58 = vsub.f32 %v10852_v7, %v10853_v20  ;;  %30777 = vst [vmem:[#allocation88_spill] sm:$0xff] %v24572_v50  ;;  %3656 = vrot.lane.b32.xlu1 %v30780_v17, %s22790_s15 }
 0x276   :  { %30778 = vst [vmem:[#allocation91_spill] sm:$0xff] %v24574_v61  ;;  %v10862_v60 = vand.u32 4294901760, %v10861_v31  ;;  %v10874_v16 = vand.u32 4294901760, %v10873_v34  ;;  %8079 = vrot.lane.b32.xlu0 %v24479_v5, %s22789_s2  ;;  %v24584_v33 = vpack.c.bf16 %v10860_v23, %v10853_v20 }
 0x277   :  { %30776 = vst [vmem:[#allocation86_spill] sm:$0xff] %v24570_v22  ;;  %v10855_v12 = vand.u32 4294901760, %v10854_v58  ;;  %v10867_v15 = vand.u32 4294901760, %v10866_v39  ;;  %v24582_v13 = vpack.c.bf16 %v10873_v34, %v10866_v39 }
 0x278   :  { %30782 = vst [vmem:[#allocation4_spill] sm:$0xff] %v24584_v33  ;;  %v10875_v7 = vsub.f32 %v10873_v34, %v10874_v16 }
 0x279   :  { %30781 = vst [vmem:[#allocation3_spill] sm:$0xff] %v24582_v13  ;;  %v24586_v10 = vpack.c.bf16 %v10862_v60, %v10855_v12  ;;  %v10868_v21 = vsub.f32 %v10866_v39, %v10867_v15  ;;  %v24588_v2 = vpack.c.bf16 %v10874_v16, %v10867_v15  ;;  %8081 = vrot.lane.b32.xlu1 %v24472_v27, %s22789_s2 }
 0x27a   :  { %v10876_v3 = vand.u32 4294901760, %v10875_v7  ;;  %8083 = vrot.lane.b32.xlu0 %v24511_v41, %s22789_s2 }
 0x27b   :  { %30783 = vst [vmem:[#allocation5_spill] sm:$0xff] %v24586_v10  ;;  %30784 = vst [vmem:[#allocation6_spill] sm:$0xff] %v24588_v2  ;;  %v10869_v5 = vand.u32 4294901760, %v10868_v21 }
 0x27d   :  { %v24594_v25 = vpack.c.bf16 %v10876_v3, %v10869_v5  ;;  %8085 = vrot.lane.b32.xlu1 %v24501_v63, %s22789_s2 }
 0x27e   :  { %8087 = vrot.lane.b32.xlu0 %v7971_v46, %s22789_s2 }
 0x27f   :  { %30785 = vst [vmem:[#allocation7_spill] sm:$0xff] %v24594_v25 }
 0x281   :  { %8089 = vrot.lane.b32.xlu1 %v7972_v0, %s22789_s2 }
 0x282   :  { %8091 = vrot.lane.b32.xlu0 %v7973_v8, %s22789_s2 }
 0x285   :  { %8093 = vrot.lane.b32.xlu1 %v7974_v56, %s22789_s2 }
 0x286   :  { %8007 = vrot.lane.b32.xlu0 %v24271_v62, %s22790_s15 }
 0x289   :  { %8009 = vrot.lane.b32.xlu1 %v24264_v32, %s22790_s15 }
 0x28a   :  { %8011 = vrot.lane.b32.xlu0 %v24293_v38, %s22790_s15 }
 0x28d   :  { %8013 = vrot.lane.b32.xlu1 %v24289_v29, %s22790_s15 }
 0x28e   :  { %8015 = vrot.lane.b32.xlu0 %v24311_v6, %s22790_s15 }
 0x291   :  { %8017 = vrot.lane.b32.xlu1 %v24305_v26, %s22790_s15 }
 0x292   :  { %8019 = vrot.lane.b32.xlu0 %v24345_v57, %s22790_s15 }
 0x295   :  { %8021 = vrot.lane.b32.xlu1 %v24333_v45, %s22790_s15 }
 0x296   :  { %8023 = vrot.lane.b32.xlu0 %v24359_v14, %s22790_s15 }
 0x297   :  { %v3667_v32 = vpop.permute.xlu0 %3666 }
 0x298   :  { %v3747_v62 = vsel %vm3682_vm1, %v3667_v32, 0 }
 0x299   :  { %8025 = vrot.lane.b32.xlu1 %v24357_v44, %s22790_s15  ;;  %v3764_v29 = vand.u32 4294901760, %v3747_v62 }
 0x29a   :  { %8027 = vrot.lane.b32.xlu0 %v24373_v19, %s22790_s15 }
 0x29b   :  { %v3669_v38 = vpop.permute.xlu0 %3668  ;;  %v3671_v6 = vpop.permute.xlu1 %3670  ;;  %v24631_v46 = vsub.f32 %v3747_v62, %v3764_v29 }
 0x29c   :  { %v3749_v26 = vsel %vm3682_vm1, %v3669_v38, 0  ;;  %v3751_v60 = vsel %vm3682_vm1, %v3671_v6, 0 }
 0x29d   :  { %v3767_v45 = vand.u32 4294901760, %v3749_v26  ;;  %8029 = vrot.lane.b32.xlu1 %v24371_v24, %s22790_s15  ;;  %v3770_v0 = vand.u32 4294901760, %v3751_v60  ;;  %v4159_v24 = vand.u32 4294901760, %v24631_v46 }
 0x29e   :  { %8031 = vrot.lane.b32.xlu0 %v24387_v59, %s22790_s15 }
 0x29f   :  { %v24633_v57 = vpack.c.bf16 %v3767_v45, %v3764_v29  ;;  %v24635_v8 = vsub.f32 %v3749_v26, %v3767_v45  ;;  %v3673_v44 = vpop.permute.xlu1 %3672  ;;  %v24647_v59 = vsub.f32 %v3751_v60, %v3770_v0 }
 0x2a0   :  { %v3675_v14 = vpop.permute.xlu0 %3674  ;;  %v3753_v19 = vsel %vm3682_vm1, %v3673_v44, 0 }
 0x2a1   :  { %v4166_v27 = vand.u32 4294901760, %v24635_v8  ;;  %v3773_v63 = vand.u32 4294901760, %v3753_v19  ;;  %v3755_v41 = vsel %vm3682_vm1, %v3675_v14, 0  ;;  %20623 = vmatprep.subr.bf16.mxu1 %v24633_v57  ;;  %8033 = vrot.lane.b32.xlu1 %v24385_v53, %s22790_s15  ;;  %v4173_v15 = vand.u32 4294901760, %v24647_v59 }
 0x2a2   :  { %8035 = vrot.lane.b32.xlu0 %v24401_v49, %s22790_s15  ;;  %20625 = vmatpush3.bf16.xpose.msra.mxu1 %v24633_v57  ;;  %v3776_v43 = vand.u32 4294901760, %v3755_v41 }
 0x2a3   :  { %v24649_v23 = vpack.c.bf16 %v3773_v63, %v3770_v0  ;;  %v24651_v56 = vsub.f32 %v3753_v19, %v3773_v63  ;;  %v3677_v58 = vpop.permute.xlu1 %3676  ;;  %v24659_v49 = vpack.c.bf16 %v4166_v27, %v4159_v24 }
 0x2a4   :  { %v3679_v36 = vpop.permute.xlu0 %3678  ;;  %v3757_v20 = vsel %vm3682_vm1, %v3677_v58, 0  ;;  %v24674_v7 = vsub.f32 %v3755_v41, %v3776_v43 }
 0x2a5   :  { %30786 = vst [vmem:[#allocation8_spill] sm:$0xff] %v24649_v23  ;;  %v3759_v53 = vsel %vm3682_vm1, %v3679_v36, 0  ;;  %30787 = vst [vmem:[#allocation9_spill] sm:$0xff] %v24659_v49  ;;  %v3779_v34 = vand.u32 4294901760, %v3757_v20  ;;  %20627 = vmatprep.subr.bf16.mxu1 %v24649_v23  ;;  %8037 = vrot.lane.b32.xlu1 %v24399_v42, %s22790_s15  ;;  %v4180_v52 = vand.u32 4294901760, %v24651_v56  ;;  %v24669_v39 = vpack.c.bf16 %v24651_v56, %v24647_v59 }
 0x2a6   :  { %v3782_v31 = vand.u32 4294901760, %v3759_v53  ;;  %8039 = vrot.lane.b32.xlu0 %v24415_v18, %s22790_s15  ;;  %v29598_v60 = vand.u32 4294901760, %v24674_v7 }
 0x2a7   :  { %v24671_v16 = vsub.f32 %v3757_v20, %v3779_v34  ;;  %v3681_v17 = vpop.permute.xlu1 %3680  ;;  %v24678_v3 = vpack.c.bf16 %v3779_v34, %v3776_v43  ;;  %v24698_v38 = vpack.c.bf16 %v4180_v52, %v4173_v15 }
 0x2a8   :  { %v3595_v12 = vpop.permute.xlu0 %3594  ;;  %v3761_v42 = vsel %vm3682_vm1, %v3681_v17, 0  ;;  %v24685_v62 = vsub.f32 %v3759_v53, %v3782_v31 }
 0x2a9   :  { %v3683_v21 = vsel %vm3682_vm1, %v3595_v12, 0  ;;  %30788 = vst [vmem:[#allocation10_spill] sm:$0xff] %v24678_v3  ;;  %v3785_v5 = vand.u32 4294901760, %v3761_v42  ;;  %8041 = vrot.lane.b32.xlu1 %v24413_v55, %s22790_s15  ;;  %v29596_v32 = vand.u32 4294901760, %v24671_v16  ;;  %v24692_v29 = vpack.c.bf16 %v24671_v16, %v24674_v7  ;;  %30790 = vst [vmem:[#allocation12_spill] sm:$0xff] %v24698_v38 }
 0x2aa   :  { %v24680_v18 = vand.u32 4294901760, %v3683_v21  ;;  %8043 = vrot.lane.b32.xlu0 %v24425_v9, %s22790_s15  ;;  %20629 = vmatpush3.bf16.xpose.msra.mxu1 %v24649_v23  ;;  %v29594_v19 = vand.u32 4294901760, %v24685_v62 }
 0x2ab   :  { %v24700_v55 = vsub.f32 %v3761_v42, %v3785_v5  ;;  %20631 = vmatprep.subr.bf16.mxu1 %v24678_v3  ;;  %v3597_v9 = vpop.permute.xlu1 %3596  ;;  %v24724_v41 = vpack.c.bf16 %v29596_v32, %v29598_v60  ;;  %v24740_v34 = vpack.c.bf16 %v3785_v5, %v3782_v31  ;;  %v4167_v42 = vsub.f32 %v24635_v8, %v4166_v27 }
 0x2ac   :  { %30789 = vst [vmem:[#allocation11_spill] sm:$0xff] %v24680_v18  ;;  %v24703_v6 = vsub.f32 %v3683_v21, %v24680_v18  ;;  %v3599_v26 = vpop.permute.xlu0 %3598  ;;  %v3685_v45 = vsel %vm3682_vm1, %v3597_v9, 0  ;;  %v4160_v27 = vsub.f32 %v24631_v46, %v4159_v24 }
 0x2ad   :  { %v3687_v0 = vsel %vm3682_vm1, %v3599_v26, 0  ;;  %v29593_v44 = vand.u32 4294901760, %v24700_v55  ;;  %8045 = vrot.lane.b32.xlu1 %v24423_v4, %s22790_s15  ;;  %v24718_v63 = vpack.c.bf16 %v24700_v55, %v24685_v62  ;;  %30792 = vst [vmem:[#allocation15_spill] sm:$0xff] %v24724_v41  ;;  %v24726_v58 = vand.u32 4294901760, %v3685_v45  ;;  %30796 = vst [vmem:[#allocation23_spill] sm:$0xff] %v24740_v34 }
 0x2ae   :  { %30791 = vst [vmem:[#allocation13_spill] sm:$0xff] %v24703_v6  ;;  %v29592_v14 = vand.u32 4294901760, %v24703_v6  ;;  %8047 = vrot.lane.b32.xlu0 %v24435_v35, %s22790_s15  ;;  %v24728_v4 = vand.u32 4294901760, %v3687_v0  ;;  %v30834_v10 = vand.u32 4294901760, %v24700_v55 }
 0x2af   :  { %30793 = vst [vmem:[#allocation17_spill] sm:$0xff] %v24726_v58  ;;  %v3601_v36 = vpop.permute.xlu1 %3600  ;;  %v24738_v53 = vpack.c.bf16 %v29593_v44, %v29594_v19  ;;  %v24752_v21 = vsub.f32 %v3685_v45, %v24726_v58 }
 0x2b0   :  { %30794 = vst [vmem:[#allocation19_spill] sm:$0xff] %v24728_v4  ;;  %v3603_v43 = vpop.permute.xlu0 %3602  ;;  %v3839_v35 = vsub.f32 %v24703_v6, %v29592_v14  ;;  %v3689_v20 = vsel %vm3682_vm1, %v3601_v36, 0  ;;  %v24755_v31 = vsub.f32 %v3687_v0, %v24728_v4  ;;  %v4168_v0 = vand.u32 4294901760, %v4167_v42 }
 0x2b1   :  { %30795 = vst [vmem:[#allocation22_spill] sm:$0xff] %v24738_v53  ;;  %v3691_v17 = vsel %vm3682_vm1, %v3603_v43, 0  ;;  %8049 = vrot.lane.b32.xlu1 %v24433_v40, %s22790_s15  ;;  %30797 = vst [vmem:[#allocation26_spill] sm:$0xff] %v24752_v21  ;;  %v24757_v5 = vand.u32 4294901760, %v3689_v20  ;;  %v29595_v43 = vand.u32 4294901760, %v24752_v21  ;;  %v4161_v14 = vand.u32 4294901760, %v4160_v27 }
 0x2b2   :  { %v3840_v12 = vand.u32 4294901760, %v3839_v35  ;;  %8051 = vrot.lane.b32.xlu0 %v24445_v51, %s22790_s15  ;;  %20633 = vmatpush3.bf16.xpose.msra.mxu1 %v24678_v3  ;;  %30798 = vst [vmem:[#allocation28_spill] sm:$0xff] %v24755_v31  ;;  %v24763_v51 = vand.u32 4294901760, %v3691_v17  ;;  %v4181_v27 = vsub.f32 %v24651_v56, %v4180_v52  ;;  %v4209_v61 = vsub.f32 %v24700_v55, %v30834_v10 }
 0x2b3   :  { %30799 = vst [vmem:[#allocation29_spill] sm:$0xff] %v24757_v5  ;;  %v3605_v9 = vpop.permute.xlu1 %3604  ;;  %20635 = vmatprep.subr.bf16.mxu1 %v24740_v34  ;;  %v24775_v35 = vsub.f32 %v3689_v20, %v24757_v5  ;;  %v4174_v20 = vsub.f32 %v24647_v59, %v4173_v15 }
 0x2b4   :  { %18382 = vmatprep.mubr.f32.mxu1 %v3840_v12  ;;  %v3607_v40 = vpop.permute.xlu0 %3606  ;;  %30800 = vst [vmem:[#allocation31_spill] sm:$0xff] %v24763_v51  ;;  %v3693_v26 = vsel %vm3682_vm1, %v3605_v9, 0  ;;  %v29597_v9 = vand.u32 4294901760, %v24755_v31 }
 0x2b5   :  { %v3695_v45 = vsel %vm3682_vm1, %v3607_v40, 0  ;;  %8053 = vrot.lane.b32.xlu1 %v24443_v47, %s22790_s15  ;;  %v24769_v36 = vand.u32 4294901760, %v3693_v26  ;;  %30802 = vst [vmem:[#allocation35_spill] sm:$0xff] %v24775_v35  ;;  %v24779_v40 = vsub.f32 %v3691_v17, %v24763_v51 }
 0x2b6   :  { %8055 = vrot.lane.b32.xlu0 %v24455_v54, %s22790_s15  ;;  %v24781_v47 = vand.u32 4294901760, %v3695_v45  ;;  %v20638_v54 = vpack.c.bf16 %v4168_v0, %v4161_v14  ;;  %v3859_v56 = vsub.f32 %v24755_v31, %v29597_v9 }
 0x2b7   :  { %30801 = vst [vmem:[#allocation33_spill] sm:$0xff] %v24769_v36  ;;  %v3609_v24 = vpop.permute.xlu1 %3608  ;;  %30803 = vst [vmem:[#allocation37_spill] sm:$0xff] %v24779_v40  ;;  %v24794_v17 = vsub.f32 %v3693_v26, %v24769_v36  ;;  %v30815_v33 = vand.u32 4294901760, %v24779_v40 }
 0x2b8   :  { %v3611_v12 = vpop.permute.xlu0 %3610  ;;  %30804 = vst [vmem:[#allocation39_spill] sm:$0xff] %v24781_v47  ;;  %v3697_v42 = vsel %vm3682_vm1, %v3609_v24, 0  ;;  %v24811_v14 = vsub.f32 %v3695_v45, %v24781_v47  ;;  %v30812_v45 = vld [vmem:[#allocation62_spill] sm:$0xff] }
 0x2b9   :  { %v3699_v44 = vsel %vm3682_vm1, %v3611_v12, 0  ;;  %8057 = vrot.lane.b32.xlu1 %v24453_v28, %s22790_s15  ;;  %30805 = vst [vmem:[#allocation41_spill] sm:$0xff] %v24794_v17  ;;  %v24796_v19 = vand.u32 4294901760, %v3697_v42  ;;  %v3849_v28 = vsub.f32 %v24752_v21, %v29595_v43  ;;  %v4175_v12 = vand.u32 4294901760, %v4174_v20 }
 0x2ba   :  { %v24798_v24 = vand.u32 4294901760, %v3699_v44  ;;  %8059 = vrot.lane.b32.xlu0 %v24474_v48, %s22790_s15  ;;  %20637 = vmatpush3.bf16.xpose.msra.mxu1 %v24740_v34  ;;  %30808 = vst [vmem:[#allocation50_spill] sm:$0xff] %v24811_v14  ;;  %v4182_v43 = vand.u32 4294901760, %v4181_v27  ;;  %v3860_v20 = vand.u32 4294901760, %v3859_v56  ;;  %v30814_v27 = vand.u32 4294901760, %v24775_v35 }
 0x2bb   :  { %30806 = vst [vmem:[#allocation43_spill] sm:$0xff] %v24796_v19  ;;  %v3613_v59 = vpop.permute.xlu1 %3612  ;;  %20639 = vmatprep.subr.bf16.mxu1 %v20638_v54  ;;  %v24819_v32 = vsub.f32 %v3697_v42, %v24796_v19  ;;  %v30817_v56 = vand.u32 4294901760, %v24674_v7 }
 0x2bc   :  { %30807 = vst [vmem:[#allocation45_spill] sm:$0xff] %v24798_v24  ;;  %v3615_v15 = vpop.permute.xlu0 %3614  ;;  %v3701_v48 = vsel %vm3682_vm1, %v3613_v59, 0  ;;  %v24822_v9 = vsub.f32 %v3699_v44, %v24798_v24  ;;  %v3869_v42 = vsub.f32 %v24775_v35, %v30814_v27  ;;  %v20642_v1 = vpack.c.bf16 %v4182_v43, %v4175_v12 }
 0x2bd   :  { %v3703_v26 = vsel %vm3682_vm1, %v3615_v15, 0  ;;  %8061 = vrot.lane.b32.xlu1 %v24467_v11, %s22790_s15  ;;  %30809 = vst [vmem:[#allocation51_spill] sm:$0xff] %v24819_v32  ;;  %v24824_v60 = vand.u32 4294901760, %v3701_v48  ;;  %v3850_v15 = vand.u32 4294901760, %v3849_v28  ;;  %v30816_v28 = vld [vmem:[#allocation60_spill] sm:$0xff]  ;;  %v4188_v50 = vsub.f32 %v24674_v7, %v30817_v56 }
 0x2be   :  { %30810 = vst [vmem:[#allocation53_spill] sm:$0xff] %v24822_v9  ;;  %8063 = vrot.lane.b32.xlu0 %v30812_v45, %s22790_s15  ;;  %v24829_v0 = vand.u32 4294901760, %v3703_v26  ;;  %v3879_v45 = vsub.f32 %v24779_v40, %v30815_v33  ;;  %v30818_v27 = vand.u32 4294901760, %v24671_v16  ;;  %v30820_v33 = vld [vmem:[#allocation67_spill] sm:$0xff] }
 0x2bf   :  { %30811 = vst [vmem:[#allocation54_spill] sm:$0xff] %v24824_v60  ;;  %v3617_v52 = vpop.permute.xlu1 %3616  ;;  %v4189_v13 = vand.u32 4294901760, %v4188_v50 }
 0x2c0   :  { %30813 = vst [vmem:[#allocation55_spill] sm:$0xff] %v24829_v0  ;;  %v3619_v11 = vpop.permute.xlu0 %3618  ;;  %v3705_v44 = vsel %vm3682_vm1, %v3617_v52, 0  ;;  %v4195_v52 = vsub.f32 %v24671_v16, %v30818_v27  ;;  %v24859_v7 = vsub.f32 %v3703_v26, %v24829_v0  ;;  %v3880_v59 = vand.u32 4294901760, %v3879_v45  ;;  %v30826_v26 = vld [vmem:[#allocation66_spill] sm:$0xff] }
 0x2c1   :  { %v3707_v2 = vsel %vm3682_vm1, %v3619_v11, 0  ;;  %18383 = vmatmul.mubr.f32.vlgmr.msra.gmra.mrb[64].mxu1 %v3850_v15  ;;  %8065 = vrot.lane.b32.xlu1 %v30816_v28, %s22790_s15  ;;  %v24849_v11 = vsub.f32 %v3701_v48, %v24824_v60  ;;  %v30821_v15 = vand.u32 4294901760, %v24794_v17  ;;  %v24861_v56 = vand.u32 4294901760, %v3705_v44 }
 0x2c2   :  { %8067 = vrot.lane.b32.xlu0 %v30820_v33, %s22790_s15  ;;  %18385 = vmatprep.mubr.f32.mxu1 %v3860_v20  ;;  %30822 = vst [vmem:[#allocation58_spill] sm:$0xff] %v24859_v7  ;;  %v24863_v16 = vand.u32 4294901760, %v3707_v2  ;;  %v3870_v33 = vand.u32 4294901760, %v3869_v42  ;;  %v4196_v30 = vand.u32 4294901760, %v4195_v52  ;;  %v30827_v42 = vand.u32 4294901760, %v24819_v32 }
 0x2c3   :  { %30819 = vst [vmem:[#allocation57_spill] sm:$0xff] %v24849_v11  ;;  %v3889_v28 = vsub.f32 %v24794_v17, %v30821_v15  ;;  %30823 = vst [vmem:[#allocation61_spill] sm:$0xff] %v24861_v56  ;;  %20641 = vmatpush3.bf16.xpose.msra.mxu1 %v20638_v54  ;;  %v3621_v48 = vpop.permute.xlu1 %3620  ;;  %v30825_v15 = vand.u32 4294901760, %v24811_v14  ;;  %v30828_v45 = vand.u32 4294901760, %v24822_v9 }
 0x2c4   :  { %30824 = vst [vmem:[#allocation63_spill] sm:$0xff] %v24863_v16  ;;  %v3623_v27 = vpop.permute.xlu0 %3622  ;;  %v3709_v20 = vsel %vm3682_vm1, %v3621_v48, 0  ;;  %20643 = vmatprep.subr.bf16.mxu1 %v20642_v1  ;;  %v3909_v48 = vsub.f32 %v24819_v32, %v30827_v42 }
 0x2c5   :  { %v3899_v43 = vsub.f32 %v24811_v14, %v30825_v15  ;;  %v3711_v12 = vsel %vm3682_vm1, %v3623_v27, 0  ;;  %18386 = vmatmul.mubr.f32.gmra.mrb[66].mxu1 %v3870_v33  ;;  %8069 = vrot.lane.b32.xlu1 %v30826_v26, %s22790_s15  ;;  %v3890_v54 = vand.u32 4294901760, %v3889_v28  ;;  %v3919_v37 = vsub.f32 %v24822_v9, %v30828_v45 }
 0x2c6   :  { %18388 = vmatprep.mubr.f32.mxu1 %v3880_v59  ;;  %v24880_v27 = vsub.f32 %v3705_v44, %v24861_v56  ;;  %v24883_v33 = vsub.f32 %v3707_v2, %v24863_v16  ;;  %v24885_v50 = vand.u32 4294901760, %v3709_v20  ;;  %v24888_v26 = vand.u32 4294901760, %v3711_v12 }
 0x2c7   :  { %v3625_v59 = vpop.permute.xlu1 %3624  ;;  %v3900_v25 = vand.u32 4294901760, %v3899_v43  ;;  %v20646_v15 = vpack.c.bf16 %v4196_v30, %v4189_v13  ;;  %v30833_v44 = vand.u32 4294901760, %v24685_v62  ;;  %v3910_v28 = vand.u32 4294901760, %v3909_v48 }
 0x2c8   :  { %30829 = vst [vmem:[#allocation64_spill] sm:$0xff] %v24880_v27  ;;  %30830 = vst [vmem:[#allocation68_spill] sm:$0xff] %v24883_v33  ;;  %v3627_v52 = vpop.permute.xlu0 %3626  ;;  %v3713_v42 = vsel %vm3682_vm1, %v3625_v59, 0  ;;  %v3920_v53 = vand.u32 4294901760, %v3919_v37  ;;  %v30836_v59 = vand.u32 4294901760, %v24849_v11  ;;  %v24912_v37 = vsub.f32 %v3711_v12, %v24888_v26 }
 0x2c9   :  { %30831 = vst [vmem:[#allocation69_spill] sm:$0xff] %v24885_v50  ;;  %30832 = vst [vmem:[#allocation70_spill] sm:$0xff] %v24888_v26  ;;  %v3715_v45 = vsel %vm3682_vm1, %v3627_v52, 0  ;;  %18389 = vmatmul.mubr.f32.gmra.mrb[68].mxu1 %v3890_v54  ;;  %v4202_v2 = vsub.f32 %v24685_v62, %v30833_v44  ;;  %v24898_v22 = vand.u32 4294901760, %v3713_v42  ;;  %v24904_v54 = vsub.f32 %v3709_v20, %v24885_v50 }
 0x2ca   :  { %18391 = vmatprep.mubr.f32.mxu1 %v3900_v25  ;;  %v3929_v43 = vsub.f32 %v24849_v11, %v30836_v59  ;;  %v30838_v62 = vand.u32 4294901760, %v24859_v7  ;;  %30839 = vst [vmem:[#allocation75_spill] sm:$0xff] %v24912_v37  ;;  %v24914_v55 = vand.u32 4294901760, %v3715_v45  ;;  %v4210_v44 = vand.u32 4294901760, %v4209_v61 }
 0x2cb   :  { %30835 = vst [vmem:[#allocation73_spill] sm:$0xff] %v24898_v22  ;;  %30837 = vst [vmem:[#allocation74_spill] sm:$0xff] %v24904_v54  ;;  %20645 = vmatpush3.bf16.xpose.msra.mxu1 %v20642_v1  ;;  %v3629_v30 = vpop.permute.xlu1 %3628  ;;  %v4203_v20 = vand.u32 4294901760, %v4202_v2  ;;  %v24919_v59 = vsub.f32 %v3713_v42, %v24898_v22 }
 0x2cc   :  { %v3631_v13 = vpop.permute.xlu0 %3630  ;;  %v3939_v52 = vsub.f32 %v24859_v7, %v30838_v62  ;;  %30840 = vst [vmem:[#allocation76_spill] sm:$0xff] %v24914_v55  ;;  %v3717_v48 = vsel %vm3682_vm1, %v3629_v30, 0  ;;  %20647 = vmatprep.subr.bf16.mxu1 %v20646_v15  ;;  %v3930_v12 = vand.u32 4294901760, %v3929_v43  ;;  %v30844_v30 = vand.u32 4294901760, %v24880_v27 }
 0x2cd   :  { %v3719_v1 = vsel %vm3682_vm1, %v3631_v13, 0  ;;  %18392 = vmatmul.mubr.f32.gmra.mrb[70].mxu1 %v3910_v28  ;;  %30841 = vst [vmem:[#allocation78_spill] sm:$0xff] %v24919_v59  ;;  %v24921_v62 = vand.u32 4294901760, %v3717_v48  ;;  %v30845_v28 = vand.u32 4294901760, %v24883_v33  ;;  %v24933_v2 = vsub.f32 %v3715_v45, %v24914_v55 }
 0x2ce   :  { %v24923_v10 = vand.u32 4294901760, %v3719_v1  ;;  %18394 = vmatprep.mubr.f32.mxu1 %v3920_v53  ;;  %v3940_v38 = vand.u32 4294901760, %v3939_v52  ;;  %v3949_v49 = vsub.f32 %v24880_v27, %v30844_v30  ;;  %v20650_v52 = vpack.c.bf16 %v4210_v44, %v4203_v20 }
 0x2cf   :  { %30842 = vst [vmem:[#allocation80_spill] sm:$0xff] %v24921_v62  ;;  %v3633_v25 = vpop.permute.xlu1 %3632  ;;  %v3959_v61 = vsub.f32 %v24883_v33, %v30845_v28  ;;  %30846 = vst [vmem:[#allocation81_spill] sm:$0xff] %v24933_v2  ;;  %v24939_v34 = vsub.f32 %v3717_v48, %v24921_v62  ;;  %v30851_v20 = vand.u32 4294901760, %v24904_v54  ;;  %v30858_v27 = vand.u32 4294901760, %v24933_v2 }
 0x2d0   :  { %30843 = vst [vmem:[#allocation82_spill] sm:$0xff] %v24923_v10  ;;  %v3635_v41 = vpop.permute.xlu0 %3634  ;;  %v3721_v13 = vsel %vm3682_vm1, %v3633_v25, 0  ;;  %v24942_v30 = vsub.f32 %v3719_v1, %v24923_v10  ;;  %v3950_v33 = vand.u32 4294901760, %v3949_v49  ;;  %v30854_v49 = vand.u32 4294901760, %v24919_v59 }
 0x2d1   :  { %v3723_v53 = vsel %vm3682_vm1, %v3635_v41, 0  ;;  %18395 = vmatmul.mubr.f32.gmra.mrb[72].mxu1 %v3930_v12  ;;  %30847 = vst [vmem:[#allocation85_spill] sm:$0xff] %v24939_v34  ;;  %v24944_v28 = vand.u32 4294901760, %v3721_v13  ;;  %v3960_v43 = vand.u32 4294901760, %v3959_v61  ;;  %v3969_v48 = vsub.f32 %v24904_v54, %v30851_v20 }
 0x2d2   :  { %30848 = vst [vmem:[#allocation87_spill] sm:$0xff] %v24942_v30  ;;  %18397 = vmatprep.mubr.f32.mxu1 %v3940_v38  ;;  %v24947_v42 = vand.u32 4294901760, %v3723_v53  ;;  %v30852_v38 = vand.u32 4294901760, %v24912_v37  ;;  %v3989_v61 = vsub.f32 %v24919_v59, %v30854_v49  ;;  %v3999_v49 = vsub.f32 %v24933_v2, %v30858_v27 }
 0x2d3   :  { %30849 = vst [vmem:[#allocation89_spill] sm:$0xff] %v24944_v28  ;;  %20649 = vmatpush3.bf16.xpose.msra.mxu1 %v20646_v15  ;;  %v3637_v25 = vpop.permute.xlu1 %3636  ;;  %v24959_v15 = vsub.f32 %v3721_v13, %v24944_v28  ;;  %v3970_v13 = vand.u32 4294901760, %v3969_v48  ;;  %v30859_v59 = vand.u32 4294901760, %v24939_v34 }
 0x2d4   :  { %30850 = vst [vmem:[#allocation90_spill] sm:$0xff] %v24947_v42  ;;  %v3639_v41 = vpop.permute.xlu0 %3638  ;;  %v3725_v44 = vsel %vm3682_vm1, %v3637_v25, 0  ;;  %20651 = vmatprep.subr.bf16.mxu1 %v20650_v52  ;;  %v3979_v12 = vsub.f32 %v24912_v37, %v30852_v38  ;;  %v3990_v20 = vand.u32 4294901760, %v3989_v61 }
 0x2d5   :  { %v3727_v1 = vsel %vm3682_vm1, %v3639_v41, 0  ;;  %18398 = vmatmul.mubr.f32.gmra.mrb[74].mxu1 %v3950_v33  ;;  %30853 = vst [vmem:[#allocation92_spill] sm:$0xff] %v24959_v15  ;;  %v24967_v41 = vsub.f32 %v3723_v53, %v24947_v42  ;;  %v24969_v54 = vand.u32 4294901760, %v3725_v44  ;;  %v24980_v53 = vpack.c.bf16 %v24635_v8, %v24631_v46 }
 0x2d6   :  { %18400 = vmatprep.mubr.f32.mxu1 %v3960_v43  ;;  %v24971_v38 = vand.u32 4294901760, %v3727_v1  ;;  %v3980_v37 = vand.u32 4294901760, %v3979_v12  ;;  %v4009_v48 = vsub.f32 %v24939_v34, %v30859_v59 }
 0x2d7   :  { %30855 = vst [vmem:[#allocation93_spill] sm:$0xff] %v24967_v41  ;;  %30856 = vst [vmem:[#allocation94_spill] sm:$0xff] %v24969_v54  ;;  %v3641_v33 = vpop.permute.xlu1 %3640  ;;  %v24990_v27 = vsub.f32 %v3725_v44, %v24969_v54  ;;  %v30868_v11 = vand.u32 4294901760, %v24967_v41 }
 0x2d8   :  { %30857 = vst [vmem:[#allocation95_spill] sm:$0xff] %v24971_v38  ;;  %v3643_v45 = vpop.permute.xlu0 %3642  ;;  %v3729_v43 = vsel %vm3682_vm1, %v3641_v33, 0  ;;  %v30860_v33 = vand.u32 4294901760, %v24942_v30 }
 0x2d9   :  { %v3731_v25 = vsel %vm3682_vm1, %v3643_v45, 0  ;;  %18401 = vmatmul.mubr.f32.gmra.mrb[76].mxu1 %v3970_v13  ;;  %30861 = vst [vmem:[#allocation97_spill] sm:$0xff] %v24990_v27  ;;  %v24993_v45 = vsub.f32 %v3727_v1, %v24971_v38  ;;  %v24995_v46 = vand.u32 4294901760, %v3729_v43  ;;  %v4010_v1 = vand.u32 4294901760, %v4009_v48 }
 0x2da   :  { %18403 = vmatprep.mubr.f32.mxu1 %v3980_v37  ;;  %v4019_v12 = vsub.f32 %v24942_v30, %v30860_v33  ;;  %v24998_v59 = vand.u32 4294901760, %v3731_v25  ;;  %v4000_v33 = vand.u32 4294901760, %v3999_v49  ;;  %v4039_v49 = vsub.f32 %v24967_v41, %v30868_v11 }
 0x2db   :  { %30862 = vst [vmem:[#allocation99_spill] sm:$0xff] %v24993_v45  ;;  %30863 = vst [vmem:[#allocation96_spill] sm:$0xff] %v24995_v46  ;;  %20653 = vmatpush3.bf16.xpose.msra.mxu1 %v20650_v52  ;;  %v3645_v8 = vpop.permute.xlu1 %3644  ;;  %v30866_v52 = vand.u32 4294901760, %v24959_v15  ;;  %v25009_v61 = vsub.f32 %v3729_v43, %v24995_v46 }
 0x2dc   :  { %v3647_v37 = vpop.permute.xlu0 %3646  ;;  %30864 = vst [vmem:[#allocation101_spill] sm:$0xff] %v24998_v59  ;;  %v3733_v13 = vsel %vm3682_vm1, %v3645_v8, 0  ;;  %20655 = vmatprep.subr.bf16.mxu1 %v24980_v53  ;;  %v4020_v30 = vand.u32 4294901760, %v4019_v12  ;;  %v25017_v48 = vsub.f32 %v3731_v25, %v24998_v59  ;;  %v4040_v25 = vand.u32 4294901760, %v4039_v49 }
 0x2dd   :  { %v25002_v7 = vand.u32 4294901760, %v3733_v13  ;;  %v3735_v44 = vsel %vm3682_vm1, %v3647_v37, 0  ;;  %18404 = vmatmul.mubr.f32.gmra.mrb[78].mxu1 %v3990_v20  ;;  %v4029_v34 = vsub.f32 %v24959_v15, %v30866_v52  ;;  %30867 = vst [vmem:[#allocation103_spill] sm:$0xff] %v25009_v61  ;;  %v30874_v15 = vand.u32 4294901760, %v24990_v27 }
 0x2de   :  { %18406 = vmatprep.mubr.f32.mxu1 %v4000_v33  ;;  %30869 = vst [vmem:[#allocation100_spill] sm:$0xff] %v25017_v48  ;;  %v25019_v12 = vand.u32 4294901760, %v3735_v44 }
 0x2df   :  { %30865 = vst [vmem:[#allocation98_spill] sm:$0xff] %v25002_v7  ;;  %v3649_v2 = vpop.permute.xlu1 %3648  ;;  %v25024_v33 = vsub.f32 %v3733_v13, %v25002_v7  ;;  %v4030_v9 = vand.u32 4294901760, %v4029_v34  ;;  %v4049_v32 = vsub.f32 %v24990_v27, %v30874_v15 }
 0x2e0   :  { %v3651_v8 = vpop.permute.xlu0 %3650  ;;  %30870 = vst [vmem:[#allocation105_spill] sm:$0xff] %v25019_v12  ;;  %v3737_v37 = vsel %vm3682_vm1, %v3649_v2, 0  ;;  %v30875_v2 = vand.u32 4294901760, %v24993_v45  ;;  %v25038_v3 = vsub.f32 %v3735_v44, %v25019_v12 }
 0x2e1   :  { %v3739_v43 = vsel %vm3682_vm1, %v3651_v8, 0  ;;  %30871 = vst [vmem:[#allocation102_spill] sm:$0xff] %v25024_v33  ;;  %v25026_v52 = vand.u32 4294901760, %v3737_v37  ;;  %18407 = vmatmul.mubr.f32.gmra.mrb[80].mxu1 %v4010_v1 }
 0x2e2   :  { %v25028_v11 = vand.u32 4294901760, %v3739_v43  ;;  %18409 = vmatprep.mubr.f32.mxu1 %v4020_v30  ;;  %v4059_v8 = vsub.f32 %v24993_v45, %v30875_v2  ;;  %30876 = vst [vmem:[#allocation108_spill] sm:$0xff] %v25038_v3  ;;  %v4050_v45 = vand.u32 4294901760, %v4049_v32  ;;  %v30881_v30 = vand.u32 4294901760, %v25009_v61 }
 0x2e3   :  { %30872 = vst [vmem:[#allocation107_spill] sm:$0xff] %v25026_v52  ;;  %v3653_v20 = vpop.permute.xlu1 %3652  ;;  %v25044_v49 = vsub.f32 %v3737_v37, %v25026_v52 }
 0x2e4   :  { %30873 = vst [vmem:[#allocation104_spill] sm:$0xff] %v25028_v11  ;;  %v3655_v41 = vpop.permute.xlu0 %3654  ;;  %v3741_v1 = vsel %vm3682_vm1, %v3653_v20, 0  ;;  %v25048_v27 = vsub.f32 %v3739_v43, %v25028_v11  ;;  %v4069_v37 = vsub.f32 %v25009_v61, %v30881_v30  ;;  %v30882_v43 = vand.u32 4294901760, %v25017_v48 }
 0x2e5   :  { %v3743_v34 = vsel %vm3682_vm1, %v3655_v41, 0  ;;  %30877 = vst [vmem:[#allocation106_spill] sm:$0xff] %v25044_v49  ;;  %18410 = vmatmul.mubr.f32.gmra.mrb[82].mxu1 %v4030_v9  ;;  %v25050_v2 = vand.u32 4294901760, %v3741_v1  ;;  %v4060_v41 = vand.u32 4294901760, %v4059_v8 }
 0x2e6   :  { %30878 = vst [vmem:[#allocation14_spill] sm:$0xff] %v25048_v27  ;;  %v25052_v13 = vand.u32 4294901760, %v3743_v34  ;;  %18412 = vmatprep.mubr.f32.mxu1 %v4040_v25  ;;  %v4079_v14 = vsub.f32 %v25017_v48, %v30882_v43  ;;  %v30883_v25 = vand.u32 4294901760, %v25024_v33  ;;  %v4070_v48 = vand.u32 4294901760, %v4069_v37 }
 0x2e7   :  { %30879 = vst [vmem:[#allocation18_spill] sm:$0xff] %v25050_v2  ;;  %v3657_v44 = vpop.permute.xlu1 %3656  ;;  %v25068_v40 = vsub.f32 %v3741_v1, %v25050_v2  ;;  %v30887_v1 = vand.u32 4294901760, %v25038_v3  ;;  %v30889_v37 = vand.u32 4294901760, %v25048_v27 }
 0x2e8   :  { %30880 = vst [vmem:[#allocation16_spill] sm:$0xff] %v25052_v13  ;;  %v8080_v20 = vpop.permute.xlu0 %8079  ;;  %v3745_v9 = vsel %vm3682_vm1, %v3657_v44, 0  ;;  %v4089_v32 = vsub.f32 %v25024_v33, %v30883_v25  ;;  %v25071_v30 = vsub.f32 %v3743_v34, %v25052_v13  ;;  %v4080_v8 = vand.u32 4294901760, %v4079_v14 }
 0x2e9   :  { %v8159_v15 = vsel %vm3682_vm1, %v8080_v20, 0  ;;  %18413 = vmatmul.mubr.f32.gmra.mrb[84].mxu1 %v4050_v45  ;;  %30884 = vst [vmem:[#allocation21_spill] sm:$0xff] %v25068_v40  ;;  %v25074_v43 = vand.u32 4294901760, %v3745_v9  ;;  %v4099_v33 = vsub.f32 %v25038_v3, %v30887_v1 }
 0x2ea   :  { %30885 = vst [vmem:[#allocation20_spill] sm:$0xff] %v25071_v30  ;;  %v8176_v44 = vand.u32 4294901760, %v8159_v15  ;;  %18415 = vmatprep.mubr.f32.mxu1 %v4060_v41  ;;  %v4090_v35 = vand.u32 4294901760, %v4089_v32  ;;  %v30888_v41 = vand.u32 4294901760, %v25044_v49 }
 0x2eb   :  { %30886 = vst [vmem:[#allocation27_spill] sm:$0xff] %v25074_v43  ;;  %v8082_v17 = vpop.permute.xlu1 %8081  ;;  %v25092_v1 = vsub.f32 %v3745_v9, %v25074_v43 }
 0x2ec   :  { %v8084_v45 = vpop.permute.xlu0 %8083  ;;  %v8161_v61 = vsel %vm3682_vm1, %v8082_v17, 0  ;;  %v4109_v20 = vsub.f32 %v25044_v49, %v30888_v41  ;;  %v25084_v23 = vsub.f32 %v8159_v15, %v8176_v44  ;;  %v4119_v17 = vsub.f32 %v25048_v27, %v30889_v37 }
 0x2ed   :  { %v8163_v25 = vsel %vm3682_vm1, %v8084_v45, 0  ;;  %v8179_v34 = vand.u32 4294901760, %v8161_v61  ;;  %18416 = vmatmul.mubr.f32.gmra.mrb[86].mxu1 %v4070_v48  ;;  %v29678_v45 = vand.u32 4294901760, %v25071_v30  ;;  %30890 = vst [vmem:[#allocation25_spill] sm:$0xff] %v25092_v1  ;;  %v4100_v49 = vand.u32 4294901760, %v4099_v33 }
 0x2ee   :  { %18418 = vmatprep.mubr.f32.mxu1 %v4080_v8  ;;  %v8182_v3 = vand.u32 4294901760, %v8163_v25  ;;  %v4110_v9 = vand.u32 4294901760, %v4109_v20 }
 0x2ef   :  { %v25094_v48 = vpack.c.bf16 %v8179_v34, %v8176_v44  ;;  %v25096_v32 = vsub.f32 %v8161_v61, %v8179_v34  ;;  %v8086_v41 = vpop.permute.xlu1 %8085  ;;  %v4120_v61 = vand.u32 4294901760, %v4119_v17  ;;  %v30892_v34 = vand.u32 4294901760, %v25068_v40 }
 0x2f0   :  { %v8088_v15 = vpop.permute.xlu0 %8087  ;;  %v8165_v8 = vsel %vm3682_vm1, %v8086_v41, 0  ;;  %v4139_v33 = vsub.f32 %v25071_v30, %v29678_v45  ;;  %v25110_v31 = vsub.f32 %v8163_v25, %v8182_v3 }
 0x2f1   :  { %30891 = vst [vmem:[#allocation62_spill] sm:$0xff] %v25094_v48  ;;  %v8185_v37 = vand.u32 4294901760, %v8165_v8  ;;  %v8167_v14 = vsel %vm3682_vm1, %v8088_v15, 0  ;;  %18419 = vmatmul.mubr.f32.gmra.mrb[88].mxu1 %v4090_v35  ;;  %20815 = vmatprep.subr.bf16.mxu0 %v25094_v48  ;;  %v4129_v41 = vsub.f32 %v25068_v40, %v30892_v34  ;;  %v30894_v34 = vand.u32 4294901760, %v25084_v23 }
 0x2f2   :  { %18421 = vmatprep.mubr.f32.mxu1 %v4100_v49  ;;  %20817 = vmatpush3.bf16.xpose.msra.mxu0 %v25094_v48  ;;  %v8188_v27 = vand.u32 4294901760, %v8167_v14  ;;  %v30895_v40 = vand.u32 4294901760, %v25096_v32  ;;  %v4140_v21 = vand.u32 4294901760, %v4139_v33 }
 0x2f3   :  { %v25112_v35 = vpack.c.bf16 %v8185_v37, %v8182_v3  ;;  %v25114_v15 = vsub.f32 %v8165_v8, %v8185_v37  ;;  %v8090_v20 = vpop.permute.xlu1 %8089  ;;  %v4130_v30 = vand.u32 4294901760, %v4129_v41 }
 0x2f4   :  { %v8092_v44 = vpop.permute.xlu0 %8091  ;;  %v8169_v17 = vsel %vm3682_vm1, %v8090_v20, 0  ;;  %v25123_v45 = vpack.c.bf16 %v30895_v40, %v30894_v34  ;;  %v30898_v40 = vand.u32 4294901760, %v25092_v1  ;;  %v29689_v34 = vand.u32 4294901760, %v25110_v31 }
 0x2f5   :  { %30893 = vst [vmem:[#allocation60_spill] sm:$0xff] %v25112_v35  ;;  %v8171_v48 = vsel %vm3682_vm1, %v8092_v44, 0  ;;  %v8191_v25 = vand.u32 4294901760, %v8169_v17  ;;  %18422 = vmatmul.mubr.f32.gmra.mrb[90].mxu1 %v4110_v9  ;;  %20819 = vmatprep.subr.bf16.mxu0 %v25112_v35  ;;  %v25129_v37 = vpack.c.bf16 %v25114_v15, %v25110_v31 }
 0x2f6   :  { %30896 = vst [vmem:[#allocation67_spill] sm:$0xff] %v25123_v45  ;;  %v8194_v8 = vand.u32 4294901760, %v8171_v48  ;;  %18424 = vmatprep.mubr.f32.mxu1 %v4120_v61  ;;  %v4149_v9 = vsub.f32 %v25092_v1, %v30898_v40  ;;  %v25137_v45 = vsub.f32 %v8167_v14, %v8188_v27 }
 0x2f7   :  { %30897 = vst [vmem:[#allocation66_spill] sm:$0xff] %v25129_v37  ;;  %v25131_v20 = vsub.f32 %v8169_v17, %v8191_v25  ;;  %v8094_v44 = vpop.permute.xlu1 %8093  ;;  %v25141_v6 = vpack.c.bf16 %v8191_v25, %v8188_v27  ;;  %v30902_v27 = vand.u32 4294901760, %v25114_v15 }
 0x2f8   :  { %v8008_v49 = vpop.permute.xlu0 %8007  ;;  %v8173_v61 = vsel %vm3682_vm1, %v8094_v44, 0  ;;  %v25146_v33 = vsub.f32 %v8171_v48, %v8194_v8  ;;  %v4150_v44 = vand.u32 4294901760, %v4149_v9  ;;  %v29697_v40 = vand.u32 4294901760, %v25137_v45 }
 0x2f9   :  { %v8095_v3 = vsel %vm3682_vm1, %v8008_v49, 0  ;;  %30899 = vst [vmem:[#allocation109_spill] sm:$0xff] %v25141_v6  ;;  %v8197_v17 = vand.u32 4294901760, %v8173_v61  ;;  %18425 = vmatmul.mubr.f32.gmra.mrb[92].mxu1 %v4130_v30  ;;  %v25151_v14 = vpack.c.bf16 %v25131_v20, %v25137_v45  ;;  %v25157_v49 = vpack.c.bf16 %v30902_v27, %v29689_v34 }
 0x2fa   :  { %v25143_v37 = vand.u32 4294901760, %v8095_v3  ;;  %18427 = vmatprep.mubr.f32.mxu1 %v4140_v21  ;;  %20821 = vmatpush3.bf16.xpose.msra.mxu0 %v25112_v35  ;;  %v30906_v9 = vand.u32 4294901760, %v25131_v20  ;;  %v30909_v1 = vand.u32 4294901760, %v25146_v33 }
 0x2fb   :  { %30901 = vst [vmem:[#allocation111_spill] sm:$0xff] %v25151_v14  ;;  %30903 = vst [vmem:[#allocation112_spill] sm:$0xff] %v25157_v49  ;;  %v25159_v25 = vsub.f32 %v8173_v61, %v8197_v17  ;;  %20823 = vmatprep.subr.bf16.mxu0 %v25141_v6  ;;  %v8010_v21 = vpop.permute.xlu1 %8009 }
 0x2fc   :  { %30900 = vst [vmem:[#allocation110_spill] sm:$0xff] %v25143_v37  ;;  %v25162_v30 = vsub.f32 %v8095_v3, %v25143_v37  ;;  %v8012_v48 = vpop.permute.xlu0 %8011  ;;  %v8097_v35 = vsel %vm3682_vm1, %v8010_v21, 0  ;;  %v25179_v34 = vpack.c.bf16 %v30906_v9, %v29697_v40 }
 0x2fd   :  { %18428 = vmatmul.mubr.f32.gmra.mrb[94].mxu1 %v4150_v44  ;;  %v25173_v3 = vpack.c.bf16 %v25159_v25, %v25146_v33  ;;  %v8099_v41 = vsel %vm3682_vm1, %v8012_v48, 0  ;;  %v25185_v49 = vand.u32 4294901760, %v8097_v35  ;;  %v25195_v48 = vpack.c.bf16 %v8197_v17, %v8194_v8 }
 0x2fe   :  { %30904 = vst [vmem:[#allocation113_spill] sm:$0xff] %v25162_v30  ;;  %v29699_v27 = vand.u32 4294901760, %v25162_v30  ;;  %18446 = vmatprep.mubr.f32.mxu1 %v24680_v18  ;;  %30907 = vst [vmem:[#allocation115_spill] sm:$0xff] %v25179_v34  ;;  %v25197_v40 = vand.u32 4294901760, %v8099_v41 }
 0x2ff   :  { %30905 = vst [vmem:[#allocation114_spill] sm:$0xff] %v25173_v3  ;;  %v8014_v21 = vpop.permute.xlu1 %8013  ;;  %30908 = vst [vmem:[#allocation116_spill] sm:$0xff] %v25185_v49  ;;  %v30910_v3 = vand.u32 4294901760, %v25159_v25  ;;  %v25210_v17 = vsub.f32 %v8097_v35, %v25185_v49 }
 0x300   :  { %v8016_v44 = vpop.permute.xlu0 %8015  ;;  %v8251_v61 = vsub.f32 %v25162_v30, %v29699_v27  ;;  %v8101_v18 = vsel %vm3682_vm1, %v8014_v21, 0  ;;  %30912 = vst [vmem:[#allocation118_spill] sm:$0xff] %v25195_v48  ;;  %30913 = vst [vmem:[#allocation119_spill] sm:$0xff] %v25197_v40  ;;  %v30914_v21 = vand.u32 4294901760, %v25096_v32 }
 0x301   :  { %v25192_v14 = vpack.c.bf16 %v30910_v3, %v30909_v1  ;;  %18447 = vmatmul.mubr.f32.vlgmr.msra.gmra.mrb[64].mxu1 %v24726_v58  ;;  %v8103_v34 = vsel %vm3682_vm1, %v8016_v44, 0  ;;  %v25205_v30 = vand.u32 4294901760, %v8101_v18  ;;  %30916 = vst [vmem:[#allocation121_spill] sm:$0xff] %v25210_v17 }
 0x302   :  { %v8252_v9 = vand.u32 4294901760, %v8251_v61  ;;  %20657 = vmatpush3.bf16.xpose.msra.mxu1 %v24980_v53  ;;  %18449 = vmatprep.mubr.f32.mxu1 %v24728_v4  ;;  %v8579_v27 = vsub.f32 %v25096_v32, %v30914_v21  ;;  %v30917_v53 = vand.u32 4294901760, %v25084_v23  ;;  %v25217_v44 = vand.u32 4294901760, %v8103_v34 }
 0x303   :  { %30911 = vst [vmem:[#allocation117_spill] sm:$0xff] %v25192_v14  ;;  %30915 = vst [vmem:[#allocation120_spill] sm:$0xff] %v25205_v30  ;;  %20659 = vmatprep.subr.bf16.mxu1 %v24669_v39  ;;  %20825 = vmatpush3.bf16.xpose.msra.mxu0 %v25141_v6  ;;  %v8018_v1 = vpop.permute.xlu1 %8017  ;;  %v25221_v21 = vsub.f32 %v8099_v41, %v25197_v40  ;;  %v25225_v14 = vsub.f32 %v8101_v18, %v25205_v30 }
 0x304   :  { %v8020_v8 = vpop.permute.xlu0 %8019  ;;  %v8105_v61 = vsel %vm3682_vm1, %v8018_v1, 0  ;;  %20827 = vmatprep.subr.bf16.mxu0 %v25195_v48  ;;  %19150 = vmatprep.mubr.f32.mxu0 %v8252_v9  ;;  %v8572_v3 = vsub.f32 %v25084_v23, %v30917_v53  ;;  %30918 = vst [vmem:[#allocation122_spill] sm:$0xff] %v25217_v44  ;;  %v8580_v35 = vand.u32 4294901760, %v8579_v27  ;;  %v30923_v53 = vand.u32 4294901760, %v25114_v15 }
 0x305   :  { %18450 = vmatmul.mubr.f32.gmra.mrb[66].mxu1 %v24757_v5  ;;  %30919 = vst [vmem:[#allocation123_spill] sm:$0xff] %v25221_v21  ;;  %30920 = vst [vmem:[#allocation124_spill] sm:$0xff] %v25225_v14  ;;  %v25227_v1 = vand.u32 4294901760, %v8105_v61  ;;  %v8107_v9 = vsel %vm3682_vm1, %v8020_v8, 0  ;;  %v25232_v5 = vsub.f32 %v8103_v34, %v25217_v44 }
 0x306   :  { %18452 = vmatprep.mubr.f32.mxu1 %v24763_v51  ;;  %v8573_v6 = vand.u32 4294901760, %v8572_v3  ;;  %v25236_v27 = vand.u32 4294901760, %v8107_v9  ;;  %v30926_v51 = vand.u32 4294901760, %v25110_v31 }
 0x307   :  { %30921 = vst [vmem:[#allocation125_spill] sm:$0xff] %v25227_v1  ;;  %v8022_v4 = vpop.permute.xlu1 %8021  ;;  %v25243_v3 = vsub.f32 %v8105_v61, %v25227_v1 }
 0x308   :  { %v8024_v58 = vpop.permute.xlu0 %8023  ;;  %v8109_v41 = vsel %vm3682_vm1, %v8022_v4, 0  ;;  %30922 = vst [vmem:[#allocation126_spill] sm:$0xff] %v25236_v27  ;;  %v20830_v8 = vpack.c.bf16 %v8580_v35, %v8573_v6 }
 0x309   :  { %18453 = vmatmul.mubr.f32.gmra.mrb[68].mxu1 %v24769_v36  ;;  %v8111_v18 = vsel %vm3682_vm1, %v8024_v58, 0  ;;  %v8593_v58 = vsub.f32 %v25114_v15, %v30923_v53  ;;  %v25254_v35 = vand.u32 4294901760, %v8109_v41  ;;  %v8586_v36 = vsub.f32 %v25110_v31, %v30926_v51 }
 0x30a   :  { %20661 = vmatpush3.bf16.xpose.msra.mxu1 %v24669_v39  ;;  %18455 = vmatprep.mubr.f32.mxu1 %v24781_v47  ;;  %v30924_v47 = vand.u32 4294901760, %v25210_v17  ;;  %v25266_v53 = vsub.f32 %v8107_v9, %v25236_v27  ;;  %v30935_v15 = vand.u32 4294901760, %v25137_v45 }
 0x30b   :  { %20663 = vmatprep.subr.bf16.mxu1 %v24692_v29  ;;  %20829 = vmatpush3.bf16.xpose.msra.mxu0 %v25195_v48  ;;  %v8026_v4 = vpop.permute.xlu1 %8025  ;;  %30925 = vst [vmem:[#allocation127_spill] sm:$0xff] %v25254_v35  ;;  %v25260_v48 = vand.u32 4294901760, %v8111_v18  ;;  %v25279_v9 = vsub.f32 %v8109_v41, %v25254_v35  ;;  %v8587_v27 = vand.u32 4294901760, %v8586_v36 }
 0x30c   :  { %v8028_v34 = vpop.permute.xlu0 %8027  ;;  %v8261_v6 = vsub.f32 %v25210_v17, %v30924_v47  ;;  %v8113_v61 = vsel %vm3682_vm1, %v8026_v4, 0  ;;  %20831 = vmatprep.subr.bf16.mxu0 %v20830_v8  ;;  %30928 = vst [vmem:[#allocation129_spill] sm:$0xff] %v25266_v53  ;;  %v30929_v47 = vand.u32 4294901760, %v25221_v21  ;;  %v8594_v17 = vand.u32 4294901760, %v8593_v58 }
 0x30d   :  { %30927 = vst [vmem:[#allocation128_spill] sm:$0xff] %v25260_v48  ;;  %v8115_v1 = vsel %vm3682_vm1, %v8028_v34, 0  ;;  %18456 = vmatmul.mubr.f32.gmra.mrb[70].mxu1 %v24796_v19  ;;  %v25272_v39 = vand.u32 4294901760, %v8113_v61  ;;  %v30931_v34 = vand.u32 4294901760, %v25225_v14  ;;  %30932 = vst [vmem:[#allocation131_spill] sm:$0xff] %v25279_v9  ;;  %v30934_v58 = vand.u32 4294901760, %v25232_v5 }
 0x30e   :  { %18458 = vmatprep.mubr.f32.mxu1 %v24798_v24  ;;  %v8271_v4 = vsub.f32 %v25221_v21, %v30929_v47  ;;  %v8262_v44 = vand.u32 4294901760, %v8261_v6  ;;  %v25281_v24 = vand.u32 4294901760, %v8115_v1  ;;  %v25284_v47 = vsub.f32 %v8111_v18, %v25260_v48 }
 0x30f   :  { %30930 = vst [vmem:[#allocation130_spill] sm:$0xff] %v25272_v39  ;;  %v8030_v31 = vpop.permute.xlu1 %8029  ;;  %v8281_v19 = vsub.f32 %v25225_v14, %v30931_v34  ;;  %v8291_v34 = vsub.f32 %v25232_v5, %v30934_v58  ;;  %v8600_v6 = vsub.f32 %v25137_v45, %v30935_v15  ;;  %v25301_v14 = vsub.f32 %v8113_v61, %v25272_v39 }
 0x310   :  { %v8032_v51 = vpop.permute.xlu0 %8031  ;;  %30933 = vst [vmem:[#allocation132_spill] sm:$0xff] %v25281_v24  ;;  %v8117_v21 = vsel %vm3682_vm1, %v8030_v31, 0  ;;  %v8272_v36 = vand.u32 4294901760, %v8271_v4  ;;  %v30936_v31 = vand.u32 4294901760, %v25131_v20  ;;  %v20834_v15 = vpack.c.bf16 %v8594_v17, %v8587_v27 }
 0x311   :  { %18459 = vmatmul.mubr.f32.gmra.mrb[72].mxu1 %v24824_v60  ;;  %v8119_v41 = vsel %vm3682_vm1, %v8032_v51, 0  ;;  %v8282_v51 = vand.u32 4294901760, %v8281_v19  ;;  %v25309_v4 = vsub.f32 %v8115_v1, %v25281_v24  ;;  %v25311_v58 = vand.u32 4294901760, %v8117_v21 }
 0x312   :  { %20665 = vmatpush3.bf16.xpose.msra.mxu1 %v24692_v29  ;;  %19151 = vmatmul.mubr.f32.vlgmr.msra.gmra.mrb[64].mxu0 %v8262_v44  ;;  %v8607_v60 = vsub.f32 %v25131_v20, %v30936_v31  ;;  %v30937_v29 = vand.u32 4294901760, %v25243_v3  ;;  %v25315_v18 = vand.u32 4294901760, %v8119_v41  ;;  %v8292_v19 = vand.u32 4294901760, %v8291_v34 }
 0x313   :  { %18461 = vmatprep.mubr.f32.mxu1 %v24829_v0  ;;  %20667 = vmatprep.subr.bf16.mxu1 %v24718_v63  ;;  %v8034_v45 = vpop.permute.xlu1 %8033  ;;  %30938 = vst [vmem:[#allocation133_spill] sm:$0xff] %v25311_v58  ;;  %v30940_v27 = vand.u32 4294901760, %v25266_v53  ;;  %v8601_v0 = vand.u32 4294901760, %v8600_v6  ;;  %v25328_v17 = vsub.f32 %v8117_v21, %v25311_v58  ;;  %v30944_v21 = vand.u32 4294901760, %v25284_v47 }
 0x314   :  { %v8301_v44 = vsub.f32 %v25243_v3, %v30937_v29  ;;  %19153 = vmatprep.mubr.f32.mxu0 %v8272_v36  ;;  %20833 = vmatpush3.bf16.xpose.msra.mxu0 %v20830_v8  ;;  %v8121_v20 = vsel %vm3682_vm1, %v8034_v45, 0  ;;  %v8036_v61 = vpop.permute.xlu0 %8035  ;;  %30939 = vst [vmem:[#allocation134_spill] sm:$0xff] %v25315_v18  ;;  %v8608_v36 = vand.u32 4294901760, %v8607_v60  ;;  %v30945_v60 = vand.u32 4294901760, %v25146_v33 }
 0x315   :  { %20835 = vmatprep.subr.bf16.mxu0 %v20834_v15  ;;  %18462 = vmatmul.mubr.f32.gmra.mrb[74].mxu1 %v24861_v56  ;;  %v8123_v1 = vsel %vm3682_vm1, %v8036_v61, 0  ;;  %v8311_v8 = vsub.f32 %v25266_v53, %v30940_v27  ;;  %v25324_v45 = vand.u32 4294901760, %v8121_v20  ;;  %v25336_v27 = vsub.f32 %v8119_v41, %v25315_v18 }
 0x316   :  { %19154 = vmatmul.mubr.f32.gmra.mrb[66].mxu0 %v8282_v51  ;;  %18464 = vmatprep.mubr.f32.mxu1 %v24863_v16  ;;  %v8302_v31 = vand.u32 4294901760, %v8301_v44  ;;  %v30942_v16 = vand.u32 4294901760, %v25279_v9  ;;  %v8331_v44 = vsub.f32 %v25284_v47, %v30944_v21  ;;  %v8614_v41 = vsub.f32 %v25146_v33, %v30945_v60 }
 0x317   :  { %30941 = vst [vmem:[#allocation135_spill] sm:$0xff] %v25324_v45  ;;  %19156 = vmatprep.mubr.f32.mxu0 %v8292_v19  ;;  %v8038_v29 = vpop.permute.xlu1 %8037  ;;  %v25338_v19 = vand.u32 4294901760, %v8123_v1  ;;  %v30946_v34 = vand.u32 4294901760, %v25159_v25 }
 0x318   :  { %v8125_v51 = vsel %vm3682_vm1, %v8038_v29, 0  ;;  %v8040_v61 = vpop.permute.xlu0 %8039  ;;  %v8321_v56 = vsub.f32 %v25279_v9, %v30942_v16  ;;  %v8312_v29 = vand.u32 4294901760, %v8311_v8  ;;  %v20838_v16 = vpack.c.bf16 %v8608_v36, %v8601_v0 }
 0x319   :  { %30943 = vst [vmem:[#allocation136_spill] sm:$0xff] %v25338_v19  ;;  %v8127_v6 = vsel %vm3682_vm1, %v8040_v61, 0  ;;  %18465 = vmatmul.mubr.f32.gmra.mrb[76].mxu1 %v24885_v50  ;;  %v8621_v9 = vsub.f32 %v25159_v25, %v30946_v34  ;;  %v25353_v61 = vsub.f32 %v8121_v20, %v25324_v45  ;;  %v25355_v50 = vand.u32 4294901760, %v8125_v51 }
 0x31a   :  { %20669 = vmatpush3.bf16.xpose.msra.mxu1 %v24718_v63  ;;  %19157 = vmatmul.mubr.f32.gmra.mrb[68].mxu0 %v8302_v31  ;;  %v25357_v53 = vand.u32 4294901760, %v8127_v6  ;;  %v30949_v0 = vand.u32 4294901760, %v25301_v14  ;;  %v8322_v25 = vand.u32 4294901760, %v8321_v56  ;;  %v30950_v20 = vand.u32 4294901760, %v25309_v4 }
 0x31b   :  { %30947 = vst [vmem:[#allocation137_spill] sm:$0xff] %v25355_v50  ;;  %18467 = vmatprep.mubr.f32.mxu1 %v24888_v26  ;;  %20671 = vmatprep.subr.bf16.mxu1 %v24633_v57  ;;  %v8042_v63 = vpop.permute.xlu1 %8041  ;;  %v25369_v34 = vsub.f32 %v8123_v1, %v25338_v19  ;;  %v8332_v21 = vand.u32 4294901760, %v8331_v44  ;;  %v8615_v56 = vand.u32 4294901760, %v8614_v41  ;;  %v30954_v41 = vand.u32 4294901760, %v25328_v17 }
 0x31c   :  { %30948 = vst [vmem:[#allocation138_spill] sm:$0xff] %v25357_v53  ;;  %v8341_v33 = vsub.f32 %v25301_v14, %v30949_v0  ;;  %19159 = vmatprep.mubr.f32.mxu0 %v8312_v29  ;;  %20837 = vmatpush3.bf16.xpose.msra.mxu0 %v20834_v15  ;;  %v8044_v31 = vpop.permute.xlu0 %8043  ;;  %v8351_v8 = vsub.f32 %v25309_v4, %v30950_v20  ;;  %v8129_v60 = vsel %vm3682_vm1, %v8042_v63, 0  ;;  %v8622_v0 = vand.u32 4294901760, %v8621_v9 }
 0x31d   :  { %20839 = vmatprep.subr.bf16.mxu0 %v20838_v16  ;;  %18468 = vmatmul.mubr.f32.gmra.mrb[78].mxu1 %v24898_v22  ;;  %v8131_v15 = vsel %vm3682_vm1, %v8044_v31, 0  ;;  %v25377_v20 = vsub.f32 %v8125_v51, %v25355_v50  ;;  %v25380_v1 = vsub.f32 %v8127_v6, %v25357_v53  ;;  %v25383_v22 = vand.u32 4294901760, %v8129_v60 }
 0x31e   :  { %19160 = vmatmul.mubr.f32.gmra.mrb[70].mxu0 %v8322_v25  ;;  %18470 = vmatprep.mubr.f32.mxu1 %v24914_v55  ;;  %v8342_v36 = vand.u32 4294901760, %v8341_v33  ;;  %v8352_v29 = vand.u32 4294901760, %v8351_v8  ;;  %v8361_v9 = vsub.f32 %v25328_v17, %v30954_v41  ;;  %v25389_v51 = vand.u32 4294901760, %v8131_v15 }
 0x31f   :  { %30951 = vst [vmem:[#allocation139_spill] sm:$0xff] %v25377_v20  ;;  %30952 = vst [vmem:[#allocation140_spill] sm:$0xff] %v25380_v1  ;;  %19162 = vmatprep.mubr.f32.mxu0 %v8332_v21  ;;  %v8046_v63 = vpop.permute.xlu1 %8045  ;;  %v30956_v33 = vand.u32 4294901760, %v25336_v27  ;;  %v20842_v8 = vpack.c.bf16 %v8622_v0, %v8615_v56  ;;  %v30958_v55 = vand.u32 4294901760, %v25353_v61 }
 0x320   :  { %30953 = vst [vmem:[#allocation141_spill] sm:$0xff] %v25383_v22  ;;  %v8133_v31 = vsel %vm3682_vm1, %v8046_v63, 0  ;;  %v8048_v25 = vpop.permute.xlu0 %8047  ;;  %30955 = vst [vmem:[#allocation142_spill] sm:$0xff] %v25389_v51  ;;  %v8362_v56 = vand.u32 4294901760, %v8361_v9  ;;  %v25411_v0 = vsub.f32 %v8131_v15, %v25389_v51 }
 0x321   :  { %v8135_v6 = vsel %vm3682_vm1, %v8048_v25, 0  ;;  %18471 = vmatmul.mubr.f32.gmra.mrb[80].mxu1 %v24921_v62  ;;  %v8371_v21 = vsub.f32 %v25336_v27, %v30956_v33  ;;  %v25398_v63 = vand.u32 4294901760, %v8133_v31  ;;  %v8381_v25 = vsub.f32 %v25353_v61, %v30958_v55 }
 0x322   :  { %19163 = vmatmul.mubr.f32.gmra.mrb[72].mxu0 %v8342_v36  ;;  %18473 = vmatprep.mubr.f32.mxu1 %v24923_v10  ;;  %v25406_v33 = vsub.f32 %v8129_v60, %v25383_v22  ;;  %v25408_v44 = vand.u32 4294901760, %v8135_v6  ;;  %30959 = vst [vmem:[#allocation144_spill] sm:$0xff] %v25411_v0  ;;  %v30960_v62 = vand.u32 4294901760, %v25369_v34 }
 0x323   :  { %30957 = vst [vmem:[#allocation143_spill] sm:$0xff] %v25398_v63  ;;  %19165 = vmatprep.mubr.f32.mxu0 %v8352_v29  ;;  %v8050_v41 = vpop.permute.xlu1 %8049  ;;  %v8372_v55 = vand.u32 4294901760, %v8371_v21  ;;  %v8382_v9 = vand.u32 4294901760, %v8381_v25  ;;  %v30963_v21 = vand.u32 4294901760, %v25380_v1 }
 0x324   :  { %20841 = vmatpush3.bf16.xpose.msra.mxu0 %v20838_v16  ;;  %v8052_v36 = vpop.permute.xlu0 %8051  ;;  %v8137_v29 = vsel %vm3682_vm1, %v8050_v41, 0  ;;  %v8391_v26 = vsub.f32 %v25369_v34, %v30960_v62  ;;  %v25421_v16 = vsub.f32 %v8133_v31, %v25398_v63  ;;  %v30962_v41 = vand.u32 4294901760, %v25377_v20 }
 0x325   :  { %20843 = vmatprep.subr.bf16.mxu0 %v20842_v8  ;;  %18474 = vmatmul.mubr.f32.gmra.mrb[82].mxu1 %v24944_v28  ;;  %v8139_v60 = vsel %vm3682_vm1, %v8052_v36, 0  ;;  %v8411_v10 = vsub.f32 %v25380_v1, %v30963_v21  ;;  %v25430_v62 = vsub.f32 %v8135_v6, %v25408_v44  ;;  %v25432_v36 = vand.u32 4294901760, %v8137_v29 }
 0x326   :  { %19166 = vmatmul.mubr.f32.gmra.mrb[74].mxu0 %v8362_v56  ;;  %18476 = vmatprep.mubr.f32.mxu1 %v24947_v42  ;;  %30961 = vst [vmem:[#allocation145_spill] sm:$0xff] %v25421_v16  ;;  %v8401_v28 = vsub.f32 %v25377_v20, %v30962_v41  ;;  %v25436_v42 = vand.u32 4294901760, %v8139_v60  ;;  %v8392_v25 = vand.u32 4294901760, %v8391_v26  ;;  %v29775_v1 = vand.u32 4294901760, %v25421_v16 }
 0x327   :  { %19168 = vmatprep.mubr.f32.mxu0 %v8372_v55  ;;  %v8054_v15 = vpop.permute.xlu1 %8053  ;;  %30964 = vst [vmem:[#allocation146_spill] sm:$0xff] %v25430_v62  ;;  %30965 = vst [vmem:[#allocation147_spill] sm:$0xff] %v25432_v36  ;;  %v25450_v26 = vsub.f32 %v8137_v29, %v25432_v36 }
 0x328   :  { %v8141_v56 = vsel %vm3682_vm1, %v8054_v15, 0  ;;  %v8056_v31 = vpop.permute.xlu0 %8055  ;;  %30966 = vst [vmem:[#allocation148_spill] sm:$0xff] %v25436_v42  ;;  %v25446_v15 = vpack.c.bf16 %v25096_v32, %v25084_v23  ;;  %v8402_v55 = vand.u32 4294901760, %v8401_v28  ;;  %v30969_v32 = vand.u32 4294901760, %v25411_v0 }
 0x329   :  { %18477 = vmatmul.mubr.f32.gmra.mrb[84].mxu1 %v24969_v54  ;;  %v8143_v20 = vsel %vm3682_vm1, %v8056_v31, 0  ;;  %v25442_v6 = vand.u32 4294901760, %v8141_v56  ;;  %v8412_v31 = vand.u32 4294901760, %v8411_v10  ;;  %v25457_v54 = vsub.f32 %v8139_v60, %v25436_v42 }
 0x32a   :  { %19169 = vmatmul.mubr.f32.gmra.mrb[76].mxu0 %v8382_v9  ;;  %18479 = vmatprep.mubr.f32.mxu1 %v24971_v38  ;;  %v30968_v9 = vand.u32 4294901760, %v25406_v33  ;;  %v25459_v23 = vand.u32 4294901760, %v8143_v20  ;;  %v8431_v10 = vsub.f32 %v25411_v0, %v30969_v32  ;;  %v30971_v32 = vand.u32 4294901760, %v25430_v62 }
 0x32b   :  { %30967 = vst [vmem:[#allocation149_spill] sm:$0xff] %v25442_v6  ;;  %19171 = vmatprep.mubr.f32.mxu0 %v8392_v25  ;;  %v8058_v21 = vpop.permute.xlu1 %8057 }
 0x32c   :  { %20845 = vmatpush3.bf16.xpose.msra.mxu0 %v20842_v8  ;;  %v8060_v41 = vpop.permute.xlu0 %8059  ;;  %v8421_v38 = vsub.f32 %v25406_v33, %v30968_v9  ;;  %v8145_v28 = vsel %vm3682_vm1, %v8058_v21, 0  ;;  %v25469_v8 = vsub.f32 %v8141_v56, %v25442_v6  ;;  %v8441_v21 = vsub.f32 %v25421_v16, %v29775_v1 }
 0x32d   :  { %20847 = vmatprep.subr.bf16.mxu0 %v25446_v15  ;;  %18480 = vmatmul.mubr.f32.gmra.mrb[86].mxu1 %v24995_v46  ;;  %v8147_v29 = vsel %vm3682_vm1, %v8060_v41, 0  ;;  %v25475_v9 = vand.u32 4294901760, %v8145_v28  ;;  %v25482_v56 = vsub.f32 %v8143_v20, %v25459_v23  ;;  %v30974_v1 = vand.u32 4294901760, %v25450_v26 }
 0x32e   :  { %19172 = vmatmul.mubr.f32.gmra.mrb[78].mxu0 %v8402_v55  ;;  %18482 = vmatprep.mubr.f32.mxu1 %v24998_v59  ;;  %30970 = vst [vmem:[#allocation150_spill] sm:$0xff] %v25469_v8  ;;  %v8422_v46 = vand.u32 4294901760, %v8421_v38  ;;  %v8451_v55 = vsub.f32 %v25430_v62, %v30971_v32  ;;  %v25487_v16 = vand.u32 4294901760, %v8147_v29  ;;  %v8442_v59 = vand.u32 4294901760, %v8441_v21 }
 0x32f   :  { %19174 = vmatprep.mubr.f32.mxu0 %v8412_v31  ;;  %v8062_v60 = vpop.permute.xlu1 %8061  ;;  %30972 = vst [vmem:[#allocation151_spill] sm:$0xff] %v25482_v56  ;;  %v8432_v31 = vand.u32 4294901760, %v8431_v10  ;;  %v25493_v62 = vsub.f32 %v8145_v28, %v25475_v9  ;;  %v8461_v0 = vsub.f32 %v25450_v26, %v30974_v1  ;;  %v30975_v21 = vand.u32 4294901760, %v25457_v54 }
 0x330   :  { %v8064_v25 = vpop.permute.xlu0 %8063  ;;  %v8149_v41 = vsel %vm3682_vm1, %v8062_v60, 0  ;;  %v25509_v20 = vsub.f32 %v8147_v29, %v25487_v16 }
 0x331   :  { %18483 = vmatmul.mubr.f32.gmra.mrb[88].mxu1 %v25002_v7  ;;  %v8151_v38 = vsel %vm3682_vm1, %v8064_v25, 0  ;;  %30973 = vst [vmem:[#allocation152_spill] sm:$0xff] %v25493_v62  ;;  %v25495_v60 = vand.u32 4294901760, %v8149_v41  ;;  %v8452_v7 = vand.u32 4294901760, %v8451_v55  ;;  %v8462_v28 = vand.u32 4294901760, %v8461_v0 }
 0x332   :  { %19175 = vmatmul.mubr.f32.gmra.mrb[80].mxu0 %v8422_v46  ;;  %18485 = vmatprep.mubr.f32.mxu1 %v25019_v12  ;;  %v25500_v25 = vand.u32 4294901760, %v8151_v38  ;;  %30976 = vst [vmem:[#allocation153_spill] sm:$0xff] %v25509_v20  ;;  %v29794_v29 = vand.u32 4294901760, %v25493_v62 }
 0x333   :  { %19177 = vmatprep.mubr.f32.mxu0 %v8432_v31  ;;  %v8066_v32 = vpop.permute.xlu1 %8065  ;;  %v8471_v31 = vsub.f32 %v25457_v54, %v30975_v21  ;;  %v25517_v12 = vsub.f32 %v8149_v41, %v25495_v60 }
 0x334   :  { %v8068_v10 = vpop.permute.xlu0 %8067  ;;  %v8153_v46 = vsel %vm3682_vm1, %v8066_v32, 0  ;;  %v30977_v32 = vand.u32 4294901760, %v25469_v8 }
 0x335   :  { %18486 = vmatmul.mubr.f32.gmra.mrb[90].mxu1 %v25026_v52  ;;  %v8155_v1 = vsel %vm3682_vm1, %v8068_v10, 0  ;;  %30978 = vst [vmem:[#allocation154_spill] sm:$0xff] %v25517_v12  ;;  %v25519_v21 = vand.u32 4294901760, %v8153_v46  ;;  %v30980_v10 = vand.u32 4294901760, %v25482_v56 }
 0x336   :  { %19178 = vmatmul.mubr.f32.gmra.mrb[82].mxu0 %v8442_v59  ;;  %18488 = vmatprep.mubr.f32.mxu1 %v25028_v11  ;;  %v8481_v52 = vsub.f32 %v25469_v8, %v30977_v32  ;;  %v25523_v59 = vsub.f32 %v8151_v38, %v25500_v25  ;;  %v25530_v8 = vand.u32 4294901760, %v8155_v1 }
 0x337   :  { %19180 = vmatprep.mubr.f32.mxu0 %v8452_v7  ;;  %v8070_v55 = vpop.permute.xlu1 %8069  ;;  %v8472_v7 = vand.u32 4294901760, %v8471_v31  ;;  %v8491_v32 = vsub.f32 %v25482_v56, %v30980_v10  ;;  %v25535_v38 = vsub.f32 %v8153_v46, %v25519_v21  ;;  %v8501_v31 = vsub.f32 %v25493_v62, %v29794_v29  ;;  %v30990_v62 = vld [vmem:[#allocation35_spill] sm:$0xff] }
 0x338   :  { %30979 = vst [vmem:[#allocation155_spill] sm:$0xff] %v25523_v59  ;;  %v8157_v11 = vsel %vm3682_vm1, %v8070_v55, 0  ;;  %v8482_v41 = vand.u32 4294901760, %v8481_v52  ;;  %v25546_v0 = vsub.f32 %v8155_v1, %v25530_v8  ;;  %v30982_v52 = vld [vmem:[#allocation13_spill] sm:$0xff]  ;;  %v30983_v46 = vand.u32 4294901760, %v25509_v20  ;;  %v30986_v1 = vld [vmem:[#allocation26_spill] sm:$0xff] }
 0x339   :  { %18489 = vmatmul.mubr.f32.gmra.mrb[92].mxu1 %v25050_v2  ;;  %30981 = vst [vmem:[#allocation156_spill] sm:$0xff] %v25535_v38  ;;  %v25537_v55 = vand.u32 4294901760, %v8157_v11  ;;  %v8502_v10 = vand.u32 4294901760, %v8501_v31  ;;  %v30989_v31 = vld [vmem:[#allocation8_spill] sm:$0xff]  ;;  %v30995_v56 = vld [vmem:[#allocation51_spill] sm:$0xff] }
 0x33a   :  { %19181 = vmatmul.mubr.f32.gmra.mrb[84].mxu0 %v8462_v28  ;;  %18491 = vmatprep.mubr.f32.mxu1 %v25052_v13  ;;  %v8492_v28 = vand.u32 4294901760, %v8491_v32  ;;  %v29807_v13 = vand.u32 4294901760, %v25535_v38 }
 0x33b   :  { %19183 = vmatprep.mubr.f32.mxu0 %v8472_v7  ;;  %v8511_v7 = vsub.f32 %v25509_v20, %v30983_v46  ;;  %v25553_v29 = vsub.f32 %v8157_v11, %v25537_v55  ;;  %v29813_v11 = vand.u32 4294901760, %v25546_v0  ;;  %v30988_v46 = vld [vmem:[#allocation28_spill] sm:$0xff] }
 0x33d   :  { %18492 = vmatmul.mubr.f32.gmra.mrb[94].mxu1 %v25074_v43  ;;  %30984 = vst [vmem:[#allocation13_spill] sm:$0xff] %v25553_v29  ;;  %v30985_v43 = vand.u32 4294901760, %v25517_v12  ;;  %v29812_v20 = vand.u32 4294901760, %v25553_v29 }
 0x33e   :  { %19184 = vmatmul.mubr.f32.gmra.mrb[86].mxu0 %v8482_v41  ;;  %18510 = vmatprep.mubr.f32.mxu1 %v30982_v52  ;;  %v30987_v41 = vand.u32 4294901760, %v25523_v59 }
 0x33f   :  { %19186 = vmatprep.mubr.f32.mxu0 %v8492_v28  ;;  %v8521_v32 = vsub.f32 %v25517_v12, %v30985_v43  ;;  %v8512_v28 = vand.u32 4294901760, %v8511_v7  ;;  %v8541_v12 = vsub.f32 %v25535_v38, %v29807_v13  ;;  %v8551_v7 = vsub.f32 %v25546_v0, %v29813_v11  ;;  %v31004_v11 = vld [vmem:[#allocation74_spill] sm:$0xff] }
 0x340   :  { %v8531_v2 = vsub.f32 %v25523_v59, %v30987_v41 }
 0x341   :  { %18511 = vmatmul.mubr.f32.vlgmr.msra.gmra.mrb[64].mxu1 %v30986_v1  ;;  %v8522_v43 = vand.u32 4294901760, %v8521_v32  ;;  %v8542_v59 = vand.u32 4294901760, %v8541_v12  ;;  %v8561_v32 = vsub.f32 %v25553_v29, %v29812_v20  ;;  %v8552_v13 = vand.u32 4294901760, %v8551_v7  ;;  %v30996_v12 = vld [vmem:[#allocation53_spill] sm:$0xff]  ;;  %v30999_v7 = vld [vmem:[#allocation23_spill] sm:$0xff]  ;;  %v31003_v20 = vld [vmem:[#allocation122_spill] sm:$0xff] }
 0x342   :  { %20673 = vmatpush3.bf16.xpose.msra.mxu1 %v24633_v57  ;;  %19187 = vmatmul.mubr.f32.gmra.mrb[88].mxu0 %v8502_v10  ;;  %v8532_v41 = vand.u32 4294901760, %v8531_v2  ;;  %v30991_v10 = vld [vmem:[#allocation37_spill] sm:$0xff]  ;;  %v30993_v2 = vld [vmem:[#allocation50_spill] sm:$0xff]  ;;  %v31009_v29 = vld [vmem:[#allocation111_spill] sm:$0xff] }
 0x343   :  { %18513 = vmatprep.mubr.f32.mxu1 %v30988_v46  ;;  %20675 = vmatprep.subr.bf16.mxu1 %v30989_v31  ;;  %v8562_v38 = vand.u32 4294901760, %v8561_v32  ;;  %v31002_v32 = vld [vmem:[#allocation68_spill] sm:$0xff] }
 0x344   :  { %19189 = vmatprep.mubr.f32.mxu0 %v8512_v28  ;;  %v30992_v28 = vld [vmem:[#allocation41_spill] sm:$0xff] }
 0x345   :  { %18514 = vmatmul.mubr.f32.gmra.mrb[66].mxu1 %v30990_v62 }
 0x346   :  { %19190 = vmatmul.mubr.f32.gmra.mrb[90].mxu0 %v8522_v43  ;;  %18516 = vmatprep.mubr.f32.mxu1 %v30991_v10  ;;  %v30994_v43 = vld [vmem:[#allocation10_spill] sm:$0xff] }
 0x347   :  { %19192 = vmatprep.mubr.f32.mxu0 %v8532_v41  ;;  %v30997_v41 = vld [vmem:[#allocation57_spill] sm:$0xff] }
 0x349   :  { %18517 = vmatmul.mubr.f32.gmra.mrb[68].mxu1 %v30992_v28 }
 0x34a   :  { %20677 = vmatpush3.bf16.xpose.msra.mxu1 %v30989_v31  ;;  %19193 = vmatmul.mubr.f32.gmra.mrb[92].mxu0 %v8542_v59  ;;  %v30998_v59 = vld [vmem:[#allocation58_spill] sm:$0xff] }
 0x34b   :  { %18519 = vmatprep.mubr.f32.mxu1 %v30993_v2  ;;  %20679 = vmatprep.subr.bf16.mxu1 %v30994_v43 }
 0x34c   :  { %19195 = vmatprep.mubr.f32.mxu0 %v8552_v13  ;;  %v31000_v13 = vld [vmem:[#allocation66_spill] sm:$0xff] }
 0x34d   :  { %18520 = vmatmul.mubr.f32.gmra.mrb[70].mxu1 %v30995_v56 }
 0x34e   :  { %19196 = vmatmul.mubr.f32.gmra.mrb[94].mxu0 %v8562_v38  ;;  %18522 = vmatprep.mubr.f32.mxu1 %v30996_v12  ;;  %v31001_v38 = vld [vmem:[#allocation64_spill] sm:$0xff] }
 0x34f   :  { %19214 = vmatprep.mubr.f32.mxu0 %v25143_v37  ;;  %v31008_v37 = vld [vmem:[#allocation126_spill] sm:$0xff] }
 0x351   :  { %18523 = vmatmul.mubr.f32.gmra.mrb[72].mxu1 %v30997_v41 }
 0x352   :  { %20681 = vmatpush3.bf16.xpose.msra.mxu1 %v30994_v43  ;;  %19215 = vmatmul.mubr.f32.vlgmr.msra.gmra.mrb[64].mxu0 %v25185_v49  ;;  %v31006_v49 = vld [vmem:[#allocation75_spill] sm:$0xff] }
 0x353   :  { %20849 = vmatpush3.bf16.xpose.msra.mxu0 %v25446_v15  ;;  %18525 = vmatprep.mubr.f32.mxu1 %v30998_v59  ;;  %v31005_v15 = vld [vmem:[#allocation125_spill] sm:$0xff] }
 0x354   :  { %20683 = vmatprep.subr.bf16.mxu1 %v30999_v7  ;;  %19217 = vmatprep.mubr.f32.mxu0 %v25197_v40  ;;  %v31007_v40 = vld [vmem:[#allocation9_spill] sm:$0xff] }
 0x355   :  { %20851 = vmatprep.subr.bf16.mxu0 %v31000_v13  ;;  %18526 = vmatmul.mubr.f32.gmra.mrb[74].mxu1 %v31001_v38 }
 0x356   :  { %19218 = vmatmul.mubr.f32.gmra.mrb[66].mxu0 %v25205_v30  ;;  %18528 = vmatprep.mubr.f32.mxu1 %v31002_v32  ;;  %v31010_v30 = vld [vmem:[#allocation78_spill] sm:$0xff] }
 0x357   :  { %19220 = vmatprep.mubr.f32.mxu0 %v31003_v20  ;;  %v31011_v20 = vld [vmem:[#allocation81_spill] sm:$0xff] }
 0x359   :  { %18529 = vmatmul.mubr.f32.gmra.mrb[76].mxu1 %v31004_v11 }
 0x35a   :  { %20685 = vmatpush3.bf16.xpose.msra.mxu1 %v30999_v7  ;;  %19221 = vmatmul.mubr.f32.gmra.mrb[68].mxu0 %v31005_v15  ;;  %v31012_v7 = vld [vmem:[#allocation85_spill] sm:$0xff]  ;;  %v31015_v15 = vld [vmem:[#allocation92_spill] sm:$0xff] }
 0x35b   :  { %20853 = vmatpush3.bf16.xpose.msra.mxu0 %v31000_v13  ;;  %18531 = vmatprep.mubr.f32.mxu1 %v31006_v49  ;;  %v31013_v13 = vld [vmem:[#allocation87_spill] sm:$0xff] }
 0x35c   :  { %20687 = vmatprep.subr.bf16.mxu1 %v31007_v40  ;;  %19223 = vmatprep.mubr.f32.mxu0 %v31008_v37  ;;  %v31014_v37 = vld [vmem:[#allocation114_spill] sm:$0xff] }
 0x35d   :  { %20855 = vmatprep.subr.bf16.mxu0 %v31009_v29  ;;  %18532 = vmatmul.mubr.f32.gmra.mrb[78].mxu1 %v31010_v30 }
 0x35e   :  { %19224 = vmatmul.mubr.f32.gmra.mrb[70].mxu0 %v25254_v35  ;;  %18534 = vmatprep.mubr.f32.mxu1 %v31011_v20  ;;  %v31016_v35 = vld [vmem:[#allocation93_spill] sm:$0xff] }
 0x35f   :  { %19226 = vmatprep.mubr.f32.mxu0 %v25260_v48  ;;  %v31017_v48 = vld [vmem:[#allocation97_spill] sm:$0xff] }
 0x361   :  { %18535 = vmatmul.mubr.f32.gmra.mrb[80].mxu1 %v31012_v7 }
 0x362   :  { %19227 = vmatmul.mubr.f32.gmra.mrb[72].mxu0 %v25272_v39  ;;  %18537 = vmatprep.mubr.f32.mxu1 %v31013_v13  ;;  %v31018_v39 = vld [vmem:[#allocation99_spill] sm:$0xff] }
 0x363   :  { %20857 = vmatpush3.bf16.xpose.msra.mxu0 %v31009_v29  ;;  %19229 = vmatprep.mubr.f32.mxu0 %v25281_v24  ;;  %v31019_v29 = vld [vmem:[#allocation62_spill] sm:$0xff]  ;;  %v31020_v24 = vld [vmem:[#allocation103_spill] sm:$0xff] }
 0x364   :  { %20859 = vmatprep.subr.bf16.mxu0 %v31014_v37 }
 0x365   :  { %18538 = vmatmul.mubr.f32.gmra.mrb[82].mxu1 %v31015_v15 }
 0x366   :  { %19230 = vmatmul.mubr.f32.gmra.mrb[74].mxu0 %v25311_v58  ;;  %18540 = vmatprep.mubr.f32.mxu1 %v31016_v35  ;;  %v31021_v58 = vld [vmem:[#allocation100_spill] sm:$0xff] }
 0x367   :  { %19232 = vmatprep.mubr.f32.mxu0 %v25315_v18  ;;  %v31022_v18 = vld [vmem:[#allocation102_spill] sm:$0xff] }
 0x369   :  { %18541 = vmatmul.mubr.f32.gmra.mrb[84].mxu1 %v31017_v48 }
 0x36a   :  { %19233 = vmatmul.mubr.f32.gmra.mrb[76].mxu0 %v25324_v45  ;;  %18543 = vmatprep.mubr.f32.mxu1 %v31018_v39  ;;  %v31023_v45 = vld [vmem:[#allocation108_spill] sm:$0xff] }
 0x36b   :  { %20861 = vmatpush3.bf16.xpose.msra.mxu0 %v31014_v37  ;;  %19235 = vmatprep.mubr.f32.mxu0 %v25338_v19  ;;  %v31024_v37 = vld [vmem:[#allocation106_spill] sm:$0xff] }
 0x36c   :  { %20863 = vmatprep.subr.bf16.mxu0 %v31019_v29  ;;  %v31025_v19 = vld [vmem:[#allocation14_spill] sm:$0xff] }
 0x36d   :  { %18544 = vmatmul.mubr.f32.gmra.mrb[86].mxu1 %v31020_v24 }
 0x36e   :  { %19236 = vmatmul.mubr.f32.gmra.mrb[78].mxu0 %v25355_v50  ;;  %18546 = vmatprep.mubr.f32.mxu1 %v31021_v58  ;;  %v31026_v50 = vld [vmem:[#allocation21_spill] sm:$0xff] }
 0x36f   :  { %19238 = vmatprep.mubr.f32.mxu0 %v25357_v53  ;;  %v31027_v53 = vld [vmem:[#allocation20_spill] sm:$0xff] }
 0x371   :  { %18547 = vmatmul.mubr.f32.gmra.mrb[88].mxu1 %v31022_v18 }
 0x372   :  { %19239 = vmatmul.mubr.f32.gmra.mrb[80].mxu0 %v25383_v22  ;;  %18549 = vmatprep.mubr.f32.mxu1 %v31023_v45  ;;  %v31028_v22 = vld [vmem:[#allocation25_spill] sm:$0xff] }
 0x373   :  { %19241 = vmatprep.mubr.f32.mxu0 %v25389_v51  ;;  %v31029_v51 = vand.u32 4294901760, %v30982_v52  ;;  %v31040_v52 = vld [vmem:[#allocation113_spill] sm:$0xff] }
 0x375   :  { %18550 = vmatmul.mubr.f32.gmra.mrb[90].mxu1 %v31024_v37 }
 0x376   :  { %19242 = vmatmul.mubr.f32.gmra.mrb[82].mxu0 %v25398_v63  ;;  %18552 = vmatprep.mubr.f32.mxu1 %v31025_v19  ;;  %v31030_v63 = vand.u32 4294901760, %v30986_v1  ;;  %v31042_v1 = vld [vmem:[#allocation121_spill] sm:$0xff] }
 0x377   :  { %19244 = vmatprep.mubr.f32.mxu0 %v25408_v44 }
 0x379   :  { %18553 = vmatmul.mubr.f32.gmra.mrb[92].mxu1 %v31026_v50 }
 0x37a   :  { %19245 = vmatmul.mubr.f32.gmra.mrb[84].mxu0 %v25432_v36  ;;  %18555 = vmatprep.mubr.f32.mxu1 %v31027_v53  ;;  %v31031_v36 = vand.u32 4294901760, %v30988_v46  ;;  %v31043_v46 = vand.u32 4294901760, %v30998_v59  ;;  %v31051_v59 = vand.u32 4294901760, %v31006_v49  ;;  %v31058_v49 = vand.u32 4294901760, %v31013_v13 }
 0x37b   :  { %19247 = vmatprep.mubr.f32.mxu0 %v25436_v42  ;;  %v31032_v42 = vld [vmem:[#allocation12_spill] sm:$0xff]  ;;  %v31063_v13 = vand.u32 4294901760, %v31018_v39  ;;  %v31070_v39 = vand.u32 4294901760, %v31023_v45  ;;  %v31077_v45 = vand.u32 4294901760, %v31027_v53  ;;  %v31085_v53 = vld [vmem:[#allocation153_spill] sm:$0xff] }
 0x37d   :  { %18556 = vmatmul.mubr.f32.gmra.mrb[94].mxu1 %v31028_v22 }
 0x37e   :  { %19248 = vmatmul.mubr.f32.gmra.mrb[86].mxu0 %v25442_v6  ;;  %18574 = vmatprep.mubr.f32.mxu1 %v31029_v51  ;;  %v31033_v6 = vand.u32 4294901760, %v30990_v62  ;;  %v31034_v51 = vand.u32 4294901760, %v30991_v10  ;;  %v31038_v62 = vand.u32 4294901760, %v30995_v56  ;;  %v31044_v56 = vld [vmem:[#allocation22_spill] sm:$0xff]  ;;  %v31045_v10 = vld [vmem:[#allocation123_spill] sm:$0xff] }
 0x37f   :  { %19250 = vmatprep.mubr.f32.mxu0 %v25459_v23 }
 0x381   :  { %18575 = vmatmul.mubr.f32.vlgmr.msra.gmra.mrb[64].mxu1 %v31030_v63  ;;  %v31036_v63 = vand.u32 4294901760, %v30993_v2  ;;  %v31047_v2 = vand.u32 4294901760, %v31001_v38  ;;  %v31052_v38 = vld [vmem:[#allocation129_spill] sm:$0xff] }
 0x382   :  { %20689 = vmatpush3.bf16.xpose.msra.mxu1 %v31007_v40  ;;  %19251 = vmatmul.mubr.f32.gmra.mrb[88].mxu0 %v25475_v9  ;;  %v31035_v40 = vand.u32 4294901760, %v30992_v28  ;;  %v31046_v28 = vld [vmem:[#allocation60_spill] sm:$0xff] }
 0x383   :  { %18577 = vmatprep.mubr.f32.mxu1 %v31031_v36  ;;  %20691 = vmatprep.subr.bf16.mxu1 %v31032_v42  ;;  %v31037_v36 = vld [vmem:[#allocation15_spill] sm:$0xff] }
 0x384   :  { %19253 = vmatprep.mubr.f32.mxu0 %v25487_v16 }
 0x385   :  { %18578 = vmatmul.mubr.f32.gmra.mrb[66].mxu1 %v31033_v6  ;;  %v31039_v6 = vand.u32 4294901760, %v30996_v12  ;;  %v31048_v12 = vld [vmem:[#allocation124_spill] sm:$0xff] }
 0x386   :  { %19254 = vmatmul.mubr.f32.gmra.mrb[90].mxu0 %v25495_v60  ;;  %18580 = vmatprep.mubr.f32.mxu1 %v31034_v51  ;;  %v31050_v51 = vand.u32 4294901760, %v31004_v11  ;;  %v31055_v11 = vld [vmem:[#allocation131_spill] sm:$0xff] }
 0x387   :  { %19256 = vmatprep.mubr.f32.mxu0 %v25500_v25 }
 0x389   :  { %18581 = vmatmul.mubr.f32.gmra.mrb[68].mxu1 %v31035_v40  ;;  %v31054_v40 = vand.u32 4294901760, %v31010_v30  ;;  %v31059_v30 = vld [vmem:[#allocation118_spill] sm:$0xff] }
 0x38a   :  { %20693 = vmatpush3.bf16.xpose.msra.mxu1 %v31032_v42  ;;  %19257 = vmatmul.mubr.f32.gmra.mrb[92].mxu0 %v25519_v21  ;;  %v31041_v42 = vand.u32 4294901760, %v30997_v41  ;;  %v31049_v41 = vand.u32 4294901760, %v31002_v32  ;;  %v31053_v32 = vld [vmem:[#allocation109_spill] sm:$0xff] }
 0x38b   :  { %18583 = vmatprep.mubr.f32.mxu1 %v31036_v63  ;;  %20695 = vmatprep.subr.bf16.mxu1 %v31037_v36  ;;  %v31056_v63 = vand.u32 4294901760, %v31011_v20  ;;  %v31061_v20 = vand.u32 4294901760, %v31016_v35  ;;  %v31066_v35 = vld [vmem:[#allocation139_spill] sm:$0xff] }
 0x38c   :  { %19259 = vmatprep.mubr.f32.mxu0 %v25530_v8 }
 0x38d   :  { %18584 = vmatmul.mubr.f32.gmra.mrb[70].mxu1 %v31038_v62  ;;  %v31060_v62 = vand.u32 4294901760, %v31015_v15  ;;  %v31064_v15 = vld [vmem:[#allocation67_spill] sm:$0xff] }
 0x38e   :  { %19260 = vmatmul.mubr.f32.gmra.mrb[94].mxu0 %v25537_v55  ;;  %18586 = vmatprep.mubr.f32.mxu1 %v31039_v6  ;;  %v31065_v6 = vand.u32 4294901760, %v31020_v24  ;;  %v31072_v24 = vand.u32 4294901760, %v31024_v37  ;;  %v31078_v37 = vand.u32 4294901760, %v31028_v22  ;;  %v31086_v22 = vld [vmem:[#allocation29_spill] sm:$0xff] }
 0x38f   :  { %19278 = vmatprep.mubr.f32.mxu0 %v31040_v52 }
 0x391   :  { %18587 = vmatmul.mubr.f32.gmra.mrb[72].mxu1 %v31041_v42  ;;  %v31067_v42 = vand.u32 4294901760, %v31021_v58  ;;  %v31074_v58 = vand.u32 4294901760, %v31025_v19  ;;  %v31081_v19 = vld [vmem:[#allocation151_spill] sm:$0xff] }
 0x392   :  { %20697 = vmatpush3.bf16.xpose.msra.mxu1 %v31037_v36  ;;  %19279 = vmatmul.mubr.f32.vlgmr.msra.gmra.mrb[64].mxu0 %v31042_v1  ;;  %v31057_v36 = vand.u32 4294901760, %v31012_v7  ;;  %v31062_v7 = vand.u32 4294901760, %v31017_v48  ;;  %v31068_v48 = vld [vmem:[#allocation140_spill] sm:$0xff] }
 0x393   :  { %20865 = vmatpush3.bf16.xpose.msra.mxu0 %v31019_v29  ;;  %18589 = vmatprep.mubr.f32.mxu1 %v31043_v46  ;;  %v31069_v46 = vand.u32 4294901760, %v31022_v18  ;;  %v31076_v18 = vand.u32 4294901760, %v31026_v50  ;;  %v31083_v50 = vld [vmem:[#allocation152_spill] sm:$0xff] }
 0x394   :  { %20699 = vmatprep.subr.bf16.mxu1 %v31044_v56  ;;  %19281 = vmatprep.mubr.f32.mxu0 %v31045_v10 }
 0x395   :  { %20867 = vmatprep.subr.bf16.mxu0 %v31046_v28  ;;  %18590 = vmatmul.mubr.f32.gmra.mrb[74].mxu1 %v31047_v2  ;;  %v31073_v2 = vld [vmem:[#allocation145_spill] sm:$0xff] }
 0x396   :  { %19282 = vmatmul.mubr.f32.gmra.mrb[66].mxu0 %v31048_v12  ;;  %18592 = vmatprep.mubr.f32.mxu1 %v31049_v41  ;;  %v31075_v41 = vld [vmem:[#allocation146_spill] sm:$0xff] }
 0x397   :  { %19284 = vmatprep.mubr.f32.mxu0 %v25232_v5 }
 0x399   :  { %18593 = vmatmul.mubr.f32.gmra.mrb[76].mxu1 %v31050_v51  ;;  %v31079_v51 = vld [vmem:[#allocation150_spill] sm:$0xff] }
 0x39a   :  { %20701 = vmatpush3.bf16.xpose.msra.mxu1 %v31044_v56  ;;  %19285 = vmatmul.mubr.f32.gmra.mrb[68].mxu0 %v25243_v3  ;;  %v31071_v56 = vld [vmem:[#allocation144_spill] sm:$0xff] }
 0x39b   :  { %20869 = vmatpush3.bf16.xpose.msra.mxu0 %v31046_v28  ;;  %18595 = vmatprep.mubr.f32.mxu1 %v31051_v59  ;;  %v31080_v59 = vld [vmem:[#allocation11_spill] sm:$0xff] }
 0x39c   :  { %20703 = vmatprep.subr.bf16.mxu1 %v24633_v57  ;;  %19287 = vmatprep.mubr.f32.mxu0 %v31052_v38 }
 0x39d   :  { %20871 = vmatprep.subr.bf16.mxu0 %v31053_v32  ;;  %18596 = vmatmul.mubr.f32.gmra.mrb[78].mxu1 %v31054_v40  ;;  %v31082_v40 = vld [vmem:[#allocation17_spill] sm:$0xff] }
 0x39e   :  { %19288 = vmatmul.mubr.f32.gmra.mrb[70].mxu0 %v31055_v11  ;;  %18598 = vmatprep.mubr.f32.mxu1 %v31056_v63  ;;  %v31084_v63 = vld [vmem:[#allocation19_spill] sm:$0xff] }
 0x39f   :  { %19290 = vmatprep.mubr.f32.mxu0 %v25284_v47 }
 0x3a1   :  { %18599 = vmatmul.mubr.f32.gmra.mrb[80].mxu1 %v31057_v36  ;;  %v31087_v36 = vld [vmem:[#allocation154_spill] sm:$0xff] }
 0x3a2   :  { %19291 = vmatmul.mubr.f32.gmra.mrb[72].mxu0 %v25301_v14  ;;  %18601 = vmatprep.mubr.f32.mxu1 %v31058_v49  ;;  %v31088_v49 = vld [vmem:[#allocation31_spill] sm:$0xff] }
 0x3a3   :  { %20873 = vmatpush3.bf16.xpose.msra.mxu0 %v31053_v32  ;;  %19293 = vmatprep.mubr.f32.mxu0 %v25309_v4 }
 0x3a4   :  { %20875 = vmatprep.subr.bf16.mxu0 %v31059_v30 }
 0x3a5   :  { %18602 = vmatmul.mubr.f32.gmra.mrb[82].mxu1 %v31060_v62  ;;  %v31089_v62 = vld [vmem:[#allocation155_spill] sm:$0xff] }
 0x3a6   :  { %19294 = vmatmul.mubr.f32.gmra.mrb[74].mxu0 %v25328_v17  ;;  %18604 = vmatprep.mubr.f32.mxu1 %v31061_v20  ;;  %v31090_v20 = vld [vmem:[#allocation33_spill] sm:$0xff] }
 0x3a7   :  { %19296 = vmatprep.mubr.f32.mxu0 %v25336_v27 }
 0x3a9   :  { %18605 = vmatmul.mubr.f32.gmra.mrb[84].mxu1 %v31062_v7  ;;  %v31092_v7 = vld [vmem:[#allocation39_spill] sm:$0xff] }
 0x3aa   :  { %19297 = vmatmul.mubr.f32.gmra.mrb[76].mxu0 %v25353_v61  ;;  %18607 = vmatprep.mubr.f32.mxu1 %v31063_v13  ;;  %v31093_v13 = vld [vmem:[#allocation43_spill] sm:$0xff] }
 0x3ab   :  { %20877 = vmatpush3.bf16.xpose.msra.mxu0 %v31059_v30  ;;  %19299 = vmatprep.mubr.f32.mxu0 %v25369_v34 }
 0x3ac   :  { %20879 = vmatprep.subr.bf16.mxu0 %v31064_v15 }
 0x3ad   :  { %18608 = vmatmul.mubr.f32.gmra.mrb[86].mxu1 %v31065_v6  ;;  %v31094_v6 = vld [vmem:[#allocation13_spill] sm:$0xff] }
 0x3ae   :  { %19300 = vmatmul.mubr.f32.gmra.mrb[78].mxu0 %v31066_v35  ;;  %18610 = vmatprep.mubr.f32.mxu1 %v31067_v42  ;;  %v31095_v42 = vld [vmem:[#allocation45_spill] sm:$0xff] }
 0x3af   :  { %19302 = vmatprep.mubr.f32.mxu0 %v31068_v48 }
 0x3b1   :  { %18611 = vmatmul.mubr.f32.gmra.mrb[88].mxu1 %v31069_v46  ;;  %v31096_v46 = vand.u32 4294901760, %v31040_v52  ;;  %v31103_v52 = vld [vmem:[#allocation61_spill] sm:$0xff] }
 0x3b2   :  { %19303 = vmatmul.mubr.f32.gmra.mrb[80].mxu0 %v25406_v33  ;;  %18613 = vmatprep.mubr.f32.mxu1 %v31070_v39  ;;  %v31097_v39 = vld [vmem:[#allocation54_spill] sm:$0xff] }
 0x3b3   :  { %19305 = vmatprep.mubr.f32.mxu0 %v31071_v56 }
 0x3b5   :  { %18614 = vmatmul.mubr.f32.gmra.mrb[90].mxu1 %v31072_v24  ;;  %v31099_v24 = vld [vmem:[#allocation55_spill] sm:$0xff] }
 0x3b6   :  { %19306 = vmatmul.mubr.f32.gmra.mrb[82].mxu0 %v31073_v2  ;;  %18616 = vmatprep.mubr.f32.mxu1 %v31074_v58  ;;  %v31100_v58 = vld [vmem:[#allocation23_spill] sm:$0xff] }
 0x3b7   :  { %19308 = vmatprep.mubr.f32.mxu0 %v31075_v41 }
 0x3b9   :  { %18617 = vmatmul.mubr.f32.gmra.mrb[92].mxu1 %v31076_v18  ;;  %v31101_v18 = vand.u32 4294901760, %v31045_v10  ;;  %v31109_v10 = vld [vmem:[#allocation70_spill] sm:$0xff] }
 0x3ba   :  { %19309 = vmatmul.mubr.f32.gmra.mrb[84].mxu0 %v25450_v26  ;;  %18619 = vmatprep.mubr.f32.mxu1 %v31077_v45  ;;  %v31102_v45 = vld [vmem:[#allocation112_spill] sm:$0xff] }
 0x3bb   :  { %19311 = vmatprep.mubr.f32.mxu0 %v25457_v54 }
 0x3bd   :  { %18620 = vmatmul.mubr.f32.gmra.mrb[94].mxu1 %v31078_v37  ;;  %v31104_v37 = vand.u32 4294901760, %v31048_v12  ;;  %v31111_v12 = vand.u32 4294901760, %v31052_v38  ;;  %v31120_v38 = vand.u32 4294901760, %v25309_v4  ;;  %v31129_v4 = vand.u32 4294901760, %v25369_v34 }
 0x3be   :  { %19312 = vmatmul.mubr.f32.gmra.mrb[86].mxu0 %v31079_v51  ;;  %18638 = vmatprep.mubr.f32.mxu1 %v31080_v59  ;;  %v31137_v34 = vand.u32 4294901760, %v31071_v56  ;;  %v31145_v56 = vand.u32 4294901760, %v25457_v54  ;;  %v31150_v54 = vld [vmem:[#allocation30_spill] sm:$0xff] }
 0x3bf   :  { %19314 = vmatprep.mubr.f32.mxu0 %v31081_v19 }
 0x3c1   :  { %18639 = vmatmul.mubr.f32.vlgmr.msra.gmra.mrb[64].mxu1 %v31082_v40 }
 0x3c2   :  { %20705 = vmatpush3.bf16.xpose.msra.mxu1 %v24633_v57  ;;  %19315 = vmatmul.mubr.f32.gmra.mrb[88].mxu0 %v31083_v50  ;;  %v31091_v57 = vld [vmem:[#allocation156_spill] sm:$0xff] }
 0x3c3   :  { %18641 = vmatprep.mubr.f32.mxu1 %v31084_v63  ;;  %20707 = vmatprep.subr.bf16.mxu1 %v30989_v31 }
 0x3c4   :  { %19317 = vmatprep.mubr.f32.mxu0 %v31085_v53 }
 0x3c5   :  { %18642 = vmatmul.mubr.f32.gmra.mrb[66].mxu1 %v31086_v22 }
 0x3c6   :  { %19318 = vmatmul.mubr.f32.gmra.mrb[90].mxu0 %v31087_v36  ;;  %18644 = vmatprep.mubr.f32.mxu1 %v31088_v49 }
 0x3c7   :  { %19320 = vmatprep.mubr.f32.mxu0 %v31089_v62 }
 0x3c9   :  { %18645 = vmatmul.mubr.f32.gmra.mrb[68].mxu1 %v31090_v20 }
 0x3ca   :  { %20709 = vmatpush3.bf16.xpose.msra.mxu1 %v30989_v31  ;;  %19321 = vmatmul.mubr.f32.gmra.mrb[92].mxu0 %v31091_v57  ;;  %v31098_v31 = vand.u32 4294901760, %v31042_v1  ;;  %v31106_v1 = vand.u32 4294901760, %v25232_v5  ;;  %v31113_v5 = vld [vmem:[#allocation73_spill] sm:$0xff] }
 0x3cb   :  { %18647 = vmatprep.mubr.f32.mxu1 %v31092_v7  ;;  %20711 = vmatprep.subr.bf16.mxu1 %v30994_v43 }
 0x3cc   :  { %19323 = vmatprep.mubr.f32.mxu0 %v25546_v0 }
 0x3cd   :  { %18648 = vmatmul.mubr.f32.gmra.mrb[70].mxu1 %v31093_v13 }
 0x3ce   :  { %19324 = vmatmul.mubr.f32.gmra.mrb[94].mxu0 %v31094_v6  ;;  %18650 = vmatprep.mubr.f32.mxu1 %v31095_v42 }
 0x3cf   :  { %19342 = vmatprep.mubr.f32.mxu0 %v31096_v46  ;;  %v31108_v46 = vand.u32 4294901760, %v25243_v3  ;;  %v31116_v3 = vand.u32 4294901760, %v25284_v47  ;;  %v31124_v47 = vld [vmem:[#allocation90_spill] sm:$0xff] }
 0x3d1   :  { %18651 = vmatmul.mubr.f32.gmra.mrb[72].mxu1 %v31097_v39 }
 0x3d2   :  { %20713 = vmatpush3.bf16.xpose.msra.mxu1 %v30994_v43  ;;  %19343 = vmatmul.mubr.f32.vlgmr.msra.gmra.mrb[64].mxu0 %v31098_v31  ;;  %v31105_v43 = vld [vmem:[#allocation63_spill] sm:$0xff]  ;;  %v31110_v31 = vld [vmem:[#allocation24_spill] sm:$0xff] }
 0x3d3   :  { %20881 = vmatpush3.bf16.xpose.msra.mxu0 %v31064_v15  ;;  %18653 = vmatprep.mubr.f32.mxu1 %v31099_v24  ;;  %v31107_v15 = vld [vmem:[#allocation69_spill] sm:$0xff] }
 0x3d4   :  { %20715 = vmatprep.subr.bf16.mxu1 %v31100_v58  ;;  %19345 = vmatprep.mubr.f32.mxu0 %v31101_v18  ;;  %v31112_v18 = vld [vmem:[#allocation115_spill] sm:$0xff] }
 0x3d5   :  { %20883 = vmatprep.subr.bf16.mxu0 %v31102_v45  ;;  %18654 = vmatmul.mubr.f32.gmra.mrb[74].mxu1 %v31103_v52 }
 0x3d6   :  { %19346 = vmatmul.mubr.f32.gmra.mrb[66].mxu0 %v31104_v37  ;;  %18656 = vmatprep.mubr.f32.mxu1 %v31105_v43  ;;  %v31114_v37 = vand.u32 4294901760, %v31055_v11  ;;  %v31122_v11 = vld [vmem:[#allocation89_spill] sm:$0xff] }
 0x3d7   :  { %19348 = vmatprep.mubr.f32.mxu0 %v31106_v1  ;;  %v31118_v1 = vand.u32 4294901760, %v25301_v14  ;;  %v31126_v14 = vld [vmem:[#allocation94_spill] sm:$0xff] }
 0x3d9   :  { %18657 = vmatmul.mubr.f32.gmra.mrb[76].mxu1 %v31107_v15 }
 0x3da   :  { %20717 = vmatpush3.bf16.xpose.msra.mxu1 %v31100_v58  ;;  %19349 = vmatmul.mubr.f32.gmra.mrb[68].mxu0 %v31108_v46  ;;  %v31115_v58 = vld [vmem:[#allocation76_spill] sm:$0xff]  ;;  %v31119_v46 = vld [vmem:[#allocation82_spill] sm:$0xff] }
 0x3db   :  { %20885 = vmatpush3.bf16.xpose.msra.mxu0 %v31102_v45  ;;  %18659 = vmatprep.mubr.f32.mxu1 %v31109_v10  ;;  %v31117_v45 = vld [vmem:[#allocation80_spill] sm:$0xff] }
 0x3dc   :  { %20719 = vmatprep.subr.bf16.mxu1 %v31110_v31  ;;  %19351 = vmatprep.mubr.f32.mxu0 %v31111_v12  ;;  %v31121_v12 = vld [vmem:[#allocation117_spill] sm:$0xff] }
 0x3dd   :  { %20887 = vmatprep.subr.bf16.mxu0 %v31112_v18  ;;  %18660 = vmatmul.mubr.f32.gmra.mrb[78].mxu1 %v31113_v5 }
 0x3de   :  { %19352 = vmatmul.mubr.f32.gmra.mrb[70].mxu0 %v31114_v37  ;;  %18662 = vmatprep.mubr.f32.mxu1 %v31115_v58  ;;  %v31123_v37 = vand.u32 4294901760, %v25328_v17  ;;  %v31130_v17 = vld [vmem:[#allocation96_spill] sm:$0xff] }
 0x3df   :  { %19354 = vmatprep.mubr.f32.mxu0 %v31116_v3  ;;  %v31125_v3 = vand.u32 4294901760, %v25336_v27  ;;  %v31132_v27 = vld [vmem:[#allocation101_spill] sm:$0xff] }
 0x3e1   :  { %18663 = vmatmul.mubr.f32.gmra.mrb[80].mxu1 %v31117_v45 }
 0x3e2   :  { %19355 = vmatmul.mubr.f32.gmra.mrb[72].mxu0 %v31118_v1  ;;  %18665 = vmatprep.mubr.f32.mxu1 %v31119_v46  ;;  %v31127_v1 = vand.u32 4294901760, %v25353_v61  ;;  %v31134_v61 = vld [vmem:[#allocation98_spill] sm:$0xff] }
 0x3e3   :  { %20889 = vmatpush3.bf16.xpose.msra.mxu0 %v31112_v18  ;;  %19357 = vmatprep.mubr.f32.mxu0 %v31120_v38  ;;  %v31128_v18 = vld [vmem:[#allocation95_spill] sm:$0xff]  ;;  %v31131_v38 = vand.u32 4294901760, %v31066_v35  ;;  %v31139_v35 = vand.u32 4294901760, %v31073_v2  ;;  %v31147_v2 = vand.u32 4294901760, %v31079_v51  ;;  %v31152_v51 = vand.u32 4294901760, %v31087_v36  ;;  %v31160_v36 = vld [vmem:[#allocation110_spill] sm:$0xff] }
 0x3e4   :  { %20891 = vmatprep.subr.bf16.mxu0 %v31121_v12 }
 0x3e5   :  { %18666 = vmatmul.mubr.f32.gmra.mrb[82].mxu1 %v31122_v11 }
 0x3e6   :  { %19358 = vmatmul.mubr.f32.gmra.mrb[74].mxu0 %v31123_v37  ;;  %18668 = vmatprep.mubr.f32.mxu1 %v31124_v47  ;;  %v31133_v37 = vand.u32 4294901760, %v31068_v48  ;;  %v31141_v48 = vand.u32 4294901760, %v31075_v41  ;;  %v31148_v41 = vand.u32 4294901760, %v31081_v19  ;;  %v31154_v19 = vand.u32 4294901760, %v31089_v62  ;;  %v31163_v62 = vld [vmem:[#allocation120_spill] sm:$0xff] }
 0x3e7   :  { %19360 = vmatprep.mubr.f32.mxu0 %v31125_v3  ;;  %v31135_v3 = vand.u32 4294901760, %v25406_v33  ;;  %v31143_v33 = vand.u32 4294901760, %v25450_v26  ;;  %v31149_v26 = vand.u32 4294901760, %v31083_v50  ;;  %v31156_v50 = vld [vmem:[#allocation36_spill] sm:$0xff] }
 0x3e9   :  { %18669 = vmatmul.mubr.f32.gmra.mrb[84].mxu1 %v31126_v14 }
 0x3ea   :  { %19361 = vmatmul.mubr.f32.gmra.mrb[76].mxu0 %v31127_v1  ;;  %18671 = vmatprep.mubr.f32.mxu1 %v31128_v18  ;;  %v31138_v1 = vld [vmem:[#allocation107_spill] sm:$0xff] }
 0x3eb   :  { %20893 = vmatpush3.bf16.xpose.msra.mxu0 %v31121_v12  ;;  %19363 = vmatprep.mubr.f32.mxu0 %v31129_v4  ;;  %v31136_v12 = vld [vmem:[#allocation105_spill] sm:$0xff]  ;;  %v31140_v4 = vld [vmem:[#allocation104_spill] sm:$0xff] }
 0x3ec   :  { %20895 = vmatprep.subr.bf16.mxu0 %v31019_v29 }
 0x3ed   :  { %18672 = vmatmul.mubr.f32.gmra.mrb[86].mxu1 %v31130_v17 }
 0x3ee   :  { %19364 = vmatmul.mubr.f32.gmra.mrb[78].mxu0 %v31131_v38  ;;  %18674 = vmatprep.mubr.f32.mxu1 %v31132_v27  ;;  %v31142_v38 = vld [vmem:[#allocation18_spill] sm:$0xff] }
 0x3ef   :  { %19366 = vmatprep.mubr.f32.mxu0 %v31133_v37  ;;  %v31144_v37 = vld [vmem:[#allocation16_spill] sm:$0xff] }
 0x3f1   :  { %18675 = vmatmul.mubr.f32.gmra.mrb[88].mxu1 %v31134_v61 }
 0x3f2   :  { %19367 = vmatmul.mubr.f32.gmra.mrb[80].mxu0 %v31135_v3  ;;  %18677 = vmatprep.mubr.f32.mxu1 %v31136_v12  ;;  %v31146_v3 = vld [vmem:[#allocation27_spill] sm:$0xff] }
 0x3f3   :  { %19369 = vmatprep.mubr.f32.mxu0 %v31137_v34  ;;  %v31151_v34 = vand.u32 4294901760, %v31085_v53  ;;  %v31158_v53 = vand.u32 4294901760, %v31094_v6  ;;  %v31169_v6 = vld [vmem:[#allocation130_spill] sm:$0xff] }
 0x3f5   :  { %18678 = vmatmul.mubr.f32.gmra.mrb[90].mxu1 %v31138_v1 }
 0x3f6   :  { %19370 = vmatmul.mubr.f32.gmra.mrb[82].mxu0 %v31139_v35  ;;  %18680 = vmatprep.mubr.f32.mxu1 %v31140_v4 }
 0x3f7   :  { %19372 = vmatprep.mubr.f32.mxu0 %v31141_v48 }
 0x3f9   :  { %18681 = vmatmul.mubr.f32.gmra.mrb[92].mxu1 %v31142_v38 }
 0x3fa   :  { %19373 = vmatmul.mubr.f32.gmra.mrb[84].mxu0 %v31143_v33  ;;  %18683 = vmatprep.mubr.f32.mxu1 %v31144_v37 }
 0x3fb   :  { %19375 = vmatprep.mubr.f32.mxu0 %v31145_v56 }
 0x3fd   :  { %18684 = vmatmul.mubr.f32.gmra.mrb[94].mxu1 %v31146_v3 }
 0x3fe   :  { %19376 = vmatmul.mubr.f32.gmra.mrb[86].mxu0 %v31147_v2  ;;  %18702 = vmatprep.mubr.f32.mxu1 %v31080_v59  ;;  %v31153_v59 = vld [vmem:[#allocation32_spill] sm:$0xff] }
 0x3ff   :  { %19378 = vmatprep.mubr.f32.mxu0 %v31148_v41 }
 0x401   :  { %18703 = vmatmul.mubr.f32.vlgmr.msra.gmra.mrb[64].mxu1 %v31082_v40  ;;  %v31155_v40 = vand.u32 4294901760, %v31091_v57  ;;  %v31165_v57 = vld [vmem:[#allocation125_spill] sm:$0xff] }
 0x402   :  { %20721 = vmatpush3.bf16.msra.mxu1 %v31110_v31  ;;  %19379 = vmatmul.mubr.f32.gmra.mrb[88].mxu0 %v31149_v26 }
 0x403   :  { %18705 = vmatprep.mubr.f32.mxu1 %v31084_v63  ;;  %20723 = vmatprep.subr.bf16.mxu1 %v31150_v54  ;;  %v31157_v63 = vand.u32 4294901760, %v25546_v0  ;;  %v31162_v0 = vld [vmem:[#allocation119_spill] sm:$0xff] }
 0x404   :  { %19381 = vmatprep.mubr.f32.mxu0 %v31151_v34 }
 0x405   :  { %18706 = vmatmul.mubr.f32.gmra.mrb[66].mxu1 %v31086_v22  ;;  %v31159_v22 = vld [vmem:[#allocation34_spill] sm:$0xff] }
 0x406   :  { %20725 = vmatpush3.bf16.msra.mxu1 %v31150_v54  ;;  %19382 = vmatmul.mubr.f32.gmra.mrb[90].mxu0 %v31152_v51 }
 0x407   :  { %18708 = vmatprep.mubr.f32.mxu1 %v31088_v49  ;;  %20727 = vmatprep.subr.bf16.mxu1 %v31153_v59  ;;  %v31161_v49 = vld [vmem:[#allocation116_spill] sm:$0xff] }
 0x408   :  { %19384 = vmatprep.mubr.f32.mxu0 %v31154_v19 }
 0x409   :  { %18709 = vmatmul.mubr.f32.gmra.mrb[68].mxu1 %v31090_v20  ;;  %v31164_v20 = vld [vmem:[#allocation122_spill] sm:$0xff] }
 0x40a   :  { %20729 = vmatpush3.bf16.msra.mxu1 %v31153_v59  ;;  %19385 = vmatmul.mubr.f32.gmra.mrb[92].mxu0 %v31155_v40 }
 0x40b   :  { %18711 = vmatprep.mubr.f32.mxu1 %v31092_v7  ;;  %20731 = vmatprep.subr.bf16.mxu1 %v31156_v50  ;;  %v31167_v7 = vld [vmem:[#allocation127_spill] sm:$0xff] }
 0x40c   :  { %19387 = vmatprep.mubr.f32.mxu0 %v31157_v63 }
 0x40d   :  { %18712 = vmatmul.mubr.f32.gmra.mrb[70].mxu1 %v31093_v13  ;;  %v31168_v13 = vld [vmem:[#allocation128_spill] sm:$0xff] }
 0x40e   :  { %20733 = vmatpush3.bf16.msra.mxu1 %v31156_v50  ;;  %19388 = vmatmul.mubr.f32.gmra.mrb[94].mxu0 %v31158_v53 }
 0x40f   :  { %18714 = vmatprep.mubr.f32.mxu1 %v31095_v42  ;;  %20735 = vmatprep.subr.bf16.mxu1 %v31159_v22  ;;  %v31171_v42 = vld [vmem:[#allocation133_spill] sm:$0xff] }
 0x410   :  { %19406 = vmatprep.mubr.f32.mxu0 %v31160_v36 }
 0x411   :  { %18715 = vmatmul.mubr.f32.gmra.mrb[72].mxu1 %v31097_v39  ;;  %v31172_v39 = vld [vmem:[#allocation134_spill] sm:$0xff] }
 0x412   :  { %19407 = vmatmul.mubr.f32.vlgmr.msra.gmra.mrb[64].mxu0 %v31161_v49  ;;  %18717 = vmatprep.mubr.f32.mxu1 %v31099_v24  ;;  %v31173_v24 = vld [vmem:[#allocation135_spill] sm:$0xff] }
 0x413   :  { %20897 = vmatpush3.bf16.xpose.msra.mxu0 %v31019_v29  ;;  %19409 = vmatprep.mubr.f32.mxu0 %v31162_v0  ;;  %v31166_v29 = vld [vmem:[#allocation126_spill] sm:$0xff] }
 0x414   :  { %20899 = vmatprep.subr.bf16.mxu0 %v31046_v28 }
 0x415   :  { %18718 = vmatmul.mubr.f32.gmra.mrb[74].mxu1 %v31103_v52  ;;  %v31175_v52 = vld [vmem:[#allocation137_spill] sm:$0xff] }
 0x416   :  { %19410 = vmatmul.mubr.f32.gmra.mrb[66].mxu0 %v31163_v62  ;;  %18720 = vmatprep.mubr.f32.mxu1 %v31105_v43  ;;  %v31176_v43 = vld [vmem:[#allocation138_spill] sm:$0xff] }
 0x417   :  { %19412 = vmatprep.mubr.f32.mxu0 %v31164_v20 }
 0x419   :  { %18721 = vmatmul.mubr.f32.gmra.mrb[76].mxu1 %v31107_v15  ;;  %v31177_v15 = vld [vmem:[#allocation141_spill] sm:$0xff] }
 0x41a   :  { %19413 = vmatmul.mubr.f32.gmra.mrb[68].mxu0 %v31165_v57  ;;  %18723 = vmatprep.mubr.f32.mxu1 %v31109_v10  ;;  %v31178_v10 = vld [vmem:[#allocation142_spill] sm:$0xff] }
 0x41b   :  { %20901 = vmatpush3.bf16.xpose.msra.mxu0 %v31046_v28  ;;  %19415 = vmatprep.mubr.f32.mxu0 %v31166_v29  ;;  %v31170_v28 = vld [vmem:[#allocation132_spill] sm:$0xff] }
 0x41c   :  { %20903 = vmatprep.subr.bf16.mxu0 %v31053_v32 }
 0x41d   :  { %18724 = vmatmul.mubr.f32.gmra.mrb[78].mxu1 %v31113_v5  ;;  %v31180_v5 = vld [vmem:[#allocation147_spill] sm:$0xff] }
 0x41e   :  { %19416 = vmatmul.mubr.f32.gmra.mrb[70].mxu0 %v31167_v7  ;;  %18726 = vmatprep.mubr.f32.mxu1 %v31115_v58  ;;  %v31181_v58 = vld [vmem:[#allocation148_spill] sm:$0xff] }
 0x41f   :  { %19418 = vmatprep.mubr.f32.mxu0 %v31168_v13 }
 0x421   :  { %18727 = vmatmul.mubr.f32.gmra.mrb[80].mxu1 %v31117_v45  ;;  %v31182_v45 = vld [vmem:[#allocation149_spill] sm:$0xff] }
 0x422   :  { %19419 = vmatmul.mubr.f32.gmra.mrb[72].mxu0 %v31169_v6  ;;  %18729 = vmatprep.mubr.f32.mxu1 %v31119_v46 }
 0x423   :  { %20905 = vmatpush3.bf16.xpose.msra.mxu0 %v31053_v32  ;;  %19421 = vmatprep.mubr.f32.mxu0 %v31170_v28  ;;  %v31174_v32 = vld [vmem:[#allocation136_spill] sm:$0xff] }
 0x424   :  { %20907 = vmatprep.subr.bf16.mxu0 %v31059_v30 }
 0x425   :  { %18730 = vmatmul.mubr.f32.gmra.mrb[82].mxu1 %v31122_v11 }
 0x426   :  { %19422 = vmatmul.mubr.f32.gmra.mrb[74].mxu0 %v31171_v42  ;;  %18732 = vmatprep.mubr.f32.mxu1 %v31124_v47 }
 0x427   :  { %19424 = vmatprep.mubr.f32.mxu0 %v31172_v39 }
 0x429   :  { %18733 = vmatmul.mubr.f32.gmra.mrb[84].mxu1 %v31126_v14 }
 0x42a   :  { %19425 = vmatmul.mubr.f32.gmra.mrb[76].mxu0 %v31173_v24  ;;  %18735 = vmatprep.mubr.f32.mxu1 %v31128_v18 }
 0x42b   :  { %20909 = vmatpush3.bf16.xpose.msra.mxu0 %v31059_v30  ;;  %19427 = vmatprep.mubr.f32.mxu0 %v31174_v32  ;;  %v31179_v30 = vld [vmem:[#allocation143_spill] sm:$0xff] }
 0x42d   :  { %18736 = vmatmul.mubr.f32.gmra.mrb[86].mxu1 %v31130_v17 }
 0x42e   :  { %19428 = vmatmul.mubr.f32.gmra.mrb[78].mxu0 %v31175_v52  ;;  %18738 = vmatprep.mubr.f32.mxu1 %v31132_v27 }
 0x42f   :  { %19430 = vmatprep.mubr.f32.mxu0 %v31176_v43 }
 0x431   :  { %18739 = vmatmul.mubr.f32.gmra.mrb[88].mxu1 %v31134_v61 }
 0x432   :  { %19431 = vmatmul.mubr.f32.gmra.mrb[80].mxu0 %v31177_v15  ;;  %18741 = vmatprep.mubr.f32.mxu1 %v31136_v12 }
 0x433   :  { %19433 = vmatprep.mubr.f32.mxu0 %v31178_v10 }
 0x435   :  { %18742 = vmatmul.mubr.f32.gmra.mrb[90].mxu1 %v31138_v1 }
 0x436   :  { %19434 = vmatmul.mubr.f32.gmra.mrb[82].mxu0 %v31179_v30  ;;  %18744 = vmatprep.mubr.f32.mxu1 %v31140_v4 }
 0x437   :  { %19436 = vmatprep.mubr.f32.mxu0 %v25408_v44 }
 0x439   :  { %18745 = vmatmul.mubr.f32.gmra.mrb[92].mxu1 %v31142_v38 }
 0x43a   :  { %19437 = vmatmul.mubr.f32.gmra.mrb[84].mxu0 %v31180_v5  ;;  %18747 = vmatprep.mubr.f32.mxu1 %v31144_v37 }
 0x43b   :  { %19439 = vmatprep.mubr.f32.mxu0 %v31181_v58 }
 0x43d   :  { %18748 = vmatmul.mubr.f32.gmra.mrb[94].mxu1 %v31146_v3 }
 0x43e   :  { %19440 = vmatmul.mubr.f32.gmra.mrb[86].mxu0 %v31182_v45 }
 0x43f   :  { %19442 = vmatprep.mubr.f32.mxu0 %v25459_v23 }
 0x442   :  { %19443 = vmatmul.mubr.f32.gmra.mrb[88].mxu0 %v25475_v9 }
 0x443   :  { %19445 = vmatprep.mubr.f32.mxu0 %v25487_v16 }
 0x446   :  { %19446 = vmatmul.mubr.f32.gmra.mrb[90].mxu0 %v25495_v60 }
 0x447   :  { %19448 = vmatprep.mubr.f32.mxu0 %v25500_v25 }
 0x44a   :  { %19449 = vmatmul.mubr.f32.gmra.mrb[92].mxu0 %v25519_v21 }
 0x44b   :  { %19451 = vmatprep.mubr.f32.mxu0 %v25530_v8 }
 0x44e   :  { %19452 = vmatmul.mubr.f32.gmra.mrb[94].mxu0 %v25537_v55 }
 0x44f   :  { %19470 = vmatprep.mubr.f32.mxu0 %v31160_v36 }
 0x452   :  { %19471 = vmatmul.mubr.f32.vlgmr.msra.gmra.mrb[64].mxu0 %v31161_v49 }
 0x453   :  { %19473 = vmatprep.mubr.f32.mxu0 %v31162_v0 }
 0x456   :  { %19474 = vmatmul.mubr.f32.gmra.mrb[66].mxu0 %v31163_v62 }
 0x457   :  { %19476 = vmatprep.mubr.f32.mxu0 %v31164_v20 }
 0x45a   :  { %19477 = vmatmul.mubr.f32.gmra.mrb[68].mxu0 %v31165_v57 }
 0x45b   :  { %19479 = vmatprep.mubr.f32.mxu0 %v31166_v29 }
 0x45e   :  { %19480 = vmatmul.mubr.f32.gmra.mrb[70].mxu0 %v31167_v7 }
 0x45f   :  { %19482 = vmatprep.mubr.f32.mxu0 %v31168_v13 }
 0x462   :  { %19483 = vmatmul.mubr.f32.gmra.mrb[72].mxu0 %v31169_v6 }
 0x463   :  { %19485 = vmatprep.mubr.f32.mxu0 %v31170_v28 }
 0x466   :  { %19486 = vmatmul.mubr.f32.gmra.mrb[74].mxu0 %v31171_v42 }
 0x467   :  { %19488 = vmatprep.mubr.f32.mxu0 %v31172_v39 }
 0x46a   :  { %19489 = vmatmul.mubr.f32.gmra.mrb[76].mxu0 %v31173_v24 }
 0x46b   :  { %19491 = vmatprep.mubr.f32.mxu0 %v31174_v32 }
 0x46e   :  { %19492 = vmatmul.mubr.f32.gmra.mrb[78].mxu0 %v31175_v52 }
 0x46f   :  { %19494 = vmatprep.mubr.f32.mxu0 %v31176_v43 }
 0x472   :  { %19495 = vmatmul.mubr.f32.gmra.mrb[80].mxu0 %v31177_v15 }
 0x473   :  { %19497 = vmatprep.mubr.f32.mxu0 %v31178_v10 }
 0x476   :  { %19498 = vmatmul.mubr.f32.gmra.mrb[82].mxu0 %v31179_v30 }
 0x477   :  { %19500 = vmatprep.mubr.f32.mxu0 %v25408_v44 }
 0x47a   :  { %19501 = vmatmul.mubr.f32.gmra.mrb[84].mxu0 %v31180_v5 }
 0x47b   :  { %19503 = vmatprep.mubr.f32.mxu0 %v31181_v58 }
 0x47e   :  { %19504 = vmatmul.mubr.f32.gmra.mrb[86].mxu0 %v31182_v45 }
 0x47f   :  { %19506 = vmatprep.mubr.f32.mxu0 %v25459_v23 }
 0x482   :  { %19507 = vmatmul.mubr.f32.gmra.mrb[88].mxu0 %v25475_v9 }
 0x483   :  { %19509 = vmatprep.mubr.f32.mxu0 %v25487_v16 }
 0x486   :  { %19510 = vmatmul.mubr.f32.gmra.mrb[90].mxu0 %v25495_v60 }
 0x487   :  { %19512 = vmatprep.mubr.f32.mxu0 %v25500_v25 }
 0x48a   :  { %19513 = vmatmul.mubr.f32.gmra.mrb[92].mxu0 %v25519_v21 }
 0x48b   :  { %19515 = vmatprep.mubr.f32.mxu0 %v25530_v8 }
 0x48e   :  { %19516 = vmatmul.mubr.f32.gmra.mrb[94].mxu0 %v25537_v55 }
 0x4d4   :  { %v25987_v44 = vpop.f32.mrb[64].mxu1 }
 0x4d5   :  { %v25989_v46 = vpop.f32.mrb[65].mxu1  ;;  %v5636_v23 = vsel %vm99_vm0, %v25987_v44, -inf }
 0x4d6   :  { %5637 = vmax.xlane.f32.xlu1 %v5636_v23  ;;  %v5633_v16 = vsel %vm99_vm0, %v25989_v46, -inf }
 0x4d7   :  { %5634 = vmax.xlane.f32.xlu0 %v5633_v16 }
 0x4d8   :  { %v25995_v9 = vpop.f32.mrb[66].mxu1 }
 0x4d9   :  { %v25997_v60 = vpop.f32.mrb[67].mxu1  ;;  %v5642_v11 = vsel %vm99_vm0, %v25995_v9, -inf }
 0x4da   :  { %v5639_v8 = vsel %vm99_vm0, %v25997_v60, -inf }
 0x4db   :  { %5640 = vmax.xlane.f32.xlu0 %v5639_v8 }
 0x4dc   :  { %v26001_v25 = vpop.f32.mrb[68].mxu1 }
 0x4dd   :  { %v26003_v21 = vpop.f32.mrb[69].mxu1  ;;  %v5648_v17 = vsel %vm99_vm0, %v26001_v25, -inf }
 0x4de   :  { %v5645_v55 = vsel %vm99_vm0, %v26003_v21, -inf }
 0x4df   :  { %5646 = vmax.xlane.f32.xlu1 %v5645_v55  ;;  %5643 = vmax.xlane.f32.xlu0 %v5642_v11 }
 0x4e0   :  { %v26009_v47 = vpop.f32.mrb[70].mxu1 }
 0x4e1   :  { %v26011_v14 = vpop.f32.mrb[71].mxu1  ;;  %v5654_v1 = vsel %vm99_vm0, %v26009_v47, -inf }
 0x4e2   :  { %v5651_v18 = vsel %vm99_vm0, %v26011_v14, -inf }
 0x4e3   :  { %5652 = vmax.xlane.f32.xlu1 %v5651_v18  ;;  %5649 = vmax.xlane.f32.xlu0 %v5648_v17 }
 0x4e4   :  { %v26017_v27 = vpop.f32.mrb[72].mxu1 }
 0x4e5   :  { %v26019_v61 = vpop.f32.mrb[73].mxu1  ;;  %v5660_v38 = vsel %vm99_vm0, %v26017_v27, -inf }
 0x4e6   :  { %v5657_v12 = vsel %vm99_vm0, %v26019_v61, -inf }
 0x4e7   :  { %5658 = vmax.xlane.f32.xlu1 %v5657_v12  ;;  %5655 = vmax.xlane.f32.xlu0 %v5654_v1 }
 0x4e8   :  { %v26025_v35 = vpop.f32.mrb[74].mxu1 }
 0x4e9   :  { %v26027_v4 = vpop.f32.mrb[75].mxu1  ;;  %v5666_v3 = vsel %vm99_vm0, %v26025_v35, -inf }
 0x4ea   :  { %v5663_v48 = vsel %vm99_vm0, %v26027_v4, -inf }
 0x4eb   :  { %5664 = vmax.xlane.f32.xlu1 %v5663_v48  ;;  %5661 = vmax.xlane.f32.xlu0 %v5660_v38 }
 0x4ec   :  { %v26033_v33 = vpop.f32.mrb[76].mxu1 }
 0x4ed   :  { %v26035_v37 = vpop.f32.mrb[77].mxu1  ;;  %v5672_v34 = vsel %vm99_vm0, %v26033_v33, -inf }
 0x4ee   :  { %v5669_v56 = vsel %vm99_vm0, %v26035_v37, -inf }
 0x4ef   :  { %5670 = vmax.xlane.f32.xlu1 %v5669_v56  ;;  %5667 = vmax.xlane.f32.xlu0 %v5666_v3 }
 0x4f0   :  { %v26041_v2 = vpop.f32.mrb[78].mxu1 }
 0x4f1   :  { %v26043_v41 = vpop.f32.mrb[79].mxu1  ;;  %v5678_v63 = vsel %vm99_vm0, %v26041_v2, -inf }
 0x4f2   :  { %v5675_v26 = vsel %vm99_vm0, %v26043_v41, -inf }
 0x4f3   :  { %5676 = vmax.xlane.f32.xlu1 %v5675_v26  ;;  %5673 = vmax.xlane.f32.xlu0 %v5672_v34 }
 0x4f4   :  { %v26049_v51 = vpop.f32.mrb[80].mxu1 }
 0x4f5   :  { %v26051_v19 = vpop.f32.mrb[81].mxu1  ;;  %v5684_v0 = vsel %vm99_vm0, %v26049_v51, -inf }
 0x4f6   :  { %v5681_v40 = vsel %vm99_vm0, %v26051_v19, -inf }
 0x4f7   :  { %5682 = vmax.xlane.f32.xlu1 %v5681_v40  ;;  %5679 = vmax.xlane.f32.xlu0 %v5678_v63 }
 0x4f8   :  { %v26057_v53 = vpop.f32.mrb[82].mxu1 }
 0x4f9   :  { %v26059_v36 = vpop.f32.mrb[83].mxu1  ;;  %v5690_v29 = vsel %vm99_vm0, %v26057_v53, -inf }
 0x4fa   :  { %v5687_v49 = vsel %vm99_vm0, %v26059_v36, -inf }
 0x4fb   :  { %5688 = vmax.xlane.f32.xlu1 %v5687_v49  ;;  %5685 = vmax.xlane.f32.xlu0 %v5684_v0 }
 0x4fc   :  { %v26065_v62 = vpop.f32.mrb[84].mxu1 }
 0x4fd   :  { %v26067_v20 = vpop.f32.mrb[85].mxu1  ;;  %v5696_v28 = vsel %vm99_vm0, %v26065_v62, -inf }
 0x4fe   :  { %v5693_v57 = vsel %vm99_vm0, %v26067_v20, -inf }
 0x4ff   :  { %5694 = vmax.xlane.f32.xlu1 %v5693_v57  ;;  %5691 = vmax.xlane.f32.xlu0 %v5690_v29 }
 0x500   :  { %v26073_v7 = vpop.f32.mrb[86].mxu1 }
 0x501   :  { %v26075_v13 = vpop.f32.mrb[87].mxu1  ;;  %v5702_v32 = vsel %vm99_vm0, %v26073_v7, -inf }
 0x502   :  { %v5699_v6 = vsel %vm99_vm0, %v26075_v13, -inf }
 0x503   :  { %5700 = vmax.xlane.f32.xlu1 %v5699_v6  ;;  %5697 = vmax.xlane.f32.xlu0 %v5696_v28 }
 0x504   :  { %v26081_v42 = vpop.f32.mrb[88].mxu1 }
 0x505   :  { %v26083_v39 = vpop.f32.mrb[89].mxu1  ;;  %v5708_v10 = vsel %vm99_vm0, %v26081_v42, -inf }
 0x506   :  { %v5705_v24 = vsel %vm99_vm0, %v26083_v39, -inf }
 0x507   :  { %5706 = vmax.xlane.f32.xlu1 %v5705_v24  ;;  %5703 = vmax.xlane.f32.xlu0 %v5702_v32 }
 0x508   :  { %v26089_v52 = vpop.f32.mrb[90].mxu1 }
 0x509   :  { %v26091_v43 = vpop.f32.mrb[91].mxu1  ;;  %v5714_v45 = vsel %vm99_vm0, %v26089_v52, -inf }
 0x50a   :  { %v5711_v15 = vsel %vm99_vm0, %v26091_v43, -inf }
 0x50b   :  { %5712 = vmax.xlane.f32.xlu1 %v5711_v15  ;;  %5709 = vmax.xlane.f32.xlu0 %v5708_v10 }
 0x50c   :  { %v26097_v30 = vpop.f32.mrb[92].mxu1 }
 0x50d   :  { %v26099_v5 = vpop.f32.mrb[93].mxu1  ;;  %v5720_v55 = vsel %vm99_vm0, %v26097_v30, -inf }
 0x50e   :  { %v5717_v58 = vsel %vm99_vm0, %v26099_v5, -inf }
 0x50f   :  { %5718 = vmax.xlane.f32.xlu1 %v5717_v58  ;;  %5715 = vmax.xlane.f32.xlu0 %v5714_v45 }
 0x510   :  { %v26105_v23 = vpop.f32.mrb[94].mxu1 }
 0x511   :  { %v26107_v16 = vpop.f32.mrb[95].mxu1  ;;  %v5726_v11 = vsel %vm99_vm0, %v26105_v23, -inf }
 0x512   :  { %v5723_v8 = vsel %vm99_vm0, %v26107_v16, -inf }
 0x513   :  { %5724 = vmax.xlane.f32.xlu1 %v5723_v8  ;;  %5721 = vmax.xlane.f32.xlu0 %v5720_v55 }
 0x517   :  { %5727 = vmax.xlane.f32.xlu0 %v5726_v11 }
 0x525   :  { %v26115_v18 = vpop.f32.mrb[64].mxu0 }
 0x526   :  { %v26117_v17 = vpop.f32.mrb[65].mxu0  ;;  %v10048_v12 = vsel %vm99_vm0, %v26115_v18, -inf }
 0x527   :  { %10049 = vmax.xlane.f32.xlu0 %v10048_v12  ;;  %v10045_v1 = vsel %vm99_vm0, %v26117_v17, -inf }
 0x528   :  { %10046 = vmax.xlane.f32.xlu1 %v10045_v1 }
 0x529   :  { %v26123_v48 = vpop.f32.mrb[66].mxu0 }
 0x52a   :  { %v26125_v38 = vpop.f32.mrb[67].mxu0  ;;  %v10054_v56 = vsel %vm99_vm0, %v26123_v48, -inf }
 0x52b   :  { %10055 = vmax.xlane.f32.xlu0 %v10054_v56  ;;  %v10051_v3 = vsel %vm99_vm0, %v26125_v38, -inf }
 0x52c   :  { %10052 = vmax.xlane.f32.xlu1 %v10051_v3 }
 0x52d   :  { %v26131_v26 = vpop.f32.mrb[68].mxu0 }
 0x52e   :  { %v26133_v34 = vpop.f32.mrb[69].mxu0  ;;  %v10060_v40 = vsel %vm99_vm0, %v26131_v26, -inf }
 0x52f   :  { %10061 = vmax.xlane.f32.xlu0 %v10060_v40  ;;  %v10057_v63 = vsel %vm99_vm0, %v26133_v34, -inf }
 0x530   :  { %10058 = vmax.xlane.f32.xlu1 %v10057_v63 }
 0x531   :  { %v26139_v49 = vpop.f32.mrb[70].mxu0 }
 0x532   :  { %v26141_v0 = vpop.f32.mrb[71].mxu0  ;;  %v10066_v57 = vsel %vm99_vm0, %v26139_v49, -inf }
 0x533   :  { %10067 = vmax.xlane.f32.xlu0 %v10066_v57  ;;  %v10063_v29 = vsel %vm99_vm0, %v26141_v0, -inf }
 0x534   :  { %10064 = vmax.xlane.f32.xlu1 %v10063_v29 }
 0x535   :  { %v26147_v6 = vpop.f32.mrb[72].mxu0 }
 0x536   :  { %v26149_v28 = vpop.f32.mrb[73].mxu0  ;;  %v10072_v24 = vsel %vm99_vm0, %v26147_v6, -inf }
 0x537   :  { %10073 = vmax.xlane.f32.xlu0 %v10072_v24  ;;  %v10069_v32 = vsel %vm99_vm0, %v26149_v28, -inf }
 0x538   :  { %10070 = vmax.xlane.f32.xlu1 %v10069_v32 }
 0x539   :  { %v26155_v15 = vpop.f32.mrb[74].mxu0 }
 0x53a   :  { %v26157_v10 = vpop.f32.mrb[75].mxu0  ;;  %v10078_v58 = vsel %vm99_vm0, %v26155_v15, -inf }
 0x53b   :  { %10079 = vmax.xlane.f32.xlu0 %v10078_v58  ;;  %v10075_v45 = vsel %vm99_vm0, %v26157_v10, -inf }
 0x53c   :  { %10076 = vmax.xlane.f32.xlu1 %v10075_v45 }
 0x53d   :  { %v26163_v8 = vpop.f32.mrb[76].mxu0 }
 0x53e   :  { %v26165_v55 = vpop.f32.mrb[77].mxu0  ;;  %v10084_v11 = vsel %vm99_vm0, %v26163_v8, -inf }
 0x53f   :  { %10085 = vmax.xlane.f32.xlu0 %v10084_v11  ;;  %v10081_v12 = vsel %vm99_vm0, %v26165_v55, -inf }
 0x540   :  { %10082 = vmax.xlane.f32.xlu1 %v10081_v12 }
 0x541   :  { %v26171_v1 = vpop.f32.mrb[78].mxu0 }
 0x542   :  { %v26173_v56 = vpop.f32.mrb[79].mxu0  ;;  %v10090_v3 = vsel %vm99_vm0, %v26171_v1, -inf }
 0x543   :  { %10091 = vmax.xlane.f32.xlu0 %v10090_v3  ;;  %v10087_v40 = vsel %vm99_vm0, %v26173_v56, -inf }
 0x544   :  { %10088 = vmax.xlane.f32.xlu1 %v10087_v40 }
 0x545   :  { %v26179_v63 = vpop.f32.mrb[80].mxu0 }
 0x546   :  { %31183 = vst [vmem:[#allocation26_spill] sm:$0xff] %v26179_v63  ;;  %v26181_v57 = vpop.f32.mrb[81].mxu0  ;;  %v10096_v29 = vsel %vm99_vm0, %v26179_v63, -inf }
 0x547   :  { %31184 = vst [vmem:[#allocation28_spill] sm:$0xff] %v26181_v57  ;;  %10097 = vmax.xlane.f32.xlu0 %v10096_v29  ;;  %v10093_v24 = vsel %vm99_vm0, %v26181_v57, -inf }
 0x548   :  { %10094 = vmax.xlane.f32.xlu1 %v10093_v24 }
 0x549   :  { %v26187_v32 = vpop.f32.mrb[82].mxu0 }
 0x54a   :  { %31185 = vst [vmem:[#allocation8_spill] sm:$0xff] %v26187_v32  ;;  %v26189_v58 = vpop.f32.mrb[83].mxu0  ;;  %v10102_v45 = vsel %vm99_vm0, %v26187_v32, -inf }
 0x54b   :  { %31186 = vst [vmem:[#allocation35_spill] sm:$0xff] %v26189_v58  ;;  %10103 = vmax.xlane.f32.xlu0 %v10102_v45  ;;  %v10099_v11 = vsel %vm99_vm0, %v26189_v58, -inf }
 0x54c   :  { %10100 = vmax.xlane.f32.xlu1 %v10099_v11 }
 0x54d   :  { %v26195_v12 = vpop.f32.mrb[84].mxu0 }
 0x54e   :  { %31187 = vst [vmem:[#allocation37_spill] sm:$0xff] %v26195_v12  ;;  %v26197_v3 = vpop.f32.mrb[85].mxu0  ;;  %v10108_v40 = vsel %vm99_vm0, %v26195_v12, -inf }
 0x54f   :  { %31188 = vst [vmem:[#allocation41_spill] sm:$0xff] %v26197_v3  ;;  %10109 = vmax.xlane.f32.xlu0 %v10108_v40  ;;  %v10105_v29 = vsel %vm99_vm0, %v26197_v3, -inf }
 0x550   :  { %10106 = vmax.xlane.f32.xlu1 %v10105_v29 }
 0x551   :  { %v26203_v24 = vpop.f32.mrb[86].mxu0 }
 0x552   :  { %31189 = vst [vmem:[#allocation50_spill] sm:$0xff] %v26203_v24  ;;  %v26205_v50 = vpop.f32.mrb[87].mxu0  ;;  %v10114_v45 = vsel %vm99_vm0, %v26203_v24, -inf }
 0x553   :  { %31190 = vst [vmem:[#allocation10_spill] sm:$0xff] %v26205_v50  ;;  %10115 = vmax.xlane.f32.xlu0 %v10114_v45  ;;  %v10111_v11 = vsel %vm99_vm0, %v26205_v50, -inf }
 0x554   :  { %10112 = vmax.xlane.f32.xlu1 %v10111_v11 }
 0x555   :  { %v26211_v59 = vpop.f32.mrb[88].mxu0 }
 0x556   :  { %31191 = vst [vmem:[#allocation51_spill] sm:$0xff] %v26211_v59  ;;  %v26213_v54 = vpop.f32.mrb[89].mxu0  ;;  %v10120_v40 = vsel %vm99_vm0, %v26211_v59, -inf }
 0x557   :  { %31192 = vst [vmem:[#allocation53_spill] sm:$0xff] %v26213_v54  ;;  %10121 = vmax.xlane.f32.xlu0 %v10120_v40  ;;  %v10117_v29 = vsel %vm99_vm0, %v26213_v54, -inf }
 0x558   :  { %10118 = vmax.xlane.f32.xlu1 %v10117_v29 }
 0x559   :  { %v26219_v31 = vpop.f32.mrb[90].mxu0 }
 0x55a   :  { %31193 = vst [vmem:[#allocation57_spill] sm:$0xff] %v26219_v31  ;;  %v26221_v24 = vpop.f32.mrb[91].mxu0  ;;  %v10126_v45 = vsel %vm99_vm0, %v26219_v31, -inf }
 0x55b   :  { %31194 = vst [vmem:[#allocation58_spill] sm:$0xff] %v26221_v24  ;;  %10127 = vmax.xlane.f32.xlu0 %v10126_v45  ;;  %v10123_v11 = vsel %vm99_vm0, %v26221_v24, -inf }
 0x55c   :  { %10124 = vmax.xlane.f32.xlu1 %v10123_v11 }
 0x55d   :  { %v26227_v50 = vpop.f32.mrb[92].mxu0 }
 0x55e   :  { %31195 = vst [vmem:[#allocation66_spill] sm:$0xff] %v26227_v50  ;;  %v26229_v59 = vpop.f32.mrb[93].mxu0  ;;  %v10132_v40 = vsel %vm99_vm0, %v26227_v50, -inf }
 0x55f   :  { %31196 = vst [vmem:[#allocation64_spill] sm:$0xff] %v26229_v59  ;;  %10133 = vmax.xlane.f32.xlu0 %v10132_v40  ;;  %v10129_v29 = vsel %vm99_vm0, %v26229_v59, -inf }
 0x560   :  { %10130 = vmax.xlane.f32.xlu1 %v10129_v29 }
 0x561   :  { %v26235_v54 = vpop.f32.mrb[94].mxu0 }
 0x562   :  { %31197 = vst [vmem:[#allocation68_spill] sm:$0xff] %v26235_v54  ;;  %v26237_v31 = vpop.f32.mrb[95].mxu0  ;;  %v10138_v45 = vsel %vm99_vm0, %v26235_v54, -inf }
 0x563   :  { %31198 = vst [vmem:[#allocation74_spill] sm:$0xff] %v26237_v31  ;;  %10139 = vmax.xlane.f32.xlu0 %v10138_v45  ;;  %v5638_v11 = vpop.xlane.xlu1 %5637  ;;  %v10135_v24 = vsel %vm99_vm0, %v26237_v31, -inf }
 0x564   :  { %v5730_v3 = vsub.f32 %v25987_v44, %v5638_v11  ;;  %10136 = vmax.xlane.f32.xlu1 %v10135_v24  ;;  %v5635_v40 = vpop.xlane.xlu0 %5634 }
 0x565   :  { %v5729_v50 = vsub.f32 %v25989_v46, %v5635_v40 }
 0x566   :  { %v5763_v59 = vmul.f32 1.442695, %v5730_v3 }
 0x567   :  { %v5761_v29 = vmul.f32 1.442695, %v5729_v50 }
 0x568   :  { %22464 = vpow2.f32 %v5763_v59  ;;  %v5641_v12 = vpop.xlane.xlu0 %5640 }
 0x569   :  { %22466 = vpow2.f32 %v5761_v29  ;;  %v5731_v58 = vsub.f32 %v25997_v60, %v5641_v12 }
 0x56b   :  { %v5765_v32 = vmul.f32 1.442695, %v5731_v58 }
 0x56c   :  { %v5647_v54 = vpop.xlane.xlu1 %5646  ;;  %v5644_v45 = vpop.xlane.xlu0 %5643 }
 0x56d   :  { %22468 = vpow2.f32 %v5765_v32  ;;  %v5733_v57 = vsub.f32 %v26003_v21, %v5647_v54  ;;  %v5732_v31 = vsub.f32 %v25995_v9, %v5644_v45 }
 0x56f   :  { %v5769_v44 = vmul.f32 1.442695, %v5733_v57  ;;  %v5767_v24 = vmul.f32 1.442695, %v5732_v31 }
 0x570   :  { %v5653_v11 = vpop.xlane.xlu1 %5652  ;;  %v5650_v63 = vpop.xlane.xlu0 %5649 }
 0x571   :  { %22470 = vpow2.f32 %v5769_v44  ;;  %v5735_v50 = vsub.f32 %v26011_v14, %v5653_v11  ;;  %v5734_v59 = vsub.f32 %v26001_v25, %v5650_v63 }
 0x572   :  { %v22465_v46 = vpop.eup %22464  ;;  %22472 = vpow2.f32 %v5767_v24 }
 0x573   :  { %v22467_v60 = vpop.eup %22466  ;;  %v5925_v58 = vsel %vm99_vm0, %v22465_v46, 0  ;;  %v5773_v12 = vmul.f32 1.442695, %v5735_v50  ;;  %v5771_v32 = vmul.f32 1.442695, %v5734_v59  ;;  %v5828_v54 = vsel %vm99_vm0, %v22465_v46, 0.0 }
 0x574   :  { %v26252_v21 = vand.u32 4294901760, %v5925_v58  ;;  %v5659_v9 = vpop.xlane.xlu1 %5658  ;;  %5829 = vadd.xlane.f32.xlu0 %v5828_v54  ;;  %v5656_v31 = vpop.xlane.xlu0 %5655  ;;  %v5825_v57 = vsel %vm99_vm0, %v22467_v60, 0.0  ;;  %v5922_v14 = vsel %vm99_vm0, %v22467_v60, 0 }
 0x575   :  { %22474 = vpow2.f32 %v5773_v12  ;;  %v5737_v25 = vsub.f32 %v26019_v61, %v5659_v9  ;;  %v5736_v63 = vsub.f32 %v26009_v47, %v5656_v31  ;;  %5826 = vadd.xlane.f32.xlu1 %v5825_v57  ;;  %v26258_v3 = vand.u32 4294901760, %v5922_v14 }
 0x576   :  { %v26261_v40 = vsub.f32 %v5925_v58, %v26252_v21  ;;  %22476 = vpow2.f32 %v5771_v32 }
 0x577   :  { %v22469_v29 = vpop.eup %22468  ;;  %v5777_v45 = vmul.f32 1.442695, %v5737_v25  ;;  %v5775_v44 = vmul.f32 1.442695, %v5736_v63  ;;  %v26264_v24 = vsub.f32 %v5922_v14, %v26258_v3 }
 0x578   :  { %31199 = vst [vmem:[#allocation75_spill] sm:$0xff] %v26261_v40  ;;  %v5665_v11 = vpop.xlane.xlu1 %5664  ;;  %v5662_v50 = vpop.xlane.xlu0 %5661  ;;  %v5831_v59 = vsel %vm99_vm0, %v22469_v29, 0.0  ;;  %v29877_v61 = vand.u32 4294901760, %v26261_v40  ;;  %v5928_v47 = vsel %vm99_vm0, %v22469_v29, 0 }
 0x579   :  { %31200 = vst [vmem:[#allocation9_spill] sm:$0xff] %v26264_v24  ;;  %22478 = vpow2.f32 %v5777_v45  ;;  %v5739_v46 = vsub.f32 %v26027_v4, %v5665_v11  ;;  %v5738_v60 = vsub.f32 %v26017_v27, %v5662_v50  ;;  %5832 = vadd.xlane.f32.xlu1 %v5831_v59  ;;  %v29878_v58 = vand.u32 4294901760, %v26264_v24 }
 0x57a   :  { %22480 = vpow2.f32 %v5775_v44  ;;  %v6103_v12 = vsub.f32 %v26261_v40, %v29877_v61  ;;  %v26275_v32 = vand.u32 4294901760, %v5928_v47 }
 0x57b   :  { %v22471_v54 = vpop.eup %22470  ;;  %v5781_v9 = vmul.f32 1.442695, %v5739_v46  ;;  %v5779_v31 = vmul.f32 1.442695, %v5738_v60  ;;  %v6093_v57 = vsub.f32 %v26264_v24, %v29878_v58 }
 0x57c   :  { %v22473_v4 = vpop.eup %22472  ;;  %v5671_v14 = vpop.xlane.xlu1 %5670  ;;  %v5837_v25 = vsel %vm99_vm0, %v22471_v54, 0.0  ;;  %v6104_v63 = vand.u32 4294901760, %v6103_v12  ;;  %v26282_v29 = vsub.f32 %v5928_v47, %v26275_v32  ;;  %v5934_v45 = vsel %vm99_vm0, %v22471_v54, 0 }
 0x57d   :  { %v5668_v27 = vpop.xlane.xlu0 %5667  ;;  %22482 = vpow2.f32 %v5781_v9  ;;  %v5741_v44 = vsub.f32 %v26035_v37, %v5671_v14  ;;  %5838 = vadd.xlane.f32.xlu1 %v5837_v25  ;;  %v5834_v50 = vsel %vm99_vm0, %v22473_v4, 0.0  ;;  %v6094_v59 = vand.u32 4294901760, %v6093_v57 }
 0x57e   :  { %31201 = vst [vmem:[#allocation111_spill] sm:$0xff] %v26282_v29  ;;  %v5740_v11 = vsub.f32 %v26025_v35, %v5668_v27  ;;  %22484 = vpow2.f32 %v5779_v31  ;;  %5835 = vadd.xlane.f32.xlu0 %v5834_v50  ;;  %v29880_v46 = vand.u32 4294901760, %v26282_v29  ;;  %v5931_v60 = vsel %vm99_vm0, %v22473_v4, 0 }
 0x57f   :  { %v22475_v12 = vpop.eup %22474  ;;  %v5785_v47 = vmul.f32 1.442695, %v5741_v44  ;;  %v26290_v58 = vand.u32 4294901760, %v5931_v60  ;;  %v26292_v54 = vand.u32 4294901760, %v5934_v45  ;;  %18766 = vmatprep.mubr.f32.mxu1 %v6094_v59 }
 0x580   :  { %v5783_v61 = vmul.f32 1.442695, %v5740_v11  ;;  %v22477_v37 = vpop.eup %22476  ;;  %v5677_v35 = vpop.xlane.xlu1 %5676  ;;  %v5843_v14 = vsel %vm99_vm0, %v22475_v12, 0.0  ;;  %v6113_v31 = vsub.f32 %v26282_v29, %v29880_v46  ;;  %v5940_v57 = vsel %vm99_vm0, %v22475_v12, 0  ;;  %18767 = vmatmul.mubr.f32.vlgmr.msra.gmra.mrb[96].mxu1 %v6104_v63  ;;  %v31204_v63 = vld [vmem:[#allocation40_spill] sm:$0xff] }
 0x581   :  { %v5674_v9 = vpop.xlane.xlu0 %5673  ;;  %22486 = vpow2.f32 %v5785_v47  ;;  %v5743_v4 = vsub.f32 %v26043_v41, %v5677_v35  ;;  %5844 = vadd.xlane.f32.xlu1 %v5843_v14  ;;  %v5840_v25 = vsel %vm99_vm0, %v22477_v37, 0.0  ;;  %20737 = vmatpush3.bf16.msra.mxu1 %v31159_v22  ;;  %v26304_v11 = vsub.f32 %v5931_v60, %v26290_v58 }
 0x582   :  { %v5742_v27 = vsub.f32 %v26033_v33, %v5674_v9  ;;  %22488 = vpow2.f32 %v5783_v61  ;;  %5841 = vadd.xlane.f32.xlu0 %v5840_v25  ;;  %v6114_v44 = vand.u32 4294901760, %v6113_v31  ;;  %v26307_v50 = vsub.f32 %v5934_v45, %v26292_v54  ;;  %20739 = vmatprep.subr.bf16.mxu1 %v31204_v63 }
 0x583   :  { %31202 = vst [vmem:[#allocation78_spill] sm:$0xff] %v26304_v11  ;;  %v22479_v59 = vpop.eup %22478  ;;  %v5789_v12 = vmul.f32 1.442695, %v5743_v4  ;;  %v5937_v33 = vsel %vm99_vm0, %v22477_v37, 0  ;;  %v26311_v47 = vand.u32 4294901760, %v5940_v57  ;;  %v29879_v60 = vand.u32 4294901760, %v26304_v11 }
 0x584   :  { %31203 = vst [vmem:[#allocation81_spill] sm:$0xff] %v26307_v50  ;;  %v5787_v41 = vmul.f32 1.442695, %v5742_v27  ;;  %v22481_v61 = vpop.eup %22480  ;;  %18769 = vmatprep.mubr.f32.mxu1 %v6114_v44  ;;  %v5683_v22 = vpop.xlane.xlu1 %5682  ;;  %v5849_v9 = vsel %vm99_vm0, %v22479_v59, 0.0  ;;  %v29881_v45 = vand.u32 4294901760, %v26307_v50  ;;  %v26316_v14 = vand.u32 4294901760, %v5937_v33 }
 0x585   :  { %v5680_v35 = vpop.xlane.xlu0 %5679  ;;  %22490 = vpow2.f32 %v5789_v12  ;;  %v5745_v31 = vsub.f32 %v26051_v19, %v5683_v22  ;;  %5850 = vadd.xlane.f32.xlu1 %v5849_v9  ;;  %v5846_v37 = vsel %vm99_vm0, %v22481_v61, 0.0  ;;  %20741 = vmatpush3.bf16.msra.mxu1 %v31204_v63  ;;  %v6123_v27 = vsub.f32 %v26304_v11, %v29879_v60  ;;  %v31206_v22 = vld [vmem:[#allocation42_spill] sm:$0xff] }
 0x586   :  { %v5744_v4 = vsub.f32 %v26041_v2, %v5680_v35  ;;  %22492 = vpow2.f32 %v5787_v41  ;;  %5847 = vadd.xlane.f32.xlu0 %v5846_v37  ;;  %v6133_v25 = vsub.f32 %v26307_v50, %v29881_v45  ;;  %v26329_v44 = vsub.f32 %v5937_v33, %v26316_v14  ;;  %20743 = vmatprep.subr.bf16.mxu1 %v31206_v22 }
 0x587   :  { %v22483_v19 = vpop.eup %22482  ;;  %v5793_v2 = vmul.f32 1.442695, %v5745_v31  ;;  %v26333_v41 = vsub.f32 %v5940_v57, %v26311_v47  ;;  %v5943_v63 = vsel %vm99_vm0, %v22481_v61, 0  ;;  %v6124_v9 = vand.u32 4294901760, %v6123_v27 }
 0x588   :  { %31205 = vst [vmem:[#allocation85_spill] sm:$0xff] %v26329_v44  ;;  %v5791_v12 = vmul.f32 1.442695, %v5744_v4  ;;  %v22485_v35 = vpop.eup %22484  ;;  %v5689_v37 = vpop.xlane.xlu1 %5688  ;;  %v6134_v60 = vand.u32 4294901760, %v6133_v25  ;;  %v5855_v45 = vsel %vm99_vm0, %v22483_v19, 0.0  ;;  %v29884_v33 = vand.u32 4294901760, %v26329_v44 }
 0x589   :  { %31207 = vst [vmem:[#allocation87_spill] sm:$0xff] %v26333_v41  ;;  %v5686_v46 = vpop.xlane.xlu0 %5685  ;;  %22494 = vpow2.f32 %v5793_v2  ;;  %v5747_v31 = vsub.f32 %v26059_v36, %v5689_v37  ;;  %5856 = vadd.xlane.f32.xlu1 %v5855_v45  ;;  %v5852_v57 = vsel %vm99_vm0, %v22485_v35, 0.0  ;;  %18770 = vmatmul.mubr.f32.gmra.mrb[98].mxu1 %v6124_v9  ;;  %v29885_v27 = vand.u32 4294901760, %v26333_v41 }
 0x58a   :  { %v5746_v4 = vsub.f32 %v26049_v51, %v5686_v46  ;;  %22496 = vpow2.f32 %v5791_v12  ;;  %5853 = vadd.xlane.f32.xlu0 %v5852_v57  ;;  %v6143_v61 = vsub.f32 %v26329_v44, %v29884_v33  ;;  %v26345_v25 = vand.u32 4294901760, %v5943_v63  ;;  %18772 = vmatprep.mubr.f32.mxu1 %v6134_v60  ;;  %v31208_v12 = vld [vmem:[#allocation56_spill] sm:$0xff] }
 0x58b   :  { %v26347_v50 = vpop.eup %22486  ;;  %v5797_v2 = vmul.f32 1.442695, %v5747_v31  ;;  %20745 = vmatpush3.bf16.msra.mxu1 %v31206_v22  ;;  %v5946_v36 = vsel %vm99_vm0, %v22479_v59, 0  ;;  %v5949_v46 = vsel %vm99_vm0, %v22485_v35, 0  ;;  %v6153_v57 = vsub.f32 %v26333_v41, %v29885_v27 }
 0x58c   :  { %v5795_v51 = vmul.f32 1.442695, %v5746_v4  ;;  %v22489_v45 = vpop.eup %22488  ;;  %20747 = vmatprep.subr.bf16.mxu1 %v31208_v12  ;;  %v6144_v9 = vand.u32 4294901760, %v6143_v61  ;;  %v5695_v37 = vpop.xlane.xlu1 %5694  ;;  %v5861_v60 = vsel %vm99_vm0, %v26347_v50, 0.0  ;;  %v26359_v22 = vsub.f32 %v5943_v63, %v26345_v25 }
 0x58d   :  { %v5692_v33 = vpop.xlane.xlu0 %5691  ;;  %22498 = vpow2.f32 %v5797_v2  ;;  %v5749_v59 = vsub.f32 %v26067_v20, %v5695_v37  ;;  %5862 = vadd.xlane.f32.xlu1 %v5861_v60  ;;  %v5858_v31 = vsel %vm99_vm0, %v22489_v45, 0.0  ;;  %v6154_v4 = vand.u32 4294901760, %v6153_v57 }
 0x58e   :  { %31209 = vst [vmem:[#allocation114_spill] sm:$0xff] %v26359_v22  ;;  %v5748_v35 = vsub.f32 %v26057_v53, %v5692_v33  ;;  %22500 = vpow2.f32 %v5795_v51  ;;  %18773 = vmatmul.mubr.f32.gmra.mrb[100].mxu1 %v6144_v9  ;;  %5859 = vadd.xlane.f32.xlu0 %v5858_v31  ;;  %v29888_v61 = vand.u32 4294901760, %v26359_v22  ;;  %v26365_v27 = vand.u32 4294901760, %v5946_v36  ;;  %v31210_v51 = vld [vmem:[#allocation38_spill] sm:$0xff] }
 0x58f   :  { %v26367_v41 = vpop.eup %22490  ;;  %v5801_v63 = vmul.f32 1.442695, %v5749_v59  ;;  %20749 = vmatpush3.bf16.msra.mxu1 %v31208_v12  ;;  %v26370_v20 = vand.u32 4294901760, %v5949_v46  ;;  %v5952_v53 = vsel %vm99_vm0, %v22483_v19, 0  ;;  %18775 = vmatprep.mubr.f32.mxu1 %v6154_v4 }
 0x590   :  { %v5799_v2 = vmul.f32 1.442695, %v5748_v35  ;;  %v22493_v33 = vpop.eup %22492  ;;  %20751 = vmatprep.subr.bf16.mxu1 %v31210_v51  ;;  %v6163_v9 = vsub.f32 %v26359_v22, %v29888_v61  ;;  %v5701_v37 = vpop.xlane.xlu1 %5700  ;;  %v26378_v57 = vsub.f32 %v5946_v36, %v26365_v27  ;;  %v5867_v12 = vsel %vm99_vm0, %v26367_v41, 0.0 }
 0x591   :  { %v5698_v60 = vpop.xlane.xlu0 %5697  ;;  %v26382_v59 = vand.u32 4294901760, %v5952_v53  ;;  %22502 = vpow2.f32 %v5801_v63  ;;  %v5751_v19 = vsub.f32 %v26075_v13, %v5701_v37  ;;  %5868 = vadd.xlane.f32.xlu1 %v5867_v12  ;;  %v5864_v31 = vsel %vm99_vm0, %v22493_v33, 0.0 }
 0x592   :  { %31211 = vst [vmem:[#allocation92_spill] sm:$0xff] %v26378_v57  ;;  %v5750_v35 = vsub.f32 %v26065_v62, %v5698_v60  ;;  %22504 = vpow2.f32 %v5799_v2  ;;  %v6164_v4 = vand.u32 4294901760, %v6163_v9  ;;  %v29895_v61 = vand.u32 4294901760, %v26378_v57  ;;  %5865 = vadd.xlane.f32.xlu0 %v5864_v31 }
 0x593   :  { %v26389_v36 = vsub.f32 %v5949_v46, %v26370_v20  ;;  %v26391_v22 = vpop.eup %22494  ;;  %v5805_v44 = vmul.f32 1.442695, %v5751_v19  ;;  %v26394_v63 = vsub.f32 %v5952_v53, %v26382_v59  ;;  %v5955_v62 = vsel %vm99_vm0, %v22489_v45, 0 }
 0x594   :  { %v5803_v11 = vmul.f32 1.442695, %v5750_v35  ;;  %v26397_v13 = vpop.eup %22496  ;;  %18776 = vmatmul.mubr.f32.gmra.mrb[102].mxu1 %v6164_v4  ;;  %v6173_v2 = vsub.f32 %v26378_v57, %v29895_v61  ;;  %v5707_v46 = vpop.xlane.xlu1 %5706  ;;  %v5873_v60 = vsel %vm99_vm0, %v26391_v22, 0.0  ;;  %v26405_v12 = vand.u32 4294901760, %v5955_v62 }
 0x595   :  { %31212 = vst [vmem:[#allocation93_spill] sm:$0xff] %v26389_v36  ;;  %31213 = vst [vmem:[#allocation97_spill] sm:$0xff] %v26394_v63  ;;  %v29898_v9 = vand.u32 4294901760, %v26389_v36  ;;  %v5704_v37 = vpop.xlane.xlu0 %5703  ;;  %22506 = vpow2.f32 %v5805_v44  ;;  %v5753_v53 = vsub.f32 %v26083_v39, %v5707_v46  ;;  %v29899_v45 = vand.u32 4294901760, %v26394_v63  ;;  %5874 = vadd.xlane.f32.xlu1 %v5873_v60 }
 0x596   :  { %v5752_v19 = vsub.f32 %v26073_v7, %v5704_v37  ;;  %v6174_v35 = vand.u32 4294901760, %v6173_v2  ;;  %22508 = vpow2.f32 %v5803_v11  ;;  %v5870_v4 = vsel %vm99_vm0, %v26397_v13, 0.0 }
 0x597   :  { %v6183_v31 = vsub.f32 %v26389_v36, %v29898_v9  ;;  %v26415_v61 = vpop.eup %22498  ;;  %v5809_v57 = vmul.f32 1.442695, %v5753_v53  ;;  %v6193_v39 = vsub.f32 %v26394_v63, %v29899_v45  ;;  %5871 = vadd.xlane.f32.xlu0 %v5870_v4  ;;  %v26421_v7 = vsub.f32 %v5955_v62, %v26405_v12 }
 0x598   :  { %v5807_v44 = vmul.f32 1.442695, %v5752_v19  ;;  %v26423_v11 = vpop.eup %22500  ;;  %18778 = vmatprep.mubr.f32.mxu1 %v6174_v35  ;;  %v5713_v46 = vpop.xlane.xlu1 %5712  ;;  %v5958_v37 = vsel %vm99_vm0, %v26347_v50, 0  ;;  %v5879_v53 = vsel %vm99_vm0, %v26415_v61, 0.0  ;;  %v5961_v9 = vsel %vm99_vm0, %v22493_v33, 0 }
 0x599   :  { %31214 = vst [vmem:[#allocation99_spill] sm:$0xff] %v26421_v7  ;;  %v6184_v2 = vand.u32 4294901760, %v6183_v31  ;;  %v5710_v60 = vpop.xlane.xlu0 %5709  ;;  %22510 = vpow2.f32 %v5809_v57  ;;  %v6194_v19 = vand.u32 4294901760, %v6193_v39  ;;  %v29900_v4 = vand.u32 4294901760, %v26421_v7  ;;  %5880 = vadd.xlane.f32.xlu1 %v5879_v53 }
 0x59a   :  { %v5755_v62 = vsub.f32 %v26091_v43, %v5713_v46  ;;  %22512 = vpow2.f32 %v5807_v44  ;;  %v26432_v35 = vand.u32 4294901760, %v5958_v37  ;;  %v5754_v31 = vsub.f32 %v26081_v42, %v5710_v60 }
 0x59b   :  { %18779 = vmatmul.mubr.f32.gmra.mrb[104].mxu1 %v6184_v2  ;;  %v5876_v50 = vsel %vm99_vm0, %v26423_v11, 0.0  ;;  %v26437_v45 = vpop.eup %22502  ;;  %v6203_v33 = vsub.f32 %v26421_v7, %v29900_v4  ;;  %v26442_v43 = vand.u32 4294901760, %v5961_v9  ;;  %v5964_v39 = vsel %vm99_vm0, %v26367_v41, 0 }
 0x59c   :  { %18781 = vmatprep.mubr.f32.mxu1 %v6194_v19  ;;  %v5813_v57 = vmul.f32 1.442695, %v5755_v62  ;;  %5877 = vadd.xlane.f32.xlu0 %v5876_v50  ;;  %v26446_v44 = vpop.eup %22504  ;;  %v26449_v42 = vsub.f32 %v5958_v37, %v26432_v35  ;;  %v5811_v2 = vmul.f32 1.442695, %v5754_v31  ;;  %v5719_v46 = vpop.xlane.xlu1 %5718  ;;  %v26451_v60 = vand.u32 4294901760, %v5964_v39 }
 0x59d   :  { %v5716_v53 = vpop.xlane.xlu0 %5715  ;;  %v5885_v19 = vsel %vm99_vm0, %v26437_v45, 0.0  ;;  %v6204_v62 = vand.u32 4294901760, %v6203_v33  ;;  %v26456_v50 = vsub.f32 %v5961_v9, %v26442_v43  ;;  %v5757_v41 = vsub.f32 %v26099_v5, %v5719_v46 }
 0x59e   :  { %31215 = vst [vmem:[#allocation62_spill] sm:$0xff] %v26449_v42  ;;  %22514 = vpow2.f32 %v5813_v57  ;;  %5886 = vadd.xlane.f32.xlu1 %v5885_v19  ;;  %v29907_v4 = vand.u32 4294901760, %v26449_v42  ;;  %v26461_v37 = vsub.f32 %v5964_v39, %v26451_v60  ;;  %v5756_v31 = vsub.f32 %v26089_v52, %v5716_v53 }
 0x59f   :  { %31216 = vst [vmem:[#allocation103_spill] sm:$0xff] %v26456_v50  ;;  %22516 = vpow2.f32 %v5811_v2  ;;  %v26464_v7 = vpop.eup %22506  ;;  %18782 = vmatmul.mubr.f32.gmra.mrb[106].mxu1 %v6204_v62  ;;  %v29912_v33 = vand.u32 4294901760, %v26456_v50  ;;  %v5817_v57 = vmul.f32 1.442695, %v5757_v41  ;;  %v5882_v9 = vsel %vm99_vm0, %v26446_v44, 0.0 }
 0x5a0   :  { %31217 = vst [vmem:[#allocation100_spill] sm:$0xff] %v26461_v37  ;;  %v5967_v5 = vsel %vm99_vm0, %v26397_v13, 0  ;;  %v26471_v46 = vpop.eup %22508  ;;  %v6213_v39 = vsub.f32 %v26449_v42, %v29907_v4  ;;  %v29914_v52 = vand.u32 4294901760, %v26461_v37  ;;  %v5815_v2 = vmul.f32 1.442695, %v5756_v31  ;;  %5883 = vadd.xlane.f32.xlu0 %v5882_v9  ;;  %v5725_v19 = vpop.xlane.xlu1 %5724 }
 0x5a1   :  { %v26477_v53 = vand.u32 4294901760, %v5967_v5  ;;  %v5722_v62 = vpop.xlane.xlu0 %5721  ;;  %v6223_v41 = vsub.f32 %v26456_v50, %v29912_v33  ;;  %22518 = vpow2.f32 %v5817_v57  ;;  %v5759_v13 = vsub.f32 %v26107_v16, %v5725_v19 }
 0x5a2   :  { %v5970_v63 = vsel %vm99_vm0, %v26391_v22, 0  ;;  %v6214_v36 = vand.u32 4294901760, %v6213_v39  ;;  %v6233_v31 = vsub.f32 %v26461_v37, %v29914_v52  ;;  %22520 = vpow2.f32 %v5815_v2 }
 0x5a3   :  { %v26489_v9 = vsub.f32 %v5967_v5, %v26477_v53  ;;  %v26491_v4 = vpop.eup %22510  ;;  %v6224_v42 = vand.u32 4294901760, %v6223_v41  ;;  %v5821_v29 = vmul.f32 1.442695, %v5759_v13  ;;  %v26493_v33 = vand.u32 4294901760, %v5970_v63 }
 0x5a4   :  { %v5758_v16 = vsub.f32 %v26097_v30, %v5722_v62  ;;  %v26496_v57 = vpop.eup %22512  ;;  %18784 = vmatprep.mubr.f32.mxu1 %v6214_v36  ;;  %v6234_v22 = vand.u32 4294901760, %v6233_v31  ;;  %v5891_v2 = vsel %vm99_vm0, %v26464_v7, 0.0  ;;  %v5888_v5 = vsel %vm99_vm0, %v26471_v46, 0.0 }
 0x5a5   :  { %31218 = vst [vmem:[#allocation102_spill] sm:$0xff] %v26489_v9  ;;  %v29913_v39 = vand.u32 4294901760, %v26489_v9  ;;  %v5728_v19 = vpop.xlane.xlu0 %5727  ;;  %18785 = vmatmul.mubr.f32.gmra.mrb[108].mxu1 %v6224_v42  ;;  %22522 = vpow2.f32 %v5821_v29  ;;  %v26504_v41 = vsub.f32 %v5970_v63, %v26493_v33  ;;  %5892 = vadd.xlane.f32.xlu1 %v5891_v2  ;;  %v5973_v30 = vsel %vm99_vm0, %v26423_v11, 0 }
 0x5a6   :  { %v5819_v13 = vmul.f32 1.442695, %v5758_v16  ;;  %18787 = vmatprep.mubr.f32.mxu1 %v6234_v22  ;;  %5889 = vadd.xlane.f32.xlu0 %v5888_v5  ;;  %v26511_v62 = vand.u32 4294901760, %v5973_v30  ;;  %v5976_v42 = vsel %vm99_vm0, %v26415_v61, 0  ;;  %v5760_v29 = vsub.f32 %v26105_v23, %v5728_v19 }
 0x5a7   :  { %31219 = vst [vmem:[#allocation108_spill] sm:$0xff] %v26504_v41  ;;  %v6243_v36 = vsub.f32 %v26489_v9, %v29913_v39  ;;  %v29915_v31 = vand.u32 4294901760, %v26504_v41  ;;  %v26519_v16 = vand.u32 4294901760, %v5976_v42  ;;  %v5897_v11 = vsel %vm99_vm0, %v26491_v4, 0.0 }
 0x5a8   :  { %v26516_v63 = vpop.eup %22514  ;;  %22524 = vpow2.f32 %v5819_v13  ;;  %v26524_v5 = vsub.f32 %v5973_v30, %v26511_v62  ;;  %v5823_v39 = vmul.f32 1.442695, %v5760_v29  ;;  %v5894_v61 = vsel %vm99_vm0, %v26496_v57, 0.0 }
 0x5a9   :  { %v22517_v22 = vpop.eup %22516  ;;  %v6244_v2 = vand.u32 4294901760, %v6243_v36  ;;  %v6253_v23 = vsub.f32 %v26504_v41, %v29915_v31  ;;  %v26532_v19 = vsub.f32 %v5976_v42, %v26519_v16  ;;  %5898 = vadd.xlane.f32.xlu1 %v5897_v11  ;;  %v5979_v13 = vsel %vm99_vm0, %v26446_v44, 0 }
 0x5aa   :  { %31220 = vst [vmem:[#allocation106_spill] sm:$0xff] %v26524_v5  ;;  %v5982_v36 = vsel %vm99_vm0, %v26437_v45, 0  ;;  %v29922_v30 = vand.u32 4294901760, %v26524_v5  ;;  %22526 = vpow2.f32 %v5823_v39  ;;  %5895 = vadd.xlane.f32.xlu0 %v5894_v61  ;;  %v26539_v29 = vand.u32 4294901760, %v5979_v13 }
 0x5ab   :  { %31221 = vst [vmem:[#allocation14_spill] sm:$0xff] %v26532_v19  ;;  %18788 = vmatmul.mubr.f32.gmra.mrb[110].mxu1 %v6244_v2  ;;  %v26541_v52 = vand.u32 4294901760, %v5982_v36  ;;  %v26543_v31 = vpop.eup %22518  ;;  %v6254_v42 = vand.u32 4294901760, %v6253_v23  ;;  %v29927_v11 = vand.u32 4294901760, %v26532_v19  ;;  %v5903_v44 = vsel %vm99_vm0, %v26516_v63, 0.0 }
 0x5ac   :  { %v5900_v41 = vsel %vm99_vm0, %v22517_v22, 0.0  ;;  %v22521_v45 = vpop.eup %22520  ;;  %v6263_v39 = vsub.f32 %v26524_v5, %v29922_v30  ;;  %v26553_v2 = vsub.f32 %v5979_v13, %v26539_v29  ;;  %v5985_v23 = vsel %vm99_vm0, %v26471_v46, 0 }
 0x5ad   :  { %31222 = vst [vmem:[#allocation21_spill] sm:$0xff] %v26541_v52  ;;  %v26556_v61 = vsub.f32 %v5982_v36, %v26541_v52  ;;  %18790 = vmatprep.mubr.f32.mxu1 %v6254_v42  ;;  %v6273_v9 = vsub.f32 %v26532_v19, %v29927_v11  ;;  %5904 = vadd.xlane.f32.xlu1 %v5903_v44  ;;  %v26563_v37 = vand.u32 4294901760, %v5985_v23  ;;  %v5988_v30 = vsel %vm99_vm0, %v26464_v7, 0 }
 0x5ae   :  { %31223 = vst [vmem:[#allocation20_spill] sm:$0xff] %v26553_v2  ;;  %v5909_v13 = vsel %vm99_vm0, %v26543_v31, 0.0  ;;  %v6264_v5 = vand.u32 4294901760, %v6263_v39  ;;  %v29934_v36 = vand.u32 4294901760, %v26553_v2  ;;  %5901 = vadd.xlane.f32.xlu0 %v5900_v41  ;;  %v26571_v46 = vand.u32 4294901760, %v5988_v30 }
 0x5af   :  { %31224 = vst [vmem:[#allocation25_spill] sm:$0xff] %v26556_v61  ;;  %31225 = vst [vmem:[#allocation12_spill] sm:$0xff] %v26563_v37  ;;  %v29935_v50 = vand.u32 4294901760, %v26556_v61  ;;  %v26573_v42 = vpop.eup %22522  ;;  %v6274_v11 = vand.u32 4294901760, %v6273_v9  ;;  %v26576_v44 = vsub.f32 %v5985_v23, %v26563_v37  ;;  %v5906_v19 = vsel %vm99_vm0, %v22521_v45, 0.0 }
 0x5b0   :  { %31226 = vst [vmem:[#allocation15_spill] sm:$0xff] %v26571_v46  ;;  %v5991_v7 = vsel %vm99_vm0, %v26496_v57, 0  ;;  %18791 = vmatmul.mubr.f32.gmra.mrb[112].mxu1 %v6264_v5  ;;  %v6283_v39 = vsub.f32 %v26553_v2, %v29934_v36  ;;  %v26588_v40 = vsub.f32 %v5988_v30, %v26571_v46  ;;  %v5994_v57 = vsel %vm99_vm0, %v26491_v4, 0 }
 0x5b1   :  { %31227 = vst [vmem:[#allocation113_spill] sm:$0xff] %v26576_v44  ;;  %v6293_v41 = vsub.f32 %v26556_v61, %v29935_v50  ;;  %v26590_v9 = vand.u32 4294901760, %v5991_v7  ;;  %18793 = vmatprep.mubr.f32.mxu1 %v6274_v11  ;;  %v29942_v24 = vand.u32 4294901760, %v26576_v44  ;;  %5910 = vadd.xlane.f32.xlu1 %v5909_v13  ;;  %v5915_v5 = vsel %vm99_vm0, %v26573_v42, 0.0 }
 0x5b2   :  { %31228 = vst [vmem:[#allocation121_spill] sm:$0xff] %v26588_v40  ;;  %v26592_v23 = vpop.eup %22524  ;;  %v5997_v36 = vsel %vm99_vm0, %v22517_v22, 0  ;;  %v6284_v50 = vand.u32 4294901760, %v6283_v39  ;;  %v29949_v30 = vand.u32 4294901760, %v26588_v40  ;;  %5907 = vadd.xlane.f32.xlu0 %v5906_v19  ;;  %v26607_v13 = vand.u32 4294901760, %v5994_v57 }
 0x5b3   :  { %31229 = vst [vmem:[#allocation22_spill] sm:$0xff] %v26590_v9  ;;  %v6294_v61 = vand.u32 4294901760, %v6293_v41  ;;  %v26602_v2 = vsub.f32 %v5991_v7, %v26590_v9  ;;  %v6303_v11 = vsub.f32 %v26576_v44, %v29942_v24  ;;  %v5912_v4 = vsel %vm99_vm0, %v26592_v23, 0.0 }
 0x5b4   :  { %31230 = vst [vmem:[#allocation123_spill] sm:$0xff] %v26607_v13  ;;  %v26611_v46 = vand.u32 4294901760, %v5997_v36  ;;  %v26613_v22 = vpop.eup %22526  ;;  %18794 = vmatmul.mubr.f32.gmra.mrb[114].mxu1 %v6284_v50  ;;  %v6313_v19 = vsub.f32 %v26588_v40, %v29949_v30  ;;  %v10050_v39 = vpop.xlane.xlu0 %10049  ;;  %v6000_v41 = vsel %vm99_vm0, %v26516_v63, 0  ;;  %v6003_v24 = vsel %vm99_vm0, %v22521_v45, 0 }
 0x5b5   :  { %v29954_v7 = vand.u32 4294901760, %v26602_v2  ;;  %18796 = vmatprep.mubr.f32.mxu1 %v6294_v61  ;;  %v6304_v44 = vand.u32 4294901760, %v6303_v11  ;;  %v26623_v9 = vsub.f32 %v5994_v57, %v26607_v13  ;;  %5916 = vadd.xlane.f32.xlu1 %v5915_v5  ;;  %v10142_v37 = vsub.f32 %v26115_v18, %v10050_v39  ;;  %v10047_v30 = vpop.xlane.xlu1 %10046 }
 0x5b6   :  { %31231 = vst [vmem:[#allocation60_spill] sm:$0xff] %v26611_v46  ;;  %v26626_v50 = vsub.f32 %v5997_v36, %v26611_v46  ;;  %v6314_v40 = vand.u32 4294901760, %v6313_v19  ;;  %5913 = vadd.xlane.f32.xlu0 %v5912_v4  ;;  %v10141_v63 = vsub.f32 %v26117_v17, %v10047_v30  ;;  %v26633_v45 = vand.u32 4294901760, %v6000_v41 }
 0x5b7   :  { %31232 = vst [vmem:[#allocation124_spill] sm:$0xff] %v26623_v9  ;;  %v6323_v52 = vsub.f32 %v26602_v2, %v29954_v7  ;;  %v29955_v61 = vand.u32 4294901760, %v26623_v9  ;;  %v10175_v5 = vmul.f32 1.442695, %v10142_v37  ;;  %v5918_v36 = vsel %vm99_vm0, %v26613_v22, 0.0 }
 0x5b8   :  { %31233 = vst [vmem:[#allocation129_spill] sm:$0xff] %v26633_v45  ;;  %v29963_v57 = vand.u32 4294901760, %v26626_v50  ;;  %18797 = vmatmul.mubr.f32.gmra.mrb[116].mxu1 %v6304_v44  ;;  %v10173_v11 = vmul.f32 1.442695, %v10141_v63  ;;  %v26640_v19 = vsub.f32 %v6000_v41, %v26633_v45  ;;  %v26642_v39 = vand.u32 4294901760, %v6003_v24  ;;  %v10056_v4 = vpop.xlane.xlu0 %10055 }
 0x5b9   :  { %v6324_v18 = vand.u32 4294901760, %v6323_v52  ;;  %18799 = vmatprep.mubr.f32.mxu1 %v6314_v40  ;;  %v6333_v17 = vsub.f32 %v26623_v9, %v29955_v61  ;;  %22528 = vpow2.f32 %v10175_v5  ;;  %v10144_v44 = vsub.f32 %v26123_v48, %v10056_v4  ;;  %v10053_v52 = vpop.xlane.xlu1 %10052 }
 0x5ba   :  { %31234 = vst [vmem:[#allocation109_spill] sm:$0xff] %v26642_v39  ;;  %v6343_v37 = vsub.f32 %v26626_v50, %v29963_v57  ;;  %22530 = vpow2.f32 %v10173_v11  ;;  %v29960_v30 = vand.u32 4294901760, %v26640_v19  ;;  %5919 = vadd.xlane.f32.xlu0 %v5918_v36  ;;  %v26653_v41 = vsub.f32 %v6003_v24, %v26642_v39 }
 0x5bb   :  { %v10143_v40 = vsub.f32 %v26125_v38, %v10053_v52  ;;  %v6334_v63 = vand.u32 4294901760, %v6333_v17  ;;  %v10179_v61 = vmul.f32 1.442695, %v10144_v44  ;;  %v6006_v9 = vsel %vm99_vm0, %v26543_v31, 0 }
 0x5bc   :  { %v6344_v7 = vand.u32 4294901760, %v6343_v37  ;;  %18800 = vmatmul.mubr.f32.gmra.mrb[118].mxu1 %v6324_v18  ;;  %v6353_v48 = vsub.f32 %v26640_v19, %v29960_v30  ;;  %v29959_v5 = vand.u32 4294901760, %v26653_v41  ;;  %v26662_v36 = vand.u32 4294901760, %v6006_v9  ;;  %v10062_v24 = vpop.xlane.xlu0 %10061 }
 0x5bd   :  { %v10177_v11 = vmul.f32 1.442695, %v10143_v40  ;;  %18802 = vmatprep.mubr.f32.mxu1 %v6334_v63  ;;  %22532 = vpow2.f32 %v10179_v61  ;;  %v6009_v38 = vsel %vm99_vm0, %v26592_v23, 0  ;;  %v10146_v4 = vsub.f32 %v26131_v26, %v10062_v24  ;;  %v10059_v17 = vpop.xlane.xlu1 %10058 }
 0x5be   :  { %31235 = vst [vmem:[#allocation131_spill] sm:$0xff] %v26662_v36  ;;  %v6012_v31 = vsel %vm99_vm0, %v26573_v42, 0  ;;  %v6354_v18 = vand.u32 4294901760, %v6353_v48  ;;  %v6363_v37 = vsub.f32 %v26653_v41, %v29959_v5  ;;  %v26673_v44 = vsub.f32 %v6006_v9, %v26662_v36 }
 0x5bf   :  { %22534 = vpow2.f32 %v10177_v11  ;;  %v26675_v52 = vand.u32 4294901760, %v6009_v38  ;;  %v10183_v61 = vmul.f32 1.442695, %v10146_v4  ;;  %v10145_v23 = vsub.f32 %v26133_v34, %v10059_v17 }
 0x5c0   :  { %v26678_v40 = vand.u32 4294901760, %v6012_v31  ;;  %18803 = vmatmul.mubr.f32.gmra.mrb[120].mxu1 %v6344_v7  ;;  %v6364_v26 = vand.u32 4294901760, %v6363_v37  ;;  %v29958_v42 = vand.u32 4294901760, %v26673_v44  ;;  %v6015_v63 = vsel %vm99_vm0, %v26613_v22, 0  ;;  %v10068_v48 = vpop.xlane.xlu0 %10067 }
 0x5c1   :  { %31236 = vst [vmem:[#allocation118_spill] sm:$0xff] %v26675_v52  ;;  %18805 = vmatprep.mubr.f32.mxu1 %v6354_v18  ;;  %v26684_v11 = vsub.f32 %v6009_v38, %v26675_v52  ;;  %22536 = vpow2.f32 %v10183_v61  ;;  %v10181_v9 = vmul.f32 1.442695, %v10145_v23  ;;  %v10065_v34 = vpop.xlane.xlu1 %10064  ;;  %v26692_v4 = vand.u32 4294901760, %v6015_v63 }
 0x5c2   :  { %31237 = vst [vmem:[#allocation67_spill] sm:$0xff] %v26678_v40  ;;  %v26687_v24 = vsub.f32 %v6012_v31, %v26678_v40  ;;  %v6373_v7 = vsub.f32 %v26673_v44, %v29958_v42  ;;  %v10148_v17 = vsub.f32 %v26139_v49, %v10068_v48  ;;  %v10147_v22 = vsub.f32 %v26141_v0, %v10065_v34 }
 0x5c3   :  { %31238 = vst [vmem:[#allocation139_spill] sm:$0xff] %v26692_v4  ;;  %v26696_v18 = vpop.eup %22528  ;;  %v29961_v38 = vand.u32 4294901760, %v26684_v11  ;;  %22538 = vpow2.f32 %v10181_v9  ;;  %v26703_v23 = vsub.f32 %v6015_v63, %v26692_v4 }
 0x5c4   :  { %31239 = vst [vmem:[#allocation140_spill] sm:$0xff] %v26696_v18  ;;  %v29962_v37 = vand.u32 4294901760, %v26687_v24  ;;  %v26700_v31 = vpop.eup %22530  ;;  %18806 = vmatmul.mubr.f32.gmra.mrb[122].mxu1 %v6364_v26  ;;  %v6374_v61 = vand.u32 4294901760, %v6373_v7  ;;  %v10187_v42 = vmul.f32 1.442695, %v10148_v17  ;;  %v10074_v5 = vpop.xlane.xlu0 %10073 }
 0x5c5   :  { %31240 = vst [vmem:[#allocation144_spill] sm:$0xff] %v26700_v31  ;;  %v6383_v49 = vsub.f32 %v26684_v11, %v29961_v38  ;;  %v10185_v48 = vmul.f32 1.442695, %v10147_v22  ;;  %v10071_v9 = vpop.xlane.xlu1 %10070  ;;  %v29964_v34 = vand.u32 4294901760, %v26703_v23  ;;  %v10150_v26 = vsub.f32 %v26147_v6, %v10074_v5 }
 0x5c6   :  { %v6393_v0 = vsub.f32 %v26687_v24, %v29962_v37  ;;  %18808 = vmatprep.mubr.f32.mxu1 %v6374_v61  ;;  %22540 = vpow2.f32 %v10187_v42  ;;  %v10149_v63 = vsub.f32 %v26149_v28, %v10071_v9  ;;  %v10240_v42 = vsel %vm99_vm0, %v26696_v18, 0.0  ;;  %v31316_v18 = vld [vmem:[#allocation106_spill] sm:$0xff] }
 0x5c7   :  { %v26714_v7 = vpop.eup %22532  ;;  %v6384_v17 = vand.u32 4294901760, %v6383_v49  ;;  %22542 = vpow2.f32 %v10185_v48  ;;  %v6403_v22 = vsub.f32 %v26703_v23, %v29964_v34  ;;  %v10191_v37 = vmul.f32 1.442695, %v10150_v26  ;;  %10241 = vadd.xlane.f32.xlu0 %v10240_v42  ;;  %v31263_v34 = vld [vmem:[#allocation24_spill] sm:$0xff] }
 0x5c8   :  { %31241 = vst [vmem:[#allocation145_spill] sm:$0xff] %v26714_v7  ;;  %v6394_v30 = vand.u32 4294901760, %v6393_v0  ;;  %v10189_v61 = vmul.f32 1.442695, %v10149_v63  ;;  %v10080_v57 = vpop.xlane.xlu0 %10079  ;;  %v10237_v6 = vsel %vm99_vm0, %v26700_v31, 0.0  ;;  %v10246_v48 = vsel %vm99_vm0, %v26714_v7, 0.0 }
 0x5c9   :  { %v26716_v38 = vpop.eup %22534  ;;  %18809 = vmatmul.mubr.f32.gmra.mrb[124].mxu1 %v6384_v17  ;;  %v10152_v28 = vsub.f32 %v26155_v15, %v10080_v57  ;;  %v10077_v5 = vpop.xlane.xlu1 %10076  ;;  %v6404_v49 = vand.u32 4294901760, %v6403_v22  ;;  %22544 = vpow2.f32 %v10191_v37  ;;  %10238 = vadd.xlane.f32.xlu1 %v10237_v6  ;;  %v31314_v7 = vld [vmem:[#allocation102_spill] sm:$0xff] }
 0x5ca   :  { %31242 = vst [vmem:[#allocation146_spill] sm:$0xff] %v26716_v38  ;;  %18811 = vmatprep.mubr.f32.mxu1 %v6394_v30  ;;  %v10151_v0 = vsub.f32 %v26157_v10, %v10077_v5  ;;  %22546 = vpow2.f32 %v10189_v61  ;;  %v10243_v63 = vsel %vm99_vm0, %v26716_v38, 0.0  ;;  %v31315_v38 = vld [vmem:[#allocation108_spill] sm:$0xff]  ;;  %v31317_v31 = vld [vmem:[#allocation14_spill] sm:$0xff] }
 0x5cb   :  { %v26729_v9 = vpop.eup %22536  ;;  %v10195_v26 = vmul.f32 1.442695, %v10152_v28  ;;  %10247 = vadd.xlane.f32.xlu0 %v10246_v48 }
 0x5cc   :  { %31243 = vst [vmem:[#allocation150_spill] sm:$0xff] %v26729_v9  ;;  %v10193_v17 = vmul.f32 1.442695, %v10151_v0  ;;  %v10086_v42 = vpop.xlane.xlu0 %10085  ;;  %v10252_v37 = vsel %vm99_vm0, %v26729_v9, 0.0  ;;  %v31312_v9 = vld [vmem:[#allocation103_spill] sm:$0xff] }
 0x5cd   :  { %v26733_v15 = vpop.eup %22538  ;;  %18812 = vmatmul.mubr.f32.gmra.mrb[126].mxu1 %v6404_v49  ;;  %22548 = vpow2.f32 %v10195_v26  ;;  %v10154_v57 = vsub.f32 %v26163_v8, %v10086_v42  ;;  %v10083_v10 = vpop.xlane.xlu1 %10082  ;;  %10244 = vadd.xlane.f32.xlu1 %v10243_v63  ;;  %v31247_v26 = vld [vmem:[#allocation44_spill] sm:$0xff] }
 0x5ce   :  { %31244 = vst [vmem:[#allocation11_spill] sm:$0xff] %v26733_v15  ;;  %18830 = vmatprep.mubr.f32.mxu1 %v26258_v3  ;;  %v10153_v30 = vsub.f32 %v26165_v55, %v10083_v10  ;;  %22550 = vpow2.f32 %v10193_v17  ;;  %v10249_v28 = vsel %vm99_vm0, %v26733_v15, 0.0  ;;  %v31313_v15 = vld [vmem:[#allocation100_spill] sm:$0xff] }
 0x5cf   :  { %v10199_v22 = vmul.f32 1.442695, %v10154_v57  ;;  %10253 = vadd.xlane.f32.xlu0 %v10252_v37  ;;  %v31251_v37 = vld [vmem:[#allocation28_spill] sm:$0xff] }
 0x5d0   :  { %v26740_v61 = vpop.eup %22540  ;;  %v10197_v6 = vmul.f32 1.442695, %v10153_v30  ;;  %v10092_v5 = vpop.xlane.xlu0 %10091 }
 0x5d1   :  { %31245 = vst [vmem:[#allocation151_spill] sm:$0xff] %v26740_v61  ;;  %v26744_v49 = vpop.eup %22542  ;;  %18831 = vmatmul.mubr.f32.vlgmr.msra.gmra.mrb[96].mxu1 %v26252_v21  ;;  %22552 = vpow2.f32 %v10199_v22  ;;  %v10156_v8 = vsub.f32 %v26171_v1, %v10092_v5  ;;  %v10089_v55 = vpop.xlane.xlu1 %10088  ;;  %v10258_v48 = vsel %vm99_vm0, %v26740_v61, 0.0  ;;  %10250 = vadd.xlane.f32.xlu1 %v10249_v28  ;;  %v31253_v5 = vld [vmem:[#allocation46_spill] sm:$0xff]  ;;  %v31310_v61 = vld [vmem:[#allocation99_spill] sm:$0xff] }
 0x5d2   :  { %31246 = vst [vmem:[#allocation17_spill] sm:$0xff] %v26744_v49  ;;  %20753 = vmatpush3.bf16.msra.mxu1 %v31210_v51  ;;  %18833 = vmatprep.mubr.f32.mxu1 %v26275_v32  ;;  %v10155_v0 = vsub.f32 %v26173_v56, %v10089_v55  ;;  %22554 = vpow2.f32 %v10197_v6  ;;  %v10255_v1 = vsel %vm99_vm0, %v26744_v49, 0.0  ;;  %v31250_v56 = vld [vmem:[#allocation26_spill] sm:$0xff] }
 0x5d3   :  { %20755 = vmatprep.subr.bf16.mxu1 %v31247_v26  ;;  %v10203_v63 = vmul.f32 1.442695, %v10156_v8  ;;  %v26754_v17 = vpop.eup %22544  ;;  %10259 = vadd.xlane.f32.xlu0 %v10258_v48  ;;  %v31311_v49 = vld [vmem:[#allocation62_spill] sm:$0xff] }
 0x5d4   :  { %31248 = vst [vmem:[#allocation152_spill] sm:$0xff] %v26754_v17  ;;  %v10201_v42 = vmul.f32 1.442695, %v10155_v0  ;;  %v10098_v57 = vpop.xlane.xlu0 %10097  ;;  %v26758_v51 = vpop.eup %22546  ;;  %v10264_v6 = vsel %vm99_vm0, %v26754_v17, 0.0  ;;  %v31308_v17 = vld [vmem:[#allocation93_spill] sm:$0xff] }
 0x5d5   :  { %31249 = vst [vmem:[#allocation19_spill] sm:$0xff] %v26758_v51  ;;  %18834 = vmatmul.mubr.f32.gmra.mrb[98].mxu1 %v26290_v58  ;;  %22556 = vpow2.f32 %v10203_v63  ;;  %v10158_v10 = vsub.f32 %v31250_v56, %v10098_v57  ;;  %v10095_v30 = vpop.xlane.xlu1 %10094  ;;  %10256 = vadd.xlane.f32.xlu1 %v10255_v1  ;;  %v10261_v0 = vsel %vm99_vm0, %v26758_v51, 0.0  ;;  %v31255_v63 = vld [vmem:[#allocation8_spill] sm:$0xff]  ;;  %v31309_v51 = vld [vmem:[#allocation97_spill] sm:$0xff] }
 0x5d6   :  { %20757 = vmatpush3.bf16.msra.mxu1 %v31247_v26  ;;  %18836 = vmatprep.mubr.f32.mxu1 %v26292_v54  ;;  %v10157_v22 = vsub.f32 %v31251_v37, %v10095_v30  ;;  %22558 = vpow2.f32 %v10201_v42  ;;  %v31256_v42 = vld [vmem:[#allocation35_spill] sm:$0xff] }
 0x5d7   :  { %v26767_v28 = vpop.eup %22548  ;;  %20759 = vmatprep.subr.bf16.mxu1 %v31253_v5  ;;  %v10207_v8 = vmul.f32 1.442695, %v10158_v10  ;;  %10265 = vadd.xlane.f32.xlu0 %v10264_v6  ;;  %v31258_v37 = vld [vmem:[#allocation47_spill] sm:$0xff] }
 0x5d8   :  { %31252 = vst [vmem:[#allocation153_spill] sm:$0xff] %v26767_v28  ;;  %v10205_v55 = vmul.f32 1.442695, %v10157_v22  ;;  %v10104_v48 = vpop.xlane.xlu0 %10103  ;;  %v26772_v26 = vpop.eup %22550  ;;  %v10270_v10 = vsel %vm99_vm0, %v26767_v28, 0.0  ;;  %v31266_v28 = vld [vmem:[#allocation10_spill] sm:$0xff] }
 0x5d9   :  { %31254 = vst [vmem:[#allocation29_spill] sm:$0xff] %v26772_v26  ;;  %18837 = vmatmul.mubr.f32.gmra.mrb[100].mxu1 %v26316_v14  ;;  %22560 = vpow2.f32 %v10207_v8  ;;  %v10160_v57 = vsub.f32 %v31255_v63, %v10104_v48  ;;  %v10101_v56 = vpop.xlane.xlu1 %10100  ;;  %10262 = vadd.xlane.f32.xlu1 %v10261_v0  ;;  %v10267_v8 = vsel %vm99_vm0, %v26772_v26, 0.0  ;;  %v31260_v63 = vld [vmem:[#allocation37_spill] sm:$0xff] }
 0x5da   :  { %20761 = vmatpush3.bf16.msra.mxu1 %v31253_v5  ;;  %18839 = vmatprep.mubr.f32.mxu1 %v26311_v47  ;;  %v10159_v1 = vsub.f32 %v31256_v42, %v10101_v56  ;;  %22562 = vpow2.f32 %v10205_v55  ;;  %v31261_v55 = vld [vmem:[#allocation41_spill] sm:$0xff] }
 0x5db   :  { %v26781_v30 = vpop.eup %22552  ;;  %20763 = vmatprep.subr.bf16.mxu1 %v31258_v37  ;;  %v10211_v22 = vmul.f32 1.442695, %v10160_v57  ;;  %10271 = vadd.xlane.f32.xlu0 %v10270_v10 }
 0x5dc   :  { %31257 = vst [vmem:[#allocation154_spill] sm:$0xff] %v26781_v30  ;;  %v10209_v6 = vmul.f32 1.442695, %v10159_v1  ;;  %v10110_v48 = vpop.xlane.xlu0 %10109  ;;  %v26786_v5 = vpop.eup %22554  ;;  %v10276_v57 = vsel %vm99_vm0, %v26781_v30, 0.0 }
 0x5dd   :  { %31259 = vst [vmem:[#allocation31_spill] sm:$0xff] %v26786_v5  ;;  %18840 = vmatmul.mubr.f32.gmra.mrb[102].mxu1 %v26345_v25  ;;  %22564 = vpow2.f32 %v10211_v22  ;;  %v10162_v56 = vsub.f32 %v31260_v63, %v10110_v48  ;;  %v10107_v42 = vpop.xlane.xlu1 %10106  ;;  %10268 = vadd.xlane.f32.xlu1 %v10267_v8  ;;  %v10273_v48 = vsel %vm99_vm0, %v26786_v5, 0.0 }
 0x5de   :  { %20765 = vmatpush3.bf16.msra.mxu1 %v31258_v37  ;;  %18842 = vmatprep.mubr.f32.mxu1 %v26365_v27  ;;  %v10161_v0 = vsub.f32 %v31261_v55, %v10107_v42  ;;  %22566 = vpow2.f32 %v10209_v6  ;;  %v31265_v42 = vld [vmem:[#allocation50_spill] sm:$0xff] }
 0x5df   :  { %v26795_v1 = vpop.eup %22556  ;;  %20767 = vmatprep.subr.bf16.mxu1 %v31263_v34  ;;  %v10215_v22 = vmul.f32 1.442695, %v10162_v56  ;;  %10277 = vadd.xlane.f32.xlu0 %v10276_v57 }
 0x5e0   :  { %31262 = vst [vmem:[#allocation155_spill] sm:$0xff] %v26795_v1  ;;  %v10213_v10 = vmul.f32 1.442695, %v10161_v0  ;;  %v10116_v63 = vpop.xlane.xlu0 %10115  ;;  %v26800_v37 = vpop.eup %22558  ;;  %v10282_v8 = vsel %vm99_vm0, %v26795_v1, 0.0 }
 0x5e1   :  { %31264 = vst [vmem:[#allocation33_spill] sm:$0xff] %v26800_v37  ;;  %18843 = vmatmul.mubr.f32.gmra.mrb[104].mxu1 %v26370_v20  ;;  %22568 = vpow2.f32 %v10215_v22  ;;  %v10164_v55 = vsub.f32 %v31265_v42, %v10116_v63  ;;  %v10113_v30 = vpop.xlane.xlu1 %10112  ;;  %10274 = vadd.xlane.f32.xlu1 %v10273_v48  ;;  %v10279_v22 = vsel %vm99_vm0, %v26800_v37, 0.0  ;;  %v31270_v42 = vld [vmem:[#allocation53_spill] sm:$0xff] }
 0x5e2   :  { %18845 = vmatprep.mubr.f32.mxu1 %v26382_v59  ;;  %v10163_v6 = vsub.f32 %v31266_v28, %v10113_v30  ;;  %22570 = vpow2.f32 %v10213_v10  ;;  %v31269_v28 = vld [vmem:[#allocation51_spill] sm:$0xff] }
 0x5e3   :  { %v26808_v56 = vpop.eup %22560  ;;  %v10219_v0 = vmul.f32 1.442695, %v10164_v55  ;;  %10283 = vadd.xlane.f32.xlu0 %v10282_v8 }
 0x5e4   :  { %31267 = vst [vmem:[#allocation156_spill] sm:$0xff] %v26808_v56  ;;  %v10217_v5 = vmul.f32 1.442695, %v10163_v6  ;;  %v10122_v57 = vpop.xlane.xlu0 %10121  ;;  %v26812_v26 = vpop.eup %22562  ;;  %v10288_v48 = vsel %vm99_vm0, %v26808_v56, 0.0 }
 0x5e5   :  { %31268 = vst [vmem:[#allocation39_spill] sm:$0xff] %v26812_v26  ;;  %18846 = vmatmul.mubr.f32.gmra.mrb[106].mxu1 %v26405_v12  ;;  %22572 = vpow2.f32 %v10219_v0  ;;  %v10166_v30 = vsub.f32 %v31269_v28, %v10122_v57  ;;  %v10119_v63 = vpop.xlane.xlu1 %10118  ;;  %10280 = vadd.xlane.f32.xlu1 %v10279_v22  ;;  %v10285_v0 = vsel %vm99_vm0, %v26812_v26, 0.0  ;;  %v31273_v57 = vld [vmem:[#allocation57_spill] sm:$0xff] }
 0x5e6   :  { %18848 = vmatprep.mubr.f32.mxu1 %v26432_v35  ;;  %v10165_v10 = vsub.f32 %v31270_v42, %v10119_v63  ;;  %22574 = vpow2.f32 %v10217_v5  ;;  %v31274_v42 = vld [vmem:[#allocation58_spill] sm:$0xff] }
 0x5e7   :  { %v26820_v55 = vpop.eup %22564  ;;  %v10223_v6 = vmul.f32 1.442695, %v10166_v30  ;;  %10289 = vadd.xlane.f32.xlu0 %v10288_v48 }
 0x5e8   :  { %31271 = vst [vmem:[#allocation43_spill] sm:$0xff] %v26820_v55  ;;  %v10221_v1 = vmul.f32 1.442695, %v10165_v10  ;;  %v10128_v8 = vpop.xlane.xlu0 %10127  ;;  %v26824_v37 = vpop.eup %22566  ;;  %v10294_v22 = vsel %vm99_vm0, %v26820_v55, 0.0 }
 0x5e9   :  { %31272 = vst [vmem:[#allocation13_spill] sm:$0xff] %v26824_v37  ;;  %18849 = vmatmul.mubr.f32.gmra.mrb[108].mxu1 %v26442_v43  ;;  %22576 = vpow2.f32 %v10223_v6  ;;  %v10168_v28 = vsub.f32 %v31273_v57, %v10128_v8  ;;  %v10125_v63 = vpop.xlane.xlu1 %10124  ;;  %10286 = vadd.xlane.f32.xlu1 %v10285_v0  ;;  %v10291_v6 = vsel %vm99_vm0, %v26824_v37, 0.0  ;;  %v31277_v8 = vld [vmem:[#allocation66_spill] sm:$0xff] }
 0x5ea   :  { %18851 = vmatprep.mubr.f32.mxu1 %v26451_v60  ;;  %v10167_v5 = vsub.f32 %v31274_v42, %v10125_v63  ;;  %22578 = vpow2.f32 %v10221_v1  ;;  %v31278_v42 = vld [vmem:[#allocation64_spill] sm:$0xff] }
 0x5eb   :  { %v26832_v30 = vpop.eup %22568  ;;  %v10227_v10 = vmul.f32 1.442695, %v10168_v28  ;;  %10295 = vadd.xlane.f32.xlu0 %v10294_v22 }
 0x5ec   :  { %31275 = vst [vmem:[#allocation45_spill] sm:$0xff] %v26832_v30  ;;  %v10225_v56 = vmul.f32 1.442695, %v10167_v5  ;;  %v10134_v48 = vpop.xlane.xlu0 %10133  ;;  %v26836_v26 = vpop.eup %22570  ;;  %v10300_v0 = vsel %vm99_vm0, %v26832_v30, 0.0 }
 0x5ed   :  { %31276 = vst [vmem:[#allocation54_spill] sm:$0xff] %v26836_v26  ;;  %18852 = vmatmul.mubr.f32.gmra.mrb[110].mxu1 %v26477_v53  ;;  %22580 = vpow2.f32 %v10227_v10  ;;  %v10170_v57 = vsub.f32 %v31277_v8, %v10134_v48  ;;  %v10131_v63 = vpop.xlane.xlu1 %10130  ;;  %10292 = vadd.xlane.f32.xlu1 %v10291_v6  ;;  %v10297_v10 = vsel %vm99_vm0, %v26836_v26, 0.0  ;;  %v31281_v48 = vld [vmem:[#allocation68_spill] sm:$0xff] }
 0x5ee   :  { %18854 = vmatprep.mubr.f32.mxu1 %v26493_v33  ;;  %v10169_v1 = vsub.f32 %v31278_v42, %v10131_v63  ;;  %22582 = vpow2.f32 %v10225_v56  ;;  %v31282_v42 = vld [vmem:[#allocation74_spill] sm:$0xff]  ;;  %v31307_v26 = vld [vmem:[#allocation48_spill] sm:$0xff] }
 0x5ef   :  { %v26844_v28 = vpop.eup %22572  ;;  %v10231_v5 = vmul.f32 1.442695, %v10170_v57  ;;  %10301 = vadd.xlane.f32.xlu0 %v10300_v0 }
 0x5f0   :  { %31279 = vst [vmem:[#allocation55_spill] sm:$0xff] %v26844_v28  ;;  %v10229_v55 = vmul.f32 1.442695, %v10169_v1  ;;  %v10140_v22 = vpop.xlane.xlu0 %10139  ;;  %v26848_v37 = vpop.eup %22574  ;;  %v10306_v6 = vsel %vm99_vm0, %v26844_v28, 0.0  ;;  %v31305_v28 = vld [vmem:[#allocation114_spill] sm:$0xff] }
 0x5f1   :  { %31280 = vst [vmem:[#allocation23_spill] sm:$0xff] %v26848_v37  ;;  %18855 = vmatmul.mubr.f32.gmra.mrb[112].mxu1 %v26511_v62  ;;  %22584 = vpow2.f32 %v10231_v5  ;;  %v10172_v8 = vsub.f32 %v31281_v48, %v10140_v22  ;;  %v10137_v63 = vpop.xlane.xlu1 %10136  ;;  %10298 = vadd.xlane.f32.xlu1 %v10297_v10  ;;  %v10303_v5 = vsel %vm99_vm0, %v26848_v37, 0.0  ;;  %v31285_v22 = vld [vmem:[#allocation21_spill] sm:$0xff]  ;;  %v31306_v37 = vld [vmem:[#allocation92_spill] sm:$0xff] }
 0x5f2   :  { %18857 = vmatprep.mubr.f32.mxu1 %v26519_v16  ;;  %v10171_v56 = vsub.f32 %v31282_v42, %v10137_v63  ;;  %22586 = vpow2.f32 %v10229_v55  ;;  %v31289_v42 = vld [vmem:[#allocation15_spill] sm:$0xff] }
 0x5f3   :  { %v26856_v57 = vpop.eup %22576  ;;  %v10235_v1 = vmul.f32 1.442695, %v10172_v8  ;;  %10307 = vadd.xlane.f32.xlu0 %v10306_v6  ;;  %v31288_v8 = vld [vmem:[#allocation12_spill] sm:$0xff] }
 0x5f4   :  { %31283 = vst [vmem:[#allocation112_spill] sm:$0xff] %v26856_v57  ;;  %v10233_v30 = vmul.f32 1.442695, %v10171_v56  ;;  %v26860_v0 = vpop.eup %22578  ;;  %v10312_v48 = vsel %vm99_vm0, %v26856_v57, 0.0 }
 0x5f5   :  { %31284 = vst [vmem:[#allocation61_spill] sm:$0xff] %v26860_v0  ;;  %18858 = vmatmul.mubr.f32.gmra.mrb[114].mxu1 %v26539_v29  ;;  %22588 = vpow2.f32 %v10235_v1  ;;  %10304 = vadd.xlane.f32.xlu1 %v10303_v5  ;;  %v10309_v55 = vsel %vm99_vm0, %v26860_v0, 0.0  ;;  %v31292_v5 = vld [vmem:[#allocation22_spill] sm:$0xff]  ;;  %v31304_v0 = vld [vmem:[#allocation36_spill] sm:$0xff] }
 0x5f6   :  { %18860 = vmatprep.mubr.f32.mxu1 %v31285_v22  ;;  %22590 = vpow2.f32 %v10233_v30 }
 0x5f7   :  { %v26866_v63 = vpop.eup %22580  ;;  %10313 = vadd.xlane.f32.xlu0 %v10312_v48 }
 0x5f8   :  { %31286 = vst [vmem:[#allocation63_spill] sm:$0xff] %v26866_v63  ;;  %v26870_v10 = vpop.eup %22582  ;;  %v10318_v56 = vsel %vm99_vm0, %v26866_v63, 0.0 }
 0x5f9   :  { %31287 = vst [vmem:[#allocation69_spill] sm:$0xff] %v26870_v10  ;;  %18861 = vmatmul.mubr.f32.gmra.mrb[116].mxu1 %v31288_v8  ;;  %10310 = vadd.xlane.f32.xlu1 %v10309_v55  ;;  %v10315_v30 = vsel %vm99_vm0, %v26870_v10, 0.0  ;;  %v31303_v10 = vld [vmem:[#allocation87_spill] sm:$0xff] }
 0x5fa   :  { %18863 = vmatprep.mubr.f32.mxu1 %v31289_v42 }
 0x5fb   :  { %v26876_v6 = vpop.eup %22584  ;;  %10319 = vadd.xlane.f32.xlu0 %v10318_v56 }
 0x5fc   :  { %31290 = vst [vmem:[#allocation70_spill] sm:$0xff] %v26876_v6  ;;  %v26880_v1 = vpop.eup %22586  ;;  %v10324_v48 = vsel %vm99_vm0, %v26876_v6, 0.0 }
 0x5fd   :  { %31291 = vst [vmem:[#allocation115_spill] sm:$0xff] %v26880_v1  ;;  %18864 = vmatmul.mubr.f32.gmra.mrb[118].mxu1 %v31292_v5  ;;  %10316 = vadd.xlane.f32.xlu1 %v10315_v30  ;;  %v10321_v63 = vsel %vm99_vm0, %v26880_v1, 0.0  ;;  %v31295_v30 = vld [vmem:[#allocation9_spill] sm:$0xff] }
 0x5fe   :  { %18866 = vmatprep.mubr.f32.mxu1 %v26607_v13  ;;  %v31302_v1 = vld [vmem:[#allocation85_spill] sm:$0xff] }
 0x5ff   :  { %v26886_v57 = vpop.eup %22588  ;;  %10325 = vadd.xlane.f32.xlu0 %v10324_v48  ;;  %v31296_v48 = vld [vmem:[#allocation75_spill] sm:$0xff]  ;;  %v31326_v5 = vld [vmem:[#allocation49_spill] sm:$0xff] }
 0x600   :  { %31293 = vst [vmem:[#allocation73_spill] sm:$0xff] %v26886_v57  ;;  %v26890_v55 = vpop.eup %22590  ;;  %v10330_v56 = vsel %vm99_vm0, %v26886_v57, 0.0  ;;  %v31298_v57 = vld [vmem:[#allocation30_spill] sm:$0xff] }
 0x601   :  { %31294 = vst [vmem:[#allocation76_spill] sm:$0xff] %v26890_v55  ;;  %18867 = vmatmul.mubr.f32.gmra.mrb[120].mxu1 %v26611_v46  ;;  %10322 = vadd.xlane.f32.xlu1 %v10321_v63  ;;  %v10327_v6 = vsel %vm99_vm0, %v26890_v55, 0.0  ;;  %v31297_v63 = vld [vmem:[#allocation111_spill] sm:$0xff]  ;;  %v31301_v55 = vld [vmem:[#allocation32_spill] sm:$0xff]  ;;  %v31324_v46 = vand.u32 4294901760, %v31296_v48 }
 0x602   :  { %18869 = vmatprep.mubr.f32.mxu1 %v26633_v45  ;;  %v31323_v45 = vand.u32 4294901760, %v31295_v30  ;;  %v31325_v13 = vand.u32 4294901760, %v31297_v63 }
 0x603   :  { %10331 = vadd.xlane.f32.xlu0 %v10330_v56  ;;  %v31299_v56 = vld [vmem:[#allocation78_spill] sm:$0xff] }
 0x604   :  { %v31327_v42 = vand.u32 4294901760, %v31299_v56 }
 0x605   :  { %18870 = vmatmul.mubr.f32.gmra.mrb[122].mxu1 %v26642_v39  ;;  %10328 = vadd.xlane.f32.xlu1 %v10327_v6  ;;  %v31300_v6 = vld [vmem:[#allocation81_spill] sm:$0xff]  ;;  %v31322_v39 = vld [vmem:[#allocation124_spill] sm:$0xff] }
 0x606   :  { %18872 = vmatprep.mubr.f32.mxu1 %v26662_v36  ;;  %v31321_v36 = vld [vmem:[#allocation121_spill] sm:$0xff]  ;;  %v31328_v8 = vand.u32 4294901760, %v31300_v6 }
 0x609   :  { %18873 = vmatmul.mubr.f32.gmra.mrb[124].mxu1 %v26675_v52  ;;  %v31320_v52 = vld [vmem:[#allocation113_spill] sm:$0xff] }
 0x60a   :  { %18875 = vmatprep.mubr.f32.mxu1 %v26678_v40  ;;  %v31319_v40 = vld [vmem:[#allocation25_spill] sm:$0xff] }
 0x60d   :  { %18876 = vmatmul.mubr.f32.gmra.mrb[126].mxu1 %v26692_v4  ;;  %v31318_v4 = vld [vmem:[#allocation20_spill] sm:$0xff] }
 0x60e   :  { %18894 = vmatprep.mubr.f32.mxu1 %v31295_v30  ;;  %v31329_v30 = vld [vmem:[#allocation52_spill] sm:$0xff] }
 0x611   :  { %18895 = vmatmul.mubr.f32.vlgmr.msra.gmra.mrb[96].mxu1 %v31296_v48  ;;  %v31341_v48 = vand.u32 4294901760, %v31314_v7 }
 0x612   :  { %20769 = vmatpush3.bf16.msra.mxu1 %v31263_v34  ;;  %18897 = vmatprep.mubr.f32.mxu1 %v31297_v63  ;;  %v31369_v63 = vld [vmem:[#allocation139_spill] sm:$0xff] }
 0x613   :  { %20771 = vmatprep.subr.bf16.mxu1 %v31298_v57 }
 0x615   :  { %18898 = vmatmul.mubr.f32.gmra.mrb[98].mxu1 %v31299_v56  ;;  %v31370_v56 = vld [vmem:[#allocation71_spill] sm:$0xff] }
 0x616   :  { %20773 = vmatpush3.bf16.msra.mxu1 %v31298_v57  ;;  %18900 = vmatprep.mubr.f32.mxu1 %v31300_v6  ;;  %v31371_v6 = vld [vmem:[#allocation77_spill] sm:$0xff] }
 0x617   :  { %20775 = vmatprep.subr.bf16.mxu1 %v31301_v55 }
 0x619   :  { %18901 = vmatmul.mubr.f32.gmra.mrb[100].mxu1 %v31302_v1 }
 0x61a   :  { %20777 = vmatpush3.bf16.msra.mxu1 %v31301_v55  ;;  %18903 = vmatprep.mubr.f32.mxu1 %v31303_v10 }
 0x61b   :  { %20779 = vmatprep.subr.bf16.mxu1 %v31304_v0 }
 0x61d   :  { %18904 = vmatmul.mubr.f32.gmra.mrb[102].mxu1 %v31305_v28 }
 0x61e   :  { %20781 = vmatpush3.bf16.msra.mxu1 %v31304_v0  ;;  %18906 = vmatprep.mubr.f32.mxu1 %v31306_v37 }
 0x61f   :  { %20783 = vmatprep.subr.bf16.mxu1 %v31307_v26 }
 0x621   :  { %18907 = vmatmul.mubr.f32.gmra.mrb[104].mxu1 %v31308_v17 }
 0x622   :  { %18909 = vmatprep.mubr.f32.mxu1 %v31309_v51 }
 0x625   :  { %18910 = vmatmul.mubr.f32.gmra.mrb[106].mxu1 %v31310_v61 }
 0x626   :  { %18912 = vmatprep.mubr.f32.mxu1 %v31311_v49 }
 0x629   :  { %18913 = vmatmul.mubr.f32.gmra.mrb[108].mxu1 %v31312_v9 }
 0x62a   :  { %18915 = vmatprep.mubr.f32.mxu1 %v31313_v15 }
 0x62d   :  { %18916 = vmatmul.mubr.f32.gmra.mrb[110].mxu1 %v31314_v7  ;;  %v31348_v7 = vand.u32 4294901760, %v31321_v36 }
 0x62e   :  { %18918 = vmatprep.mubr.f32.mxu1 %v31315_v38 }
 0x631   :  { %18919 = vmatmul.mubr.f32.gmra.mrb[112].mxu1 %v31316_v18 }
 0x632   :  { %18921 = vmatprep.mubr.f32.mxu1 %v31317_v31 }
 0x635   :  { %18922 = vmatmul.mubr.f32.gmra.mrb[114].mxu1 %v31318_v4 }
 0x636   :  { %18924 = vmatprep.mubr.f32.mxu1 %v31319_v40 }
 0x639   :  { %18925 = vmatmul.mubr.f32.gmra.mrb[116].mxu1 %v31320_v52 }
 0x63a   :  { %18927 = vmatprep.mubr.f32.mxu1 %v31321_v36  ;;  %v31355_v36 = vand.u32 4294901760, %v26684_v11 }
 0x63d   :  { %18928 = vmatmul.mubr.f32.gmra.mrb[118].mxu1 %v26602_v2 }
 0x63e   :  { %18930 = vmatprep.mubr.f32.mxu1 %v31322_v39 }
 0x641   :  { %18931 = vmatmul.mubr.f32.gmra.mrb[120].mxu1 %v26626_v50 }
 0x642   :  { %18933 = vmatprep.mubr.f32.mxu1 %v26640_v19 }
 0x645   :  { %18934 = vmatmul.mubr.f32.gmra.mrb[122].mxu1 %v26653_v41 }
 0x646   :  { %18936 = vmatprep.mubr.f32.mxu1 %v26673_v44 }
 0x649   :  { %18937 = vmatmul.mubr.f32.gmra.mrb[124].mxu1 %v26684_v11  ;;  %v31362_v11 = vld [vmem:[#allocation123_spill] sm:$0xff] }
 0x64a   :  { %18939 = vmatprep.mubr.f32.mxu1 %v26687_v24 }
 0x64d   :  { %18940 = vmatmul.mubr.f32.gmra.mrb[126].mxu1 %v26703_v23 }
 0x64e   :  { %18958 = vmatprep.mubr.f32.mxu1 %v31323_v45  ;;  %v31330_v45 = vand.u32 4294901760, %v31302_v1  ;;  %v31336_v1 = vand.u32 4294901760, %v31309_v51  ;;  %v31343_v51 = vand.u32 4294901760, %v31316_v18  ;;  %v31350_v18 = vand.u32 4294901760, %v31322_v39 }
 0x64f   :  { %v31357_v39 = vand.u32 4294901760, %v26703_v23  ;;  %v31364_v23 = vld [vmem:[#allocation129_spill] sm:$0xff] }
 0x651   :  { %18959 = vmatmul.mubr.f32.vlgmr.msra.gmra.mrb[96].mxu1 %v31324_v46  ;;  %v31331_v46 = vand.u32 4294901760, %v31303_v10  ;;  %v31337_v10 = vand.u32 4294901760, %v31310_v61  ;;  %v31344_v61 = vand.u32 4294901760, %v31317_v31  ;;  %v31351_v31 = vand.u32 4294901760, %v26626_v50  ;;  %v31358_v50 = vld [vmem:[#allocation65_spill] sm:$0xff] }
 0x652   :  { %20785 = vmatpush3.bf16.msra.mxu1 %v31307_v26  ;;  %18961 = vmatprep.mubr.f32.mxu1 %v31325_v13  ;;  %v31332_v13 = vld [vmem:[#allocation59_spill] sm:$0xff]  ;;  %v31333_v26 = vand.u32 4294901760, %v31305_v28  ;;  %v31339_v28 = vand.u32 4294901760, %v31312_v9  ;;  %v31346_v9 = vand.u32 4294901760, %v31319_v40  ;;  %v31353_v40 = vand.u32 4294901760, %v26653_v41 }
 0x653   :  { %20787 = vmatprep.subr.bf16.mxu1 %v31326_v5  ;;  %v31360_v41 = vld [vmem:[#allocation15_spill] sm:$0xff] }
 0x655   :  { %18962 = vmatmul.mubr.f32.gmra.mrb[98].mxu1 %v31327_v42  ;;  %v31334_v42 = vand.u32 4294901760, %v31306_v37  ;;  %v31340_v37 = vand.u32 4294901760, %v31313_v15  ;;  %v31347_v15 = vand.u32 4294901760, %v31320_v52  ;;  %v31354_v52 = vand.u32 4294901760, %v26673_v44  ;;  %v31361_v44 = vld [vmem:[#allocation22_spill] sm:$0xff] }
 0x656   :  { %20789 = vmatpush3.bf16.msra.mxu1 %v31326_v5  ;;  %18964 = vmatprep.mubr.f32.mxu1 %v31328_v8  ;;  %v31335_v8 = vand.u32 4294901760, %v31308_v17  ;;  %v31338_v5 = vand.u32 4294901760, %v31311_v49  ;;  %v31342_v17 = vand.u32 4294901760, %v31315_v38  ;;  %v31345_v49 = vand.u32 4294901760, %v31318_v4 }
 0x657   :  { %20791 = vmatprep.subr.bf16.mxu1 %v31329_v30  ;;  %v31349_v38 = vand.u32 4294901760, %v26602_v2  ;;  %v31352_v4 = vand.u32 4294901760, %v26640_v19  ;;  %v31356_v2 = vand.u32 4294901760, %v26687_v24  ;;  %v31359_v19 = vld [vmem:[#allocation12_spill] sm:$0xff] }
 0x658   :  { %v31363_v24 = vld [vmem:[#allocation60_spill] sm:$0xff] }
 0x659   :  { %18965 = vmatmul.mubr.f32.gmra.mrb[100].mxu1 %v31330_v45 }
 0x65a   :  { %20793 = vmatpush3.bf16.msra.mxu1 %v31329_v30  ;;  %18967 = vmatprep.mubr.f32.mxu1 %v31331_v46  ;;  %v31382_v46 = vld [vmem:[#allocation17_spill] sm:$0xff] }
 0x65b   :  { %20795 = vmatprep.subr.bf16.mxu1 %v31332_v13 }
 0x65d   :  { %18968 = vmatmul.mubr.f32.gmra.mrb[102].mxu1 %v31333_v26 }
 0x65e   :  { %20797 = vmatpush3.bf16.msra.mxu1 %v31332_v13  ;;  %18970 = vmatprep.mubr.f32.mxu1 %v31334_v42  ;;  %v10352_v13 = vsel %vm99_vm0, %v31382_v46, 0 }
 0x65f   :  { %20799 = vmatprep.subr.bf16.mxu1 %v31263_v34 }
 0x661   :  { %18971 = vmatmul.mubr.f32.gmra.mrb[104].mxu1 %v31335_v8 }
 0x662   :  { %18973 = vmatprep.mubr.f32.mxu1 %v31336_v1 }
 0x665   :  { %18974 = vmatmul.mubr.f32.gmra.mrb[106].mxu1 %v31337_v10 }
 0x666   :  { %18976 = vmatprep.mubr.f32.mxu1 %v31338_v5 }
 0x669   :  { %18977 = vmatmul.mubr.f32.gmra.mrb[108].mxu1 %v31339_v28  ;;  %v27139_v28 = vand.u32 4294901760, %v10352_v13 }
 0x66a   :  { %18979 = vmatprep.mubr.f32.mxu1 %v31340_v37  ;;  %v31385_v37 = vld [vmem:[#allocation151_spill] sm:$0xff] }
 0x66b   :  { %31384 = vst [vmem:[#allocation89_spill] sm:$0xff] %v27139_v28 }
 0x66d   :  { %18980 = vmatmul.mubr.f32.gmra.mrb[110].mxu1 %v31341_v48  ;;  %v10355_v48 = vsel %vm99_vm0, %v31385_v37, 0 }
 0x66e   :  { %18982 = vmatprep.mubr.f32.mxu1 %v31342_v17  ;;  %v31386_v17 = vld [vmem:[#allocation19_spill] sm:$0xff] }
 0x671   :  { %18983 = vmatmul.mubr.f32.gmra.mrb[112].mxu1 %v31343_v51  ;;  %v10358_v51 = vsel %vm99_vm0, %v31386_v17, 0 }
 0x672   :  { %18985 = vmatprep.mubr.f32.mxu1 %v31344_v61 }
 0x675   :  { %18986 = vmatmul.mubr.f32.gmra.mrb[114].mxu1 %v31345_v49 }
 0x676   :  { %18988 = vmatprep.mubr.f32.mxu1 %v31346_v9 }
 0x679   :  { %18989 = vmatmul.mubr.f32.gmra.mrb[116].mxu1 %v31347_v15 }
 0x67a   :  { %18991 = vmatprep.mubr.f32.mxu1 %v31348_v7  ;;  %v27157_v7 = vand.u32 4294901760, %v10355_v48 }
 0x67c   :  { %31387 = vst [vmem:[#allocation90_spill] sm:$0xff] %v27157_v7 }
 0x67d   :  { %18992 = vmatmul.mubr.f32.gmra.mrb[118].mxu1 %v31349_v38  ;;  %v27159_v38 = vand.u32 4294901760, %v10358_v51 }
 0x67e   :  { %18994 = vmatprep.mubr.f32.mxu1 %v31350_v18  ;;  %v31389_v18 = vld [vmem:[#allocation152_spill] sm:$0xff] }
 0x67f   :  { %31388 = vst [vmem:[#allocation94_spill] sm:$0xff] %v27159_v38 }
 0x681   :  { %18995 = vmatmul.mubr.f32.gmra.mrb[120].mxu1 %v31351_v31  ;;  %v10361_v31 = vsel %vm99_vm0, %v31389_v18, 0 }
 0x682   :  { %18997 = vmatprep.mubr.f32.mxu1 %v31352_v4 }
 0x685   :  { %18998 = vmatmul.mubr.f32.gmra.mrb[122].mxu1 %v31353_v40 }
 0x686   :  { %19000 = vmatprep.mubr.f32.mxu1 %v31354_v52  ;;  %v27165_v52 = vsub.f32 %v10352_v13, %v27139_v28 }
 0x689   :  { %19001 = vmatmul.mubr.f32.gmra.mrb[124].mxu1 %v31355_v36  ;;  %v31390_v36 = vld [vmem:[#allocation29_spill] sm:$0xff] }
 0x68a   :  { %19003 = vmatprep.mubr.f32.mxu1 %v31356_v2  ;;  %v10364_v2 = vsel %vm99_vm0, %v31390_v36, 0 }
 0x68d   :  { %19004 = vmatmul.mubr.f32.gmra.mrb[126].mxu1 %v31357_v39 }
 0x68e   :  { %19022 = vmatprep.mubr.f32.mxu1 %v26258_v3 }
 0x691   :  { %19023 = vmatmul.mubr.f32.vlgmr.msra.gmra.mrb[96].mxu1 %v26252_v21 }
 0x692   :  { %20801 = vmatpush3.bf16.msra.mxu1 %v31263_v34  ;;  %19025 = vmatprep.mubr.f32.mxu1 %v26275_v32  ;;  %v31365_v34 = vld [vmem:[#allocation109_spill] sm:$0xff] }
 0x693   :  { %20803 = vmatprep.subr.bf16.mxu1 %v31298_v57 }
 0x695   :  { %19026 = vmatmul.mubr.f32.gmra.mrb[98].mxu1 %v26290_v58 }
 0x696   :  { %20805 = vmatpush3.bf16.msra.mxu1 %v31298_v57  ;;  %19028 = vmatprep.mubr.f32.mxu1 %v26292_v54  ;;  %v31366_v57 = vld [vmem:[#allocation131_spill] sm:$0xff] }
 0x697   :  { %20807 = vmatprep.subr.bf16.mxu1 %v31301_v55 }
 0x699   :  { %19029 = vmatmul.mubr.f32.gmra.mrb[100].mxu1 %v26316_v14 }
 0x69a   :  { %20809 = vmatpush3.bf16.msra.mxu1 %v31301_v55  ;;  %19031 = vmatprep.mubr.f32.mxu1 %v26311_v47  ;;  %v31368_v55 = vld [vmem:[#allocation67_spill] sm:$0xff] }
 0x69b   :  { %20811 = vmatprep.subr.bf16.mxu1 %v31304_v0 }
 0x69d   :  { %19032 = vmatmul.mubr.f32.gmra.mrb[102].mxu1 %v26345_v25 }
 0x69e   :  { %20813 = vmatpush3.bf16.msra.mxu1 %v31304_v0  ;;  %19034 = vmatprep.mubr.f32.mxu1 %v26365_v27  ;;  %v31367_v0 = vld [vmem:[#allocation118_spill] sm:$0xff] }
 0x69f   :  { %20911 = vmatprep.subr.bf16.mxu1 %v31358_v50 }
 0x6a1   :  { %19035 = vmatmul.mubr.f32.gmra.mrb[104].mxu1 %v26370_v20 }
 0x6a2   :  { %19037 = vmatprep.mubr.f32.mxu1 %v26382_v59 }
 0x6a5   :  { %19038 = vmatmul.mubr.f32.gmra.mrb[106].mxu1 %v26405_v12 }
 0x6a6   :  { %19040 = vmatprep.mubr.f32.mxu1 %v26432_v35 }
 0x6a9   :  { %19041 = vmatmul.mubr.f32.gmra.mrb[108].mxu1 %v26442_v43 }
 0x6aa   :  { %19043 = vmatprep.mubr.f32.mxu1 %v26451_v60 }
 0x6ad   :  { %19044 = vmatmul.mubr.f32.gmra.mrb[110].mxu1 %v26477_v53 }
 0x6ae   :  { %19046 = vmatprep.mubr.f32.mxu1 %v26493_v33 }
 0x6b1   :  { %19047 = vmatmul.mubr.f32.gmra.mrb[112].mxu1 %v26511_v62 }
 0x6b2   :  { %19049 = vmatprep.mubr.f32.mxu1 %v26519_v16 }
 0x6b5   :  { %19050 = vmatmul.mubr.f32.gmra.mrb[114].mxu1 %v26539_v29 }
 0x6b6   :  { %19052 = vmatprep.mubr.f32.mxu1 %v31285_v22 }
 0x6b9   :  { %19053 = vmatmul.mubr.f32.gmra.mrb[116].mxu1 %v31359_v19 }
 0x6ba   :  { %19055 = vmatprep.mubr.f32.mxu1 %v31360_v41 }
 0x6bd   :  { %19056 = vmatmul.mubr.f32.gmra.mrb[118].mxu1 %v31361_v44 }
 0x6be   :  { %19058 = vmatprep.mubr.f32.mxu1 %v31362_v11 }
 0x6c1   :  { %19059 = vmatmul.mubr.f32.gmra.mrb[120].mxu1 %v31363_v24 }
 0x6c2   :  { %19061 = vmatprep.mubr.f32.mxu1 %v31364_v23 }
 0x6c5   :  { %19062 = vmatmul.mubr.f32.gmra.mrb[122].mxu1 %v31365_v34 }
 0x6c6   :  { %19064 = vmatprep.mubr.f32.mxu1 %v31366_v57 }
 0x6c9   :  { %19065 = vmatmul.mubr.f32.gmra.mrb[124].mxu1 %v31367_v0 }
 0x6ca   :  { %19067 = vmatprep.mubr.f32.mxu1 %v31368_v55 }
 0x6cd   :  { %19068 = vmatmul.mubr.f32.gmra.mrb[126].mxu1 %v31369_v63 }
 0x6ce   :  { %19086 = vmatprep.mubr.f32.mxu1 %v26258_v3  ;;  %v31373_v3 = vld [vmem:[#allocation79_spill] sm:$0xff] }
 0x6d1   :  { %19087 = vmatmul.mubr.f32.vlgmr.msra.gmra.mrb[96].mxu1 %v26252_v21  ;;  %v31372_v21 = vld [vmem:[#allocation86_spill] sm:$0xff] }
 0x6d2   :  { %20913 = vmatpush3.bf16.msra.mxu1 %v31358_v50  ;;  %19089 = vmatprep.mubr.f32.mxu1 %v26275_v32 }
 0x6d3   :  { %20915 = vmatprep.subr.bf16.mxu1 %v31370_v56 }
 0x6d5   :  { %19090 = vmatmul.mubr.f32.gmra.mrb[98].mxu1 %v26290_v58  ;;  %v31374_v58 = vld [vmem:[#allocation144_spill] sm:$0xff] }
 0x6d6   :  { %20917 = vmatpush3.bf16.msra.mxu1 %v31370_v56  ;;  %19092 = vmatprep.mubr.f32.mxu1 %v26292_v54  ;;  %v10334_v32 = vsel %vm99_vm0, %v31374_v58, 0  ;;  %v31375_v54 = vld [vmem:[#allocation140_spill] sm:$0xff]  ;;  %v31396_v58 = vld [vmem:[#allocation31_spill] sm:$0xff] }
 0x6d7   :  { %20919 = vmatprep.subr.bf16.mxu1 %v31371_v6 }
 0x6d9   :  { %19093 = vmatmul.mubr.f32.gmra.mrb[100].mxu1 %v26316_v14  ;;  %v27090_v14 = vand.u32 4294901760, %v10334_v32 }
 0x6da   :  { %20921 = vmatpush3.bf16.msra.mxu1 %v31371_v6  ;;  %19095 = vmatprep.mubr.f32.mxu1 %v26311_v47  ;;  %v10337_v47 = vsel %vm99_vm0, %v31375_v54, 0 }
 0x6db   :  { %20923 = vmatprep.subr.bf16.mxu1 %v31372_v21 }
 0x6dd   :  { %19096 = vmatmul.mubr.f32.gmra.mrb[102].mxu1 %v26345_v25 }
 0x6de   :  { %20925 = vmatpush3.bf16.msra.mxu1 %v31372_v21  ;;  %19098 = vmatprep.mubr.f32.mxu1 %v26365_v27  ;;  %v31376_v27 = vld [vmem:[#allocation146_spill] sm:$0xff] }
 0x6df   :  { %20927 = vmatprep.subr.bf16.mxu1 %v31373_v3  ;;  %v10340_v25 = vsel %vm99_vm0, %v31376_v27, 0 }
 0x6e1   :  { %19099 = vmatmul.mubr.f32.gmra.mrb[104].mxu1 %v26370_v20  ;;  %v27095_v20 = vand.u32 4294901760, %v10337_v47 }
 0x6e2   :  { %19101 = vmatprep.mubr.f32.mxu1 %v26382_v59  ;;  %v27099_v59 = vsub.f32 %v10334_v32, %v27090_v14  ;;  %v10370_v32 = vsel %vm99_vm0, %v31396_v58, 0 }
 0x6e5   :  { %19102 = vmatmul.mubr.f32.gmra.mrb[106].mxu1 %v26405_v12  ;;  %v27101_v12 = vand.u32 4294901760, %v10340_v25 }
 0x6e6   :  { %19104 = vmatprep.mubr.f32.mxu1 %v26432_v35  ;;  %v31377_v35 = vld [vmem:[#allocation145_spill] sm:$0xff] }
 0x6e9   :  { %19105 = vmatmul.mubr.f32.gmra.mrb[108].mxu1 %v26442_v43  ;;  %v10343_v43 = vsel %vm99_vm0, %v31377_v35, 0  ;;  %v31399_v35 = vld [vmem:[#allocation91_spill] sm:$0xff] }
 0x6ea   :  { %19107 = vmatprep.mubr.f32.mxu1 %v26451_v60  ;;  %v31378_v60 = vld [vmem:[#allocation11_spill] sm:$0xff] }
 0x6ed   :  { %19108 = vmatmul.mubr.f32.gmra.mrb[110].mxu1 %v26477_v53  ;;  %v27109_v53 = vsub.f32 %v10337_v47, %v27095_v20 }
 0x6ee   :  { %19110 = vmatprep.mubr.f32.mxu1 %v26493_v33  ;;  %v10346_v33 = vsel %vm99_vm0, %v31378_v60, 0 }
 0x6ef   :  { %v27120_v45 = vand.u32 4294901760, %v10346_v33  ;;  %v30026_v26 = vand.u32 4294901760, %v27109_v53 }
 0x6f1   :  { %19111 = vmatmul.mubr.f32.gmra.mrb[112].mxu1 %v26511_v62  ;;  %v27112_v62 = vand.u32 4294901760, %v10343_v43  ;;  %31381 = vst [vmem:[#allocation82_spill] sm:$0xff] %v27120_v45  ;;  %v27137_v5 = vsub.f32 %v10346_v33, %v27120_v45  ;;  %v10515_v61 = vsub.f32 %v27109_v53, %v30026_v26  ;;  %v27204_v33 = vand.u32 4294901760, %v10370_v32 }
 0x6f2   :  { %19113 = vmatprep.mubr.f32.mxu1 %v26519_v16  ;;  %v30027_v16 = vand.u32 4294901760, %v27099_v59 }
 0x6f3   :  { %31379 = vst [vmem:[#allocation80_spill] sm:$0xff] %v27112_v62  ;;  %v27128_v42 = vsub.f32 %v10343_v43, %v27112_v62  ;;  %v30021_v40 = vand.u32 4294901760, %v27137_v5  ;;  %v10516_v39 = vand.u32 4294901760, %v10515_v61  ;;  %31400 = vst [vmem:[#allocation104_spill] sm:$0xff] %v27204_v33  ;;  %v31406_v61 = vld [vmem:[#allocation5_spill] sm:$0xff] }
 0x6f4   :  { %v10505_v1 = vsub.f32 %v27099_v59, %v30027_v16  ;;  %v31435_v16 = vld [vmem:[#allocation61_spill] sm:$0xff] }
 0x6f5   :  { %19114 = vmatmul.mubr.f32.gmra.mrb[114].mxu1 %v26539_v29  ;;  %v27116_v29 = vsub.f32 %v10340_v25, %v27101_v12  ;;  %v30023_v49 = vand.u32 4294901760, %v27128_v42 }
 0x6f6   :  { %19116 = vmatprep.mubr.f32.mxu1 %v31285_v22  ;;  %v31380_v22 = vld [vmem:[#allocation150_spill] sm:$0xff]  ;;  %v10506_v4 = vand.u32 4294901760, %v10505_v1  ;;  %v31403_v1 = vld [vmem:[#allocation33_spill] sm:$0xff] }
 0x6f7   :  { %v10349_v30 = vsel %vm99_vm0, %v31380_v22, 0  ;;  %v30025_v10 = vand.u32 4294901760, %v27116_v29  ;;  %v10376_v37 = vsel %vm99_vm0, %v31403_v1, 0 }
 0x6f8   :  { %v27130_v8 = vand.u32 4294901760, %v10349_v30 }
 0x6f9   :  { %19117 = vmatmul.mubr.f32.gmra.mrb[116].mxu1 %v31359_v19  ;;  %v10525_v15 = vsub.f32 %v27116_v29, %v30025_v10  ;;  %v10535_v19 = vsub.f32 %v27128_v42, %v30023_v49 }
 0x6fa   :  { %19119 = vmatprep.mubr.f32.mxu1 %v31360_v41  ;;  %31383 = vst [vmem:[#allocation117_spill] sm:$0xff] %v27130_v8  ;;  %v27152_v9 = vsub.f32 %v10349_v30, %v27130_v8 }
 0x6fb   :  { %v10536_v54 = vand.u32 4294901760, %v10535_v19  ;;  %v31409_v19 = vld [vmem:[#allocation155_spill] sm:$0xff] }
 0x6fc   :  { %v30020_v41 = vand.u32 4294901760, %v27152_v9 }
 0x6fd   :  { %19120 = vmatmul.mubr.f32.gmra.mrb[118].mxu1 %v31361_v44  ;;  %v27174_v44 = vand.u32 4294901760, %v10361_v31 }
 0x6fe   :  { %19122 = vmatprep.mubr.f32.mxu1 %v31362_v11  ;;  %v10526_v11 = vand.u32 4294901760, %v10525_v15  ;;  %v10555_v47 = vsub.f32 %v27152_v9, %v30020_v41 }
 0x6ff   :  { %31391 = vst [vmem:[#allocation95_spill] sm:$0xff] %v27174_v44  ;;  %v27197_v27 = vsub.f32 %v10361_v31, %v27174_v44 }
 0x700   :  { %v10556_v15 = vand.u32 4294901760, %v10555_v47 }
 0x701   :  { %19123 = vmatmul.mubr.f32.gmra.mrb[120].mxu1 %v31363_v24  ;;  %v27177_v24 = vsub.f32 %v10355_v48, %v27157_v7  ;;  %31397 = vst [vmem:[#allocation105_spill] sm:$0xff] %v27197_v27  ;;  %v30015_v48 = vand.u32 4294901760, %v27197_v27 }
 0x702   :  { %19125 = vmatprep.mubr.f32.mxu1 %v31364_v23  ;;  %v27180_v23 = vsub.f32 %v10358_v51, %v27159_v38 }
 0x703   :  { %31392 = vst [vmem:[#allocation96_spill] sm:$0xff] %v27177_v24  ;;  %v30018_v43 = vand.u32 4294901760, %v27177_v24 }
 0x704   :  { %31393 = vst [vmem:[#allocation101_spill] sm:$0xff] %v27180_v23  ;;  %v30016_v60 = vand.u32 4294901760, %v27180_v23 }
 0x705   :  { %19126 = vmatmul.mubr.f32.gmra.mrb[122].mxu1 %v31365_v34  ;;  %v31394_v34 = vld [vmem:[#allocation153_spill] sm:$0xff]  ;;  %v10575_v18 = vsub.f32 %v27177_v24, %v30018_v43 }
 0x706   :  { %19128 = vmatprep.mubr.f32.mxu1 %v31366_v57  ;;  %v10367_v57 = vsel %vm99_vm0, %v31394_v34, 0  ;;  %v10585_v31 = vsub.f32 %v27180_v23, %v30016_v60  ;;  %v31410_v34 = vld [vmem:[#allocation39_spill] sm:$0xff]  ;;  %v31424_v60 = vld [vmem:[#allocation54_spill] sm:$0xff] }
 0x707   :  { %v27199_v25 = vand.u32 4294901760, %v10367_v57  ;;  %v10576_v47 = vand.u32 4294901760, %v10575_v18 }
 0x709   :  { %19129 = vmatmul.mubr.f32.gmra.mrb[124].mxu1 %v31367_v0  ;;  %v10545_v0 = vsub.f32 %v27137_v5, %v30021_v40  ;;  %31398 = vst [vmem:[#allocation107_spill] sm:$0xff] %v27199_v25  ;;  %v27219_v17 = vsub.f32 %v10367_v57, %v27199_v25  ;;  %v10382_v57 = vsel %vm99_vm0, %v31410_v34, 0  ;;  %v31418_v34 = vld [vmem:[#allocation72_spill] sm:$0xff] }
 0x70a   :  { %19131 = vmatprep.mubr.f32.mxu1 %v31368_v55  ;;  %v30019_v55 = vand.u32 4294901760, %v27165_v52 }
 0x70b   :  { %v10546_v30 = vand.u32 4294901760, %v10545_v0  ;;  %31404 = vst [vmem:[#allocation16_spill] sm:$0xff] %v27219_v17  ;;  %v10595_v0 = vsub.f32 %v27197_v27, %v30015_v48  ;;  %v30014_v58 = vand.u32 4294901760, %v27219_v17 }
 0x70c   :  { %v10565_v46 = vsub.f32 %v27165_v52, %v30019_v55 }
 0x70d   :  { %19132 = vmatmul.mubr.f32.gmra.mrb[126].mxu1 %v31369_v63  ;;  %v27188_v63 = vand.u32 4294901760, %v10364_v2 }
 0x70e   :  { %19534 = vmatprep.mubr.f32.mxu1 %v10506_v4  ;;  %v27231_v4 = vsub.f32 %v10370_v32, %v27204_v33  ;;  %v10566_v36 = vand.u32 4294901760, %v10565_v46 }
 0x70f   :  { %31395 = vst [vmem:[#allocation98_spill] sm:$0xff] %v27188_v63  ;;  %v27212_v13 = vsub.f32 %v10364_v2, %v27188_v63 }
 0x710   :  { %31407 = vst [vmem:[#allocation34_spill] sm:$0xff] %v27231_v4 }
 0x711   :  { %19535 = vmatmul.mubr.f32.vlgmr.msra.gmra.mrb[128].mxu1 %v10516_v39  ;;  %31402 = vst [vmem:[#allocation18_spill] sm:$0xff] %v27212_v13  ;;  %v30013_v2 = vand.u32 4294901760, %v27212_v13  ;;  %v27234_v39 = vand.u32 4294901760, %v10376_v37 }
 0x712   :  { %20929 = vmatpush3.bf16.msra.mxu1 %v31373_v3  ;;  %19537 = vmatprep.mubr.f32.mxu1 %v10526_v11  ;;  %v31401_v3 = vld [vmem:[#allocation154_spill] sm:$0xff]  ;;  %v10379_v11 = vsel %vm99_vm0, %v31409_v19, 0  ;;  %v10615_v19 = vsub.f32 %v27219_v17, %v30014_v58 }
 0x713   :  { %20931 = vmatprep.subr.bf16.mxu1 %v31399_v35  ;;  %v10373_v22 = vsel %vm99_vm0, %v31401_v3, 0  ;;  %31408 = vst [vmem:[#allocation110_spill] sm:$0xff] %v27234_v39  ;;  %v30017_v3 = vand.u32 4294901760, %v27231_v4  ;;  %v10605_v46 = vsub.f32 %v27212_v13, %v30013_v2  ;;  %v27256_v1 = vsub.f32 %v10376_v37, %v27234_v39  ;;  %v31455_v13 = vld [vmem:[#allocation115_spill] sm:$0xff] }
 0x714   :  { %v27221_v51 = vand.u32 4294901760, %v10373_v22 }
 0x715   :  { %19538 = vmatmul.mubr.f32.gmra.mrb[130].mxu1 %v10536_v54  ;;  %v31412_v54 = vld [vmem:[#allocation7_spill] sm:$0xff]  ;;  %31414 = vst [vmem:[#allocation120_spill] sm:$0xff] %v27256_v1  ;;  %v30024_v2 = vand.u32 4294901760, %v27256_v1 }
 0x716   :  { %20933 = vmatpush3.bf16.msra.mxu1 %v31399_v35  ;;  %19540 = vmatprep.mubr.f32.mxu1 %v10546_v30  ;;  %31405 = vst [vmem:[#allocation27_spill] sm:$0xff] %v27221_v51  ;;  %v27246_v32 = vsub.f32 %v10373_v22, %v27221_v51  ;;  %v10586_v35 = vand.u32 4294901760, %v10585_v31  ;;  %v27250_v30 = vand.u32 4294901760, %v10379_v11  ;;  %v10596_v31 = vand.u32 4294901760, %v10595_v0 }
 0x717   :  { %20935 = vmatprep.subr.bf16.mxu1 %v31406_v61 }
 0x718   :  { %31411 = vst [vmem:[#allocation116_spill] sm:$0xff] %v27246_v32  ;;  %31413 = vst [vmem:[#allocation119_spill] sm:$0xff] %v27250_v30  ;;  %v30022_v37 = vand.u32 4294901760, %v27246_v32 }
 0x719   :  { %19541 = vmatmul.mubr.f32.gmra.mrb[132].mxu1 %v10556_v15  ;;  %v31416_v15 = vld [vmem:[#allocation156_spill] sm:$0xff] }
 0x71a   :  { %20937 = vmatpush3.bf16.msra.mxu1 %v31406_v61  ;;  %19543 = vmatprep.mubr.f32.mxu1 %v10566_v36  ;;  %v27258_v61 = vand.u32 4294901760, %v10382_v57  ;;  %v10385_v22 = vsel %vm99_vm0, %v31416_v15, 0  ;;  %v31417_v36 = vld [vmem:[#allocation13_spill] sm:$0xff]  ;;  %v10625_v15 = vsub.f32 %v27231_v4, %v30017_v3  ;;  %v10394_v3 = vsel %vm99_vm0, %v31424_v60, 0 }
 0x71b   :  { %20939 = vmatprep.subr.bf16.mxu1 %v31412_v54  ;;  %v10388_v18 = vsel %vm99_vm0, %v31417_v36, 0  ;;  %v27276_v36 = vand.u32 4294901760, %v10385_v22  ;;  %v10635_v43 = vsub.f32 %v27246_v32, %v30022_v37  ;;  %v27308_v49 = vand.u32 4294901760, %v10394_v3  ;;  %v31445_v32 = vld [vmem:[#allocation69_spill] sm:$0xff] }
 0x71c   :  { %31415 = vst [vmem:[#allocation122_spill] sm:$0xff] %v27258_v61  ;;  %v27282_v58 = vsub.f32 %v10382_v57, %v27258_v61  ;;  %v27284_v48 = vand.u32 4294901760, %v10388_v18  ;;  %v10626_v41 = vand.u32 4294901760, %v10625_v15 }
 0x71d   :  { %19544 = vmatmul.mubr.f32.gmra.mrb[134].mxu1 %v10576_v47  ;;  %v27274_v47 = vsub.f32 %v10379_v11, %v27250_v30  ;;  %31420 = vst [vmem:[#allocation126_spill] sm:$0xff] %v27276_v36  ;;  %v10616_v11 = vand.u32 4294901760, %v10615_v19  ;;  %v27297_v40 = vsub.f32 %v10385_v22, %v27276_v36  ;;  %v10645_v19 = vsub.f32 %v27256_v1, %v30024_v2 }
 0x71e   :  { %20941 = vmatpush3.bf16.msra.mxu1 %v31412_v54  ;;  %19546 = vmatprep.mubr.f32.mxu1 %v10586_v35  ;;  %v31421_v54 = vld [vmem:[#allocation43_spill] sm:$0xff]  ;;  %v10606_v35 = vand.u32 4294901760, %v10605_v46  ;;  %31422 = vst [vmem:[#allocation127_spill] sm:$0xff] %v27282_v58  ;;  %31423 = vst [vmem:[#allocation128_spill] sm:$0xff] %v27284_v48  ;;  %v31426_v46 = vld [vmem:[#allocation45_spill] sm:$0xff]  ;;  %v27306_v37 = vsub.f32 %v10388_v18, %v27284_v48  ;;  %v10636_v22 = vand.u32 4294901760, %v10635_v43 }
 0x71f   :  { %20943 = vmatprep.subr.bf16.mxu1 %v31418_v34  ;;  %31419 = vst [vmem:[#allocation125_spill] sm:$0xff] %v27274_v47  ;;  %v10391_v0 = vsel %vm99_vm0, %v31421_v54, 0  ;;  %v10397_v54 = vsel %vm99_vm0, %v31426_v46, 0  ;;  %v30030_v57 = vand.u32 4294901760, %v27274_v47  ;;  %31427 = vst [vmem:[#allocation132_spill] sm:$0xff] %v27297_v40  ;;  %v31434_v18 = vld [vmem:[#allocation55_spill] sm:$0xff]  ;;  %v27330_v1 = vsub.f32 %v10394_v3, %v27308_v49 }
 0x720   :  { %v27291_v55 = vand.u32 4294901760, %v10391_v0  ;;  %31429 = vst [vmem:[#allocation133_spill] sm:$0xff] %v27306_v37  ;;  %31430 = vst [vmem:[#allocation134_spill] sm:$0xff] %v27308_v49  ;;  %v27310_v15 = vand.u32 4294901760, %v10397_v54  ;;  %v10403_v26 = vsel %vm99_vm0, %v31434_v18, 0  ;;  %v31444_v18 = vld [vmem:[#allocation112_spill] sm:$0xff] }
 0x721   :  { %19547 = vmatmul.mubr.f32.gmra.mrb[136].mxu1 %v10596_v31  ;;  %v31428_v31 = vld [vmem:[#allocation23_spill] sm:$0xff]  ;;  %v10655_v2 = vsub.f32 %v27274_v47, %v30030_v57  ;;  %31437 = vst [vmem:[#allocation138_spill] sm:$0xff] %v27330_v1 }
 0x722   :  { %19549 = vmatprep.mubr.f32.mxu1 %v10606_v35  ;;  %31425 = vst [vmem:[#allocation130_spill] sm:$0xff] %v27291_v55  ;;  %v10400_v60 = vsel %vm99_vm0, %v31428_v31, 0  ;;  %31431 = vst [vmem:[#allocation135_spill] sm:$0xff] %v27310_v15  ;;  %v27313_v46 = vsub.f32 %v10391_v0, %v27291_v55  ;;  %v10646_v35 = vand.u32 4294901760, %v10645_v19  ;;  %v27333_v57 = vsub.f32 %v10397_v54, %v27310_v15 }
 0x723   :  { %v27315_v31 = vand.u32 4294901760, %v10400_v60  ;;  %v31442_v0 = vand.u32 4294901760, %v27297_v40 }
 0x724   :  { %31432 = vst [vmem:[#allocation136_spill] sm:$0xff] %v27313_v46  ;;  %31438 = vst [vmem:[#allocation141_spill] sm:$0xff] %v27333_v57  ;;  %v31446_v4 = vand.u32 4294901760, %v27313_v46  ;;  %v31454_v17 = vand.u32 4294901760, %v27333_v57 }
 0x725   :  { %19550 = vmatmul.mubr.f32.gmra.mrb[138].mxu1 %v10616_v11  ;;  %31433 = vst [vmem:[#allocation137_spill] sm:$0xff] %v27315_v31  ;;  %v10406_v11 = vsel %vm99_vm0, %v31435_v16, 0  ;;  %v27337_v10 = vsub.f32 %v10400_v60, %v27315_v31  ;;  %v27339_v16 = vand.u32 4294901760, %v10403_v26  ;;  %v10675_v3 = vsub.f32 %v27297_v40, %v31442_v0 }
 0x726   :  { %19552 = vmatprep.mubr.f32.mxu1 %v10626_v41  ;;  %v31436_v41 = vand.u32 4294901760, %v27282_v58  ;;  %v27341_v19 = vand.u32 4294901760, %v10406_v11  ;;  %v10409_v60 = vsel %vm99_vm0, %v31444_v18, 0  ;;  %v27368_v18 = vld [vmem:[%s29399_s3] sm:$0xff] }
 0x727   :  { %31439 = vst [vmem:[#allocation142_spill] sm:$0xff] %v27337_v10  ;;  %31440 = vst [vmem:[#allocation143_spill] sm:$0xff] %v27339_v16 }
 0x728   :  { %v10665_v43 = vsub.f32 %v27282_v58, %v31436_v41  ;;  %31441 = vst [vmem:[#allocation147_spill] sm:$0xff] %v27341_v19  ;;  %v10656_v41 = vand.u32 4294901760, %v10655_v2  ;;  %v10412_v2 = vsel %vm99_vm0, %v31445_v32, 0  ;;  %31448 = vst [vmem:[#allocation149_spill] sm:$0xff] %v27368_v18  ;;  %v10676_v32 = vand.u32 4294901760, %v10675_v3 }
 0x729   :  { %19553 = vmatmul.mubr.f32.gmra.mrb[140].mxu1 %v10636_v22  ;;  %v31443_v22 = vand.u32 4294901760, %v27306_v37  ;;  %v10715_v3 = vsub.f32 %v27333_v57, %v31454_v17  ;;  %v27410_v17 = vld [vmem:[%s29399_s3 + $0x18] sm:$0xff] }
 0x72a   :  { %19555 = vmatprep.mubr.f32.mxu1 %v10646_v35  ;;  %v10666_v58 = vand.u32 4294901760, %v10665_v43  ;;  %v10695_v43 = vsub.f32 %v27313_v46, %v31446_v4  ;;  %v27363_v35 = vsub.f32 %v10406_v11, %v27341_v19  ;;  %v27375_v4 = vand.u32 4294901760, %v10409_v60  ;;  %31461 = vst [vmem:[#allocation26_spill] sm:$0xff] %v27410_v17 }
 0x72b   :  { %v10685_v54 = vsub.f32 %v27306_v37, %v31443_v22  ;;  %v27360_v22 = vsub.f32 %v10403_v26, %v27339_v16  ;;  %v31451_v11 = vand.u32 4294901760, %v27330_v1  ;;  %v27382_v46 = vand.u32 4294901760, %v10412_v2  ;;  %v31453_v37 = vld [vmem:[#allocation63_spill] sm:$0xff] }
 0x72c   :  { %31447 = vst [vmem:[#allocation148_spill] sm:$0xff] %v27363_v35  ;;  %31450 = vst [vmem:[#allocation42_spill] sm:$0xff] %v27375_v4  ;;  %v10415_v40 = vsel %vm99_vm0, %v31453_v37, 0  ;;  %v31456_v26 = vand.u32 4294901760, %v27368_v18 }
 0x72d   :  { %19556 = vmatmul.mubr.f32.gmra.mrb[142].mxu1 %v10656_v41  ;;  %v10686_v0 = vand.u32 4294901760, %v10685_v54  ;;  %v10705_v47 = vsub.f32 %v27330_v1, %v31451_v11  ;;  %31452 = vst [vmem:[#allocation56_spill] sm:$0xff] %v27382_v46  ;;  %v10418_v41 = vsel %vm99_vm0, %v31455_v13, 0  ;;  %v10696_v11 = vand.u32 4294901760, %v10695_v43  ;;  %v27405_v13 = vld [vmem:[%s29399_s3 + $0x10] sm:$0xff] }
 0x72e   :  { %19558 = vmatprep.mubr.f32.mxu1 %v10666_v58  ;;  %v27373_v58 = vld [vmem:[%s29399_s3 + $0x8] sm:$0xff]  ;;  %v31459_v1 = vand.u32 4294901760, %v27337_v10  ;;  %31460 = vst [vmem:[#allocation44_spill] sm:$0xff] %v27405_v13  ;;  %v27413_v43 = vsub.f32 %v10409_v60, %v27375_v4  ;;  %v27421_v23 = vsub.f32 %v10412_v2, %v27382_v46  ;;  %v31465_v60 = vld [vmem:[#allocation76_spill] sm:$0xff]  ;;  %v31467_v2 = vand.u32 4294901760, %v27360_v22 }
 0x72f   :  { %31449 = vst [vmem:[#allocation40_spill] sm:$0xff] %v27373_v58  ;;  %v31457_v54 = vand.u32 4294901760, %v27373_v58  ;;  %v31464_v58 = vld [vmem:[#allocation70_spill] sm:$0xff] }
 0x730   :  { %v10725_v37 = vsub.f32 %v27337_v10, %v31459_v1  ;;  %v30068_v1 = vand.u32 4294901760, %v27405_v13  ;;  %v10421_v18 = vsel %vm99_vm0, %v31464_v58, 0  ;;  %v10424_v10 = vsel %vm99_vm0, %v31465_v60, 0 }
 0x731   :  { %19559 = vmatmul.mubr.f32.gmra.mrb[144].mxu1 %v10676_v32  ;;  %v27395_v27 = vpack.c.bf16 %v31457_v54, %v31456_v26  ;;  %v30067_v26 = vand.u32 4294901760, %v27410_v17  ;;  %v10706_v54 = vand.u32 4294901760, %v10705_v47  ;;  %v27423_v32 = vand.u32 4294901760, %v10418_v41 }
 0x732   :  { %19561 = vmatprep.mubr.f32.mxu1 %v10686_v0  ;;  %v27415_v0 = vand.u32 4294901760, %v10415_v40  ;;  %v10716_v47 = vand.u32 4294901760, %v10715_v3  ;;  %v10735_v24 = vsub.f32 %v27360_v22, %v31467_v2  ;;  %v31468_v58 = vand.u32 4294901760, %v27363_v35 }
 0x733   :  { %31458 = vst [vmem:[#allocation38_spill] sm:$0xff] %v27395_v27  ;;  %21007 = vmatprep.subr.bf16.mxu0 %v27395_v27  ;;  %31463 = vst [vmem:[#allocation46_spill] sm:$0xff] %v27423_v32  ;;  %v27434_v57 = vpack.c.bf16 %v30067_v26, %v30068_v1  ;;  %v30072_v21 = vand.u32 4294901760, %v27413_v43  ;;  %v27446_v13 = vand.u32 4294901760, %v10421_v18  ;;  %v27453_v2 = vand.u32 4294901760, %v10424_v10  ;;  %v31471_v26 = vld [vmem:[#allocation73_spill] sm:$0xff] }
 0x734   :  { %31462 = vst [vmem:[#allocation28_spill] sm:$0xff] %v27415_v0  ;;  %21009 = vmatpush3.bf16.msra.mxu0 %v27395_v27  ;;  %v10745_v27 = vsub.f32 %v27363_v35, %v31468_v58  ;;  %v27444_v60 = vsub.f32 %v10415_v40, %v27415_v0  ;;  %v10427_v58 = vsel %vm99_vm0, %v31471_v26, 0  ;;  %v10736_v40 = vand.u32 4294901760, %v10735_v24 }
 0x735   :  { %19562 = vmatmul.mubr.f32.gmra.mrb[146].mxu1 %v10696_v11  ;;  %31466 = vst [vmem:[#allocation8_spill] sm:$0xff] %v27434_v57  ;;  %v10726_v11 = vand.u32 4294901760, %v10725_v37  ;;  %31469 = vst [vmem:[#allocation35_spill] sm:$0xff] %v27446_v13  ;;  %21011 = vmatprep.subr.bf16.mxu0 %v27434_v57  ;;  %v10755_v37 = vsub.f32 %v27413_v43, %v30072_v21  ;;  %v27463_v3 = vsub.f32 %v10421_v18, %v27446_v13 }
 0x736   :  { %19564 = vmatprep.mubr.f32.mxu1 %v10706_v54  ;;  %v27451_v54 = vsub.f32 %v10418_v41, %v27423_v32  ;;  %31470 = vst [vmem:[#allocation47_spill] sm:$0xff] %v27453_v2  ;;  %v30075_v1 = vand.u32 4294901760, %v27444_v60  ;;  %v27465_v41 = vand.u32 4294901760, %v10427_v58  ;;  %v10746_v17 = vand.u32 4294901760, %v10745_v27 }
 0x737   :  { %v31473_v35 = vand.u32 4294901760, %v27421_v23  ;;  %v27472_v24 = vsub.f32 %v10424_v10, %v27453_v2  ;;  %v30078_v21 = vand.u32 4294901760, %v27463_v3 }
 0x738   :  { %21013 = vmatpush3.bf16.msra.mxu0 %v27434_v57  ;;  %31472 = vst [vmem:[#allocation37_spill] sm:$0xff] %v27465_v41  ;;  %v10775_v18 = vsub.f32 %v27444_v60, %v30075_v1  ;;  %v27479_v27 = vsub.f32 %v10427_v58, %v27465_v41 }
 0x739   :  { %19565 = vmatmul.mubr.f32.gmra.mrb[148].mxu1 %v10716_v47  ;;  %v10765_v26 = vsub.f32 %v27421_v23, %v31473_v35  ;;  %v30079_v47 = vand.u32 4294901760, %v27451_v54  ;;  %v30077_v10 = vand.u32 4294901760, %v27472_v24 }
 0x73a   :  { %19567 = vmatprep.mubr.f32.mxu1 %v10726_v11  ;;  %v10756_v11 = vand.u32 4294901760, %v10755_v37  ;;  %v30076_v37 = vand.u32 4294901760, %v27479_v27 }
 0x73b   :  { %v10766_v57 = vand.u32 4294901760, %v10765_v26  ;;  %v10785_v35 = vsub.f32 %v27451_v54, %v30079_v47  ;;  %v10805_v58 = vsub.f32 %v27472_v24, %v30077_v10  ;;  %v31477_v47 = vld [vmem:[#allocation86_spill] sm:$0xff] }
 0x73d   :  { %19568 = vmatmul.mubr.f32.gmra.mrb[150].mxu1 %v10736_v40  ;;  %v10795_v40 = vsub.f32 %v27463_v3, %v30078_v21  ;;  %v10786_v1 = vand.u32 4294901760, %v10785_v35  ;;  %v31474_v35 = vld [vmem:[#allocation83_spill] sm:$0xff] }
 0x73e   :  { %19570 = vmatprep.mubr.f32.mxu1 %v10746_v17  ;;  %v10776_v17 = vand.u32 4294901760, %v10775_v18 }
 0x73f   :  { %v10796_v26 = vand.u32 4294901760, %v10795_v40  ;;  %v5827_v40 = vpop.xlane.xlu1 %5826 }
 0x741   :  { %19571 = vmatmul.mubr.f32.gmra.mrb[152].mxu1 %v10756_v11  ;;  %v10815_v11 = vsub.f32 %v27479_v27, %v30076_v37 }
 0x742   :  { %19573 = vmatprep.mubr.f32.mxu1 %v10766_v57  ;;  %v10806_v57 = vand.u32 4294901760, %v10805_v58 }
 0x743   :  { %v10816_v18 = vand.u32 4294901760, %v10815_v11 }
 0x745   :  { %19574 = vmatmul.mubr.f32.gmra.mrb[154].mxu1 %v10776_v17  ;;  %v31476_v17 = vld [vmem:[#allocation3_spill] sm:$0xff] }
 0x746   :  { %19576 = vmatprep.mubr.f32.mxu1 %v10786_v1  ;;  %v31475_v1 = vld [vmem:[#allocation84_spill] sm:$0xff] }
 0x749   :  { %19577 = vmatmul.mubr.f32.gmra.mrb[156].mxu1 %v10796_v26  ;;  %v5833_v26 = vpop.xlane.xlu1 %5832 }
 0x74a   :  { %19579 = vmatprep.mubr.f32.mxu1 %v10806_v57 }
 0x74d   :  { %19580 = vmatmul.mubr.f32.gmra.mrb[158].mxu1 %v10816_v18  ;;  %v5839_v57 = vpop.xlane.xlu1 %5838 }
 0x74e   :  { %19598 = vmatprep.mubr.f32.mxu1 %v27090_v14 }
 0x751   :  { %19599 = vmatmul.mubr.f32.vlgmr.msra.gmra.mrb[128].mxu1 %v27095_v20 }
 0x752   :  { %20945 = vmatpush3.bf16.msra.mxu1 %v31418_v34  ;;  %19601 = vmatprep.mubr.f32.mxu1 %v27101_v12  ;;  %v5830_v34 = vpop.xlane.xlu0 %5829 }
 0x753   :  { %20947 = vmatprep.subr.bf16.mxu1 %v31474_v35  ;;  %22592 = vrcp.f32 %v5830_v34  ;;  %v31480_v34 = vld [vmem:[#allocation88_spill] sm:$0xff] }
 0x754   :  { %22594 = vrcp.f32 %v5827_v40  ;;  %v31482_v40 = vld [vmem:[#allocation18_spill] sm:$0xff] }
 0x755   :  { %19602 = vmatmul.mubr.f32.gmra.mrb[130].mxu1 %v27112_v62 }
 0x756   :  { %20949 = vmatpush3.bf16.msra.mxu1 %v31474_v35  ;;  %19604 = vmatprep.mubr.f32.mxu1 %v27120_v45  ;;  %v5836_v58 = vpop.xlane.xlu0 %5835  ;;  %v5845_v35 = vpop.xlane.xlu1 %5844 }
 0x757   :  { %20951 = vmatprep.subr.bf16.mxu1 %v31475_v1  ;;  %22596 = vrcp.f32 %v5836_v58 }
 0x758   :  { %22598 = vrcp.f32 %v5833_v26 }
 0x759   :  { %19605 = vmatmul.mubr.f32.gmra.mrb[132].mxu1 %v27130_v8  ;;  %v31507_v8 = vld [vmem:[#allocation138_spill] sm:$0xff] }
 0x75a   :  { %20953 = vmatpush3.bf16.msra.mxu1 %v31475_v1  ;;  %19607 = vmatprep.mubr.f32.mxu1 %v27139_v28  ;;  %v5842_v11 = vpop.xlane.xlu0 %5841  ;;  %v31501_v28 = vld [vmem:[#allocation133_spill] sm:$0xff] }
 0x75b   :  { %20955 = vmatprep.subr.bf16.mxu1 %v31476_v17  ;;  %22600 = vrcp.f32 %v5842_v11 }
 0x75c   :  { %22602 = vrcp.f32 %v5839_v57 }
 0x75d   :  { %19608 = vmatmul.mubr.f32.gmra.mrb[134].mxu1 %v27157_v7 }
 0x75e   :  { %20957 = vmatpush3.bf16.msra.mxu1 %v31476_v17  ;;  %19610 = vmatprep.mubr.f32.mxu1 %v27159_v38  ;;  %v5848_v18 = vpop.xlane.xlu0 %5847  ;;  %v5851_v17 = vpop.xlane.xlu1 %5850 }
 0x75f   :  { %20959 = vmatprep.subr.bf16.mxu1 %v31358_v50  ;;  %22604 = vrcp.f32 %v5848_v18  ;;  %v31487_v18 = vld [vmem:[#allocation116_spill] sm:$0xff] }
 0x760   :  { %22606 = vrcp.f32 %v5845_v35  ;;  %v31489_v35 = vld [vmem:[#allocation120_spill] sm:$0xff] }
 0x761   :  { %19611 = vmatmul.mubr.f32.gmra.mrb[136].mxu1 %v27174_v44  ;;  %v31495_v44 = vld [vmem:[#allocation127_spill] sm:$0xff] }
 0x762   :  { %19613 = vmatprep.mubr.f32.mxu1 %v27188_v63  ;;  %v5854_v1 = vpop.xlane.xlu0 %5853  ;;  %v27546_v10 = vpop.xlane.xlu1 %5856 }
 0x763   :  { %22608 = vrcp.f32 %v5854_v1 }
 0x764   :  { %22610 = vrcp.f32 %v5851_v17 }
 0x765   :  { %19614 = vmatmul.mubr.f32.gmra.mrb[138].mxu1 %v27199_v25 }
 0x766   :  { %19616 = vmatprep.mubr.f32.mxu1 %v27204_v33  ;;  %v27540_v37 = vpop.xlane.xlu0 %5859 }
 0x767   :  { %22612 = vrcp.f32 %v27540_v37 }
 0x768   :  { %22614 = vrcp.f32 %v27546_v10 }
 0x769   :  { %19617 = vmatmul.mubr.f32.gmra.mrb[140].mxu1 %v27221_v51 }
 0x76a   :  { %19619 = vmatprep.mubr.f32.mxu1 %v27234_v39  ;;  %v27551_v21 = vpop.xlane.xlu0 %5865 }
 0x76b   :  { %22616 = vrcp.f32 %v27551_v21 }
 0x76d   :  { %19620 = vmatmul.mubr.f32.gmra.mrb[142].mxu1 %v27250_v30 }
 0x76e   :  { %19622 = vmatprep.mubr.f32.mxu1 %v27258_v61 }
 0x771   :  { %19623 = vmatmul.mubr.f32.gmra.mrb[144].mxu1 %v27276_v36 }
 0x772   :  { %19625 = vmatprep.mubr.f32.mxu1 %v27284_v48 }
 0x775   :  { %19626 = vmatmul.mubr.f32.gmra.mrb[146].mxu1 %v27291_v55 }
 0x776   :  { %19628 = vmatprep.mubr.f32.mxu1 %v27308_v49  ;;  %v31484_v49 = vld [vmem:[#allocation34_spill] sm:$0xff] }
 0x779   :  { %19629 = vmatmul.mubr.f32.gmra.mrb[148].mxu1 %v27310_v15  ;;  %v31483_v15 = vld [vmem:[#allocation16_spill] sm:$0xff] }
 0x77a   :  { %19631 = vmatprep.mubr.f32.mxu1 %v27315_v31 }
 0x77d   :  { %19632 = vmatmul.mubr.f32.gmra.mrb[150].mxu1 %v27339_v16 }
 0x77e   :  { %19634 = vmatprep.mubr.f32.mxu1 %v27341_v19 }
 0x781   :  { %19635 = vmatmul.mubr.f32.gmra.mrb[152].mxu1 %v27375_v4 }
 0x782   :  { %19637 = vmatprep.mubr.f32.mxu1 %v27382_v46  ;;  %v22593_v46 = vpop.eup %22592 }
 0x783   :  { %v22595_v19 = vpop.eup %22594 }
 0x784   :  { %v22597_v48 = vpop.eup %22596 }
 0x785   :  { %19638 = vmatmul.mubr.f32.gmra.mrb[154].mxu1 %v27415_v0  ;;  %v31481_v0 = vld [vmem:[#allocation105_spill] sm:$0xff]  ;;  %v22599_v30 = vpop.eup %22598 }
 0x786   :  { %19640 = vmatprep.mubr.f32.mxu1 %v27423_v32  ;;  %v27560_v32 = vpop.xlane.xlu0 %5871  ;;  %v22601_v33 = vpop.eup %22600 }
 0x787   :  { %v22603_v63 = vpop.eup %22602 }
 0x788   :  { %v22605_v38 = vpop.eup %22604 }
 0x789   :  { %19641 = vmatmul.mubr.f32.gmra.mrb[156].mxu1 %v27446_v13  ;;  %v31479_v13 = vld [vmem:[#allocation101_spill] sm:$0xff] }
 0x78a   :  { %19643 = vmatprep.mubr.f32.mxu1 %v27453_v2  ;;  %v27555_v2 = vpop.xlane.xlu1 %5862  ;;  %v27568_v55 = vpop.xlane.xlu0 %5877 }
 0x78b   :  { %22618 = vrcp.f32 %v27555_v2 }
 0x78c   :  { %22620 = vrcp.f32 %v27560_v32 }
 0x78d   :  { %19644 = vmatmul.mubr.f32.gmra.mrb[158].mxu1 %v27465_v41  ;;  %v31478_v41 = vld [vmem:[#allocation96_spill] sm:$0xff] }
 0x78e   :  { %19662 = vmatprep.mubr.f32.mxu1 %v27099_v59  ;;  %v27564_v4 = vpop.xlane.xlu1 %5868 }
 0x78f   :  { %22622 = vrcp.f32 %v27564_v4 }
 0x790   :  { %22624 = vrcp.f32 %v27568_v55 }
 0x791   :  { %19663 = vmatmul.mubr.f32.vlgmr.msra.gmra.mrb[128].mxu1 %v27109_v53 }
 0x792   :  { %20961 = vmatpush3.bf16.msra.mxu1 %v31358_v50  ;;  %19665 = vmatprep.mubr.f32.mxu1 %v27116_v29 }
 0x793   :  { %20963 = vmatprep.subr.bf16.mxu1 %v31370_v56 }
 0x795   :  { %19666 = vmatmul.mubr.f32.gmra.mrb[130].mxu1 %v27128_v42 }
 0x796   :  { %20965 = vmatpush3.bf16.msra.mxu1 %v31370_v56  ;;  %19668 = vmatprep.mubr.f32.mxu1 %v27137_v5 }
 0x797   :  { %20967 = vmatprep.subr.bf16.mxu1 %v31371_v6 }
 0x799   :  { %19669 = vmatmul.mubr.f32.gmra.mrb[132].mxu1 %v27152_v9 }
 0x79a   :  { %20969 = vmatpush3.bf16.msra.mxu1 %v31371_v6  ;;  %19671 = vmatprep.mubr.f32.mxu1 %v27165_v52 }
 0x79b   :  { %20971 = vmatprep.subr.bf16.mxu1 %v31477_v47 }
 0x79d   :  { %19672 = vmatmul.mubr.f32.gmra.mrb[134].mxu1 %v31478_v41 }
 0x79e   :  { %20973 = vmatpush3.bf16.msra.mxu1 %v31477_v47  ;;  %19674 = vmatprep.mubr.f32.mxu1 %v31479_v13 }
 0x79f   :  { %20975 = vmatprep.subr.bf16.mxu1 %v31480_v34 }
 0x7a1   :  { %19675 = vmatmul.mubr.f32.gmra.mrb[136].mxu1 %v31481_v0 }
 0x7a2   :  { %19677 = vmatprep.mubr.f32.mxu1 %v31482_v40 }
 0x7a4   :  { %v19088_v58 = vpop.f32.mrb[96].mxu1 }
 0x7a5   :  { %v7920_v16 = vmul.f32 %v22593_v46, %v19088_v58  ;;  %v7697_v31 = vpop.f32.mrb[97].mxu1  ;;  %19678 = vmatmul.mubr.f32.gmra.mrb[138].mxu1 %v31483_v15 }
 0x7a6   :  { %v7919_v26 = vmul.f32 %v22595_v19, %v7697_v31  ;;  %19680 = vmatprep.mubr.f32.mxu1 %v31484_v49  ;;  %v27577_v31 = vpop.xlane.xlu1 %5874 }
 0x7a7   :  { %v12378_v11 = vsel %vm3682_vm1, %v7920_v16, 0  ;;  %22626 = vrcp.f32 %v27577_v31 }
 0x7a8   :  { %v27571_v57 = vand.u32 4294901760, %v12378_v11  ;;  %v12375_v36 = vsel %vm3682_vm1, %v7919_v26, 0  ;;  %v19091_v61 = vpop.f32.mrb[98].mxu1 }
 0x7a9   :  { %v27574_v46 = vand.u32 4294901760, %v12375_v36  ;;  %v7922_v58 = vmul.f32 %v22597_v48, %v19091_v61  ;;  %v7709_v39 = vpop.f32.mrb[99].mxu1  ;;  %19681 = vmatmul.mubr.f32.gmra.mrb[140].mxu1 %v31487_v18 }
 0x7aa   :  { %31485 = vst [vmem:[#allocation41_spill] sm:$0xff] %v27571_v57  ;;  %v27580_v19 = vsub.f32 %v12378_v11, %v27571_v57  ;;  %v7921_v16 = vmul.f32 %v22599_v30, %v7709_v39  ;;  %19683 = vmatprep.mubr.f32.mxu1 %v31489_v35  ;;  %v27591_v11 = vpop.xlane.xlu0 %5883  ;;  %v31493_v57 = vld [vmem:[#allocation125_spill] sm:$0xff] }
 0x7ab   :  { %31486 = vst [vmem:[#allocation24_spill] sm:$0xff] %v27574_v46  ;;  %v27584_v26 = vsub.f32 %v12375_v36, %v27574_v46  ;;  %v12384_v51 = vsel %vm3682_vm1, %v7922_v58, 0  ;;  %22628 = vrcp.f32 %v27591_v11 }
 0x7ac   :  { %31488 = vst [vmem:[#allocation50_spill] sm:$0xff] %v27580_v19  ;;  %v30132_v48 = vand.u32 4294901760, %v27580_v19  ;;  %v27588_v61 = vand.u32 4294901760, %v12384_v51  ;;  %v12381_v1 = vsel %vm3682_vm1, %v7921_v16, 0  ;;  %v19094_v25 = vpop.f32.mrb[100].mxu1 }
 0x7ad   :  { %31490 = vst [vmem:[#allocation10_spill] sm:$0xff] %v27584_v26  ;;  %v27593_v39 = vand.u32 4294901760, %v12381_v1  ;;  %v7924_v30 = vmul.f32 %v22601_v33, %v19094_v25  ;;  %v7721_v17 = vpop.f32.mrb[101].mxu1  ;;  %19684 = vmatmul.mubr.f32.gmra.mrb[142].mxu1 %v31493_v57  ;;  %v30139_v36 = vand.u32 4294901760, %v27584_v26 }
 0x7ae   :  { %31491 = vst [vmem:[#allocation51_spill] sm:$0xff] %v27588_v61  ;;  %v12648_v58 = vsub.f32 %v27580_v19, %v30132_v48  ;;  %v27602_v16 = vsub.f32 %v12384_v51, %v27588_v61  ;;  %v7923_v46 = vmul.f32 %v22603_v63, %v7721_v17  ;;  %19686 = vmatprep.mubr.f32.mxu1 %v31495_v44  ;;  %v27614_v48 = vpop.xlane.xlu1 %5880 }
 0x7af   :  { %31492 = vst [vmem:[#allocation53_spill] sm:$0xff] %v27593_v39  ;;  %v27607_v25 = vsub.f32 %v12381_v1, %v27593_v39  ;;  %v12390_v33 = vsel %vm3682_vm1, %v7924_v30, 0  ;;  %v12638_v37 = vsub.f32 %v27584_v26, %v30139_v36  ;;  %v22607_v1 = vpop.eup %22606  ;;  %v31499_v39 = vld [vmem:[#allocation132_spill] sm:$0xff]  ;;  %22630 = vrcp.f32 %v27614_v48 }
 0x7b0   :  { %31494 = vst [vmem:[#allocation57_spill] sm:$0xff] %v27602_v16  ;;  %v27616_v51 = vand.u32 4294901760, %v12390_v33  ;;  %v12387_v63 = vsel %vm3682_vm1, %v7923_v46, 0  ;;  %v19097_v17 = vpop.f32.mrb[102].mxu1  ;;  %v30147_v10 = vand.u32 4294901760, %v27602_v16  ;;  %v12649_v21 = vand.u32 4294901760, %v12648_v58  ;;  %v22609_v58 = vpop.eup %22608 }
 0x7b1   :  { %31496 = vst [vmem:[#allocation58_spill] sm:$0xff] %v27607_v25  ;;  %v27620_v19 = vand.u32 4294901760, %v12387_v63  ;;  %v7926_v30 = vmul.f32 %v22605_v38, %v19097_v17  ;;  %v7733_v61 = vpop.f32.mrb[103].mxu1  ;;  %19687 = vmatmul.mubr.f32.gmra.mrb[144].mxu1 %v31499_v39  ;;  %v12639_v36 = vand.u32 4294901760, %v12638_v37  ;;  %v30154_v26 = vand.u32 4294901760, %v27607_v25  ;;  %v27632_v38 = vpop.xlane.xlu0 %5889 }
 0x7b2   :  { %31497 = vst [vmem:[#allocation66_spill] sm:$0xff] %v27616_v51  ;;  %v27625_v7 = vsub.f32 %v12390_v33, %v27616_v51  ;;  %v7925_v47 = vmul.f32 %v22607_v1, %v7733_v61  ;;  %19689 = vmatprep.mubr.f32.mxu1 %v31501_v28  ;;  %v12668_v46 = vsub.f32 %v27602_v16, %v30147_v10  ;;  %v31505_v51 = vld [vmem:[#allocation136_spill] sm:$0xff]  ;;  %22632 = vrcp.f32 %v27632_v38 }
 0x7b3   :  { %31498 = vst [vmem:[#allocation64_spill] sm:$0xff] %v27620_v19  ;;  %v27635_v17 = vsub.f32 %v12387_v63, %v27620_v19  ;;  %v12396_v37 = vsel %vm3682_vm1, %v7926_v30, 0  ;;  %19910 = vmatprep.mubr.f32.mxu0 %v12639_v36  ;;  %v12658_v61 = vsub.f32 %v27607_v25, %v30154_v26  ;;  %v22611_v63 = vpop.eup %22610  ;;  %v27650_v25 = vpop.xlane.xlu1 %5886 }
 0x7b4   :  { %31500 = vst [vmem:[#allocation68_spill] sm:$0xff] %v27625_v7  ;;  %v27642_v33 = vand.u32 4294901760, %v12396_v37  ;;  %v12393_v1 = vsel %vm3682_vm1, %v7925_v47, 0  ;;  %v19100_v2 = vpop.f32.mrb[104].mxu1  ;;  %19911 = vmatmul.mubr.f32.vlgmr.msra.gmra.mrb[96].mxu0 %v12649_v21  ;;  %v30160_v10 = vand.u32 4294901760, %v27625_v7  ;;  %v12669_v21 = vand.u32 4294901760, %v12668_v46 }
 0x7b5   :  { %31502 = vst [vmem:[#allocation74_spill] sm:$0xff] %v27635_v17  ;;  %v27646_v16 = vand.u32 4294901760, %v12393_v1  ;;  %v7928_v30 = vmul.f32 %v22609_v58, %v19100_v2  ;;  %v7745_v36 = vpop.f32.mrb[105].mxu1  ;;  %19690 = vmatmul.mubr.f32.gmra.mrb[146].mxu1 %v31505_v51  ;;  %v12659_v19 = vand.u32 4294901760, %v12658_v61  ;;  %v30165_v26 = vand.u32 4294901760, %v27635_v17  ;;  %v22613_v2 = vpop.eup %22612 }
 0x7b6   :  { %31503 = vst [vmem:[#allocation21_spill] sm:$0xff] %v27642_v33  ;;  %v27653_v32 = vsub.f32 %v12396_v37, %v27642_v33  ;;  %v7927_v47 = vmul.f32 %v22611_v63, %v7745_v36  ;;  %19692 = vmatprep.mubr.f32.mxu1 %v31507_v8  ;;  %v12688_v6 = vsub.f32 %v27625_v7, %v30160_v10  ;;  %v27672_v10 = vpop.xlane.xlu0 %5895  ;;  %v31511_v33 = vld [vmem:[#allocation141_spill] sm:$0xff]  ;;  %22634 = vrcp.f32 %v27650_v25 }
 0x7b7   :  { %31504 = vst [vmem:[#allocation9_spill] sm:$0xff] %v27646_v16  ;;  %v27661_v58 = vsub.f32 %v12393_v1, %v27646_v16  ;;  %v12402_v61 = vsel %vm3682_vm1, %v7928_v30, 0  ;;  %19913 = vmatprep.mubr.f32.mxu0 %v12659_v19  ;;  %v12678_v37 = vsub.f32 %v27635_v17, %v30165_v26  ;;  %v22615_v1 = vpop.eup %22614  ;;  %22636 = vrcp.f32 %v27672_v10 }
 0x7b8   :  { %31506 = vst [vmem:[#allocation75_spill] sm:$0xff] %v27653_v32  ;;  %v27668_v46 = vand.u32 4294901760, %v12402_v61  ;;  %v12399_v63 = vsel %vm3682_vm1, %v7927_v47, 0  ;;  %v19103_v36 = vpop.f32.mrb[106].mxu1  ;;  %19914 = vmatmul.mubr.f32.gmra.mrb[98].mxu0 %v12669_v21  ;;  %v22617_v17 = vpop.eup %22616  ;;  %v31513_v21 = vld [vmem:[#allocation142_spill] sm:$0xff]  ;;  %v12689_v4 = vand.u32 4294901760, %v12688_v6 }
 0x7b9   :  { %31508 = vst [vmem:[#allocation111_spill] sm:$0xff] %v27661_v58  ;;  %v27674_v30 = vand.u32 4294901760, %v12399_v63  ;;  %v7930_v19 = vmul.f32 %v22613_v2, %v19103_v36  ;;  %v7757_v7 = vpop.f32.mrb[107].mxu1  ;;  %19693 = vmatmul.mubr.f32.gmra.mrb[148].mxu1 %v31511_v33  ;;  %v12679_v26 = vand.u32 4294901760, %v12678_v37  ;;  %v30174_v55 = vand.u32 4294901760, %v27661_v58 }
 0x7ba   :  { %31509 = vst [vmem:[#allocation30_spill] sm:$0xff] %v27668_v46  ;;  %v27679_v16 = vsub.f32 %v12402_v61, %v27668_v46  ;;  %v7929_v47 = vmul.f32 %v22615_v1, %v7757_v7  ;;  %19695 = vmatprep.mubr.f32.mxu1 %v31513_v21  ;;  %v31514_v45 = vand.u32 4294901760, %v27653_v32  ;;  %v27694_v7 = vpop.xlane.xlu1 %5892 }
 0x7bb   :  { %31510 = vst [vmem:[#allocation78_spill] sm:$0xff] %v27674_v30  ;;  %v27687_v2 = vsub.f32 %v12399_v63, %v27674_v30  ;;  %v12408_v37 = vsel %vm3682_vm1, %v7930_v19, 0  ;;  %19916 = vmatprep.mubr.f32.mxu0 %v12679_v26  ;;  %v12698_v61 = vsub.f32 %v27661_v58, %v30174_v55  ;;  %v22619_v63 = vpop.eup %22618  ;;  %22638 = vrcp.f32 %v27694_v7 }
 0x7bc   :  { %31512 = vst [vmem:[#allocation81_spill] sm:$0xff] %v27679_v16  ;;  %v12708_v62 = vsub.f32 %v27653_v32, %v31514_v45  ;;  %v27696_v6 = vand.u32 4294901760, %v12408_v37  ;;  %v12405_v45 = vsel %vm3682_vm1, %v7929_v47, 0  ;;  %v19106_v36 = vpop.f32.mrb[108].mxu1  ;;  %19917 = vmatmul.mubr.f32.gmra.mrb[100].mxu0 %v12689_v4  ;;  %v30183_v31 = vand.u32 4294901760, %v27679_v16  ;;  %v22621_v32 = vpop.eup %22620  ;;  %v31519_v47 = vld [vmem:[#allocation148_spill] sm:$0xff] }
 0x7bd   :  { %31515 = vst [vmem:[#allocation32_spill] sm:$0xff] %v27687_v2  ;;  %v27700_v1 = vand.u32 4294901760, %v12405_v45  ;;  %v7932_v26 = vmul.f32 %v22617_v17, %v19106_v36  ;;  %v7769_v19 = vpop.f32.mrb[109].mxu1  ;;  %19696 = vmatmul.mubr.f32.gmra.mrb[150].mxu1 %v27360_v22  ;;  %v12699_v55 = vand.u32 4294901760, %v12698_v61  ;;  %v30186_v11 = vand.u32 4294901760, %v27687_v2  ;;  %v5902_v17 = vpop.xlane.xlu0 %5901 }
 0x7be   :  { %31516 = vst [vmem:[#allocation85_spill] sm:$0xff] %v27696_v6  ;;  %v27705_v58 = vsub.f32 %v12408_v37, %v27696_v6  ;;  %v7931_v46 = vmul.f32 %v22619_v63, %v7769_v19  ;;  %19698 = vmatprep.mubr.f32.mxu1 %v31519_v47  ;;  %v12709_v4 = vand.u32 4294901760, %v12708_v62  ;;  %v12728_v30 = vsub.f32 %v27679_v16, %v30183_v31  ;;  %v22623_v31 = vpop.eup %22622  ;;  %v5899_v38 = vpop.xlane.xlu1 %5898 }
 0x7bf   :  { %31517 = vst [vmem:[#allocation87_spill] sm:$0xff] %v27700_v1  ;;  %v27713_v36 = vsub.f32 %v12405_v45, %v27700_v1  ;;  %v12414_v61 = vsel %vm3682_vm1, %v7932_v26, 0  ;;  %19919 = vmatprep.mubr.f32.mxu0 %v12699_v55  ;;  %v12718_v37 = vsub.f32 %v27687_v2, %v30186_v11  ;;  %v22625_v2 = vpop.eup %22624  ;;  %22640 = vrcp.f32 %v5902_v17 }
 0x7c0   :  { %31518 = vst [vmem:[#allocation36_spill] sm:$0xff] %v27705_v58  ;;  %v27720_v62 = vand.u32 4294901760, %v12414_v61  ;;  %v12411_v63 = vsel %vm3682_vm1, %v7931_v46, 0  ;;  %v19109_v19 = vpop.f32.mrb[110].mxu1  ;;  %19920 = vmatmul.mubr.f32.gmra.mrb[102].mxu0 %v12709_v4  ;;  %v30193_v48 = vand.u32 4294901760, %v27705_v58  ;;  %v12729_v4 = vand.u32 4294901760, %v12728_v30 }
 0x7c1   :  { %31520 = vst [vmem:[#allocation114_spill] sm:$0xff] %v27713_v36  ;;  %v27724_v45 = vand.u32 4294901760, %v12411_v63  ;;  %v7934_v16 = vmul.f32 %v22621_v32, %v19109_v19  ;;  %v7781_v26 = vpop.f32.mrb[111].mxu1  ;;  %19699 = vmatmul.mubr.f32.gmra.mrb[152].mxu1 %v27413_v43  ;;  %v12719_v55 = vand.u32 4294901760, %v12718_v37  ;;  %v30196_v11 = vand.u32 4294901760, %v27713_v36 }
 0x7c2   :  { %31521 = vst [vmem:[#allocation92_spill] sm:$0xff] %v27720_v62  ;;  %v27729_v6 = vsub.f32 %v12414_v61, %v27720_v62  ;;  %v7933_v46 = vmul.f32 %v22623_v31, %v7781_v26  ;;  %19701 = vmatprep.mubr.f32.mxu1 %v27421_v23  ;;  %v12748_v1 = vsub.f32 %v27705_v58, %v30193_v48  ;;  %v22627_v26 = vpop.eup %22626  ;;  %22642 = vrcp.f32 %v5899_v38 }
 0x7c3   :  { %31522 = vst [vmem:[#allocation48_spill] sm:$0xff] %v27724_v45  ;;  %v27737_v32 = vsub.f32 %v12411_v63, %v27724_v45  ;;  %v12420_v37 = vsel %vm3682_vm1, %v7934_v16, 0  ;;  %19922 = vmatprep.mubr.f32.mxu0 %v12719_v55  ;;  %v12738_v61 = vsub.f32 %v27713_v36, %v30196_v11  ;;  %v5908_v63 = vpop.xlane.xlu0 %5907  ;;  %v22629_v10 = vpop.eup %22628 }
 0x7c4   :  { %31523 = vst [vmem:[#allocation93_spill] sm:$0xff] %v27729_v6  ;;  %v27744_v31 = vand.u32 4294901760, %v12420_v37  ;;  %v12417_v30 = vsel %vm3682_vm1, %v7933_v46, 0  ;;  %v19112_v19 = vpop.f32.mrb[112].mxu1  ;;  %19923 = vmatmul.mubr.f32.gmra.mrb[104].mxu0 %v12729_v4  ;;  %v30201_v25 = vand.u32 4294901760, %v27729_v6  ;;  %v12749_v4 = vand.u32 4294901760, %v12748_v1 }
 0x7c5   :  { %31524 = vst [vmem:[#allocation97_spill] sm:$0xff] %v27737_v32  ;;  %v27748_v48 = vand.u32 4294901760, %v12417_v30  ;;  %v7936_v16 = vmul.f32 %v22625_v2, %v19112_v19  ;;  %v7793_v55 = vpop.f32.mrb[113].mxu1  ;;  %19702 = vmatmul.mubr.f32.gmra.mrb[154].mxu1 %v27444_v60  ;;  %v12739_v58 = vand.u32 4294901760, %v12738_v61  ;;  %v30204_v11 = vand.u32 4294901760, %v27737_v32  ;;  %v5905_v19 = vpop.xlane.xlu1 %5904 }
 0x7c6   :  { %31525 = vst [vmem:[#allocation99_spill] sm:$0xff] %v27744_v31  ;;  %v27753_v36 = vsub.f32 %v12420_v37, %v27744_v31  ;;  %v7935_v46 = vmul.f32 %v22627_v26, %v7793_v55  ;;  %19704 = vmatprep.mubr.f32.mxu1 %v27451_v54  ;;  %v12768_v62 = vsub.f32 %v27729_v6, %v30201_v25  ;;  %v22631_v25 = vpop.eup %22630  ;;  %22644 = vrcp.f32 %v5908_v63 }
 0x7c7   :  { %31526 = vst [vmem:[#allocation62_spill] sm:$0xff] %v27748_v48  ;;  %v27761_v2 = vsub.f32 %v12417_v30, %v27748_v48  ;;  %v12426_v61 = vsel %vm3682_vm1, %v7936_v16, 0  ;;  %19925 = vmatprep.mubr.f32.mxu0 %v12739_v58  ;;  %v12758_v37 = vsub.f32 %v27737_v32, %v30204_v11  ;;  %v22633_v32 = vpop.eup %22632  ;;  %22646 = vrcp.f32 %v5905_v19 }
 0x7c8   :  { %31527 = vst [vmem:[#allocation103_spill] sm:$0xff] %v27753_v36  ;;  %v27767_v26 = vand.u32 4294901760, %v12426_v61  ;;  %v12423_v1 = vsel %vm3682_vm1, %v7935_v46, 0  ;;  %v19115_v55 = vpop.f32.mrb[114].mxu1  ;;  %19926 = vmatmul.mubr.f32.gmra.mrb[106].mxu0 %v12749_v4  ;;  %v30209_v7 = vand.u32 4294901760, %v27753_v36  ;;  %v12769_v46 = vand.u32 4294901760, %v12768_v62 }
 0x7c9   :  { %31528 = vst [vmem:[#allocation100_spill] sm:$0xff] %v27761_v2  ;;  %v27771_v30 = vand.u32 4294901760, %v12423_v1  ;;  %v7938_v6 = vmul.f32 %v22629_v10, %v19115_v55  ;;  %v7805_v16 = vpop.f32.mrb[115].mxu1  ;;  %19705 = vmatmul.mubr.f32.gmra.mrb[156].mxu1 %v27463_v3  ;;  %v12759_v58 = vand.u32 4294901760, %v12758_v37  ;;  %v30214_v11 = vand.u32 4294901760, %v27761_v2  ;;  %v5914_v10 = vpop.xlane.xlu0 %5913 }
 0x7ca   :  { %31529 = vst [vmem:[#allocation102_spill] sm:$0xff] %v27767_v26  ;;  %v27776_v17 = vsub.f32 %v12426_v61, %v27767_v26  ;;  %v7937_v31 = vmul.f32 %v22631_v25, %v7805_v16  ;;  %19707 = vmatprep.mubr.f32.mxu1 %v27472_v24  ;;  %v12788_v4 = vsub.f32 %v27753_v36, %v30209_v7  ;;  %v22635_v7 = vpop.eup %22634  ;;  %v5911_v63 = vpop.xlane.xlu1 %5910  ;;  %22648 = vrcp.f32 %v5914_v10 }
 0x7cb   :  { %31530 = vst [vmem:[#allocation108_spill] sm:$0xff] %v27771_v30  ;;  %v27783_v55 = vsub.f32 %v12423_v1, %v27771_v30  ;;  %v12432_v37 = vsel %vm3682_vm1, %v7938_v6, 0  ;;  %19928 = vmatprep.mubr.f32.mxu0 %v12759_v58  ;;  %v12778_v61 = vsub.f32 %v27761_v2, %v30214_v11  ;;  %v22637_v11 = vpop.eup %22636  ;;  %22650 = vrcp.f32 %v5911_v63 }
 0x7cc   :  { %31531 = vst [vmem:[#allocation106_spill] sm:$0xff] %v27776_v17  ;;  %v27789_v25 = vand.u32 4294901760, %v12432_v37  ;;  %v12429_v62 = vsel %vm3682_vm1, %v7937_v31, 0  ;;  %v19118_v16 = vpop.f32.mrb[116].mxu1  ;;  %19929 = vmatmul.mubr.f32.gmra.mrb[108].mxu0 %v12769_v46  ;;  %v31536_v46 = vand.u32 4294901760, %v27099_v59  ;;  %v12789_v38 = vand.u32 4294901760, %v12788_v4  ;;  %v22639_v19 = vpop.eup %22638 }
 0x7cd   :  { %31532 = vst [vmem:[#allocation14_spill] sm:$0xff] %v27783_v55  ;;  %v27793_v36 = vand.u32 4294901760, %v12429_v62  ;;  %v7940_v1 = vmul.f32 %v22633_v32, %v19118_v16  ;;  %v7817_v26 = vpop.f32.mrb[117].mxu1  ;;  %19708 = vmatmul.mubr.f32.gmra.mrb[158].mxu1 %v27479_v27  ;;  %v12779_v6 = vand.u32 4294901760, %v12778_v61  ;;  %v30221_v58 = vand.u32 4294901760, %v27783_v55  ;;  %v5920_v4 = vpop.xlane.xlu0 %5919 }
 0x7ce   :  { %31533 = vst [vmem:[#allocation20_spill] sm:$0xff] %v27789_v25  ;;  %v27798_v2 = vsub.f32 %v12432_v37, %v27789_v25  ;;  %v7939_v31 = vmul.f32 %v22635_v7, %v7817_v26  ;;  %19726 = vmatprep.mubr.f32.mxu1 %v31536_v46  ;;  %v31537_v30 = vand.u32 4294901760, %v27776_v17  ;;  %22652 = vrcp.f32 %v5920_v4 }
 0x7cf   :  { %31534 = vst [vmem:[#allocation25_spill] sm:$0xff] %v27793_v36  ;;  %v27806_v16 = vsub.f32 %v12429_v62, %v27793_v36  ;;  %v12438_v61 = vsel %vm3682_vm1, %v7940_v1, 0  ;;  %19931 = vmatprep.mubr.f32.mxu0 %v12779_v6  ;;  %v12798_v37 = vsub.f32 %v27783_v55, %v30221_v58  ;;  %v31541_v6 = vand.u32 4294901760, %v27109_v53  ;;  %v22641_v58 = vpop.eup %22640 }
 0x7d0   :  { %31535 = vst [vmem:[#allocation113_spill] sm:$0xff] %v27798_v2  ;;  %v12808_v32 = vsub.f32 %v27776_v17, %v31537_v30  ;;  %v27812_v26 = vand.u32 4294901760, %v12438_v61  ;;  %v12435_v59 = vsel %vm3682_vm1, %v7939_v31, 0  ;;  %v19121_v7 = vpop.f32.mrb[118].mxu1  ;;  %19932 = vmatmul.mubr.f32.gmra.mrb[110].mxu0 %v12789_v38  ;;  %v31543_v38 = vand.u32 4294901760, %v27116_v29  ;;  %v5917_v29 = vpop.xlane.xlu1 %5916 }
 0x7d1   :  { %31538 = vst [vmem:[#allocation121_spill] sm:$0xff] %v27806_v16  ;;  %v27816_v62 = vand.u32 4294901760, %v12435_v59  ;;  %v7942_v46 = vmul.f32 %v22637_v11, %v19121_v7  ;;  %v7829_v1 = vpop.f32.mrb[119].mxu1  ;;  %19727 = vmatmul.mubr.f32.vlgmr.msra.gmra.mrb[128].mxu1 %v31541_v6  ;;  %v12799_v17 = vand.u32 4294901760, %v12798_v37  ;;  %v30224_v10 = vand.u32 4294901760, %v27806_v16  ;;  %v31546_v6 = vld [vmem:[#allocation2_spill] sm:$0xff] }
 0x7d2   :  { %31539 = vst [vmem:[#allocation124_spill] sm:$0xff] %v27812_v26  ;;  %v27822_v55 = vsub.f32 %v12438_v61, %v27812_v26  ;;  %v7941_v31 = vmul.f32 %v22639_v19, %v7829_v1  ;;  %20977 = vmatpush3.bf16.msra.mxu1 %v31480_v34  ;;  %19729 = vmatprep.mubr.f32.mxu1 %v31543_v38  ;;  %v12809_v30 = vand.u32 4294901760, %v12808_v32  ;;  %v31544_v11 = vand.u32 4294901760, %v27798_v2 }
 0x7d3   :  { %31540 = vst [vmem:[#allocation49_spill] sm:$0xff] %v27816_v62  ;;  %v27831_v53 = vsub.f32 %v12435_v59, %v27816_v62  ;;  %v12444_v37 = vsel %vm3682_vm1, %v7942_v46, 0  ;;  %20979 = vmatprep.subr.bf16.mxu1 %v31546_v6  ;;  %19934 = vmatprep.mubr.f32.mxu0 %v12799_v17  ;;  %v12818_v34 = vsub.f32 %v27806_v16, %v30224_v10  ;;  %v22643_v59 = vpop.eup %22642  ;;  %v31549_v17 = vand.u32 4294901760, %v27128_v42 }
 0x7d4   :  { %31542 = vst [vmem:[#allocation52_spill] sm:$0xff] %v27822_v55  ;;  %v12828_v7 = vsub.f32 %v27798_v2, %v31544_v11  ;;  %v27838_v32 = vand.u32 4294901760, %v12444_v37  ;;  %v12441_v61 = vsel %vm3682_vm1, %v7941_v31, 0  ;;  %v19124_v19 = vpop.f32.mrb[120].mxu1  ;;  %19935 = vmatmul.mubr.f32.gmra.mrb[112].mxu0 %v12809_v30  ;;  %v22645_v4 = vpop.eup %22644  ;;  %v31551_v30 = vand.u32 4294901760, %v27137_v5 }
 0x7d5   :  { %31545 = vst [vmem:[#allocation59_spill] sm:$0xff] %v27831_v53  ;;  %v27842_v1 = vand.u32 4294901760, %v12441_v61  ;;  %v7944_v46 = vmul.f32 %v22641_v58, %v19124_v19  ;;  %v7841_v38 = vpop.f32.mrb[121].mxu1  ;;  %19730 = vmatmul.mubr.f32.gmra.mrb[130].mxu1 %v31549_v17  ;;  %v12819_v11 = vand.u32 4294901760, %v12818_v34  ;;  %v30227_v10 = vand.u32 4294901760, %v27831_v53  ;;  %v31554_v17 = vld [vmem:[#allocation4_spill] sm:$0xff] }
 0x7d6   :  { %31547 = vst [vmem:[#allocation65_spill] sm:$0xff] %v27838_v32  ;;  %v27848_v2 = vsub.f32 %v12444_v37, %v27838_v32  ;;  %v7943_v31 = vmul.f32 %v22643_v59, %v7841_v38  ;;  %20981 = vmatpush3.bf16.msra.mxu1 %v31546_v6  ;;  %19732 = vmatprep.mubr.f32.mxu1 %v31551_v30  ;;  %v12829_v63 = vand.u32 4294901760, %v12828_v7  ;;  %v31552_v58 = vand.u32 4294901760, %v27822_v55  ;;  %v22647_v59 = vpop.eup %22646 }
 0x7d7   :  { %31548 = vst [vmem:[#allocation12_spill] sm:$0xff] %v27842_v1  ;;  %22654 = vrcp.f32 %v5917_v29  ;;  %v27857_v42 = vsub.f32 %v12441_v61, %v27842_v1  ;;  %v12450_v34 = vsel %vm3682_vm1, %v7944_v46, 0  ;;  %20983 = vmatprep.subr.bf16.mxu1 %v31554_v17  ;;  %19937 = vmatprep.mubr.f32.mxu0 %v12819_v11  ;;  %v12838_v37 = vsub.f32 %v27831_v53, %v30227_v10  ;;  %v22649_v10 = vpop.eup %22648 }
 0x7d8   :  { %31550 = vst [vmem:[#allocation15_spill] sm:$0xff] %v27848_v2  ;;  %v12848_v19 = vsub.f32 %v27822_v55, %v31552_v58  ;;  %v27864_v5 = vand.u32 4294901760, %v12450_v34  ;;  %v12447_v7 = vsel %vm3682_vm1, %v7943_v31, 0  ;;  %v19127_v6 = vpop.f32.mrb[122].mxu1  ;;  %19938 = vmatmul.mubr.f32.gmra.mrb[114].mxu0 %v12829_v63  ;;  %v31557_v30 = vand.u32 4294901760, %v27152_v9 }
 0x7d9   :  { %31553 = vst [vmem:[#allocation22_spill] sm:$0xff] %v27857_v42  ;;  %v27868_v61 = vand.u32 4294901760, %v12447_v7  ;;  %v7946_v38 = vmul.f32 %v22645_v4, %v19127_v6  ;;  %v7853_v46 = vpop.f32.mrb[123].mxu1  ;;  %v12839_v11 = vand.u32 4294901760, %v12838_v37  ;;  %v30232_v58 = vand.u32 4294901760, %v27857_v42 }
 0x7da   :  { %31555 = vst [vmem:[#allocation123_spill] sm:$0xff] %v27864_v5  ;;  %19733 = vmatmul.mubr.f32.gmra.mrb[132].mxu1 %v31557_v30  ;;  %v27874_v55 = vsub.f32 %v12450_v34, %v27864_v5  ;;  %v7945_v31 = vmul.f32 %v22647_v59, %v7853_v46  ;;  %v31559_v63 = vand.u32 4294901760, %v27165_v52  ;;  %v12849_v29 = vand.u32 4294901760, %v12848_v19  ;;  %v31562_v30 = vld [vmem:[#allocation6_spill] sm:$0xff]  ;;  %v22651_v46 = vpop.eup %22650 }
 0x7db   :  { %31556 = vst [vmem:[#allocation60_spill] sm:$0xff] %v27868_v61  ;;  %20985 = vmatpush3.bf16.msra.mxu1 %v31554_v17  ;;  %v31560_v4 = vand.u32 4294901760, %v27848_v2  ;;  %v27883_v9 = vsub.f32 %v12447_v7, %v27868_v61  ;;  %v12456_v37 = vsel %vm3682_vm1, %v7946_v38, 0  ;;  %19940 = vmatprep.mubr.f32.mxu0 %v12839_v11  ;;  %v12858_v34 = vsub.f32 %v27857_v42, %v30232_v58  ;;  %v22653_v58 = vpop.eup %22652 }
 0x7dc   :  { %31558 = vst [vmem:[#allocation129_spill] sm:$0xff] %v27874_v55  ;;  %19735 = vmatprep.mubr.f32.mxu1 %v31559_v63  ;;  %20987 = vmatprep.subr.bf16.mxu1 %v31562_v30  ;;  %v27890_v17 = vand.u32 4294901760, %v12456_v37  ;;  %v12453_v52 = vsel %vm3682_vm1, %v7945_v31, 0  ;;  %v19130_v19 = vpop.f32.mrb[124].mxu1 }
 0x7dd   :  { %v12868_v6 = vsub.f32 %v27848_v2, %v31560_v4  ;;  %31561 = vst [vmem:[#allocation109_spill] sm:$0xff] %v27883_v9  ;;  %19941 = vmatmul.mubr.f32.gmra.mrb[116].mxu0 %v12849_v29  ;;  %v27894_v7 = vand.u32 4294901760, %v12453_v52  ;;  %v7948_v63 = vmul.f32 %v22649_v10, %v19130_v19  ;;  %v7865_v38 = vpop.f32.mrb[125].mxu1  ;;  %v31565_v4 = vand.u32 4294901760, %v31478_v41 }
 0x7de   :  { %31563 = vst [vmem:[#allocation131_spill] sm:$0xff] %v27890_v17  ;;  %v12859_v11 = vand.u32 4294901760, %v12858_v34  ;;  %v30235_v2 = vand.u32 4294901760, %v27883_v9  ;;  %v27900_v42 = vsub.f32 %v12456_v37, %v27890_v17  ;;  %v7947_v31 = vmul.f32 %v22651_v46, %v7865_v38 }
 0x7df   :  { %31564 = vst [vmem:[#allocation118_spill] sm:$0xff] %v27894_v7  ;;  %19736 = vmatmul.mubr.f32.gmra.mrb[134].mxu1 %v31565_v4  ;;  %v31567_v29 = vand.u32 4294901760, %v31479_v13  ;;  %v12869_v59 = vand.u32 4294901760, %v12868_v6  ;;  %v31568_v10 = vand.u32 4294901760, %v27874_v55  ;;  %v27909_v41 = vsub.f32 %v12453_v52, %v27894_v7 }
 0x7e0   :  { %31566 = vst [vmem:[#allocation67_spill] sm:$0xff] %v27900_v42  ;;  %20989 = vmatpush3.bf16.msra.mxu1 %v31562_v30  ;;  %v12462_v34 = vsel %vm3682_vm1, %v7948_v63, 0  ;;  %19943 = vmatprep.mubr.f32.mxu0 %v12859_v11  ;;  %v12878_v37 = vsub.f32 %v27883_v9, %v30235_v2  ;;  %v12459_v13 = vsel %vm3682_vm1, %v7947_v31, 0  ;;  %v19133_v6 = vpop.f32.mrb[126].mxu1  ;;  %v30245_v46 = vand.u32 4294901760, %v27900_v42 }
 0x7e1   :  { %19738 = vmatprep.mubr.f32.mxu1 %v31567_v29  ;;  %v12888_v19 = vsub.f32 %v27874_v55, %v31568_v10  ;;  %31569 = vst [vmem:[#allocation139_spill] sm:$0xff] %v27909_v41  ;;  %20991 = vmatprep.subr.bf16.mxu1 %v31358_v50  ;;  %v27916_v30 = vand.u32 4294901760, %v12462_v34  ;;  %v22655_v38 = vpop.eup %22654  ;;  %v27920_v52 = vand.u32 4294901760, %v12459_v13  ;;  %v7950_v4 = vmul.f32 %v22653_v58, %v19133_v6  ;;  %v7877_v63 = vpop.f32.mrb[127].mxu1 }
 0x7e2   :  { %19944 = vmatmul.mubr.f32.gmra.mrb[118].mxu0 %v12869_v59  ;;  %v31572_v29 = vand.u32 4294901760, %v31481_v0  ;;  %v12879_v11 = vand.u32 4294901760, %v12878_v37  ;;  %v30246_v10 = vand.u32 4294901760, %v27909_v41  ;;  %v7949_v55 = vmul.f32 %v22655_v38, %v7877_v63 }
 0x7e3   :  { %31570 = vst [vmem:[#allocation71_spill] sm:$0xff] %v27916_v30  ;;  %31571 = vst [vmem:[#allocation79_spill] sm:$0xff] %v27920_v52  ;;  %v27926_v2 = vsub.f32 %v12462_v34, %v27916_v30  ;;  %v31574_v31 = vand.u32 4294901760, %v31482_v40  ;;  %v12889_v59 = vand.u32 4294901760, %v12888_v19  ;;  %v12908_v9 = vsub.f32 %v27900_v42, %v30245_v46 }
 0x7e4   :  { %19739 = vmatmul.mubr.f32.gmra.mrb[136].mxu1 %v31572_v29  ;;  %v27934_v58 = vsub.f32 %v12459_v13, %v27920_v52  ;;  %v12468_v0 = vsel %vm3682_vm1, %v7950_v4, 0  ;;  %19946 = vmatprep.mubr.f32.mxu0 %v12879_v11  ;;  %v12898_v34 = vsub.f32 %v27909_v41, %v30246_v10  ;;  %v12465_v40 = vsel %vm3682_vm1, %v7949_v55, 0 }
 0x7e5   :  { %31573 = vst [vmem:[#allocation144_spill] sm:$0xff] %v27926_v2  ;;  %19741 = vmatprep.mubr.f32.mxu1 %v31574_v31  ;;  %v27940_v37 = vand.u32 4294901760, %v12468_v0  ;;  %v30243_v19 = vand.u32 4294901760, %v27926_v2  ;;  %v27944_v6 = vand.u32 4294901760, %v12465_v40  ;;  %v31578_v38 = vand.u32 4294901760, %v31483_v15 }
 0x7e6   :  { %31575 = vst [vmem:[#allocation140_spill] sm:$0xff] %v27934_v58  ;;  %19947 = vmatmul.mubr.f32.gmra.mrb[120].mxu0 %v12889_v59  ;;  %v12899_v13 = vand.u32 4294901760, %v12898_v34  ;;  %v30244_v4 = vand.u32 4294901760, %v27934_v58  ;;  %v31580_v29 = vand.u32 4294901760, %v31484_v49  ;;  %v12909_v11 = vand.u32 4294901760, %v12908_v9 }
 0x7e7   :  { %31576 = vst [vmem:[#allocation146_spill] sm:$0xff] %v27940_v37  ;;  %31577 = vst [vmem:[#allocation145_spill] sm:$0xff] %v27944_v6  ;;  %v27950_v63 = vsub.f32 %v12468_v0, %v27940_v37  ;;  %v12928_v55 = vsub.f32 %v27926_v2, %v30243_v19  ;;  %v27958_v31 = vsub.f32 %v12465_v40, %v27944_v6  ;;  %v31582_v0 = vand.u32 4294901760, %v31487_v18 }
 0x7e8   :  { %19742 = vmatmul.mubr.f32.gmra.mrb[138].mxu1 %v31578_v38  ;;  %19949 = vmatprep.mubr.f32.mxu0 %v12899_v13  ;;  %v12918_v15 = vsub.f32 %v27934_v58, %v30244_v4  ;;  %v31583_v34 = vand.u32 4294901760, %v31489_v35  ;;  %v31584_v18 = vand.u32 4294901760, %v31493_v57  ;;  %v31590_v57 = vand.u32 4294901760, %v31511_v33 }
 0x7e9   :  { %31579 = vst [vmem:[#allocation11_spill] sm:$0xff] %v27950_v63  ;;  %19744 = vmatprep.mubr.f32.mxu1 %v31580_v29  ;;  %31581 = vst [vmem:[#allocation150_spill] sm:$0xff] %v27958_v31  ;;  %v30240_v59 = vand.u32 4294901760, %v27950_v63  ;;  %v30241_v9 = vand.u32 4294901760, %v27958_v31  ;;  %v12929_v38 = vand.u32 4294901760, %v12928_v55  ;;  %v31586_v55 = vand.u32 4294901760, %v31499_v39 }
 0x7ea   :  { %19950 = vmatmul.mubr.f32.gmra.mrb[122].mxu0 %v12909_v11  ;;  %v12919_v49 = vand.u32 4294901760, %v12918_v15  ;;  %v31585_v11 = vand.u32 4294901760, %v31495_v44  ;;  %v31587_v15 = vand.u32 4294901760, %v31501_v28  ;;  %v31591_v44 = vand.u32 4294901760, %v31513_v21 }
 0x7eb   :  { %v12948_v40 = vsub.f32 %v27950_v63, %v30240_v59  ;;  %v12938_v13 = vsub.f32 %v27958_v31, %v30241_v9  ;;  %v31593_v39 = vand.u32 4294901760, %v31519_v47  ;;  %v31594_v28 = vand.u32 4294901760, %v27413_v43  ;;  %v31602_v43 = vld [vmem:[#allocation82_spill] sm:$0xff] }
 0x7ec   :  { %19745 = vmatmul.mubr.f32.gmra.mrb[140].mxu1 %v31582_v0  ;;  %19952 = vmatprep.mubr.f32.mxu0 %v12919_v49  ;;  %v31588_v0 = vand.u32 4294901760, %v31505_v51  ;;  %v31589_v49 = vand.u32 4294901760, %v31507_v8  ;;  %v31595_v51 = vand.u32 4294901760, %v27421_v23  ;;  %v31596_v8 = vand.u32 4294901760, %v27444_v60  ;;  %v31601_v23 = vld [vmem:[#allocation80_spill] sm:$0xff]  ;;  %v31603_v60 = vld [vmem:[#allocation77_spill] sm:$0xff] }
 0x7ed   :  { %19747 = vmatprep.mubr.f32.mxu1 %v31583_v34  ;;  %v12939_v29 = vand.u32 4294901760, %v12938_v13  ;;  %v12949_v35 = vand.u32 4294901760, %v12948_v40  ;;  %v31592_v34 = vand.u32 4294901760, %v27360_v22  ;;  %v31597_v33 = vand.u32 4294901760, %v27451_v54  ;;  %v31605_v54 = vld [vmem:[#allocation89_spill] sm:$0xff]  ;;  %v31611_v40 = vld [vmem:[#allocation107_spill] sm:$0xff] }
 0x7ee   :  { %19953 = vmatmul.mubr.f32.gmra.mrb[124].mxu0 %v12929_v38  ;;  %v31598_v21 = vand.u32 4294901760, %v27463_v3  ;;  %v31599_v22 = vand.u32 4294901760, %v27472_v24  ;;  %v31600_v47 = vand.u32 4294901760, %v27479_v27  ;;  %v31604_v3 = vld [vmem:[#allocation117_spill] sm:$0xff]  ;;  %v31606_v24 = vld [vmem:[#allocation86_spill] sm:$0xff]  ;;  %v31609_v38 = vld [vmem:[#allocation95_spill] sm:$0xff] }
 0x7ef   :  { %19955 = vmatprep.mubr.f32.mxu0 %v12939_v29  ;;  %v31608_v27 = vld [vmem:[#allocation94_spill] sm:$0xff]  ;;  %v31612_v13 = vld [vmem:[#allocation104_spill] sm:$0xff] }
 0x7f0   :  { %19748 = vmatmul.mubr.f32.gmra.mrb[142].mxu1 %v31584_v18  ;;  %v31613_v18 = vld [vmem:[#allocation27_spill] sm:$0xff]  ;;  %v31614_v29 = vld [vmem:[#allocation110_spill] sm:$0xff] }
 0x7f1   :  { %19750 = vmatprep.mubr.f32.mxu1 %v31585_v11  ;;  %v31615_v11 = vld [vmem:[#allocation119_spill] sm:$0xff] }
 0x7f2   :  { %19956 = vmatmul.mubr.f32.gmra.mrb[126].mxu0 %v12949_v35  ;;  %v31616_v35 = vld [vmem:[#allocation122_spill] sm:$0xff] }
 0x7f4   :  { %19751 = vmatmul.mubr.f32.gmra.mrb[144].mxu1 %v31586_v55  ;;  %v31617_v55 = vld [vmem:[#allocation126_spill] sm:$0xff] }
 0x7f5   :  { %19753 = vmatprep.mubr.f32.mxu1 %v31587_v15  ;;  %v31618_v15 = vld [vmem:[#allocation128_spill] sm:$0xff] }
 0x7f8   :  { %19754 = vmatmul.mubr.f32.gmra.mrb[146].mxu1 %v31588_v0  ;;  %v31619_v0 = vld [vmem:[#allocation130_spill] sm:$0xff] }
 0x7f9   :  { %19756 = vmatprep.mubr.f32.mxu1 %v31589_v49  ;;  %v31620_v49 = vld [vmem:[#allocation134_spill] sm:$0xff] }
 0x7fc   :  { %19757 = vmatmul.mubr.f32.gmra.mrb[148].mxu1 %v31590_v57  ;;  %v31621_v57 = vld [vmem:[#allocation135_spill] sm:$0xff] }
 0x7fd   :  { %19759 = vmatprep.mubr.f32.mxu1 %v31591_v44  ;;  %v31622_v44 = vld [vmem:[#allocation137_spill] sm:$0xff] }
 0x800   :  { %19760 = vmatmul.mubr.f32.gmra.mrb[150].mxu1 %v31592_v34  ;;  %v31623_v34 = vld [vmem:[#allocation143_spill] sm:$0xff] }
 0x801   :  { %19762 = vmatprep.mubr.f32.mxu1 %v31593_v39  ;;  %v31624_v39 = vld [vmem:[#allocation147_spill] sm:$0xff] }
 0x804   :  { %19763 = vmatmul.mubr.f32.gmra.mrb[152].mxu1 %v31594_v28  ;;  %v31625_v28 = vld [vmem:[#allocation42_spill] sm:$0xff] }
 0x805   :  { %19765 = vmatprep.mubr.f32.mxu1 %v31595_v51  ;;  %v31626_v51 = vld [vmem:[#allocation56_spill] sm:$0xff] }
 0x808   :  { %19766 = vmatmul.mubr.f32.gmra.mrb[154].mxu1 %v31596_v8  ;;  %v31627_v8 = vld [vmem:[#allocation28_spill] sm:$0xff] }
 0x809   :  { %19768 = vmatprep.mubr.f32.mxu1 %v31597_v33  ;;  %v31628_v33 = vld [vmem:[#allocation46_spill] sm:$0xff] }
 0x80c   :  { %19769 = vmatmul.mubr.f32.gmra.mrb[156].mxu1 %v31598_v21  ;;  %v31629_v21 = vld [vmem:[#allocation35_spill] sm:$0xff] }
 0x80d   :  { %19771 = vmatprep.mubr.f32.mxu1 %v31599_v22  ;;  %v31630_v22 = vld [vmem:[#allocation47_spill] sm:$0xff] }
 0x810   :  { %19772 = vmatmul.mubr.f32.gmra.mrb[158].mxu1 %v31600_v47  ;;  %v31631_v47 = vld [vmem:[#allocation37_spill] sm:$0xff] }
 0x811   :  { %19790 = vmatprep.mubr.f32.mxu1 %v27090_v14 }
 0x814   :  { %19791 = vmatmul.mubr.f32.vlgmr.msra.gmra.mrb[128].mxu1 %v27095_v20 }
 0x815   :  { %20993 = vmatpush3.bf16.msra.mxu1 %v31358_v50  ;;  %19793 = vmatprep.mubr.f32.mxu1 %v27101_v12  ;;  %v31607_v50 = vld [vmem:[#allocation90_spill] sm:$0xff] }
 0x816   :  { %20995 = vmatprep.subr.bf16.mxu1 %v31370_v56 }
 0x818   :  { %19794 = vmatmul.mubr.f32.gmra.mrb[130].mxu1 %v31601_v23 }
 0x819   :  { %20997 = vmatpush3.bf16.msra.mxu1 %v31370_v56  ;;  %19796 = vmatprep.mubr.f32.mxu1 %v31602_v43  ;;  %v31610_v56 = vld [vmem:[#allocation98_spill] sm:$0xff] }
 0x81a   :  { %20999 = vmatprep.subr.bf16.mxu1 %v31603_v60 }
 0x81c   :  { %19797 = vmatmul.mubr.f32.gmra.mrb[132].mxu1 %v31604_v3 }
 0x81d   :  { %21001 = vmatpush3.bf16.msra.mxu1 %v31603_v60  ;;  %19799 = vmatprep.mubr.f32.mxu1 %v31605_v54  ;;  %v31635_v60 = vld [vmem:[#allocation40_spill] sm:$0xff] }
 0x81e   :  { %21003 = vmatprep.subr.bf16.mxu1 %v31606_v24 }
 0x820   :  { %19800 = vmatmul.mubr.f32.gmra.mrb[134].mxu1 %v31607_v50 }
 0x821   :  { %21005 = vmatpush3.bf16.msra.mxu1 %v31606_v24  ;;  %19802 = vmatprep.mubr.f32.mxu1 %v31608_v27 }
 0x824   :  { %19803 = vmatmul.mubr.f32.gmra.mrb[136].mxu1 %v31609_v38 }
 0x825   :  { %19805 = vmatprep.mubr.f32.mxu1 %v31610_v56 }
 0x828   :  { %19806 = vmatmul.mubr.f32.gmra.mrb[138].mxu1 %v31611_v40 }
 0x829   :  { %19808 = vmatprep.mubr.f32.mxu1 %v31612_v13 }
 0x82c   :  { %19809 = vmatmul.mubr.f32.gmra.mrb[140].mxu1 %v31613_v18 }
 0x82d   :  { %19811 = vmatprep.mubr.f32.mxu1 %v31614_v29 }
 0x830   :  { %19812 = vmatmul.mubr.f32.gmra.mrb[142].mxu1 %v31615_v11 }
 0x831   :  { %19814 = vmatprep.mubr.f32.mxu1 %v31616_v35 }
 0x834   :  { %19815 = vmatmul.mubr.f32.gmra.mrb[144].mxu1 %v31617_v55 }
 0x835   :  { %19817 = vmatprep.mubr.f32.mxu1 %v31618_v15 }
 0x838   :  { %19818 = vmatmul.mubr.f32.gmra.mrb[146].mxu1 %v31619_v0 }
 0x839   :  { %19820 = vmatprep.mubr.f32.mxu1 %v31620_v49 }
 0x83c   :  { %19821 = vmatmul.mubr.f32.gmra.mrb[148].mxu1 %v31621_v57 }
 0x83d   :  { %19823 = vmatprep.mubr.f32.mxu1 %v31622_v44 }
 0x840   :  { %19824 = vmatmul.mubr.f32.gmra.mrb[150].mxu1 %v31623_v34 }
 0x841   :  { %19826 = vmatprep.mubr.f32.mxu1 %v31624_v39 }
 0x844   :  { %19827 = vmatmul.mubr.f32.gmra.mrb[152].mxu1 %v31625_v28 }
 0x845   :  { %19829 = vmatprep.mubr.f32.mxu1 %v31626_v51 }
 0x848   :  { %19830 = vmatmul.mubr.f32.gmra.mrb[154].mxu1 %v31627_v8 }
 0x849   :  { %19832 = vmatprep.mubr.f32.mxu1 %v31628_v33 }
 0x84c   :  { %19833 = vmatmul.mubr.f32.gmra.mrb[156].mxu1 %v31629_v21 }
 0x84d   :  { %19835 = vmatprep.mubr.f32.mxu1 %v31630_v22 }
 0x850   :  { %19836 = vmatmul.mubr.f32.gmra.mrb[158].mxu1 %v31631_v47 }
 0x851   :  { %19854 = vmatprep.mubr.f32.mxu1 %v27090_v14  ;;  %v22721_v14 = vld [vmem:[%s29399_s3] sm:$0xff] }
 0x854   :  { %19855 = vmatmul.mubr.f32.vlgmr.msra.gmra.mrb[128].mxu1 %v27095_v20  ;;  %v31632_v20 = vld [vmem:[#allocation149_spill] sm:$0xff] }
 0x855   :  { %19857 = vmatprep.mubr.f32.mxu1 %v27101_v12  ;;  %v31633_v12 = vand.u32 4294901760, %v31632_v20 }
 0x858   :  { %19858 = vmatmul.mubr.f32.gmra.mrb[130].mxu1 %v31601_v23  ;;  %v28085_v23 = vsub.f32 %v22721_v14, %v31633_v12 }
 0x859   :  { %19860 = vmatprep.mubr.f32.mxu1 %v31602_v43  ;;  %v22722_v43 = vld [vmem:[%s29399_s3 + $0x8] sm:$0xff] }
 0x85a   :  { %31634 = vst [vmem:[#allocation17_spill] sm:$0xff] %v28085_v23  ;;  %v30253_v24 = vand.u32 4294901760, %v28085_v23 }
 0x85c   :  { %19861 = vmatmul.mubr.f32.gmra.mrb[132].mxu1 %v31604_v3  ;;  %v31636_v3 = vand.u32 4294901760, %v31635_v60 }
 0x85d   :  { %19863 = vmatprep.mubr.f32.mxu1 %v31605_v54 }
 0x85e   :  { %v28092_v54 = vsub.f32 %v22722_v43, %v31636_v3 }
 0x860   :  { %19864 = vmatmul.mubr.f32.gmra.mrb[134].mxu1 %v31607_v50  ;;  %31637 = vst [vmem:[#allocation151_spill] sm:$0xff] %v28092_v54  ;;  %v30251_v50 = vand.u32 4294901760, %v28092_v54 }
 0x861   :  { %19866 = vmatprep.mubr.f32.mxu1 %v31608_v27  ;;  %v13279_v27 = vsub.f32 %v28085_v23, %v30253_v24 }
 0x864   :  { %19867 = vmatmul.mubr.f32.gmra.mrb[136].mxu1 %v31609_v38  ;;  %v13286_v38 = vsub.f32 %v28092_v54, %v30251_v50 }
 0x865   :  { %19869 = vmatprep.mubr.f32.mxu1 %v31610_v56  ;;  %v13280_v56 = vand.u32 4294901760, %v13279_v27 }
 0x868   :  { %19870 = vmatmul.mubr.f32.gmra.mrb[138].mxu1 %v31611_v40  ;;  %v13287_v40 = vand.u32 4294901760, %v13286_v38 }
 0x869   :  { %19872 = vmatprep.mubr.f32.mxu1 %v31612_v13 }
 0x86a   :  { %v21014_v13 = vpack.c.bf16 %v13287_v40, %v13280_v56 }
 0x86c   :  { %19873 = vmatmul.mubr.f32.gmra.mrb[140].mxu1 %v31613_v18  ;;  %21015 = vmatprep.subr.bf16.mxu0 %v21014_v13  ;;  %v22723_v18 = vld [vmem:[%s29399_s3 + $0x10] sm:$0xff] }
 0x86d   :  { %19875 = vmatprep.mubr.f32.mxu1 %v31614_v29  ;;  %21017 = vmatpush3.bf16.msra.mxu0 %v21014_v13  ;;  %v31638_v29 = vld [vmem:[#allocation44_spill] sm:$0xff] }
 0x870   :  { %19876 = vmatmul.mubr.f32.gmra.mrb[142].mxu1 %v31615_v11  ;;  %v31639_v11 = vand.u32 4294901760, %v31638_v29 }
 0x871   :  { %19878 = vmatprep.mubr.f32.mxu1 %v31616_v35 }
 0x872   :  { %v28107_v35 = vsub.f32 %v22723_v18, %v31639_v11 }
 0x874   :  { %19879 = vmatmul.mubr.f32.gmra.mrb[144].mxu1 %v31617_v55  ;;  %v22724_v55 = vld [vmem:[%s29399_s3 + $0x18] sm:$0xff] }
 0x875   :  { %19881 = vmatprep.mubr.f32.mxu1 %v31618_v15  ;;  %v31640_v15 = vld [vmem:[#allocation26_spill] sm:$0xff] }
 0x878   :  { %19882 = vmatmul.mubr.f32.gmra.mrb[146].mxu1 %v31619_v0  ;;  %v31641_v0 = vand.u32 4294901760, %v31640_v15 }
 0x879   :  { %19884 = vmatprep.mubr.f32.mxu1 %v31620_v49 }
 0x87a   :  { %v28114_v49 = vsub.f32 %v22724_v55, %v31641_v0 }
 0x87c   :  { %19885 = vmatmul.mubr.f32.gmra.mrb[148].mxu1 %v31621_v57  ;;  %v30249_v57 = vand.u32 4294901760, %v28107_v35 }
 0x87d   :  { %19887 = vmatprep.mubr.f32.mxu1 %v31622_v44  ;;  %v30248_v44 = vand.u32 4294901760, %v28114_v49 }
 0x880   :  { %19888 = vmatmul.mubr.f32.gmra.mrb[150].mxu1 %v31623_v34  ;;  %v13293_v34 = vsub.f32 %v28107_v35, %v30249_v57 }
 0x881   :  { %19890 = vmatprep.mubr.f32.mxu1 %v31624_v39  ;;  %v13300_v39 = vsub.f32 %v28114_v49, %v30248_v44 }
 0x884   :  { %19891 = vmatmul.mubr.f32.gmra.mrb[152].mxu1 %v31625_v28  ;;  %v13294_v28 = vand.u32 4294901760, %v13293_v34 }
 0x885   :  { %19893 = vmatprep.mubr.f32.mxu1 %v31626_v51  ;;  %v13301_v51 = vand.u32 4294901760, %v13300_v39 }
 0x888   :  { %19894 = vmatmul.mubr.f32.gmra.mrb[154].mxu1 %v31627_v8  ;;  %v21018_v8 = vpack.c.bf16 %v13301_v51, %v13294_v28 }
 0x889   :  { %19896 = vmatprep.mubr.f32.mxu1 %v31628_v33  ;;  %v10242_v33 = vpop.xlane.xlu0 %10241 }
 0x88a   :  { %21019 = vmatprep.subr.bf16.mxu0 %v21018_v8  ;;  %22656 = vrcp.f32 %v10242_v33 }
 0x88b   :  { %21021 = vmatpush3.bf16.msra.mxu0 %v21018_v8 }
 0x88c   :  { %19897 = vmatmul.mubr.f32.gmra.mrb[156].mxu1 %v31629_v21  ;;  %v10239_v21 = vpop.xlane.xlu1 %10238 }
 0x88d   :  { %19899 = vmatprep.mubr.f32.mxu1 %v31630_v22  ;;  %v10248_v22 = vpop.xlane.xlu0 %10247  ;;  %22658 = vrcp.f32 %v10239_v21 }
 0x88e   :  { %22660 = vrcp.f32 %v10248_v22 }
 0x890   :  { %19900 = vmatmul.mubr.f32.gmra.mrb[158].mxu1 %v31631_v47  ;;  %v10245_v47 = vpop.xlane.xlu1 %10244 }
 0x891   :  { %v10254_v14 = vpop.xlane.xlu0 %10253  ;;  %22662 = vrcp.f32 %v10245_v47 }
 0x892   :  { %22664 = vrcp.f32 %v10254_v14 }
 0x894   :  { %v10251_v20 = vpop.xlane.xlu1 %10250  ;;  %v22657_v29 = vpop.eup %22656 }
 0x895   :  { %v10260_v12 = vpop.xlane.xlu0 %10259  ;;  %22666 = vrcp.f32 %v10251_v20 }
 0x896   :  { %22668 = vrcp.f32 %v10260_v12 }
 0x897   :  { %v22659_v55 = vpop.eup %22658 }
 0x898   :  { %v10257_v43 = vpop.xlane.xlu1 %10256  ;;  %v22661_v51 = vpop.eup %22660 }
 0x899   :  { %v10266_v60 = vpop.xlane.xlu0 %10265  ;;  %22670 = vrcp.f32 %v10257_v43 }
 0x89a   :  { %22672 = vrcp.f32 %v10266_v60 }
 0x89b   :  { %v22663_v22 = vpop.eup %22662 }
 0x89c   :  { %v10263_v3 = vpop.xlane.xlu1 %10262 }
 0x89d   :  { %v10272_v27 = vpop.xlane.xlu0 %10271  ;;  %22674 = vrcp.f32 %v10263_v3 }
 0x89e   :  { %22676 = vrcp.f32 %v10272_v27 }
 0x8a0   :  { %v10269_v38 = vpop.xlane.xlu1 %10268 }
 0x8a1   :  { %v10278_v56 = vpop.xlane.xlu0 %10277  ;;  %22678 = vrcp.f32 %v10269_v38 }
 0x8a2   :  { %22680 = vrcp.f32 %v10278_v56 }
 0x8a4   :  { %v10275_v40 = vpop.xlane.xlu1 %10274 }
 0x8a5   :  { %v28124_v13 = vpop.xlane.xlu0 %10283  ;;  %22682 = vrcp.f32 %v10275_v40 }
 0x8a6   :  { %22684 = vrcp.f32 %v28124_v13 }
 0x8a8   :  { %v28126_v18 = vpop.xlane.xlu1 %10280 }
 0x8a9   :  { %v28128_v34 = vpop.xlane.xlu0 %10289  ;;  %22686 = vrcp.f32 %v28126_v18 }
 0x8aa   :  { %22688 = vrcp.f32 %v28128_v34 }
 0x8ac   :  { %v28134_v47 = vpop.xlane.xlu1 %10286 }
 0x8ad   :  { %22690 = vrcp.f32 %v28134_v47 }
 0x8b0   :  { %v28160_v9 = vpop.xlane.xlu1 %10292 }
 0x927   :  { %v19856_v11 = vpop.f32.mrb[128].mxu1 }
 0x928   :  { %v12332_v15 = vmul.f32 %v22657_v29, %v19856_v11  ;;  %v12109_v0 = vpop.f32.mrb[129].mxu1 }
 0x929   :  { %v12331_v39 = vmul.f32 %v22659_v55, %v12109_v0  ;;  %v28145_v0 = vpop.xlane.xlu0 %10295 }
 0x92a   :  { %v12474_v28 = vsel %vm3682_vm1, %v12332_v15, 0  ;;  %v22665_v15 = vpop.eup %22664  ;;  %22692 = vrcp.f32 %v28145_v0 }
 0x92b   :  { %v28131_v8 = vand.u32 4294901760, %v12474_v28  ;;  %v12471_v33 = vsel %vm3682_vm1, %v12331_v39, 0  ;;  %v19859_v21 = vpop.f32.mrb[130].mxu1  ;;  %22694 = vrcp.f32 %v28160_v9 }
 0x92c   :  { %v28136_v14 = vand.u32 4294901760, %v12471_v33  ;;  %v12334_v20 = vmul.f32 %v22661_v51, %v19859_v21  ;;  %v12121_v29 = vpop.f32.mrb[131].mxu1  ;;  %v22667_v21 = vpop.eup %22666 }
 0x92d   :  { %31642 = vst [vmem:[#allocation19_spill] sm:$0xff] %v28131_v8  ;;  %v28139_v12 = vsub.f32 %v12474_v28, %v28131_v8  ;;  %v12333_v43 = vmul.f32 %v22663_v22, %v12121_v29  ;;  %v28176_v10 = vpop.xlane.xlu0 %10301 }
 0x92e   :  { %31643 = vst [vmem:[#allocation152_spill] sm:$0xff] %v28136_v14  ;;  %v28142_v11 = vsub.f32 %v12471_v33, %v28136_v14  ;;  %v12480_v55 = vsel %vm3682_vm1, %v12334_v20, 0  ;;  %22696 = vrcp.f32 %v28176_v10 }
 0x92f   :  { %31644 = vst [vmem:[#allocation29_spill] sm:$0xff] %v28139_v12  ;;  %v28147_v39 = vand.u32 4294901760, %v12480_v55  ;;  %v12477_v59 = vsel %vm3682_vm1, %v12333_v43, 0  ;;  %v19862_v51 = vpop.f32.mrb[132].mxu1  ;;  %v30242_v60 = vand.u32 4294901760, %v28139_v12 }
 0x930   :  { %31645 = vst [vmem:[#allocation153_spill] sm:$0xff] %v28142_v11  ;;  %v28151_v28 = vand.u32 4294901760, %v12477_v59  ;;  %v12336_v3 = vmul.f32 %v22665_v15, %v19862_v51  ;;  %v12133_v22 = vpop.f32.mrb[133].mxu1  ;;  %v30247_v33 = vand.u32 4294901760, %v28142_v11  ;;  %v22669_v51 = vpop.eup %22668 }
 0x931   :  { %31646 = vst [vmem:[#allocation31_spill] sm:$0xff] %v28147_v39  ;;  %v28155_v20 = vsub.f32 %v12480_v55, %v28147_v39  ;;  %v12335_v29 = vmul.f32 %v22667_v21, %v12133_v22  ;;  %v12968_v43 = vsub.f32 %v28139_v12, %v30242_v60  ;;  %v22671_v60 = vpop.eup %22670 }
 0x932   :  { %31647 = vst [vmem:[#allocation91_spill] sm:$0xff] %v28151_v28  ;;  %v28163_v27 = vsub.f32 %v12477_v59, %v28151_v28  ;;  %v12486_v15 = vsel %vm3682_vm1, %v12336_v3, 0  ;;  %v12958_v38 = vsub.f32 %v28142_v11, %v30247_v33 }
 0x933   :  { %31648 = vst [vmem:[#allocation154_spill] sm:$0xff] %v28155_v20  ;;  %v28169_v55 = vand.u32 4294901760, %v12486_v15  ;;  %v12483_v21 = vsel %vm3682_vm1, %v12335_v29, 0  ;;  %v19865_v22 = vpop.f32.mrb[134].mxu1  ;;  %v30250_v56 = vand.u32 4294901760, %v28155_v20  ;;  %v12969_v44 = vand.u32 4294901760, %v12968_v43 }
 0x934   :  { %31649 = vst [vmem:[#allocation33_spill] sm:$0xff] %v28163_v27  ;;  %v28173_v19 = vand.u32 4294901760, %v12483_v21  ;;  %v12338_v59 = vmul.f32 %v22669_v51, %v19865_v22  ;;  %v12145_v4 = vpop.f32.mrb[135].mxu1  ;;  %v12959_v46 = vand.u32 4294901760, %v12958_v38  ;;  %v30252_v3 = vand.u32 4294901760, %v28163_v27  ;;  %v28197_v22 = vpop.xlane.xlu1 %10298 }
 0x935   :  { %31650 = vst [vmem:[#allocation5_spill] sm:$0xff] %v28169_v55  ;;  %v28179_v33 = vsub.f32 %v12486_v15, %v28169_v55  ;;  %v12337_v40 = vmul.f32 %v22671_v60, %v12145_v4  ;;  %v12988_v29 = vsub.f32 %v28155_v20, %v30250_v56  ;;  %v22673_v15 = vpop.eup %22672  ;;  %22698 = vrcp.f32 %v28197_v22 }
 0x936   :  { %31651 = vst [vmem:[#allocation155_spill] sm:$0xff] %v28173_v19  ;;  %v28186_v57 = vsub.f32 %v12483_v21, %v28173_v19  ;;  %v12492_v38 = vsel %vm3682_vm1, %v12338_v59, 0  ;;  %19958 = vmatprep.mubr.f32.mxu0 %v12959_v46  ;;  %v12978_v51 = vsub.f32 %v28163_v27, %v30252_v3  ;;  %v22675_v21 = vpop.eup %22674 }
 0x937   :  { %31652 = vst [vmem:[#allocation39_spill] sm:$0xff] %v28179_v33  ;;  %v28193_v4 = vand.u32 4294901760, %v12492_v38  ;;  %v12489_v60 = vsel %vm3682_vm1, %v12337_v40, 0  ;;  %v19868_v43 = vpop.f32.mrb[136].mxu1  ;;  %19959 = vmatmul.mubr.f32.gmra.mrb[128].mxu0 %v12969_v44  ;;  %v30258_v13 = vand.u32 4294901760, %v28179_v33  ;;  %v12989_v20 = vand.u32 4294901760, %v12988_v29  ;;  %v22677_v40 = vpop.eup %22676 }
 0x938   :  { %31653 = vst [vmem:[#allocation7_spill] sm:$0xff] %v28186_v57  ;;  %v28199_v59 = vand.u32 4294901760, %v12489_v60  ;;  %v12340_v46 = vmul.f32 %v22673_v15, %v19868_v43  ;;  %v12157_v56 = vpop.f32.mrb[137].mxu1  ;;  %v12979_v50 = vand.u32 4294901760, %v12978_v51  ;;  %v30261_v3 = vand.u32 4294901760, %v28186_v57  ;;  %v22679_v51 = vpop.eup %22678 }
 0x939   :  { %31654 = vst [vmem:[#allocation156_spill] sm:$0xff] %v28193_v4  ;;  %v28203_v18 = vsub.f32 %v12492_v38, %v28193_v4  ;;  %v12339_v24 = vmul.f32 %v22675_v21, %v12157_v56  ;;  %v13008_v44 = vsub.f32 %v28179_v33, %v30258_v13  ;;  %v28217_v56 = vpop.xlane.xlu0 %10307  ;;  %v22681_v21 = vpop.eup %22680 }
 0x93a   :  { %31655 = vst [vmem:[#allocation13_spill] sm:$0xff] %v28199_v59  ;;  %v28210_v27 = vsub.f32 %v12489_v60, %v28199_v59  ;;  %v12498_v15 = vsel %vm3682_vm1, %v12340_v46, 0  ;;  %19961 = vmatprep.mubr.f32.mxu0 %v12979_v50  ;;  %v12998_v38 = vsub.f32 %v28186_v57, %v30261_v3  ;;  %v22683_v57 = vpop.eup %22682  ;;  %22700 = vrcp.f32 %v28217_v56 }
 0x93b   :  { %31656 = vst [vmem:[#allocation72_spill] sm:$0xff] %v28203_v18  ;;  %v28219_v29 = vand.u32 4294901760, %v12498_v15  ;;  %v12495_v43 = vsel %vm3682_vm1, %v12339_v24, 0  ;;  %v19871_v34 = vpop.f32.mrb[138].mxu1  ;;  %19962 = vmatmul.mubr.f32.gmra.mrb[130].mxu0 %v12989_v20  ;;  %v30270_v60 = vand.u32 4294901760, %v28203_v18  ;;  %v13009_v11 = vand.u32 4294901760, %v13008_v44  ;;  %v10305_v20 = vpop.xlane.xlu1 %10304 }
 0x93c   :  { %31657 = vst [vmem:[#allocation43_spill] sm:$0xff] %v28210_v27  ;;  %v28223_v46 = vand.u32 4294901760, %v12495_v43  ;;  %v12342_v50 = vmul.f32 %v22677_v40, %v19871_v34  ;;  %v12169_v13 = vpop.f32.mrb[139].mxu1  ;;  %v12999_v33 = vand.u32 4294901760, %v12998_v38  ;;  %v30273_v3 = vand.u32 4294901760, %v28210_v27 }
 0x93d   :  { %31658 = vst [vmem:[#allocation54_spill] sm:$0xff] %v28219_v29  ;;  %v28227_v47 = vsub.f32 %v12498_v15, %v28219_v29  ;;  %v12341_v12 = vmul.f32 %v22679_v51, %v12169_v13  ;;  %v13028_v24 = vsub.f32 %v28203_v18, %v30270_v60  ;;  %v22685_v51 = vpop.eup %22684  ;;  %22702 = vrcp.f32 %v10305_v20 }
 0x93e   :  { %31659 = vst [vmem:[#allocation45_spill] sm:$0xff] %v28223_v46  ;;  %v28234_v63 = vsub.f32 %v12495_v43, %v28223_v46  ;;  %v12504_v40 = vsel %vm3682_vm1, %v12342_v50, 0  ;;  %19964 = vmatprep.mubr.f32.mxu0 %v12999_v33  ;;  %v13018_v15 = vsub.f32 %v28210_v27, %v30273_v3  ;;  %v22687_v18 = vpop.eup %22686  ;;  %v10314_v3 = vpop.xlane.xlu0 %10313 }
 0x93f   :  { %31660 = vst [vmem:[#allocation23_spill] sm:$0xff] %v28227_v47  ;;  %v28241_v13 = vand.u32 4294901760, %v12504_v40  ;;  %v12501_v44 = vsel %vm3682_vm1, %v12341_v12, 0  ;;  %v19874_v38 = vpop.f32.mrb[140].mxu1  ;;  %19965 = vmatmul.mubr.f32.gmra.mrb[132].mxu0 %v13009_v11  ;;  %v30278_v0 = vand.u32 4294901760, %v28227_v47  ;;  %v13029_v31 = vand.u32 4294901760, %v13028_v24 }
 0x940   :  { %31661 = vst [vmem:[#allocation55_spill] sm:$0xff] %v28234_v63  ;;  %v28245_v43 = vand.u32 4294901760, %v12501_v44  ;;  %v12344_v34 = vmul.f32 %v22681_v21, %v19874_v38  ;;  %v12181_v50 = vpop.f32.mrb[141].mxu1  ;;  %v13019_v33 = vand.u32 4294901760, %v13018_v15  ;;  %v30281_v60 = vand.u32 4294901760, %v28234_v63  ;;  %v22689_v38 = vpop.eup %22688 }
 0x941   :  { %31662 = vst [vmem:[#allocation61_spill] sm:$0xff] %v28241_v13  ;;  %v28249_v9 = vsub.f32 %v12504_v40, %v28241_v13  ;;  %v12343_v27 = vmul.f32 %v22683_v57, %v12181_v50  ;;  %v13048_v12 = vsub.f32 %v28227_v47, %v30278_v0  ;;  %22704 = vrcp.f32 %v10314_v3 }
 0x942   :  { %31663 = vst [vmem:[#allocation112_spill] sm:$0xff] %v28245_v43  ;;  %v28256_v11 = vsub.f32 %v12501_v44, %v28245_v43  ;;  %v12510_v21 = vsel %vm3682_vm1, %v12344_v34, 0  ;;  %19967 = vmatprep.mubr.f32.mxu0 %v13019_v33  ;;  %v13038_v15 = vsub.f32 %v28234_v63, %v30281_v60  ;;  %v10311_v44 = vpop.xlane.xlu1 %10310  ;;  %v22691_v60 = vpop.eup %22690 }
 0x943   :  { %31664 = vst [vmem:[#allocation69_spill] sm:$0xff] %v28249_v9  ;;  %v28263_v57 = vand.u32 4294901760, %v12510_v21  ;;  %v12507_v24 = vsel %vm3682_vm1, %v12343_v27, 0  ;;  %v19877_v40 = vpop.f32.mrb[142].mxu1  ;;  %19968 = vmatmul.mubr.f32.gmra.mrb[134].mxu0 %v13029_v31  ;;  %v30286_v10 = vand.u32 4294901760, %v28249_v9  ;;  %v13049_v2 = vand.u32 4294901760, %v13048_v12 }
 0x944   :  { %31665 = vst [vmem:[#allocation63_spill] sm:$0xff] %v28256_v11  ;;  %v28267_v50 = vand.u32 4294901760, %v12507_v24  ;;  %v12346_v34 = vmul.f32 %v22685_v51, %v19877_v40  ;;  %v12193_v33 = vpop.f32.mrb[143].mxu1  ;;  %v13039_v0 = vand.u32 4294901760, %v13038_v15  ;;  %v30291_v47 = vand.u32 4294901760, %v28256_v11 }
 0x945   :  { %31666 = vst [vmem:[#allocation115_spill] sm:$0xff] %v28263_v57  ;;  %v28271_v22 = vsub.f32 %v12510_v21, %v28263_v57  ;;  %v12345_v63 = vmul.f32 %v22687_v18, %v12193_v33  ;;  %v13068_v31 = vsub.f32 %v28249_v9, %v30286_v10  ;;  %v10320_v21 = vpop.xlane.xlu0 %10319  ;;  %v22693_v33 = vpop.eup %22692  ;;  %22706 = vrcp.f32 %v10311_v44 }
 0x946   :  { %31667 = vst [vmem:[#allocation70_spill] sm:$0xff] %v28267_v50  ;;  %v28278_v27 = vsub.f32 %v12507_v24, %v28267_v50  ;;  %v12516_v51 = vsel %vm3682_vm1, %v12346_v34, 0  ;;  %19970 = vmatprep.mubr.f32.mxu0 %v13039_v0  ;;  %v13058_v15 = vsub.f32 %v28256_v11, %v30291_v47  ;;  %v22695_v58 = vpop.eup %22694  ;;  %22708 = vrcp.f32 %v10320_v21 }
 0x947   :  { %31668 = vst [vmem:[#allocation76_spill] sm:$0xff] %v28271_v22  ;;  %v28284_v18 = vand.u32 4294901760, %v12516_v51  ;;  %v12513_v12 = vsel %vm3682_vm1, %v12345_v63, 0  ;;  %v19880_v40 = vpop.f32.mrb[144].mxu1  ;;  %19971 = vmatmul.mubr.f32.gmra.mrb[136].mxu0 %v13049_v2  ;;  %v30296_v56 = vand.u32 4294901760, %v28271_v22  ;;  %v13069_v11 = vand.u32 4294901760, %v13068_v31  ;;  %v10317_v63 = vpop.xlane.xlu1 %10316 }
 0x948   :  { %31669 = vst [vmem:[#allocation73_spill] sm:$0xff] %v28278_v27  ;;  %v28288_v24 = vand.u32 4294901760, %v12513_v12  ;;  %v12348_v10 = vmul.f32 %v22689_v38, %v19880_v40  ;;  %v12205_v34 = vpop.f32.mrb[145].mxu1  ;;  %v13059_v0 = vand.u32 4294901760, %v13058_v15  ;;  %v30301_v9 = vand.u32 4294901760, %v28278_v27  ;;  %v22697_v40 = vpop.eup %22696 }
 0x949   :  { %31670 = vst [vmem:[#allocation83_spill] sm:$0xff] %v28284_v18  ;;  %v28292_v20 = vsub.f32 %v12516_v51, %v28284_v18  ;;  %v12347_v47 = vmul.f32 %v22691_v60, %v12205_v34  ;;  %v13088_v2 = vsub.f32 %v28271_v22, %v30296_v56  ;;  %v22699_v22 = vpop.eup %22698  ;;  %v10326_v41 = vpop.xlane.xlu0 %10325  ;;  %22710 = vrcp.f32 %v10317_v63 }
 0x94a   :  { %31671 = vst [vmem:[#allocation84_spill] sm:$0xff] %v28288_v24  ;;  %v28298_v42 = vsub.f32 %v12513_v12, %v28288_v24  ;;  %v12522_v38 = vsel %vm3682_vm1, %v12348_v10, 0  ;;  %19973 = vmatprep.mubr.f32.mxu0 %v13059_v0  ;;  %v13078_v15 = vsub.f32 %v28278_v27, %v30301_v9  ;;  %v22701_v21 = vpop.eup %22700  ;;  %22712 = vrcp.f32 %v10326_v41 }
 0x94b   :  { %31672 = vst [vmem:[#allocation3_spill] sm:$0xff] %v28292_v20  ;;  %v28304_v51 = vand.u32 4294901760, %v12522_v38  ;;  %v12519_v60 = vsel %vm3682_vm1, %v12347_v47, 0  ;;  %v19883_v31 = vpop.f32.mrb[146].mxu1  ;;  %19974 = vmatmul.mubr.f32.gmra.mrb[138].mxu0 %v13069_v11  ;;  %v30304_v3 = vand.u32 4294901760, %v28292_v20  ;;  %v13089_v27 = vand.u32 4294901760, %v13088_v2  ;;  %v22703_v53 = vpop.eup %22702 }
 0x94c   :  { %31673 = vst [vmem:[#allocation96_spill] sm:$0xff] %v28298_v42  ;;  %v28308_v34 = vand.u32 4294901760, %v12519_v60  ;;  %v12350_v12 = vmul.f32 %v22693_v33, %v19883_v31  ;;  %v12217_v56 = vpop.f32.mrb[147].mxu1  ;;  %v13079_v10 = vand.u32 4294901760, %v13078_v15  ;;  %v30309_v0 = vand.u32 4294901760, %v28298_v42  ;;  %v10323_v31 = vpop.xlane.xlu1 %10322 }
 0x94d   :  { %31674 = vst [vmem:[#allocation101_spill] sm:$0xff] %v28304_v51  ;;  %v28312_v44 = vsub.f32 %v12522_v38, %v28304_v51  ;;  %v12349_v9 = vmul.f32 %v22695_v58, %v12217_v56  ;;  %v13108_v47 = vsub.f32 %v28292_v20, %v30304_v3  ;;  %22714 = vrcp.f32 %v10323_v31 }
 0x94e   :  { %31675 = vst [vmem:[#allocation88_spill] sm:$0xff] %v28308_v34  ;;  %v28318_v11 = vsub.f32 %v12519_v60, %v28308_v34  ;;  %v12528_v33 = vsel %vm3682_vm1, %v12350_v12, 0  ;;  %19976 = vmatprep.mubr.f32.mxu0 %v13079_v10  ;;  %v13098_v15 = vsub.f32 %v28298_v42, %v30309_v0 }
 0x94f   :  { %31676 = vst [vmem:[#allocation105_spill] sm:$0xff] %v28312_v44  ;;  %v28324_v38 = vand.u32 4294901760, %v12528_v33  ;;  %v12525_v58 = vsel %vm3682_vm1, %v12349_v9, 0  ;;  %v19886_v56 = vpop.f32.mrb[148].mxu1  ;;  %19977 = vmatmul.mubr.f32.gmra.mrb[140].mxu0 %v13089_v27  ;;  %v30312_v2 = vand.u32 4294901760, %v28312_v44  ;;  %v13109_v42 = vand.u32 4294901760, %v13108_v47 }
 0x950   :  { %31677 = vst [vmem:[#allocation18_spill] sm:$0xff] %v28318_v11  ;;  %v28328_v60 = vand.u32 4294901760, %v12525_v58  ;;  %v12352_v3 = vmul.f32 %v22697_v40, %v19886_v56  ;;  %v12229_v12 = vpop.f32.mrb[149].mxu1  ;;  %v13099_v10 = vand.u32 4294901760, %v13098_v15  ;;  %v30317_v20 = vand.u32 4294901760, %v28318_v11 }
 0x951   :  { %31678 = vst [vmem:[#allocation16_spill] sm:$0xff] %v28324_v38  ;;  %v28332_v63 = vsub.f32 %v12528_v33, %v28324_v38  ;;  %v12351_v0 = vmul.f32 %v22699_v22, %v12229_v12  ;;  %v13128_v9 = vsub.f32 %v28312_v44, %v30312_v2  ;;  %v10332_v33 = vpop.xlane.xlu0 %10331  ;;  %v22705_v12 = vpop.eup %22704 }
 0x952   :  { %31679 = vst [vmem:[#allocation34_spill] sm:$0xff] %v28328_v60  ;;  %v28338_v27 = vsub.f32 %v12525_v58, %v28328_v60  ;;  %v12534_v40 = vsel %vm3682_vm1, %v12352_v3, 0  ;;  %19979 = vmatprep.mubr.f32.mxu0 %v13099_v10  ;;  %v13118_v15 = vsub.f32 %v28318_v11, %v30317_v20  ;;  %v22707_v16 = vpop.eup %22706  ;;  %22716 = vrcp.f32 %v10332_v33 }
 0x953   :  { %31680 = vst [vmem:[#allocation116_spill] sm:$0xff] %v28332_v63  ;;  %v28344_v56 = vand.u32 4294901760, %v12534_v40  ;;  %v12531_v22 = vsel %vm3682_vm1, %v12351_v0, 0  ;;  %v19889_v47 = vpop.f32.mrb[150].mxu1  ;;  %19980 = vmatmul.mubr.f32.gmra.mrb[142].mxu0 %v13109_v42  ;;  %v30320_v41 = vand.u32 4294901760, %v28332_v63  ;;  %v13129_v11 = vand.u32 4294901760, %v13128_v9 }
 0x954   :  { %31681 = vst [vmem:[#allocation120_spill] sm:$0xff] %v28338_v27  ;;  %v28348_v58 = vand.u32 4294901760, %v12531_v22  ;;  %v12354_v2 = vmul.f32 %v22701_v21, %v19889_v47  ;;  %v12241_v3 = vpop.f32.mrb[151].mxu1  ;;  %v13119_v10 = vand.u32 4294901760, %v13118_v15  ;;  %v30327_v44 = vand.u32 4294901760, %v28338_v27  ;;  %v10329_v47 = vpop.xlane.xlu1 %10328 }
 0x955   :  { %31682 = vst [vmem:[#allocation125_spill] sm:$0xff] %v28344_v56  ;;  %v28352_v31 = vsub.f32 %v12534_v40, %v28344_v56  ;;  %v12353_v20 = vmul.f32 %v22703_v53, %v12241_v3  ;;  %v13148_v42 = vsub.f32 %v28332_v63, %v30320_v41  ;;  %v22709_v41 = vpop.eup %22708  ;;  %22718 = vrcp.f32 %v10329_v47 }
 0x956   :  { %31683 = vst [vmem:[#allocation127_spill] sm:$0xff] %v28348_v58  ;;  %v28358_v0 = vsub.f32 %v12531_v22, %v28348_v58  ;;  %v12540_v21 = vsel %vm3682_vm1, %v12354_v2, 0  ;;  %19982 = vmatprep.mubr.f32.mxu0 %v13119_v10  ;;  %v13138_v15 = vsub.f32 %v28338_v27, %v30327_v44  ;;  %v22711_v58 = vpop.eup %22710 }
 0x957   :  { %31684 = vst [vmem:[#allocation132_spill] sm:$0xff] %v28352_v31  ;;  %v28364_v40 = vand.u32 4294901760, %v12540_v21  ;;  %v12537_v53 = vsel %vm3682_vm1, %v12353_v20, 0  ;;  %v19892_v9 = vpop.f32.mrb[152].mxu1  ;;  %19983 = vmatmul.mubr.f32.gmra.mrb[144].mxu0 %v13129_v11  ;;  %v13149_v3 = vand.u32 4294901760, %v13148_v42  ;;  %v30330_v33 = vand.u32 4294901760, %v28352_v31  ;;  %v22713_v47 = vpop.eup %22712 }
 0x958   :  { %31685 = vst [vmem:[#allocation133_spill] sm:$0xff] %v28358_v0  ;;  %v28368_v22 = vand.u32 4294901760, %v12537_v53  ;;  %v12356_v63 = vmul.f32 %v22705_v12, %v19892_v9  ;;  %v12253_v2 = vpop.f32.mrb[153].mxu1  ;;  %v13139_v10 = vand.u32 4294901760, %v13138_v15  ;;  %v30334_v56 = vand.u32 4294901760, %v28358_v0 }
 0x959   :  { %31686 = vst [vmem:[#allocation136_spill] sm:$0xff] %v28364_v40  ;;  %v28372_v44 = vsub.f32 %v12540_v21, %v28364_v40  ;;  %v12355_v27 = vmul.f32 %v22707_v16, %v12253_v2  ;;  %v13168_v20 = vsub.f32 %v28352_v31, %v30330_v33  ;;  %v28379_v11 = vpack.c.bf16 %v28092_v54, %v28085_v23  ;;  %v22715_v54 = vpop.eup %22714 }
 0x95a   :  { %31687 = vst [vmem:[#allocation138_spill] sm:$0xff] %v28368_v22  ;;  %v28382_v12 = vsub.f32 %v12537_v53, %v28368_v22  ;;  %v12546_v42 = vsel %vm3682_vm1, %v12356_v63, 0  ;;  %19985 = vmatprep.mubr.f32.mxu0 %v13139_v10  ;;  %v13158_v21 = vsub.f32 %v28358_v0, %v30334_v56 }
 0x95b   :  { %31688 = vst [vmem:[#allocation141_spill] sm:$0xff] %v28372_v44  ;;  %v28388_v16 = vand.u32 4294901760, %v12546_v42  ;;  %v12543_v15 = vsel %vm3682_vm1, %v12355_v27, 0  ;;  %v19895_v9 = vpop.f32.mrb[154].mxu1  ;;  %19986 = vmatmul.mubr.f32.gmra.mrb[146].mxu0 %v13149_v3  ;;  %v30340_v2 = vand.u32 4294901760, %v28372_v44  ;;  %21023 = vmatprep.subr.bf16.mxu0 %v28379_v11  ;;  %v13169_v27 = vand.u32 4294901760, %v13168_v20 }
 0x95c   :  { %31689 = vst [vmem:[#allocation142_spill] sm:$0xff] %v28382_v12  ;;  %v28393_v53 = vand.u32 4294901760, %v12543_v15  ;;  %v12358_v33 = vmul.f32 %v22709_v41, %v19895_v9  ;;  %v12265_v63 = vpop.f32.mrb[155].mxu1  ;;  %v13159_v10 = vand.u32 4294901760, %v13158_v21  ;;  %v30343_v31 = vand.u32 4294901760, %v28382_v12  ;;  %v22717_v9 = vpop.eup %22716 }
 0x95d   :  { %31690 = vst [vmem:[#allocation148_spill] sm:$0xff] %v28388_v16  ;;  %v28397_v56 = vsub.f32 %v12546_v42, %v28388_v16  ;;  %v12357_v0 = vmul.f32 %v22711_v58, %v12265_v63  ;;  %v13188_v3 = vsub.f32 %v28372_v44, %v30340_v2 }
 0x95e   :  { %31691 = vst [vmem:[#allocation2_spill] sm:$0xff] %v28393_v53  ;;  %v28403_v23 = vsub.f32 %v12543_v15, %v28393_v53  ;;  %v12552_v40 = vsel %vm3682_vm1, %v12358_v33, 0  ;;  %19988 = vmatprep.mubr.f32.mxu0 %v13159_v10  ;;  %v13178_v41 = vsub.f32 %v28382_v12, %v30343_v31 }
 0x95f   :  { %31692 = vst [vmem:[#allocation4_spill] sm:$0xff] %v28397_v56  ;;  %v28409_v21 = vand.u32 4294901760, %v12552_v40  ;;  %v12549_v42 = vsel %vm3682_vm1, %v12357_v0, 0  ;;  %v19898_v58 = vpop.f32.mrb[156].mxu1  ;;  %19989 = vmatmul.mubr.f32.gmra.mrb[148].mxu0 %v13169_v27  ;;  %v30348_v20 = vand.u32 4294901760, %v28397_v56  ;;  %v13189_v12 = vand.u32 4294901760, %v13188_v3  ;;  %v22719_v3 = vpop.eup %22718 }
 0x960   :  { %31693 = vst [vmem:[#allocation6_spill] sm:$0xff] %v28403_v23  ;;  %v28413_v63 = vand.u32 4294901760, %v12549_v42  ;;  %v12360_v15 = vmul.f32 %v22713_v47, %v19898_v58  ;;  %v12277_v2 = vpop.f32.mrb[157].mxu1  ;;  %v13179_v44 = vand.u32 4294901760, %v13178_v41  ;;  %v30351_v33 = vand.u32 4294901760, %v28403_v23 }
 0x961   :  { %31694 = vst [vmem:[#allocation80_spill] sm:$0xff] %v28409_v21  ;;  %v28417_v10 = vsub.f32 %v12552_v40, %v28409_v21  ;;  %v12359_v31 = vmul.f32 %v22715_v54, %v12277_v2  ;;  %v13208_v0 = vsub.f32 %v28397_v56, %v30348_v20 }
 0x962   :  { %31695 = vst [vmem:[#allocation82_spill] sm:$0xff] %v28413_v63  ;;  %v28423_v27 = vsub.f32 %v12549_v42, %v28413_v63  ;;  %v12558_v16 = vsel %vm3682_vm1, %v12360_v15, 0  ;;  %19991 = vmatprep.mubr.f32.mxu0 %v13179_v44  ;;  %v13198_v47 = vsub.f32 %v28403_v23, %v30351_v33 }
 0x963   :  { %31696 = vst [vmem:[#allocation77_spill] sm:$0xff] %v28417_v10  ;;  %v28429_v41 = vand.u32 4294901760, %v12558_v16  ;;  %v12555_v40 = vsel %vm3682_vm1, %v12359_v31, 0  ;;  %v19901_v54 = vpop.f32.mrb[158].mxu1  ;;  %19992 = vmatmul.mubr.f32.gmra.mrb[150].mxu0 %v13189_v12  ;;  %v30356_v2 = vand.u32 4294901760, %v28417_v10  ;;  %v13209_v23 = vand.u32 4294901760, %v13208_v0 }
 0x964   :  { %31697 = vst [vmem:[#allocation117_spill] sm:$0xff] %v28423_v27  ;;  %v28433_v58 = vand.u32 4294901760, %v12555_v40  ;;  %v12362_v42 = vmul.f32 %v22717_v9, %v19901_v54  ;;  %v12289_v20 = vpop.f32.mrb[159].mxu1  ;;  %v13199_v56 = vand.u32 4294901760, %v13198_v47  ;;  %v30357_v44 = vand.u32 4294901760, %v28423_v27 }
 0x965   :  { %31698 = vst [vmem:[#allocation89_spill] sm:$0xff] %v28429_v41  ;;  %v28437_v15 = vsub.f32 %v12558_v16, %v28429_v41  ;;  %v12361_v33 = vmul.f32 %v22719_v3, %v12289_v20  ;;  %v13228_v31 = vsub.f32 %v28417_v10, %v30356_v2 }
 0x966   :  { %31699 = vst [vmem:[#allocation86_spill] sm:$0xff] %v28433_v58  ;;  %v28443_v12 = vsub.f32 %v12555_v40, %v28433_v58  ;;  %v12564_v21 = vsel %vm3682_vm1, %v12362_v42, 0  ;;  %19994 = vmatprep.mubr.f32.mxu0 %v13199_v56  ;;  %v13218_v9 = vsub.f32 %v28423_v27, %v30357_v44 }
 0x967   :  { %v28449_v47 = vand.u32 4294901760, %v12564_v21  ;;  %v12561_v16 = vsel %vm3682_vm1, %v12361_v33, 0  ;;  %19995 = vmatmul.mubr.f32.gmra.mrb[152].mxu0 %v13209_v23  ;;  %v30358_v20 = vand.u32 4294901760, %v28437_v15  ;;  %v13229_v56 = vand.u32 4294901760, %v13228_v31 }
 0x968   :  { %v28453_v0 = vand.u32 4294901760, %v12561_v16  ;;  %v13219_v54 = vand.u32 4294901760, %v13218_v9  ;;  %v30359_v40 = vand.u32 4294901760, %v28443_v12 }
 0x969   :  { %31700 = vst [vmem:[#allocation90_spill] sm:$0xff] %v28449_v47  ;;  %v28457_v3 = vsub.f32 %v12564_v21, %v28449_v47  ;;  %v13248_v42 = vsub.f32 %v28437_v15, %v30358_v20 }
 0x96a   :  { %31701 = vst [vmem:[#allocation94_spill] sm:$0xff] %v28453_v0  ;;  %v28463_v2 = vsub.f32 %v12561_v16, %v28453_v0  ;;  %19997 = vmatprep.mubr.f32.mxu0 %v13219_v54  ;;  %v13238_v23 = vsub.f32 %v28443_v12, %v30359_v40  ;;  %v31706_v40 = vld [vmem:[#allocation53_spill] sm:$0xff] }
 0x96b   :  { %31702 = vst [vmem:[#allocation95_spill] sm:$0xff] %v28457_v3  ;;  %19998 = vmatmul.mubr.f32.gmra.mrb[154].mxu0 %v13229_v56  ;;  %v30360_v33 = vand.u32 4294901760, %v28457_v3  ;;  %v13249_v44 = vand.u32 4294901760, %v13248_v42  ;;  %v31704_v56 = vld [vmem:[#allocation24_spill] sm:$0xff]  ;;  %v31705_v42 = vld [vmem:[#allocation41_spill] sm:$0xff] }
 0x96c   :  { %31703 = vst [vmem:[#allocation98_spill] sm:$0xff] %v28463_v2  ;;  %v13239_v9 = vand.u32 4294901760, %v13238_v23  ;;  %v30361_v21 = vand.u32 4294901760, %v28463_v2  ;;  %v21026_v23 = vpack.c.bf16 %v28114_v49, %v28107_v35 }
 0x96d   :  { %v13268_v31 = vsub.f32 %v28457_v3, %v30360_v33  ;;  %v31708_v33 = vld [vmem:[#allocation64_spill] sm:$0xff] }
 0x96e   :  { %20000 = vmatprep.mubr.f32.mxu0 %v13239_v9  ;;  %v13258_v16 = vsub.f32 %v28463_v2, %v30361_v21  ;;  %v31707_v9 = vld [vmem:[#allocation51_spill] sm:$0xff]  ;;  %v31714_v21 = vld [vmem:[#allocation30_spill] sm:$0xff] }
 0x96f   :  { %20001 = vmatmul.mubr.f32.gmra.mrb[156].mxu0 %v13249_v44  ;;  %v13269_v20 = vand.u32 4294901760, %v13268_v31  ;;  %v31709_v44 = vld [vmem:[#allocation38_spill] sm:$0xff]  ;;  %v31711_v31 = vld [vmem:[#allocation9_spill] sm:$0xff] }
 0x970   :  { %v13259_v54 = vand.u32 4294901760, %v13258_v16  ;;  %v31712_v16 = vld [vmem:[#allocation21_spill] sm:$0xff] }
 0x972   :  { %20003 = vmatprep.mubr.f32.mxu0 %v13259_v54  ;;  %v31713_v54 = vld [vmem:[#allocation78_spill] sm:$0xff] }
 0x973   :  { %20004 = vmatmul.mubr.f32.gmra.mrb[158].mxu0 %v13269_v20  ;;  %v31710_v20 = vld [vmem:[#allocation66_spill] sm:$0xff] }
 0x974   :  { %20014 = vmatprep.mubr.f32.mxu0 %v31704_v56 }
 0x977   :  { %20015 = vmatmul.mubr.f32.vlgmr.msra.gmra.mrb[96].mxu0 %v31705_v42 }
 0x978   :  { %20017 = vmatprep.mubr.f32.mxu0 %v31706_v40  ;;  %21025 = vmatpush3.bf16.msra.mxu0 %v28379_v11  ;;  %v31715_v40 = vld [vmem:[#allocation87_spill] sm:$0xff]  ;;  %v31716_v11 = vld [vmem:[#allocation85_spill] sm:$0xff] }
 0x979   :  { %21027 = vmatprep.subr.bf16.mxu0 %v21026_v23 }
 0x97b   :  { %20018 = vmatmul.mubr.f32.gmra.mrb[98].mxu0 %v31707_v9 }
 0x97c   :  { %20020 = vmatprep.mubr.f32.mxu0 %v31708_v33  ;;  %21029 = vmatpush3.bf16.msra.mxu0 %v21026_v23  ;;  %v31717_v33 = vld [vmem:[#allocation92_spill] sm:$0xff]  ;;  %v31718_v23 = vld [vmem:[#allocation99_spill] sm:$0xff] }
 0x97d   :  { %21031 = vmatprep.subr.bf16.mxu0 %v31709_v44 }
 0x97f   :  { %20021 = vmatmul.mubr.f32.gmra.mrb[100].mxu0 %v31710_v20  ;;  %v31719_v20 = vld [vmem:[#allocation108_spill] sm:$0xff] }
 0x980   :  { %20023 = vmatprep.mubr.f32.mxu0 %v31711_v31  ;;  %v31720_v31 = vld [vmem:[#allocation102_spill] sm:$0xff] }
 0x983   :  { %20024 = vmatmul.mubr.f32.gmra.mrb[102].mxu0 %v31712_v16  ;;  %v31777_v16 = vld [vmem:[#allocation17_spill] sm:$0xff] }
 0x984   :  { %20026 = vmatprep.mubr.f32.mxu0 %v31713_v54  ;;  %v31776_v54 = vld [vmem:[#allocation105_spill] sm:$0xff]  ;;  %v31778_v9 = vand.u32 4294901760, %v31777_v16 }
 0x987   :  { %20027 = vmatmul.mubr.f32.gmra.mrb[104].mxu0 %v31714_v21  ;;  %v31775_v21 = vld [vmem:[#allocation18_spill] sm:$0xff] }
 0x988   :  { %20029 = vmatprep.mubr.f32.mxu0 %v31715_v40  ;;  %v31774_v40 = vld [vmem:[#allocation3_spill] sm:$0xff] }
 0x98b   :  { %20030 = vmatmul.mubr.f32.gmra.mrb[106].mxu0 %v31716_v11  ;;  %v31773_v11 = vld [vmem:[#allocation96_spill] sm:$0xff] }
 0x98c   :  { %20032 = vmatprep.mubr.f32.mxu0 %v27724_v45  ;;  %v31772_v45 = vld [vmem:[#allocation76_spill] sm:$0xff] }
 0x98f   :  { %20033 = vmatmul.mubr.f32.gmra.mrb[108].mxu0 %v31717_v33  ;;  %v31771_v33 = vld [vmem:[#allocation73_spill] sm:$0xff] }
 0x990   :  { %20035 = vmatprep.mubr.f32.mxu0 %v27748_v48  ;;  %v31770_v48 = vld [vmem:[#allocation69_spill] sm:$0xff] }
 0x993   :  { %20036 = vmatmul.mubr.f32.gmra.mrb[110].mxu0 %v31718_v23  ;;  %v31769_v23 = vld [vmem:[#allocation63_spill] sm:$0xff] }
 0x994   :  { %20038 = vmatprep.mubr.f32.mxu0 %v31719_v20  ;;  %v31768_v20 = vld [vmem:[#allocation23_spill] sm:$0xff] }
 0x997   :  { %20039 = vmatmul.mubr.f32.gmra.mrb[112].mxu0 %v31720_v31  ;;  %v31767_v31 = vld [vmem:[#allocation55_spill] sm:$0xff] }
 0x998   :  { %20041 = vmatprep.mubr.f32.mxu0 %v27793_v36  ;;  %v31766_v36 = vld [vmem:[#allocation72_spill] sm:$0xff] }
 0x99b   :  { %20042 = vmatmul.mubr.f32.gmra.mrb[114].mxu0 %v27789_v25  ;;  %v31765_v25 = vld [vmem:[#allocation43_spill] sm:$0xff] }
 0x99c   :  { %20044 = vmatprep.mubr.f32.mxu0 %v27816_v62  ;;  %v31764_v62 = vld [vmem:[#allocation39_spill] sm:$0xff] }
 0x99f   :  { %20045 = vmatmul.mubr.f32.gmra.mrb[116].mxu0 %v27812_v26  ;;  %v31763_v26 = vld [vmem:[#allocation7_spill] sm:$0xff] }
 0x9a0   :  { %20047 = vmatprep.mubr.f32.mxu0 %v27842_v1  ;;  %v31762_v1 = vld [vmem:[#allocation154_spill] sm:$0xff] }
 0x9a3   :  { %20048 = vmatmul.mubr.f32.gmra.mrb[118].mxu0 %v27838_v32  ;;  %v31761_v32 = vld [vmem:[#allocation33_spill] sm:$0xff] }
 0x9a4   :  { %20050 = vmatprep.mubr.f32.mxu0 %v27868_v61  ;;  %v31760_v61 = vld [vmem:[#allocation29_spill] sm:$0xff] }
 0x9a7   :  { %20051 = vmatmul.mubr.f32.gmra.mrb[120].mxu0 %v27864_v5  ;;  %v31759_v5 = vld [vmem:[#allocation153_spill] sm:$0xff] }
 0x9a8   :  { %20053 = vmatprep.mubr.f32.mxu0 %v27894_v7  ;;  %v31758_v7 = vld [vmem:[#allocation11_spill] sm:$0xff] }
 0x9ab   :  { %20054 = vmatmul.mubr.f32.gmra.mrb[122].mxu0 %v27890_v17  ;;  %v31757_v17 = vld [vmem:[#allocation150_spill] sm:$0xff] }
 0x9ac   :  { %20056 = vmatprep.mubr.f32.mxu0 %v27920_v52  ;;  %v31756_v52 = vld [vmem:[#allocation144_spill] sm:$0xff] }
 0x9af   :  { %20057 = vmatmul.mubr.f32.gmra.mrb[124].mxu0 %v27916_v30  ;;  %v31755_v30 = vld [vmem:[#allocation140_spill] sm:$0xff] }
 0x9b0   :  { %20059 = vmatprep.mubr.f32.mxu0 %v27944_v6  ;;  %v31754_v6 = vld [vmem:[#allocation67_spill] sm:$0xff] }
 0x9b3   :  { %20060 = vmatmul.mubr.f32.gmra.mrb[126].mxu0 %v27940_v37  ;;  %v31753_v37 = vld [vmem:[#allocation139_spill] sm:$0xff] }
 0x9b4   :  { %20062 = vmatprep.mubr.f32.mxu0 %v28136_v14  ;;  %v31752_v14 = vld [vmem:[#allocation129_spill] sm:$0xff] }
 0x9b7   :  { %20063 = vmatmul.mubr.f32.gmra.mrb[128].mxu0 %v28131_v8  ;;  %v31751_v8 = vld [vmem:[#allocation109_spill] sm:$0xff] }
 0x9b8   :  { %20065 = vmatprep.mubr.f32.mxu0 %v28151_v28  ;;  %v31750_v28 = vld [vmem:[#allocation15_spill] sm:$0xff] }
 0x9bb   :  { %20066 = vmatmul.mubr.f32.gmra.mrb[130].mxu0 %v28147_v39  ;;  %v31749_v39 = vld [vmem:[#allocation22_spill] sm:$0xff] }
 0x9bc   :  { %20068 = vmatprep.mubr.f32.mxu0 %v28173_v19  ;;  %v31748_v19 = vld [vmem:[#allocation52_spill] sm:$0xff] }
 0x9bf   :  { %20069 = vmatmul.mubr.f32.gmra.mrb[132].mxu0 %v28169_v55  ;;  %v31747_v55 = vld [vmem:[#allocation59_spill] sm:$0xff] }
 0x9c0   :  { %20071 = vmatprep.mubr.f32.mxu0 %v28199_v59  ;;  %v31746_v59 = vld [vmem:[#allocation113_spill] sm:$0xff] }
 0x9c3   :  { %20072 = vmatmul.mubr.f32.gmra.mrb[134].mxu0 %v28193_v4  ;;  %v31745_v4 = vld [vmem:[#allocation121_spill] sm:$0xff] }
 0x9c4   :  { %20074 = vmatprep.mubr.f32.mxu0 %v28223_v46  ;;  %v31744_v46 = vld [vmem:[#allocation106_spill] sm:$0xff] }
 0x9c7   :  { %20075 = vmatmul.mubr.f32.gmra.mrb[136].mxu0 %v28219_v29  ;;  %v31721_v29 = vld [vmem:[#allocation127_spill] sm:$0xff] }
 0x9c8   :  { %20077 = vmatprep.mubr.f32.mxu0 %v28245_v43  ;;  %v31722_v43 = vld [vmem:[#allocation125_spill] sm:$0xff] }
 0x9cb   :  { %20078 = vmatmul.mubr.f32.gmra.mrb[138].mxu0 %v28241_v13  ;;  %v31743_v13 = vld [vmem:[#allocation14_spill] sm:$0xff] }
 0x9cc   :  { %20080 = vmatprep.mubr.f32.mxu0 %v28267_v50  ;;  %v31723_v50 = vld [vmem:[#allocation136_spill] sm:$0xff] }
 0x9cf   :  { %20081 = vmatmul.mubr.f32.gmra.mrb[140].mxu0 %v28263_v57  ;;  %v31742_v57 = vld [vmem:[#allocation103_spill] sm:$0xff] }
 0x9d0   :  { %20083 = vmatprep.mubr.f32.mxu0 %v28288_v24  ;;  %v31724_v24 = vld [vmem:[#allocation148_spill] sm:$0xff] }
 0x9d3   :  { %20084 = vmatmul.mubr.f32.gmra.mrb[142].mxu0 %v28284_v18  ;;  %v31741_v18 = vld [vmem:[#allocation100_spill] sm:$0xff] }
 0x9d4   :  { %20086 = vmatprep.mubr.f32.mxu0 %v28308_v34  ;;  %v31725_v34 = vld [vmem:[#allocation80_spill] sm:$0xff] }
 0x9d7   :  { %20087 = vmatmul.mubr.f32.gmra.mrb[144].mxu0 %v28304_v51  ;;  %v31740_v51 = vld [vmem:[#allocation93_spill] sm:$0xff] }
 0x9d8   :  { %20089 = vmatprep.mubr.f32.mxu0 %v28328_v60  ;;  %v31739_v60 = vld [vmem:[#allocation97_spill] sm:$0xff] }
 0x9db   :  { %20090 = vmatmul.mubr.f32.gmra.mrb[146].mxu0 %v28324_v38  ;;  %v31738_v38 = vld [vmem:[#allocation36_spill] sm:$0xff] }
 0x9dc   :  { %20092 = vmatprep.mubr.f32.mxu0 %v31721_v29  ;;  %v31737_v29 = vld [vmem:[#allocation114_spill] sm:$0xff] }
 0x9df   :  { %20093 = vmatmul.mubr.f32.gmra.mrb[148].mxu0 %v31722_v43  ;;  %v31726_v43 = vld [vmem:[#allocation10_spill] sm:$0xff] }
 0x9e0   :  { %20095 = vmatprep.mubr.f32.mxu0 %v28368_v22  ;;  %v31727_v22 = vld [vmem:[#allocation50_spill] sm:$0xff] }
 0x9e3   :  { %20096 = vmatmul.mubr.f32.gmra.mrb[150].mxu0 %v31723_v50  ;;  %v31728_v50 = vld [vmem:[#allocation58_spill] sm:$0xff] }
 0x9e4   :  { %20098 = vmatprep.mubr.f32.mxu0 %v28393_v53  ;;  %v31736_v53 = vld [vmem:[#allocation81_spill] sm:$0xff] }
 0x9e7   :  { %20099 = vmatmul.mubr.f32.gmra.mrb[152].mxu0 %v31724_v24  ;;  %v31729_v24 = vld [vmem:[#allocation8_spill] sm:$0xff] }
 0x9e8   :  { %20101 = vmatprep.mubr.f32.mxu0 %v28413_v63  ;;  %v31730_v63 = vld [vmem:[#allocation57_spill] sm:$0xff] }
 0x9eb   :  { %20102 = vmatmul.mubr.f32.gmra.mrb[154].mxu0 %v31725_v34  ;;  %v31731_v34 = vld [vmem:[#allocation74_spill] sm:$0xff] }
 0x9ec   :  { %20104 = vmatprep.mubr.f32.mxu0 %v28433_v58  ;;  %v31735_v58 = vld [vmem:[#allocation32_spill] sm:$0xff] }
 0x9ef   :  { %20105 = vmatmul.mubr.f32.gmra.mrb[156].mxu0 %v28429_v41  ;;  %v31732_v41 = vld [vmem:[#allocation68_spill] sm:$0xff] }
 0x9f0   :  { %20107 = vmatprep.mubr.f32.mxu0 %v28453_v0  ;;  %v31733_v0 = vld [vmem:[#allocation111_spill] sm:$0xff] }
 0x9f3   :  { %20108 = vmatmul.mubr.f32.gmra.mrb[158].mxu0 %v28449_v47  ;;  %v31734_v47 = vld [vmem:[#allocation75_spill] sm:$0xff] }
 0x9f4   :  { %20118 = vmatprep.mubr.f32.mxu0 %v31726_v43 }
 0x9f7   :  { %20119 = vmatmul.mubr.f32.vlgmr.msra.gmra.mrb[96].mxu0 %v31727_v22 }
 0x9f8   :  { %20121 = vmatprep.mubr.f32.mxu0 %v31728_v50  ;;  %21033 = vmatpush3.bf16.msra.mxu0 %v31709_v44 }
 0x9f9   :  { %21035 = vmatprep.subr.bf16.mxu0 %v31729_v24 }
 0x9fb   :  { %20122 = vmatmul.mubr.f32.gmra.mrb[98].mxu0 %v31730_v63 }
 0x9fc   :  { %20124 = vmatprep.mubr.f32.mxu0 %v31731_v34  ;;  %21037 = vmatpush3.bf16.msra.mxu0 %v31729_v24  ;;  %v31779_v24 = vld [vmem:[#allocation151_spill] sm:$0xff] }
 0x9fd   :  { %v31780_v42 = vand.u32 4294901760, %v31779_v24  ;;  %v31789_v24 = vand.u32 4294901760, %v31726_v43  ;;  %v31798_v43 = vand.u32 4294901760, %v31734_v47 }
 0x9ff   :  { %20125 = vmatmul.mubr.f32.gmra.mrb[100].mxu0 %v31732_v41  ;;  %v21038_v56 = vpack.c.bf16 %v31780_v42, %v31778_v9  ;;  %v31790_v42 = vand.u32 4294901760, %v28107_v35  ;;  %v31791_v9 = vand.u32 4294901760, %v28114_v49  ;;  %v31796_v35 = vand.u32 4294901760, %v31732_v41 }
 0xa00   :  { %20127 = vmatprep.mubr.f32.mxu0 %v31733_v0  ;;  %v31797_v49 = vand.u32 4294901760, %v31733_v0  ;;  %v31805_v41 = vand.u32 4294901760, %v31741_v18 }
 0xa01   :  { %21039 = vmatprep.subr.bf16.mxu0 %v21038_v56  ;;  %v21042_v16 = vpack.c.bf16 %v31791_v9, %v31790_v42  ;;  %v31847_v9 = vld [vmem:[#allocation105_spill] sm:$0xff] }
 0xa03   :  { %20128 = vmatmul.mubr.f32.gmra.mrb[102].mxu0 %v31734_v47 }
 0xa04   :  { %20130 = vmatprep.mubr.f32.mxu0 %v31735_v58 }
 0xa07   :  { %20131 = vmatmul.mubr.f32.gmra.mrb[104].mxu0 %v31736_v53 }
 0xa08   :  { %20133 = vmatprep.mubr.f32.mxu0 %v31737_v29 }
 0xa0b   :  { %20134 = vmatmul.mubr.f32.gmra.mrb[106].mxu0 %v31738_v38 }
 0xa0c   :  { %20136 = vmatprep.mubr.f32.mxu0 %v31739_v60 }
 0xa0f   :  { %20137 = vmatmul.mubr.f32.gmra.mrb[108].mxu0 %v31740_v51 }
 0xa10   :  { %20139 = vmatprep.mubr.f32.mxu0 %v31741_v18  ;;  %v31812_v18 = vand.u32 4294901760, %v31748_v19 }
 0xa13   :  { %20140 = vmatmul.mubr.f32.gmra.mrb[110].mxu0 %v31742_v57 }
 0xa14   :  { %20142 = vmatprep.mubr.f32.mxu0 %v31743_v13 }
 0xa17   :  { %20143 = vmatmul.mubr.f32.gmra.mrb[112].mxu0 %v31744_v46 }
 0xa18   :  { %20145 = vmatprep.mubr.f32.mxu0 %v31745_v4 }
 0xa1b   :  { %20146 = vmatmul.mubr.f32.gmra.mrb[114].mxu0 %v31746_v59 }
 0xa1c   :  { %20148 = vmatprep.mubr.f32.mxu0 %v31747_v55 }
 0xa1f   :  { %20149 = vmatmul.mubr.f32.gmra.mrb[116].mxu0 %v31748_v19  ;;  %v31819_v19 = vand.u32 4294901760, %v31755_v30 }
 0xa20   :  { %20151 = vmatprep.mubr.f32.mxu0 %v31749_v39 }
 0xa23   :  { %20152 = vmatmul.mubr.f32.gmra.mrb[118].mxu0 %v31750_v28 }
 0xa24   :  { %20154 = vmatprep.mubr.f32.mxu0 %v31751_v8 }
 0xa27   :  { %20155 = vmatmul.mubr.f32.gmra.mrb[120].mxu0 %v31752_v14 }
 0xa28   :  { %20157 = vmatprep.mubr.f32.mxu0 %v31753_v37 }
 0xa2b   :  { %20158 = vmatmul.mubr.f32.gmra.mrb[122].mxu0 %v31754_v6 }
 0xa2c   :  { %20160 = vmatprep.mubr.f32.mxu0 %v31755_v30  ;;  %v31826_v30 = vand.u32 4294901760, %v31762_v1 }
 0xa2f   :  { %20161 = vmatmul.mubr.f32.gmra.mrb[124].mxu0 %v31756_v52 }
 0xa30   :  { %20163 = vmatprep.mubr.f32.mxu0 %v31757_v17 }
 0xa33   :  { %20164 = vmatmul.mubr.f32.gmra.mrb[126].mxu0 %v31758_v7 }
 0xa34   :  { %20166 = vmatprep.mubr.f32.mxu0 %v31759_v5 }
 0xa37   :  { %20167 = vmatmul.mubr.f32.gmra.mrb[128].mxu0 %v31760_v61 }
 0xa38   :  { %20169 = vmatprep.mubr.f32.mxu0 %v31761_v32 }
 0xa3b   :  { %20170 = vmatmul.mubr.f32.gmra.mrb[130].mxu0 %v31762_v1  ;;  %v31833_v1 = vld [vmem:[#allocation63_spill] sm:$0xff] }
 0xa3c   :  { %20172 = vmatprep.mubr.f32.mxu0 %v31763_v26 }
 0xa3f   :  { %20173 = vmatmul.mubr.f32.gmra.mrb[132].mxu0 %v31764_v62 }
 0xa40   :  { %20175 = vmatprep.mubr.f32.mxu0 %v31765_v25 }
 0xa43   :  { %20176 = vmatmul.mubr.f32.gmra.mrb[134].mxu0 %v31766_v36 }
 0xa44   :  { %20178 = vmatprep.mubr.f32.mxu0 %v31767_v31 }
 0xa47   :  { %20179 = vmatmul.mubr.f32.gmra.mrb[136].mxu0 %v31768_v20 }
 0xa48   :  { %20181 = vmatprep.mubr.f32.mxu0 %v31769_v23  ;;  %v31781_v23 = vld [vmem:[#allocation120_spill] sm:$0xff] }
 0xa4b   :  { %20182 = vmatmul.mubr.f32.gmra.mrb[138].mxu0 %v31770_v48  ;;  %v31782_v48 = vld [vmem:[#allocation116_spill] sm:$0xff] }
 0xa4c   :  { %20184 = vmatprep.mubr.f32.mxu0 %v31771_v33  ;;  %v31783_v33 = vld [vmem:[#allocation133_spill] sm:$0xff] }
 0xa4f   :  { %20185 = vmatmul.mubr.f32.gmra.mrb[140].mxu0 %v31772_v45  ;;  %v31784_v45 = vld [vmem:[#allocation132_spill] sm:$0xff] }
 0xa50   :  { %20187 = vmatprep.mubr.f32.mxu0 %v31773_v11  ;;  %v31785_v11 = vld [vmem:[#allocation142_spill] sm:$0xff] }
 0xa53   :  { %20188 = vmatmul.mubr.f32.gmra.mrb[142].mxu0 %v31774_v40  ;;  %v31786_v40 = vld [vmem:[#allocation141_spill] sm:$0xff] }
 0xa54   :  { %20190 = vmatprep.mubr.f32.mxu0 %v31775_v21  ;;  %v31787_v21 = vld [vmem:[#allocation6_spill] sm:$0xff] }
 0xa57   :  { %20191 = vmatmul.mubr.f32.gmra.mrb[144].mxu0 %v31776_v54  ;;  %v31788_v54 = vld [vmem:[#allocation4_spill] sm:$0xff] }
 0xa58   :  { %20193 = vmatprep.mubr.f32.mxu0 %v31781_v23 }
 0xa5b   :  { %20194 = vmatmul.mubr.f32.gmra.mrb[146].mxu0 %v31782_v48 }
 0xa5c   :  { %20196 = vmatprep.mubr.f32.mxu0 %v31783_v33 }
 0xa5f   :  { %20197 = vmatmul.mubr.f32.gmra.mrb[148].mxu0 %v31784_v45 }
 0xa60   :  { %20199 = vmatprep.mubr.f32.mxu0 %v31785_v11 }
 0xa63   :  { %20200 = vmatmul.mubr.f32.gmra.mrb[150].mxu0 %v31786_v40 }
 0xa64   :  { %20202 = vmatprep.mubr.f32.mxu0 %v31787_v21 }
 0xa67   :  { %20203 = vmatmul.mubr.f32.gmra.mrb[152].mxu0 %v31788_v54 }
 0xa68   :  { %20205 = vmatprep.mubr.f32.mxu0 %v28423_v27  ;;  %v31792_v27 = vand.u32 4294901760, %v31727_v22  ;;  %v31800_v22 = vand.u32 4294901760, %v31736_v53  ;;  %v31807_v53 = vand.u32 4294901760, %v31743_v13  ;;  %v31814_v13 = vand.u32 4294901760, %v31750_v28 }
 0xa69   :  { %v31821_v28 = vand.u32 4294901760, %v31757_v17  ;;  %v31828_v17 = vand.u32 4294901760, %v31764_v62  ;;  %v31837_v62 = vld [vmem:[#allocation73_spill] sm:$0xff] }
 0xa6a   :  { %v31838_v0 = vand.u32 4294901760, %v31837_v62  ;;  %v31901_v62 = vld [vmem:[#allocation19_spill] sm:$0xff] }
 0xa6b   :  { %20206 = vmatmul.mubr.f32.gmra.mrb[154].mxu0 %v28417_v10  ;;  %v31793_v10 = vand.u32 4294901760, %v31728_v50  ;;  %v31799_v50 = vand.u32 4294901760, %v31735_v58  ;;  %v31834_v58 = vand.u32 4294901760, %v31833_v1  ;;  %v31897_v1 = vld [vmem:[#allocation71_spill] sm:$0xff] }
 0xa6c   :  { %20208 = vmatprep.mubr.f32.mxu0 %v28443_v12 }
 0xa6f   :  { %20209 = vmatmul.mubr.f32.gmra.mrb[156].mxu0 %v28437_v15 }
 0xa70   :  { %20211 = vmatprep.mubr.f32.mxu0 %v28463_v2  ;;  %v31794_v2 = vand.u32 4294901760, %v31730_v63  ;;  %v31802_v63 = vand.u32 4294901760, %v31738_v38  ;;  %v31809_v38 = vand.u32 4294901760, %v31745_v4  ;;  %v31816_v4 = vand.u32 4294901760, %v31752_v14 }
 0xa71   :  { %v31823_v14 = vand.u32 4294901760, %v31759_v5  ;;  %v31830_v5 = vand.u32 4294901760, %v31766_v36  ;;  %v31841_v36 = vld [vmem:[#allocation96_spill] sm:$0xff] }
 0xa73   :  { %20212 = vmatmul.mubr.f32.gmra.mrb[158].mxu0 %v28457_v3  ;;  %v31795_v3 = vand.u32 4294901760, %v31731_v34  ;;  %v31801_v34 = vand.u32 4294901760, %v31737_v29  ;;  %v31808_v29 = vand.u32 4294901760, %v31744_v46  ;;  %v31815_v46 = vand.u32 4294901760, %v31751_v8 }
 0xa74   :  { %20222 = vmatprep.mubr.f32.mxu0 %v31789_v24  ;;  %v31822_v8 = vand.u32 4294901760, %v31758_v7  ;;  %v31829_v7 = vand.u32 4294901760, %v31765_v25  ;;  %v31839_v25 = vld [vmem:[#allocation76_spill] sm:$0xff] }
 0xa77   :  { %20223 = vmatmul.mubr.f32.vlgmr.msra.gmra.mrb[96].mxu0 %v31792_v27  ;;  %v31804_v27 = vand.u32 4294901760, %v31740_v51  ;;  %v31811_v51 = vand.u32 4294901760, %v31747_v55  ;;  %v31818_v55 = vand.u32 4294901760, %v31754_v6  ;;  %v31825_v6 = vand.u32 4294901760, %v31761_v32 }
 0xa78   :  { %20225 = vmatprep.mubr.f32.mxu0 %v31793_v10  ;;  %21041 = vmatpush3.bf16.msra.mxu0 %v21038_v56  ;;  %v31803_v10 = vand.u32 4294901760, %v31739_v60  ;;  %v31810_v60 = vand.u32 4294901760, %v31746_v59  ;;  %v31817_v59 = vand.u32 4294901760, %v31753_v37  ;;  %v31824_v37 = vand.u32 4294901760, %v31760_v61 }
 0xa79   :  { %21043 = vmatprep.subr.bf16.mxu0 %v21042_v16  ;;  %v31831_v61 = vand.u32 4294901760, %v31767_v31  ;;  %v31832_v32 = vand.u32 4294901760, %v31768_v20  ;;  %v31842_v56 = vand.u32 4294901760, %v31841_v36  ;;  %v31843_v31 = vld [vmem:[#allocation3_spill] sm:$0xff]  ;;  %v31845_v20 = vld [vmem:[#allocation18_spill] sm:$0xff]  ;;  %v31905_v36 = vld [vmem:[#allocation5_spill] sm:$0xff] }
 0xa7a   :  { %v31844_v24 = vand.u32 4294901760, %v31843_v31  ;;  %v31846_v42 = vand.u32 4294901760, %v31845_v20  ;;  %v31907_v31 = vld [vmem:[#allocation156_spill] sm:$0xff]  ;;  %v31909_v20 = vld [vmem:[#allocation54_spill] sm:$0xff] }
 0xa7b   :  { %20226 = vmatmul.mubr.f32.gmra.mrb[98].mxu0 %v31794_v2  ;;  %v31806_v2 = vand.u32 4294901760, %v31742_v57  ;;  %v31813_v57 = vand.u32 4294901760, %v31749_v39  ;;  %v31820_v39 = vand.u32 4294901760, %v31756_v52  ;;  %v31827_v52 = vand.u32 4294901760, %v31763_v26  ;;  %v31835_v26 = vld [vmem:[#allocation69_spill] sm:$0xff] }
 0xa7c   :  { %20228 = vmatprep.mubr.f32.mxu0 %v31795_v3  ;;  %21045 = vmatpush3.bf16.msra.mxu0 %v21042_v16  ;;  %v31836_v47 = vand.u32 4294901760, %v31835_v26  ;;  %v31840_v3 = vand.u32 4294901760, %v31839_v25  ;;  %v31848_v16 = vand.u32 4294901760, %v31847_v9  ;;  %v31899_v26 = vld [vmem:[#allocation146_spill] sm:$0xff]  ;;  %v31903_v25 = vld [vmem:[#allocation31_spill] sm:$0xff]  ;;  %v31911_v9 = vld [vmem:[#allocation61_spill] sm:$0xff] }
 0xa7d   :  { %21047 = vmatprep.subr.bf16.mxu0 %v31709_v44 }
 0xa7f   :  { %20229 = vmatmul.mubr.f32.gmra.mrb[100].mxu0 %v31796_v35  ;;  %v31849_v35 = vand.u32 4294901760, %v31781_v23  ;;  %v31856_v23 = vand.u32 4294901760, %v31788_v54  ;;  %v31867_v54 = vld [vmem:[#allocation24_spill] sm:$0xff] }
 0xa80   :  { %20231 = vmatprep.mubr.f32.mxu0 %v31797_v49  ;;  %v31850_v49 = vand.u32 4294901760, %v31782_v48  ;;  %v31857_v48 = vld [vmem:[#allocation117_spill] sm:$0xff] }
 0xa83   :  { %20232 = vmatmul.mubr.f32.gmra.mrb[102].mxu0 %v31798_v43  ;;  %v31851_v43 = vand.u32 4294901760, %v31783_v33  ;;  %v31859_v33 = vld [vmem:[#allocation77_spill] sm:$0xff] }
 0xa84   :  { %20234 = vmatprep.mubr.f32.mxu0 %v31799_v50  ;;  %v31852_v50 = vand.u32 4294901760, %v31784_v45  ;;  %v31861_v45 = vand.u32 4294901760, %v28443_v12  ;;  %v31871_v12 = vld [vmem:[#allocation51_spill] sm:$0xff] }
 0xa87   :  { %20235 = vmatmul.mubr.f32.gmra.mrb[104].mxu0 %v31800_v22  ;;  %v31853_v22 = vand.u32 4294901760, %v31785_v11  ;;  %v31862_v11 = vand.u32 4294901760, %v28437_v15  ;;  %v31872_v15 = vld [vmem:[#allocation64_spill] sm:$0xff] }
 0xa88   :  { %20237 = vmatprep.mubr.f32.mxu0 %v31801_v34  ;;  %v31854_v34 = vand.u32 4294901760, %v31786_v40  ;;  %v31863_v40 = vld [vmem:[#allocation98_spill] sm:$0xff] }
 0xa8b   :  { %20238 = vmatmul.mubr.f32.gmra.mrb[106].mxu0 %v31802_v63  ;;  %v31855_v63 = vand.u32 4294901760, %v31787_v21  ;;  %v31865_v21 = vld [vmem:[#allocation95_spill] sm:$0xff] }
 0xa8c   :  { %20240 = vmatprep.mubr.f32.mxu0 %v31803_v10  ;;  %v31858_v10 = vand.u32 4294901760, %v31857_v48  ;;  %v31921_v48 = vld [vmem:[#allocation125_spill] sm:$0xff] }
 0xa8f   :  { %20241 = vmatmul.mubr.f32.gmra.mrb[108].mxu0 %v31804_v27  ;;  %v31860_v27 = vand.u32 4294901760, %v31859_v33  ;;  %v31923_v33 = vld [vmem:[#allocation136_spill] sm:$0xff] }
 0xa90   :  { %20243 = vmatprep.mubr.f32.mxu0 %v31805_v41  ;;  %v31864_v41 = vand.u32 4294901760, %v31863_v40  ;;  %v31927_v40 = vld [vmem:[#allocation80_spill] sm:$0xff] }
 0xa93   :  { %20244 = vmatmul.mubr.f32.gmra.mrb[110].mxu0 %v31806_v2  ;;  %v31866_v2 = vand.u32 4294901760, %v31865_v21  ;;  %v31929_v21 = vld [vmem:[#allocation89_spill] sm:$0xff] }
 0xa94   :  { %20246 = vmatprep.mubr.f32.mxu0 %v31807_v53  ;;  %v31868_v53 = vld [vmem:[#allocation41_spill] sm:$0xff] }
 0xa97   :  { %20247 = vmatmul.mubr.f32.gmra.mrb[112].mxu0 %v31808_v29  ;;  %v31869_v29 = vld [vmem:[#allocation53_spill] sm:$0xff] }
 0xa98   :  { %20249 = vmatprep.mubr.f32.mxu0 %v31809_v38  ;;  %v31870_v38 = vld [vmem:[#allocation8_spill] sm:$0xff] }
 0xa9b   :  { %20250 = vmatmul.mubr.f32.gmra.mrb[114].mxu0 %v31810_v60  ;;  %v31873_v60 = vld [vmem:[#allocation66_spill] sm:$0xff] }
 0xa9c   :  { %20252 = vmatprep.mubr.f32.mxu0 %v31811_v51  ;;  %v31874_v51 = vld [vmem:[#allocation9_spill] sm:$0xff] }
 0xa9f   :  { %20253 = vmatmul.mubr.f32.gmra.mrb[116].mxu0 %v31812_v18  ;;  %v31875_v18 = vld [vmem:[#allocation21_spill] sm:$0xff] }
 0xaa0   :  { %20255 = vmatprep.mubr.f32.mxu0 %v31813_v57  ;;  %v31876_v57 = vld [vmem:[#allocation78_spill] sm:$0xff] }
 0xaa3   :  { %20256 = vmatmul.mubr.f32.gmra.mrb[118].mxu0 %v31814_v13  ;;  %v31877_v13 = vld [vmem:[#allocation30_spill] sm:$0xff] }
 0xaa4   :  { %20258 = vmatprep.mubr.f32.mxu0 %v31815_v46  ;;  %v31878_v46 = vld [vmem:[#allocation87_spill] sm:$0xff] }
 0xaa7   :  { %20259 = vmatmul.mubr.f32.gmra.mrb[120].mxu0 %v31816_v4  ;;  %v31880_v4 = vld [vmem:[#allocation48_spill] sm:$0xff] }
 0xaa8   :  { %20261 = vmatprep.mubr.f32.mxu0 %v31817_v59  ;;  %v31881_v59 = vld [vmem:[#allocation92_spill] sm:$0xff] }
 0xaab   :  { %20262 = vmatmul.mubr.f32.gmra.mrb[122].mxu0 %v31818_v55  ;;  %v31882_v55 = vld [vmem:[#allocation62_spill] sm:$0xff] }
 0xaac   :  { %20264 = vmatprep.mubr.f32.mxu0 %v31819_v19  ;;  %v31883_v19 = vld [vmem:[#allocation99_spill] sm:$0xff] }
 0xaaf   :  { %20265 = vmatmul.mubr.f32.gmra.mrb[124].mxu0 %v31820_v39  ;;  %v31884_v39 = vld [vmem:[#allocation108_spill] sm:$0xff] }
 0xab0   :  { %20267 = vmatprep.mubr.f32.mxu0 %v31821_v28  ;;  %v31885_v28 = vld [vmem:[#allocation102_spill] sm:$0xff] }
 0xab3   :  { %20268 = vmatmul.mubr.f32.gmra.mrb[126].mxu0 %v31822_v8  ;;  %v31886_v8 = vld [vmem:[#allocation25_spill] sm:$0xff] }
 0xab4   :  { %20270 = vmatprep.mubr.f32.mxu0 %v31823_v14  ;;  %v31887_v14 = vld [vmem:[#allocation20_spill] sm:$0xff] }
 0xab7   :  { %20271 = vmatmul.mubr.f32.gmra.mrb[128].mxu0 %v31824_v37  ;;  %v31888_v37 = vld [vmem:[#allocation49_spill] sm:$0xff] }
 0xab8   :  { %20273 = vmatprep.mubr.f32.mxu0 %v31825_v6  ;;  %v31889_v6 = vld [vmem:[#allocation124_spill] sm:$0xff] }
 0xabb   :  { %20274 = vmatmul.mubr.f32.gmra.mrb[130].mxu0 %v31826_v30  ;;  %v31890_v30 = vld [vmem:[#allocation12_spill] sm:$0xff] }
 0xabc   :  { %20276 = vmatprep.mubr.f32.mxu0 %v31827_v52  ;;  %v31891_v52 = vld [vmem:[#allocation65_spill] sm:$0xff] }
 0xabf   :  { %20277 = vmatmul.mubr.f32.gmra.mrb[132].mxu0 %v31828_v17  ;;  %v31892_v17 = vld [vmem:[#allocation60_spill] sm:$0xff] }
 0xac0   :  { %20279 = vmatprep.mubr.f32.mxu0 %v31829_v7  ;;  %v31893_v7 = vld [vmem:[#allocation123_spill] sm:$0xff] }
 0xac3   :  { %20280 = vmatmul.mubr.f32.gmra.mrb[134].mxu0 %v31830_v5  ;;  %v31894_v5 = vld [vmem:[#allocation118_spill] sm:$0xff] }
 0xac4   :  { %20282 = vmatprep.mubr.f32.mxu0 %v31831_v61  ;;  %v31895_v61 = vld [vmem:[#allocation131_spill] sm:$0xff] }
 0xac7   :  { %20283 = vmatmul.mubr.f32.gmra.mrb[136].mxu0 %v31832_v32  ;;  %v31896_v32 = vld [vmem:[#allocation79_spill] sm:$0xff] }
 0xac8   :  { %20285 = vmatprep.mubr.f32.mxu0 %v31834_v58  ;;  %v31898_v58 = vld [vmem:[#allocation145_spill] sm:$0xff] }
 0xacb   :  { %20286 = vmatmul.mubr.f32.gmra.mrb[138].mxu0 %v31836_v47  ;;  %v31900_v47 = vld [vmem:[#allocation152_spill] sm:$0xff] }
 0xacc   :  { %20288 = vmatprep.mubr.f32.mxu0 %v31838_v0  ;;  %v31902_v0 = vld [vmem:[#allocation91_spill] sm:$0xff] }
 0xacf   :  { %20289 = vmatmul.mubr.f32.gmra.mrb[140].mxu0 %v31840_v3  ;;  %v31904_v3 = vld [vmem:[#allocation155_spill] sm:$0xff] }
 0xad0   :  { %20291 = vmatprep.mubr.f32.mxu0 %v31842_v56  ;;  %v31906_v56 = vld [vmem:[#allocation13_spill] sm:$0xff] }
 0xad3   :  { %20292 = vmatmul.mubr.f32.gmra.mrb[142].mxu0 %v31844_v24  ;;  %v31908_v24 = vld [vmem:[#allocation45_spill] sm:$0xff] }
 0xad4   :  { %20294 = vmatprep.mubr.f32.mxu0 %v31846_v42  ;;  %v31910_v42 = vld [vmem:[#allocation112_spill] sm:$0xff] }
 0xad7   :  { %20295 = vmatmul.mubr.f32.gmra.mrb[144].mxu0 %v31848_v16  ;;  %v31912_v16 = vld [vmem:[#allocation70_spill] sm:$0xff] }
 0xad8   :  { %20297 = vmatprep.mubr.f32.mxu0 %v31849_v35  ;;  %v31913_v35 = vld [vmem:[#allocation115_spill] sm:$0xff] }
 0xadb   :  { %20298 = vmatmul.mubr.f32.gmra.mrb[146].mxu0 %v31850_v49  ;;  %v31914_v49 = vld [vmem:[#allocation84_spill] sm:$0xff] }
 0xadc   :  { %20300 = vmatprep.mubr.f32.mxu0 %v31851_v43  ;;  %v31915_v43 = vld [vmem:[#allocation83_spill] sm:$0xff] }
 0xadf   :  { %20301 = vmatmul.mubr.f32.gmra.mrb[148].mxu0 %v31852_v50  ;;  %v31916_v50 = vld [vmem:[#allocation88_spill] sm:$0xff] }
 0xae0   :  { %20303 = vmatprep.mubr.f32.mxu0 %v31853_v22  ;;  %v31917_v22 = vld [vmem:[#allocation101_spill] sm:$0xff] }
 0xae3   :  { %20304 = vmatmul.mubr.f32.gmra.mrb[150].mxu0 %v31854_v34  ;;  %v31918_v34 = vld [vmem:[#allocation34_spill] sm:$0xff] }
 0xae4   :  { %20306 = vmatprep.mubr.f32.mxu0 %v31855_v63  ;;  %v31919_v63 = vld [vmem:[#allocation16_spill] sm:$0xff] }
 0xae7   :  { %20307 = vmatmul.mubr.f32.gmra.mrb[152].mxu0 %v31856_v23  ;;  %v31920_v23 = vld [vmem:[#allocation127_spill] sm:$0xff] }
 0xae8   :  { %20309 = vmatprep.mubr.f32.mxu0 %v31858_v10  ;;  %v31922_v10 = vld [vmem:[#allocation138_spill] sm:$0xff] }
 0xaeb   :  { %20310 = vmatmul.mubr.f32.gmra.mrb[154].mxu0 %v31860_v27  ;;  %v31924_v27 = vld [vmem:[#allocation2_spill] sm:$0xff] }
 0xaec   :  { %20312 = vmatprep.mubr.f32.mxu0 %v31861_v45  ;;  %v31925_v45 = vld [vmem:[#allocation148_spill] sm:$0xff] }
 0xaef   :  { %20313 = vmatmul.mubr.f32.gmra.mrb[156].mxu0 %v31862_v11  ;;  %v31926_v11 = vld [vmem:[#allocation82_spill] sm:$0xff] }
 0xaf0   :  { %20315 = vmatprep.mubr.f32.mxu0 %v31864_v41  ;;  %v31928_v41 = vld [vmem:[#allocation86_spill] sm:$0xff] }
 0xaf3   :  { %20316 = vmatmul.mubr.f32.gmra.mrb[158].mxu0 %v31866_v2  ;;  %v31930_v2 = vld [vmem:[#allocation94_spill] sm:$0xff] }
 0xaf4   :  { %20326 = vmatprep.mubr.f32.mxu0 %v31867_v54 }
 0xaf7   :  { %20327 = vmatmul.mubr.f32.vlgmr.msra.gmra.mrb[96].mxu0 %v31868_v53 }
 0xaf8   :  { %20329 = vmatprep.mubr.f32.mxu0 %v31869_v29  ;;  %21049 = vmatpush3.bf16.msra.mxu0 %v31709_v44  ;;  %v31879_v44 = vld [vmem:[#allocation85_spill] sm:$0xff] }
 0xaf9   :  { %21051 = vmatprep.subr.bf16.mxu0 %v31870_v38 }
 0xafb   :  { %20330 = vmatmul.mubr.f32.gmra.mrb[98].mxu0 %v31871_v12 }
 0xafc   :  { %20332 = vmatprep.mubr.f32.mxu0 %v31872_v15  ;;  %21053 = vmatpush3.bf16.msra.mxu0 %v31870_v38  ;;  %v31931_v38 = vld [vmem:[#allocation90_spill] sm:$0xff] }
 0xaff   :  { %20333 = vmatmul.mubr.f32.gmra.mrb[100].mxu0 %v31873_v60 }
 0xb00   :  { %20335 = vmatprep.mubr.f32.mxu0 %v31874_v51 }
 0xb03   :  { %20336 = vmatmul.mubr.f32.gmra.mrb[102].mxu0 %v31875_v18 }
 0xb04   :  { %20338 = vmatprep.mubr.f32.mxu0 %v31876_v57 }
 0xb07   :  { %20339 = vmatmul.mubr.f32.gmra.mrb[104].mxu0 %v31877_v13 }
 0xb08   :  { %20341 = vmatprep.mubr.f32.mxu0 %v31878_v46 }
 0xb0b   :  { %20342 = vmatmul.mubr.f32.gmra.mrb[106].mxu0 %v31879_v44 }
 0xb0c   :  { %20344 = vmatprep.mubr.f32.mxu0 %v31880_v4 }
 0xb0f   :  { %20345 = vmatmul.mubr.f32.gmra.mrb[108].mxu0 %v31881_v59 }
 0xb10   :  { %20347 = vmatprep.mubr.f32.mxu0 %v31882_v55 }
 0xb13   :  { %20348 = vmatmul.mubr.f32.gmra.mrb[110].mxu0 %v31883_v19 }
 0xb14   :  { %20350 = vmatprep.mubr.f32.mxu0 %v31884_v39 }
 0xb17   :  { %20351 = vmatmul.mubr.f32.gmra.mrb[112].mxu0 %v31885_v28 }
 0xb18   :  { %20353 = vmatprep.mubr.f32.mxu0 %v31886_v8 }
 0xb1b   :  { %20354 = vmatmul.mubr.f32.gmra.mrb[114].mxu0 %v31887_v14 }
 0xb1c   :  { %20356 = vmatprep.mubr.f32.mxu0 %v31888_v37 }
 0xb1f   :  { %20357 = vmatmul.mubr.f32.gmra.mrb[116].mxu0 %v31889_v6 }
 0xb20   :  { %20359 = vmatprep.mubr.f32.mxu0 %v31890_v30 }
 0xb23   :  { %20360 = vmatmul.mubr.f32.gmra.mrb[118].mxu0 %v31891_v52 }
 0xb24   :  { %20362 = vmatprep.mubr.f32.mxu0 %v31892_v17 }
 0xb27   :  { %20363 = vmatmul.mubr.f32.gmra.mrb[120].mxu0 %v31893_v7 }
 0xb28   :  { %20365 = vmatprep.mubr.f32.mxu0 %v31894_v5 }
 0xb2b   :  { %20366 = vmatmul.mubr.f32.gmra.mrb[122].mxu0 %v31895_v61 }
 0xb2c   :  { %20368 = vmatprep.mubr.f32.mxu0 %v31896_v32 }
 0xb2f   :  { %20369 = vmatmul.mubr.f32.gmra.mrb[124].mxu0 %v31897_v1 }
 0xb30   :  { %20371 = vmatprep.mubr.f32.mxu0 %v31898_v58 }
 0xb33   :  { %20372 = vmatmul.mubr.f32.gmra.mrb[126].mxu0 %v31899_v26 }
 0xb34   :  { %20374 = vmatprep.mubr.f32.mxu0 %v31900_v47 }
 0xb37   :  { %20375 = vmatmul.mubr.f32.gmra.mrb[128].mxu0 %v31901_v62 }
 0xb38   :  { %20377 = vmatprep.mubr.f32.mxu0 %v31902_v0 }
 0xb3b   :  { %20378 = vmatmul.mubr.f32.gmra.mrb[130].mxu0 %v31903_v25 }
 0xb3c   :  { %20380 = vmatprep.mubr.f32.mxu0 %v31904_v3 }
 0xb3f   :  { %20381 = vmatmul.mubr.f32.gmra.mrb[132].mxu0 %v31905_v36 }
 0xb40   :  { %20383 = vmatprep.mubr.f32.mxu0 %v31906_v56 }
 0xb43   :  { %20384 = vmatmul.mubr.f32.gmra.mrb[134].mxu0 %v31907_v31 }
 0xb44   :  { %20386 = vmatprep.mubr.f32.mxu0 %v31908_v24 }
 0xb47   :  { %20387 = vmatmul.mubr.f32.gmra.mrb[136].mxu0 %v31909_v20 }
 0xb48   :  { %20389 = vmatprep.mubr.f32.mxu0 %v31910_v42 }
 0xb4b   :  { %20390 = vmatmul.mubr.f32.gmra.mrb[138].mxu0 %v31911_v9 }
 0xb4c   :  { %20392 = vmatprep.mubr.f32.mxu0 %v31912_v16 }
 0xb4f   :  { %20393 = vmatmul.mubr.f32.gmra.mrb[140].mxu0 %v31913_v35 }
 0xb50   :  { %20395 = vmatprep.mubr.f32.mxu0 %v31914_v49 }
 0xb53   :  { %20396 = vmatmul.mubr.f32.gmra.mrb[142].mxu0 %v31915_v43 }
 0xb54   :  { %20398 = vmatprep.mubr.f32.mxu0 %v31916_v50 }
 0xb57   :  { %20399 = vmatmul.mubr.f32.gmra.mrb[144].mxu0 %v31917_v22 }
 0xb58   :  { %20401 = vmatprep.mubr.f32.mxu0 %v31918_v34 }
 0xb5b   :  { %20402 = vmatmul.mubr.f32.gmra.mrb[146].mxu0 %v31919_v63 }
 0xb5c   :  { %20404 = vmatprep.mubr.f32.mxu0 %v31920_v23 }
 0xb5f   :  { %20405 = vmatmul.mubr.f32.gmra.mrb[148].mxu0 %v31921_v48 }
 0xb60   :  { %20407 = vmatprep.mubr.f32.mxu0 %v31922_v10 }
 0xb63   :  { %20408 = vmatmul.mubr.f32.gmra.mrb[150].mxu0 %v31923_v33 }
 0xb64   :  { %20410 = vmatprep.mubr.f32.mxu0 %v31924_v27 }
 0xb67   :  { %20411 = vmatmul.mubr.f32.gmra.mrb[152].mxu0 %v31925_v45 }
 0xb68   :  { %20413 = vmatprep.mubr.f32.mxu0 %v31926_v11 }
 0xb6b   :  { %20414 = vmatmul.mubr.f32.gmra.mrb[154].mxu0 %v31927_v40 }
 0xb6c   :  { %20416 = vmatprep.mubr.f32.mxu0 %v31928_v41 }
 0xb6f   :  { %20417 = vmatmul.mubr.f32.gmra.mrb[156].mxu0 %v31929_v21 }
 0xb70   :  { %20419 = vmatprep.mubr.f32.mxu0 %v31930_v2 }
 0xb73   :  { %20420 = vmatmul.mubr.f32.gmra.mrb[158].mxu0 %v31931_v38 }
 0xb74   :  { %20430 = vmatprep.mubr.f32.mxu0 %v31867_v54  ;;  %v28882_v54 = vld [vmem:[%s29400_s4] ss:$0 sm:$0xff] }
 0xb77   :  { %20431 = vmatmul.mubr.f32.vlgmr.msra.gmra.mrb[96].mxu0 %v31868_v53 }
 0xb78   :  { %20433 = vmatprep.mubr.f32.mxu0 %v31869_v29 }
 0xb7b   :  { %20434 = vmatmul.mubr.f32.gmra.mrb[98].mxu0 %v31871_v12 }
 0xb7c   :  { %20436 = vmatprep.mubr.f32.mxu0 %v31872_v15 }
 0xb7f   :  { %20437 = vmatmul.mubr.f32.gmra.mrb[100].mxu0 %v31873_v60  ;;  %v22725_v60 = vld [vmem:[%s29397_s0 + $0x8] sm:$0xff] }
 0xb80   :  { %20439 = vmatprep.mubr.f32.mxu0 %v31874_v51 }
 0xb83   :  { %20440 = vmatmul.mubr.f32.gmra.mrb[102].mxu0 %v31875_v18  ;;  %v22726_v18 = vld [vmem:[%s29397_s0] sm:$0xff] }
 0xb84   :  { %20442 = vmatprep.mubr.f32.mxu0 %v31876_v57 }
 0xb87   :  { %20443 = vmatmul.mubr.f32.gmra.mrb[104].mxu0 %v31877_v13 }
 0xb88   :  { %20445 = vmatprep.mubr.f32.mxu0 %v31878_v46 }
 0xb8b   :  { %20446 = vmatmul.mubr.f32.gmra.mrb[106].mxu0 %v31879_v44 }
 0xb8c   :  { %20448 = vmatprep.mubr.f32.mxu0 %v31880_v4 }
 0xb8f   :  { %20449 = vmatmul.mubr.f32.gmra.mrb[108].mxu0 %v31881_v59 }
 0xb90   :  { %20451 = vmatprep.mubr.f32.mxu0 %v31882_v55 }
 0xb93   :  { %20452 = vmatmul.mubr.f32.gmra.mrb[110].mxu0 %v31883_v19 }
 0xb94   :  { %20454 = vmatprep.mubr.f32.mxu0 %v31884_v39 }
 0xb97   :  { %20455 = vmatmul.mubr.f32.gmra.mrb[112].mxu0 %v31885_v28 }
 0xb98   :  { %20457 = vmatprep.mubr.f32.mxu0 %v31886_v8 }
 0xb9b   :  { %20458 = vmatmul.mubr.f32.gmra.mrb[114].mxu0 %v31887_v14 }
 0xb9c   :  { %20460 = vmatprep.mubr.f32.mxu0 %v31888_v37 }
 0xb9f   :  { %20461 = vmatmul.mubr.f32.gmra.mrb[116].mxu0 %v31889_v6 }
 0xba0   :  { %20463 = vmatprep.mubr.f32.mxu0 %v31890_v30 }
 0xba3   :  { %20464 = vmatmul.mubr.f32.gmra.mrb[118].mxu0 %v31891_v52 }
 0xba4   :  { %20466 = vmatprep.mubr.f32.mxu0 %v31892_v17 }
 0xba7   :  { %20467 = vmatmul.mubr.f32.gmra.mrb[120].mxu0 %v31893_v7 }
 0xba8   :  { %20469 = vmatprep.mubr.f32.mxu0 %v31894_v5 }
 0xbab   :  { %20470 = vmatmul.mubr.f32.gmra.mrb[122].mxu0 %v31895_v61 }
 0xbac   :  { %20472 = vmatprep.mubr.f32.mxu0 %v31896_v32 }
 0xbaf   :  { %20473 = vmatmul.mubr.f32.gmra.mrb[124].mxu0 %v31897_v1 }
 0xbb0   :  { %20475 = vmatprep.mubr.f32.mxu0 %v31898_v58 }
 0xbb3   :  { %20476 = vmatmul.mubr.f32.gmra.mrb[126].mxu0 %v31899_v26 }
 0xbb4   :  { %20478 = vmatprep.mubr.f32.mxu0 %v31900_v47 }
 0xbb7   :  { %20479 = vmatmul.mubr.f32.gmra.mrb[128].mxu0 %v31901_v62 }
 0xbb8   :  { %20481 = vmatprep.mubr.f32.mxu0 %v31902_v0 }
 0xbbb   :  { %20482 = vmatmul.mubr.f32.gmra.mrb[130].mxu0 %v31903_v25 }
 0xbbc   :  { %20484 = vmatprep.mubr.f32.mxu0 %v31904_v3 }
 0xbbf   :  { %20485 = vmatmul.mubr.f32.gmra.mrb[132].mxu0 %v31905_v36 }
 0xbc0   :  { %20487 = vmatprep.mubr.f32.mxu0 %v31906_v56 }
 0xbc3   :  { %20488 = vmatmul.mubr.f32.gmra.mrb[134].mxu0 %v31907_v31 }
 0xbc4   :  { %20490 = vmatprep.mubr.f32.mxu0 %v31908_v24 }
 0xbc7   :  { %20491 = vmatmul.mubr.f32.gmra.mrb[136].mxu0 %v31909_v20 }
 0xbc8   :  { %20493 = vmatprep.mubr.f32.mxu0 %v31910_v42 }
 0xbcb   :  { %20494 = vmatmul.mubr.f32.gmra.mrb[138].mxu0 %v31911_v9 }
 0xbcc   :  { %20496 = vmatprep.mubr.f32.mxu0 %v31912_v16 }
 0xbcf   :  { %20497 = vmatmul.mubr.f32.gmra.mrb[140].mxu0 %v31913_v35 }
 0xbd0   :  { %20499 = vmatprep.mubr.f32.mxu0 %v31914_v49 }
 0xbd3   :  { %20500 = vmatmul.mubr.f32.gmra.mrb[142].mxu0 %v31915_v43 }
 0xbd4   :  { %20502 = vmatprep.mubr.f32.mxu0 %v31916_v50 }
 0xbd7   :  { %20503 = vmatmul.mubr.f32.gmra.mrb[144].mxu0 %v31917_v22 }
 0xbd8   :  { %20505 = vmatprep.mubr.f32.mxu0 %v31918_v34 }
 0xbdb   :  { %20506 = vmatmul.mubr.f32.gmra.mrb[146].mxu0 %v31919_v63 }
 0xbdc   :  { %20508 = vmatprep.mubr.f32.mxu0 %v31920_v23 }
 0xbdf   :  { %20509 = vmatmul.mubr.f32.gmra.mrb[148].mxu0 %v31921_v48 }
 0xbe0   :  { %20511 = vmatprep.mubr.f32.mxu0 %v31922_v10 }
 0xbe3   :  { %20512 = vmatmul.mubr.f32.gmra.mrb[150].mxu0 %v31923_v33 }
 0xbe4   :  { %20514 = vmatprep.mubr.f32.mxu0 %v31924_v27 }
 0xbe7   :  { %20515 = vmatmul.mubr.f32.gmra.mrb[152].mxu0 %v31925_v45 }
 0xbe8   :  { %20517 = vmatprep.mubr.f32.mxu0 %v31926_v11 }
 0xbeb   :  { %20518 = vmatmul.mubr.f32.gmra.mrb[154].mxu0 %v31927_v40 }
 0xbec   :  { %20520 = vmatprep.mubr.f32.mxu0 %v31928_v41 }
 0xbef   :  { %20521 = vmatmul.mubr.f32.gmra.mrb[156].mxu0 %v31929_v21 }
 0xbf0   :  { %20523 = vmatprep.mubr.f32.mxu0 %v31930_v2 }
 0xbf3   :  { %20524 = vmatmul.mubr.f32.gmra.mrb[158].mxu0 %v31931_v38 }
 0xc4a   :  { %v20432_v53 = vpop.f32.mrb[96].mxu0 }
 0xc4b   :  { %v21182_v29 = vadd.f32 %v20432_v53, %v28882_v54  ;;  %v15378_v12 = vpop.f32.mrb[97].mxu0 }
 0xc4c   :  { %v21183_v15 = vadd.f32 %v28882_v54, %v15378_v12 }
 0xc4d   :  { %v15761_v51 = vadd.f32 %v22725_v60, %v21182_v29 }
 0xc4e   :  { %v15760_v57 = vadd.f32 %v22726_v18, %v21183_v15  ;;  %v20435_v13 = vpop.f32.mrb[98].mxu0 }
 0xc4f   :  { %15825 = vst.msk [vmem:[%s29401_s5 + $0x8] sm:$0xff] %vm99_vm0, %v15761_v51  ;;  %v21184_v46 = vadd.f32 %v20435_v13, %v28882_v54  ;;  %v15390_v44 = vpop.f32.mrb[99].mxu0 }
 0xc50   :  { %15824 = vst.msk [vmem:[%s29401_s5] sm:$0xff] %vm99_vm0, %v15760_v57  ;;  %v21185_v4 = vadd.f32 %v28882_v54, %v15390_v44 }
 0xc52   :  { %v20438_v28 = vpop.f32.mrb[100].mxu0 }
 0xc53   :  { %v21186_v8 = vadd.f32 %v20438_v28, %v28882_v54  ;;  %v15402_v14 = vpop.f32.mrb[101].mxu0 }
 0xc54   :  { %v21187_v37 = vadd.f32 %v28882_v54, %v15402_v14 }
 0xc56   :  { %v20441_v7 = vpop.f32.mrb[102].mxu0 }
 0xc57   :  { %v22727_v59 = vld [vmem:[%s29397_s0 + $0x18] sm:$0xff]  ;;  %v22728_v19 = vld [vmem:[%s29397_s0 + $0x10] sm:$0xff]  ;;  %v21188_v5 = vadd.f32 %v20441_v7, %v28882_v54  ;;  %v15414_v61 = vpop.f32.mrb[103].mxu0 }
 0xc58   :  { %v15763_v55 = vadd.f32 %v22727_v59, %v21184_v46  ;;  %v15762_v39 = vadd.f32 %v22728_v19, %v21185_v4  ;;  %v21189_v32 = vadd.f32 %v28882_v54, %v15414_v61 }
 0xc5a   :  { %15827 = vst.msk [vmem:[%s29401_s5 + $0x18] sm:$0xff] %vm99_vm0, %v15763_v55  ;;  %15826 = vst.msk [vmem:[%s29401_s5 + $0x10] sm:$0xff] %vm99_vm0, %v15762_v39  ;;  %v20444_v62 = vpop.f32.mrb[104].mxu0 }
 0xc5b   :  { %v21190_v0 = vadd.f32 %v20444_v62, %v28882_v54  ;;  %v15426_v25 = vpop.f32.mrb[105].mxu0 }
 0xc5c   :  { %v21191_v3 = vadd.f32 %v28882_v54, %v15426_v25 }
 0xc5e   :  { %v20447_v20 = vpop.f32.mrb[106].mxu0 }
 0xc5f   :  { %v21192_v42 = vadd.f32 %v20447_v20, %v28882_v54  ;;  %v15438_v9 = vpop.f32.mrb[107].mxu0 }
 0xc60   :  { %v21193_v16 = vadd.f32 %v28882_v54, %v15438_v9 }
 0xc61   :  { %v22729_v6 = vld [vmem:[%s29397_s0 + $0x28] sm:$0xff]  ;;  %v22730_v52 = vld [vmem:[%s29397_s0 + $0x20] sm:$0xff] }
 0xc62   :  { %v15765_v30 = vadd.f32 %v22729_v6, %v21186_v8  ;;  %v15764_v17 = vadd.f32 %v22730_v52, %v21187_v37  ;;  %v20450_v22 = vpop.f32.mrb[108].mxu0 }
 0xc63   :  { %v21194_v34 = vadd.f32 %v20450_v22, %v28882_v54  ;;  %v15450_v63 = vpop.f32.mrb[109].mxu0 }
 0xc64   :  { %15829 = vst.msk [vmem:[%s29401_s5 + $0x28] sm:$0xff] %vm99_vm0, %v15765_v30  ;;  %15828 = vst.msk [vmem:[%s29401_s5 + $0x20] sm:$0xff] %vm99_vm0, %v15764_v17  ;;  %v21195_v23 = vadd.f32 %v28882_v54, %v15450_v63 }
 0xc66   :  { %v20453_v45 = vpop.f32.mrb[110].mxu0 }
 0xc67   :  { %v21196_v11 = vadd.f32 %v20453_v45, %v28882_v54  ;;  %v15462_v40 = vpop.f32.mrb[111].mxu0 }
 0xc68   :  { %v21197_v41 = vadd.f32 %v28882_v54, %v15462_v40 }
 0xc6a   :  { %v20456_v29 = vpop.f32.mrb[112].mxu0 }
 0xc6b   :  { %v22731_v1 = vld [vmem:[%s29397_s0 + $0x38] sm:$0xff]  ;;  %v22732_v26 = vld [vmem:[%s29397_s0 + $0x30] sm:$0xff]  ;;  %v21198_v12 = vadd.f32 %v20456_v29, %v28882_v54  ;;  %v15474_v15 = vpop.f32.mrb[113].mxu0 }
 0xc6c   :  { %v15767_v58 = vadd.f32 %v22731_v1, %v21188_v5  ;;  %v15766_v47 = vadd.f32 %v22732_v26, %v21189_v32  ;;  %v21199_v60 = vadd.f32 %v28882_v54, %v15474_v15 }
 0xc6e   :  { %15831 = vst.msk [vmem:[%s29401_s5 + $0x38] sm:$0xff] %vm99_vm0, %v15767_v58  ;;  %15830 = vst.msk [vmem:[%s29401_s5 + $0x30] sm:$0xff] %vm99_vm0, %v15766_v47  ;;  %v20459_v46 = vpop.f32.mrb[114].mxu0 }
 0xc6f   :  { %v21200_v44 = vadd.f32 %v20459_v46, %v28882_v54  ;;  %v15486_v4 = vpop.f32.mrb[115].mxu0 }
 0xc70   :  { %v21201_v59 = vadd.f32 %v28882_v54, %v15486_v4 }
 0xc72   :  { %v20462_v8 = vpop.f32.mrb[116].mxu0 }
 0xc73   :  { %v21202_v14 = vadd.f32 %v20462_v8, %v28882_v54  ;;  %v15498_v37 = vpop.f32.mrb[117].mxu0 }
 0xc74   :  { %v21203_v6 = vadd.f32 %v28882_v54, %v15498_v37 }
 0xc75   :  { %v22733_v36 = vld [vmem:[%s29397_s0 + $0x48] sm:$0xff]  ;;  %v22734_v31 = vld [vmem:[%s29397_s0 + $0x40] sm:$0xff] }
 0xc76   :  { %v15769_v56 = vadd.f32 %v22733_v36, %v21190_v0  ;;  %v15768_v24 = vadd.f32 %v22734_v31, %v21191_v3  ;;  %v20465_v5 = vpop.f32.mrb[118].mxu0 }
 0xc77   :  { %v21204_v61 = vadd.f32 %v20465_v5, %v28882_v54  ;;  %v15510_v32 = vpop.f32.mrb[119].mxu0 }
 0xc78   :  { %15833 = vst.msk [vmem:[%s29401_s5 + $0x48] sm:$0xff] %vm99_vm0, %v15769_v56  ;;  %15832 = vst.msk [vmem:[%s29401_s5 + $0x40] sm:$0xff] %vm99_vm0, %v15768_v24  ;;  %v21205_v1 = vadd.f32 %v28882_v54, %v15510_v32 }
 0xc7a   :  { %v20468_v0 = vpop.f32.mrb[120].mxu0 }
 0xc7b   :  { %v21206_v25 = vadd.f32 %v20468_v0, %v28882_v54  ;;  %v15522_v3 = vpop.f32.mrb[121].mxu0 }
 0xc7c   :  { %v21207_v36 = vadd.f32 %v28882_v54, %v15522_v3 }
 0xc7f   :  { %v22735_v35 = vld [vmem:[%s29397_s0 + $0x58] sm:$0xff]  ;;  %v22736_v43 = vld [vmem:[%s29397_s0 + $0x50] sm:$0xff] }
 0xc80   :  { %v15771_v49 = vadd.f32 %v22735_v35, %v21192_v42  ;;  %v15770_v50 = vadd.f32 %v22736_v43, %v21193_v16  ;;  %v20471_v42 = vpop.f32.mrb[122].mxu0 }
 0xc81   :  { %v21208_v9 = vadd.f32 %v20471_v42, %v28882_v54  ;;  %v15534_v16 = vpop.f32.mrb[123].mxu0 }
 0xc82   :  { %15835 = vst.msk [vmem:[%s29401_s5 + $0x58] sm:$0xff] %vm99_vm0, %v15771_v49  ;;  %15834 = vst.msk [vmem:[%s29401_s5 + $0x50] sm:$0xff] %vm99_vm0, %v15770_v50  ;;  %v21209_v35 = vadd.f32 %v28882_v54, %v15534_v16 }
 0xc89   :  { %v22737_v48 = vld [vmem:[%s29397_s0 + $0x68] sm:$0xff]  ;;  %v22738_v33 = vld [vmem:[%s29397_s0 + $0x60] sm:$0xff] }
 0xc8a   :  { %v15773_v10 = vadd.f32 %v22737_v48, %v21194_v34  ;;  %v15772_v27 = vadd.f32 %v22738_v33, %v21195_v23  ;;  %v20474_v34 = vpop.f32.mrb[124].mxu0 }
 0xc8b   :  { %v21210_v63 = vadd.f32 %v20474_v34, %v28882_v54  ;;  %v15546_v23 = vpop.f32.mrb[125].mxu0 }
 0xc8c   :  { %15837 = vst.msk [vmem:[%s29401_s5 + $0x68] sm:$0xff] %vm99_vm0, %v15773_v10  ;;  %15836 = vst.msk [vmem:[%s29401_s5 + $0x60] sm:$0xff] %vm99_vm0, %v15772_v27  ;;  %v21211_v48 = vadd.f32 %v28882_v54, %v15546_v23 }
 0xc93   :  { %v22739_v21 = vld [vmem:[%s29397_s0 + $0x78] sm:$0xff]  ;;  %v22740_v38 = vld [vmem:[%s29397_s0 + $0x70] sm:$0xff] }
 0xc94   :  { %v15775_v2 = vadd.f32 %v22739_v21, %v21196_v11  ;;  %v15774_v53 = vadd.f32 %v22740_v38, %v21197_v41  ;;  %v20477_v11 = vpop.f32.mrb[126].mxu0 }
 0xc95   :  { %v21212_v40 = vadd.f32 %v20477_v11, %v28882_v54  ;;  %v15558_v41 = vpop.f32.mrb[127].mxu0 }
 0xc96   :  { %15839 = vst.msk [vmem:[%s29401_s5 + $0x78] sm:$0xff] %vm99_vm0, %v15775_v2  ;;  %15838 = vst.msk [vmem:[%s29401_s5 + $0x70] sm:$0xff] %vm99_vm0, %v15774_v53  ;;  %v21213_v21 = vadd.f32 %v28882_v54, %v15558_v41 }
 0xc9d   :  { %v22741_v51 = vld [vmem:[%s29397_s0 + $0x88] sm:$0xff]  ;;  %v22742_v57 = vld [vmem:[%s29397_s0 + $0x80] sm:$0xff] }
 0xc9e   :  { %v15777_v18 = vadd.f32 %v22741_v51, %v21198_v12  ;;  %v15776_v13 = vadd.f32 %v22742_v57, %v21199_v60  ;;  %v20480_v12 = vpop.f32.mrb[128].mxu0 }
 0xc9f   :  { %v21214_v15 = vadd.f32 %v20480_v12, %v28882_v54  ;;  %v15570_v60 = vpop.f32.mrb[129].mxu0 }
 0xca0   :  { %15841 = vst.msk [vmem:[%s29401_s5 + $0x88] sm:$0xff] %vm99_vm0, %v15777_v18  ;;  %15840 = vst.msk [vmem:[%s29401_s5 + $0x80] sm:$0xff] %vm99_vm0, %v15776_v13  ;;  %v21215_v51 = vadd.f32 %v28882_v54, %v15570_v60 }
 0xca7   :  { %v22743_v55 = vld [vmem:[%s29397_s0 + $0x98] sm:$0xff]  ;;  %v22744_v39 = vld [vmem:[%s29397_s0 + $0x90] sm:$0xff] }
 0xca8   :  { %v15779_v19 = vadd.f32 %v22743_v55, %v21200_v44  ;;  %v15778_v28 = vadd.f32 %v22744_v39, %v21201_v59  ;;  %v20483_v44 = vpop.f32.mrb[130].mxu0 }
 0xca9   :  { %v21216_v4 = vadd.f32 %v20483_v44, %v28882_v54  ;;  %v15582_v59 = vpop.f32.mrb[131].mxu0 }
 0xcaa   :  { %15843 = vst.msk [vmem:[%s29401_s5 + $0x98] sm:$0xff] %vm99_vm0, %v15779_v19  ;;  %15842 = vst.msk [vmem:[%s29401_s5 + $0x90] sm:$0xff] %vm99_vm0, %v15778_v28  ;;  %v21217_v55 = vadd.f32 %v28882_v54, %v15582_v59 }
 0xcb1   :  { %v22745_v30 = vld [vmem:[%s29397_s0 + $0xa8] sm:$0xff]  ;;  %v22746_v17 = vld [vmem:[%s29397_s0 + $0xa0] sm:$0xff] }
 0xcb2   :  { %v15781_v52 = vadd.f32 %v22745_v30, %v21202_v14  ;;  %v15780_v7 = vadd.f32 %v22746_v17, %v21203_v6  ;;  %v20486_v14 = vpop.f32.mrb[132].mxu0 }
 0xcb3   :  { %v21218_v37 = vadd.f32 %v20486_v14, %v28882_v54  ;;  %v15594_v6 = vpop.f32.mrb[133].mxu0 }
 0xcb4   :  { %15845 = vst.msk [vmem:[%s29401_s5 + $0xa8] sm:$0xff] %vm99_vm0, %v15781_v52  ;;  %15844 = vst.msk [vmem:[%s29401_s5 + $0xa0] sm:$0xff] %vm99_vm0, %v15780_v7  ;;  %v21219_v30 = vadd.f32 %v28882_v54, %v15594_v6 }
 0xcbb   :  { %v22747_v58 = vld [vmem:[%s29397_s0 + $0xb8] sm:$0xff]  ;;  %v22748_v47 = vld [vmem:[%s29397_s0 + $0xb0] sm:$0xff] }
 0xcbc   :  { %v15783_v26 = vadd.f32 %v22747_v58, %v21204_v61  ;;  %v15782_v62 = vadd.f32 %v22748_v47, %v21205_v1  ;;  %v20489_v61 = vpop.f32.mrb[134].mxu0 }
 0xcbd   :  { %v21220_v32 = vadd.f32 %v20489_v61, %v28882_v54  ;;  %v15606_v1 = vpop.f32.mrb[135].mxu0 }
 0xcbe   :  { %15847 = vst.msk [vmem:[%s29401_s5 + $0xb8] sm:$0xff] %vm99_vm0, %v15783_v26  ;;  %15846 = vst.msk [vmem:[%s29401_s5 + $0xb0] sm:$0xff] %vm99_vm0, %v15782_v62  ;;  %v21221_v58 = vadd.f32 %v28882_v54, %v15606_v1 }
 0xcc5   :  { %v22749_v56 = vld [vmem:[%s29397_s0 + $0xc8] sm:$0xff]  ;;  %v22750_v24 = vld [vmem:[%s29397_s0 + $0xc0] sm:$0xff] }
 0xcc6   :  { %v15785_v31 = vadd.f32 %v22749_v56, %v21206_v25  ;;  %v15784_v20 = vadd.f32 %v22750_v24, %v21207_v36  ;;  %v20492_v25 = vpop.f32.mrb[136].mxu0 }
 0xcc7   :  { %v21222_v3 = vadd.f32 %v20492_v25, %v28882_v54  ;;  %v15618_v36 = vpop.f32.mrb[137].mxu0 }
 0xcc8   :  { %15849 = vst.msk [vmem:[%s29401_s5 + $0xc8] sm:$0xff] %vm99_vm0, %v15785_v31  ;;  %15848 = vst.msk [vmem:[%s29401_s5 + $0xc0] sm:$0xff] %vm99_vm0, %v15784_v20  ;;  %v21223_v56 = vadd.f32 %v28882_v54, %v15618_v36 }
 0xccf   :  { %v22751_v49 = vld [vmem:[%s29397_s0 + $0xd8] sm:$0xff]  ;;  %v22752_v50 = vld [vmem:[%s29397_s0 + $0xd0] sm:$0xff] }
 0xcd0   :  { %v15787_v43 = vadd.f32 %v22751_v49, %v21208_v9  ;;  %v15786_v22 = vadd.f32 %v22752_v50, %v21209_v35  ;;  %v20495_v9 = vpop.f32.mrb[138].mxu0 }
 0xcd1   :  { %v21224_v16 = vadd.f32 %v20495_v9, %v28882_v54  ;;  %v15630_v35 = vpop.f32.mrb[139].mxu0 }
 0xcd2   :  { %15851 = vst.msk [vmem:[%s29401_s5 + $0xd8] sm:$0xff] %vm99_vm0, %v15787_v43  ;;  %15850 = vst.msk [vmem:[%s29401_s5 + $0xd0] sm:$0xff] %vm99_vm0, %v15786_v22  ;;  %v21225_v49 = vadd.f32 %v28882_v54, %v15630_v35 }
 0xcd9   :  { %v22753_v10 = vld [vmem:[%s29397_s0 + $0xe8] sm:$0xff]  ;;  %v22754_v27 = vld [vmem:[%s29397_s0 + $0xe0] sm:$0xff] }
 0xcda   :  { %v15789_v33 = vadd.f32 %v22753_v10, %v21210_v63  ;;  %v15788_v45 = vadd.f32 %v22754_v27, %v21211_v48  ;;  %v20498_v63 = vpop.f32.mrb[140].mxu0 }
 0xcdb   :  { %v21226_v23 = vadd.f32 %v20498_v63, %v28882_v54  ;;  %v15642_v48 = vpop.f32.mrb[141].mxu0 }
 0xcdc   :  { %15853 = vst.msk [vmem:[%s29401_s5 + $0xe8] sm:$0xff] %vm99_vm0, %v15789_v33  ;;  %15852 = vst.msk [vmem:[%s29401_s5 + $0xe0] sm:$0xff] %vm99_vm0, %v15788_v45  ;;  %v21227_v10 = vadd.f32 %v28882_v54, %v15642_v48 }
 0xce3   :  { %v22755_v2 = vld [vmem:[%s29397_s0 + $0xf8] sm:$0xff]  ;;  %v22756_v53 = vld [vmem:[%s29397_s0 + $0xf0] sm:$0xff] }
 0xce4   :  { %v15791_v38 = vadd.f32 %v22755_v2, %v21212_v40  ;;  %v15790_v29 = vadd.f32 %v22756_v53, %v21213_v21  ;;  %v20501_v40 = vpop.f32.mrb[142].mxu0 }
 0xce5   :  { %v21228_v41 = vadd.f32 %v20501_v40, %v28882_v54  ;;  %v15654_v21 = vpop.f32.mrb[143].mxu0 }
 0xce6   :  { %15855 = vst.msk [vmem:[%s29401_s5 + $0xf8] sm:$0xff] %vm99_vm0, %v15791_v38  ;;  %15854 = vst.msk [vmem:[%s29401_s5 + $0xf0] sm:$0xff] %vm99_vm0, %v15790_v29  ;;  %v21229_v2 = vadd.f32 %v28882_v54, %v15654_v21 }
 0xced   :  { %v22757_v18 = vld [vmem:[%s29397_s0 + $0x108] sm:$0xff]  ;;  %v22758_v13 = vld [vmem:[%s29397_s0 + $0x100] sm:$0xff] }
 0xcee   :  { %v15793_v57 = vadd.f32 %v22757_v18, %v21214_v15  ;;  %v15792_v46 = vadd.f32 %v22758_v13, %v21215_v51  ;;  %v20504_v15 = vpop.f32.mrb[144].mxu0 }
 0xcef   :  { %v21230_v60 = vadd.f32 %v20504_v15, %v28882_v54  ;;  %v15666_v51 = vpop.f32.mrb[145].mxu0 }
 0xcf0   :  { %15857 = vst.msk [vmem:[%s29401_s5 + $0x108] sm:$0xff] %vm99_vm0, %v15793_v57  ;;  %15856 = vst.msk [vmem:[%s29401_s5 + $0x100] sm:$0xff] %vm99_vm0, %v15792_v46  ;;  %v21231_v18 = vadd.f32 %v28882_v54, %v15666_v51 }
 0xcf7   :  { %v22759_v19 = vld [vmem:[%s29397_s0 + $0x118] sm:$0xff]  ;;  %v22760_v28 = vld [vmem:[%s29397_s0 + $0x110] sm:$0xff] }
 0xcf8   :  { %v15795_v39 = vadd.f32 %v22759_v19, %v21216_v4  ;;  %v15794_v8 = vadd.f32 %v22760_v28, %v21217_v55  ;;  %v20507_v4 = vpop.f32.mrb[146].mxu0 }
 0xcf9   :  { %v21232_v59 = vadd.f32 %v20507_v4, %v28882_v54  ;;  %v15678_v55 = vpop.f32.mrb[147].mxu0 }
 0xcfa   :  { %15859 = vst.msk [vmem:[%s29401_s5 + $0x118] sm:$0xff] %vm99_vm0, %v15795_v39  ;;  %15858 = vst.msk [vmem:[%s29401_s5 + $0x110] sm:$0xff] %vm99_vm0, %v15794_v8  ;;  %v21233_v19 = vadd.f32 %v28882_v54, %v15678_v55 }
 0xd01   :  { %v22761_v52 = vld [vmem:[%s29397_s0 + $0x128] sm:$0xff]  ;;  %v22762_v7 = vld [vmem:[%s29397_s0 + $0x120] sm:$0xff] }
 0xd02   :  { %v15797_v17 = vadd.f32 %v22761_v52, %v21218_v37  ;;  %v15796_v5 = vadd.f32 %v22762_v7, %v21219_v30  ;;  %v20510_v37 = vpop.f32.mrb[148].mxu0 }
 0xd03   :  { %v21234_v6 = vadd.f32 %v20510_v37, %v28882_v54  ;;  %v15690_v30 = vpop.f32.mrb[149].mxu0 }
 0xd04   :  { %15861 = vst.msk [vmem:[%s29401_s5 + $0x128] sm:$0xff] %vm99_vm0, %v15797_v17  ;;  %15860 = vst.msk [vmem:[%s29401_s5 + $0x120] sm:$0xff] %vm99_vm0, %v15796_v5  ;;  %v21235_v52 = vadd.f32 %v28882_v54, %v15690_v30 }
 0xd0b   :  { %v22763_v26 = vld [vmem:[%s29397_s0 + $0x138] sm:$0xff]  ;;  %v22764_v62 = vld [vmem:[%s29397_s0 + $0x130] sm:$0xff] }
 0xd0c   :  { %v15799_v47 = vadd.f32 %v22763_v26, %v21220_v32  ;;  %v15798_v0 = vadd.f32 %v22764_v62, %v21221_v58  ;;  %v20513_v32 = vpop.f32.mrb[150].mxu0 }
 0xd0d   :  { %v21236_v1 = vadd.f32 %v20513_v32, %v28882_v54  ;;  %v15702_v58 = vpop.f32.mrb[151].mxu0 }
 0xd0e   :  { %15863 = vst.msk [vmem:[%s29401_s5 + $0x138] sm:$0xff] %vm99_vm0, %v15799_v47  ;;  %15862 = vst.msk [vmem:[%s29401_s5 + $0x130] sm:$0xff] %vm99_vm0, %v15798_v0  ;;  %v21237_v26 = vadd.f32 %v28882_v54, %v15702_v58 }
 0xd15   :  { %v22765_v31 = vld [vmem:[%s29397_s0 + $0x148] sm:$0xff]  ;;  %v22766_v20 = vld [vmem:[%s29397_s0 + $0x140] sm:$0xff] }
 0xd16   :  { %v15801_v24 = vadd.f32 %v22765_v31, %v21222_v3  ;;  %v15800_v42 = vadd.f32 %v22766_v20, %v21223_v56  ;;  %v20516_v3 = vpop.f32.mrb[152].mxu0 }
 0xd17   :  { %v21238_v36 = vadd.f32 %v20516_v3, %v28882_v54  ;;  %v15714_v56 = vpop.f32.mrb[153].mxu0 }
 0xd18   :  { %15865 = vst.msk [vmem:[%s29401_s5 + $0x148] sm:$0xff] %vm99_vm0, %v15801_v24  ;;  %15864 = vst.msk [vmem:[%s29401_s5 + $0x140] sm:$0xff] %vm99_vm0, %v15800_v42  ;;  %v21239_v31 = vadd.f32 %v28882_v54, %v15714_v56 }
 0xd1f   :  { %v22767_v43 = vld [vmem:[%s29397_s0 + $0x158] sm:$0xff]  ;;  %v22768_v22 = vld [vmem:[%s29397_s0 + $0x150] sm:$0xff] }
 0xd20   :  { %v15803_v50 = vadd.f32 %v22767_v43, %v21224_v16  ;;  %v15802_v34 = vadd.f32 %v22768_v22, %v21225_v49  ;;  %v20519_v16 = vpop.f32.mrb[154].mxu0 }
 0xd21   :  { %v21240_v35 = vadd.f32 %v20519_v16, %v28882_v54  ;;  %v15726_v49 = vpop.f32.mrb[155].mxu0 }
 0xd22   :  { %15867 = vst.msk [vmem:[%s29401_s5 + $0x158] sm:$0xff] %vm99_vm0, %v15803_v50  ;;  %15866 = vst.msk [vmem:[%s29401_s5 + $0x150] sm:$0xff] %vm99_vm0, %v15802_v34  ;;  %v21241_v43 = vadd.f32 %v28882_v54, %v15726_v49 }
 0xd29   :  { %v22769_v33 = vld [vmem:[%s29397_s0 + $0x168] sm:$0xff]  ;;  %v22770_v45 = vld [vmem:[%s29397_s0 + $0x160] sm:$0xff] }
 0xd2a   :  { %v15805_v27 = vadd.f32 %v22769_v33, %v21226_v23  ;;  %v15804_v11 = vadd.f32 %v22770_v45, %v21227_v10  ;;  %v20522_v23 = vpop.f32.mrb[156].mxu0 }
 0xd2b   :  { %v21242_v48 = vadd.f32 %v20522_v23, %v28882_v54  ;;  %v15738_v10 = vpop.f32.mrb[157].mxu0 }
 0xd2c   :  { %15869 = vst.msk [vmem:[%s29401_s5 + $0x168] sm:$0xff] %vm99_vm0, %v15805_v27  ;;  %15868 = vst.msk [vmem:[%s29401_s5 + $0x160] sm:$0xff] %vm99_vm0, %v15804_v11  ;;  %v21243_v33 = vadd.f32 %v28882_v54, %v15738_v10 }
 0xd33   :  { %v22771_v38 = vld [vmem:[%s29397_s0 + $0x178] sm:$0xff]  ;;  %v22772_v29 = vld [vmem:[%s29397_s0 + $0x170] sm:$0xff] }
 0xd34   :  { %v15807_v53 = vadd.f32 %v22771_v38, %v21228_v41  ;;  %v15806_v12 = vadd.f32 %v22772_v29, %v21229_v2  ;;  %v20525_v41 = vpop.f32.mrb[158].mxu0 }
 0xd35   :  { %v21244_v21 = vadd.f32 %v20525_v41, %v28882_v54  ;;  %v15750_v2 = vpop.f32.mrb[159].mxu0 }
 0xd36   :  { %15871 = vst.msk [vmem:[%s29401_s5 + $0x178] sm:$0xff] %vm99_vm0, %v15807_v53  ;;  %15870 = vst.msk [vmem:[%s29401_s5 + $0x170] sm:$0xff] %vm99_vm0, %v15806_v12  ;;  %v21245_v38 = vadd.f32 %v28882_v54, %v15750_v2 }
 0xd3d   :  { %v22773_v57 = vld [vmem:[%s29397_s0 + $0x188] sm:$0xff]  ;;  %v22774_v46 = vld [vmem:[%s29397_s0 + $0x180] sm:$0xff] }
 0xd3e   :  { %v15809_v13 = vadd.f32 %v22773_v57, %v21230_v60  ;;  %v15808_v44 = vadd.f32 %v22774_v46, %v21231_v18 }
 0xd40   :  { %15873 = vst.msk [vmem:[%s29401_s5 + $0x188] sm:$0xff] %vm99_vm0, %v15809_v13  ;;  %15872 = vst.msk [vmem:[%s29401_s5 + $0x180] sm:$0xff] %vm99_vm0, %v15808_v44 }
 0xd47   :  { %v22775_v39 = vld [vmem:[%s29397_s0 + $0x198] sm:$0xff]  ;;  %v22776_v8 = vld [vmem:[%s29397_s0 + $0x190] sm:$0xff] }
 0xd48   :  { %v15811_v28 = vadd.f32 %v22775_v39, %v21232_v59  ;;  %v15810_v14 = vadd.f32 %v22776_v8, %v21233_v19 }
 0xd4a   :  { %15875 = vst.msk [vmem:[%s29401_s5 + $0x198] sm:$0xff] %vm99_vm0, %v15811_v28  ;;  %15874 = vst.msk [vmem:[%s29401_s5 + $0x190] sm:$0xff] %vm99_vm0, %v15810_v14 }
 0xd51   :  { %v22777_v17 = vld [vmem:[%s29397_s0 + $0x1a8] sm:$0xff]  ;;  %v22778_v5 = vld [vmem:[%s29397_s0 + $0x1a0] sm:$0xff] }
 0xd52   :  { %v15813_v7 = vadd.f32 %v22777_v17, %v21234_v6  ;;  %v15812_v61 = vadd.f32 %v22778_v5, %v21235_v52 }
 0xd54   :  { %15877 = vst.msk [vmem:[%s29401_s5 + $0x1a8] sm:$0xff] %vm99_vm0, %v15813_v7  ;;  %15876 = vst.msk [vmem:[%s29401_s5 + $0x1a0] sm:$0xff] %vm99_vm0, %v15812_v61 }
 0xd5b   :  { %v22779_v47 = vld [vmem:[%s29397_s0 + $0x1b8] sm:$0xff]  ;;  %v22780_v0 = vld [vmem:[%s29397_s0 + $0x1b0] sm:$0xff] }
 0xd5c   :  { %v15815_v62 = vadd.f32 %v22779_v47, %v21236_v1  ;;  %v15814_v25 = vadd.f32 %v22780_v0, %v21237_v26 }
 0xd5e   :  { %15879 = vst.msk [vmem:[%s29401_s5 + $0x1b8] sm:$0xff] %vm99_vm0, %v15815_v62  ;;  %15878 = vst.msk [vmem:[%s29401_s5 + $0x1b0] sm:$0xff] %vm99_vm0, %v15814_v25 }
 0xd65   :  { %v22781_v24 = vld [vmem:[%s29397_s0 + $0x1c8] sm:$0xff]  ;;  %v22782_v42 = vld [vmem:[%s29397_s0 + $0x1c0] sm:$0xff] }
 0xd66   :  { %v15817_v20 = vadd.f32 %v22781_v24, %v21238_v36  ;;  %v15816_v9 = vadd.f32 %v22782_v42, %v21239_v31 }
 0xd68   :  { %15881 = vst.msk [vmem:[%s29401_s5 + $0x1c8] sm:$0xff] %vm99_vm0, %v15817_v20  ;;  %15880 = vst.msk [vmem:[%s29401_s5 + $0x1c0] sm:$0xff] %vm99_vm0, %v15816_v9 }
 0xd6f   :  { %v22783_v50 = vld [vmem:[%s29397_s0 + $0x1d8] sm:$0xff]  ;;  %v22784_v34 = vld [vmem:[%s29397_s0 + $0x1d0] sm:$0xff] }
 0xd70   :  { %v15819_v22 = vadd.f32 %v22783_v50, %v21240_v35  ;;  %v15818_v63 = vadd.f32 %v22784_v34, %v21241_v43 }
 0xd72   :  { %15883 = vst.msk [vmem:[%s29401_s5 + $0x1d8] sm:$0xff] %vm99_vm0, %v15819_v22  ;;  %15882 = vst.msk [vmem:[%s29401_s5 + $0x1d0] sm:$0xff] %vm99_vm0, %v15818_v63 }
 0xd79   :  { %v22785_v27 = vld [vmem:[%s29397_s0 + $0x1e8] sm:$0xff]  ;;  %v22786_v11 = vld [vmem:[%s29397_s0 + $0x1e0] sm:$0xff] }
 0xd7a   :  { %v15821_v45 = vadd.f32 %v22785_v27, %v21242_v48  ;;  %v15820_v40 = vadd.f32 %v22786_v11, %v21243_v33 }
 0xd7c   :  { %15885 = vst.msk [vmem:[%s29401_s5 + $0x1e8] sm:$0xff] %vm99_vm0, %v15821_v45  ;;  %15884 = vst.msk [vmem:[%s29401_s5 + $0x1e0] sm:$0xff] %vm99_vm0, %v15820_v40 }
 0xd83   :  { %v22787_v53 = vld [vmem:[%s29397_s0 + $0x1f8] sm:$0xff]  ;;  %v22788_v12 = vld [vmem:[%s29397_s0 + $0x1f0] sm:$0xff] }
 0xd84   :  { %v15823_v29 = vadd.f32 %v22787_v53, %v21244_v21  ;;  %v15822_v15 = vadd.f32 %v22788_v12, %v21245_v38 }
 0xd86   :  { %15887 = vst.msk [vmem:[%s29401_s5 + $0x1f8] sm:$0xff] %vm99_vm0, %v15823_v29  ;;  %15886 = vst.msk [vmem:[%s29401_s5 + $0x1f0] sm:$0xff] %vm99_vm0, %v15822_v15 }

</bundles_post_ra>
